<compile_context>
chip_gen: v7x
topology: tpu7x:2x2x1
jax: 0.10.0
libtpu: 0.0.40
codegen_flags: <defaults>
</compile_context>

<pallas_src>
import jax
import jax.numpy as jnp
from jax.experimental import pallas as pl
from jax.experimental.pallas import tpu as pltpu

LANES = 128          # TPU lane width; all kernel outputs are lane-dense (128 wide)
TILE_M = 2048        # row tile for the conv1 matmul (multiple of 8)
TILE_B = 128         # image tile for the fused conv2 + MLP kernel


def _round_up(x, m):
    return (x + m - 1) // m * m


def _default_vmem_limit():
    # Per-generation scoped-VMEM limit: half of physical capacity
    # (v5e/v6e: 64 MiB of 128 MiB, v7x: 32 MiB of 64 MiB).  Fallback 32 MiB.
    try:
        cap = int(pltpu.get_tpu_info().vmem_capacity_bytes)
        return int(min(cap // 2, 96 * 1024 * 1024))
    except Exception:
        return 32 * 1024 * 1024


VMEM_LIMIT = _default_vmem_limit()


def _tile_for(m, max_tile):
    """Tile size: multiple of 8, capped at max_tile, and chosen so there are at
    least 2 grid steps when m allows (lets v7x's second TensorCore work)."""
    half = _round_up(max(1, (m + 1) // 2), 8)
    return max(8, min(max_tile, half))


def _pad_rows(x, mult):
    r = _round_up(x.shape[0], mult)
    if r == x.shape[0]:
        return x
    return jnp.pad(x, ((0, r - x.shape[0]),) + ((0, 0),) * (x.ndim - 1))


def _pad_to(a, shape):
    return jnp.pad(a, [(0, s - d) for d, s in zip(a.shape, shape)])


# ---------------------------------------------------------------------------
# Pallas kernels
# ---------------------------------------------------------------------------

def _conv_pool_kernel(p0_ref, p1_ref, p2_ref, p3_ref, w_ref, b_ref, o_ref):
    """Fused conv(as matmul) + bias + ReLU + 2x2 max-pool for conv1.

    p{0..3}: (tile, K) im2col patches for the 4 pool-window corners.
    Running max over the 4 taps with bias+ReLU hoisted out (relu monotone,
    bias identical across taps), so only one MXU result tile is live at a time.
    """
    w = w_ref[...]
    acc = jnp.dot(p0_ref[...], w, preferred_element_type=jnp.float32)
    acc = jnp.maximum(acc, jnp.dot(p1_ref[...], w, preferred_element_type=jnp.float32))
    acc = jnp.maximum(acc, jnp.dot(p2_ref[...], w, preferred_element_type=jnp.float32))
    acc = jnp.maximum(acc, jnp.dot(p3_ref[...], w, preferred_element_type=jnp.float32))
    o_ref[...] = jnp.maximum(acc + b_ref[...], 0.0)


def _conv2_pool_mlp_kernel(p_ref, wc2_ref, bc2_ref, wl1_ref, bl1_ref,
                           wl2_ref, bl2_ref, wl3_ref, bl3_ref, o_ref, h1_ref):
    """conv2 + bias + ReLU + 2x2 pool + linear1 + relu + linear2 + relu + linear3.

    p_ref: (4, 25, tile, 150) conv2 quadrant patches (quadrant, spatial pos,
           image, ki*kj*c).  For each of the 25 pooled spatial positions the
           kernel computes the pooled/ReLU'd conv2 output (tile, 128) and
           immediately accumulates its lin1 contribution into VMEM scratch,
           so the conv2 activation never leaves VMEM.
    wl1_ref: (25, 128, 128) per-spatial-position lin1 weight slices (PyTorch
           NCHW-flatten order folded in at pack time).
    """
    wc2 = wc2_ref[...]
    bc2 = bc2_ref[...]
    h1_ref[...] = jnp.zeros_like(h1_ref)
    n_pos = p_ref.shape[1]
    for s in range(n_pos):  # static 25-iteration loop; scratch bounds live range
        acc = jnp.dot(p_ref[0, s], wc2, preferred_element_type=jnp.float32)
        acc = jnp.maximum(acc, jnp.dot(p_ref[1, s], wc2, preferred_element_type=jnp.float32))
        acc = jnp.maximum(acc, jnp.dot(p_ref[2, s], wc2, preferred_element_type=jnp.float32))
        acc = jnp.maximum(acc, jnp.dot(p_ref[3, s], wc2, preferred_element_type=jnp.float32))
        y = jnp.maximum(acc + bc2, 0.0)                      # (tile, 128), 16 valid lanes
        h1_ref[...] += jnp.dot(y, wl1_ref[s], preferred_element_type=jnp.float32)
    h1 = jnp.maximum(h1_ref[...] + bl1_ref[...], 0.0)
    h2 = jnp.maximum(
        jnp.dot(h1, wl2_ref[...], preferred_element_type=jnp.float32) + bl2_ref[...], 0.0)
    o_ref[...] = jnp.dot(h2, wl3_ref[...], preferred_element_type=jnp.float32) + bl3_ref[...]


# ---------------------------------------------------------------------------
# Pallas wrappers (grid / BlockSpec plumbing)
# ---------------------------------------------------------------------------

def conv_relu_pool(quads, w, b):
    """quads: 4 x (M, K) patch matrices -> (M, 128) pooled, relu'd, lane-dense."""
    M, K = quads[0].shape
    tile = _tile_for(M, TILE_M)
    quads = [_pad_rows(q, tile) for q in quads]
    Mp = quads[0].shape[0]
    out = pl.pallas_call(
        _conv_pool_kernel,
        out_shape=jax.ShapeDtypeStruct((Mp, LANES), jnp.float32),
        grid=(Mp // tile,),
        in_specs=[pl.BlockSpec((tile, K), lambda i: (i, 0))] * 4 + [
            pl.BlockSpec((K, LANES), lambda i: (0, 0)),   # weights resident
            pl.BlockSpec((1, LANES), lambda i: (0, 0)),   # bias resident
        ],
        out_specs=pl.BlockSpec((tile, LANES), lambda i: (i, 0)),
        compiler_params=pltpu.CompilerParams(
            dimension_semantics=("parallel",),
            vmem_limit_bytes=VMEM_LIMIT),
    )(*quads, w, b)
    return out[:M]


def conv2_pool_mlp(q2, packed):
    """q2: (4, 25, N, 150) conv2 quadrant patches -> (N, 128) logits (10 valid)."""
    _, S, N, K = q2.shape
    tile = _tile_for(N, TILE_B)
    Np = _round_up(N, tile)
    if Np != N:
        q2 = jnp.pad(q2, ((0, 0), (0, 0), (0, Np - N), (0, 0)))
    out = pl.pallas_call(
        _conv2_pool_mlp_kernel,
        out_shape=jax.ShapeDtypeStruct((Np, LANES), jnp.float32),
        grid=(Np // tile,),
        in_specs=[
            pl.BlockSpec((4, S, tile, K), lambda i: (0, 0, i, 0)),   # patches
            pl.BlockSpec((K, LANES), lambda i: (0, 0)),              # w_c2
            pl.BlockSpec((1, LANES), lambda i: (0, 0)),              # b_c2
            pl.BlockSpec((S, LANES, LANES), lambda i: (0, 0, 0)),    # w_l1 per pos
            pl.BlockSpec((1, LANES), lambda i: (0, 0)),              # b_l1
            pl.BlockSpec((LANES, LANES), lambda i: (0, 0)),          # w_l2
            pl.BlockSpec((1, LANES), lambda i: (0, 0)),              # b_l2
            pl.BlockSpec((LANES, LANES), lambda i: (0, 0)),          # w_l3
            pl.BlockSpec((1, LANES), lambda i: (0, 0)),              # b_l3
        ],
        out_specs=pl.BlockSpec((tile, LANES), lambda i: (i, 0)),
        scratch_shapes=[pltpu.VMEM((tile, LANES), jnp.float32)],     # lin1 accumulator
        compiler_params=pltpu.CompilerParams(
            dimension_semantics=("parallel",),
            vmem_limit_bytes=VMEM_LIMIT),
    )(q2, packed["w_c2"], packed["b_c2"], packed["w_l1s"], packed["b_l1"],
      packed["w_l2"], packed["b_l2"], packed["w_l3"], packed["b_l3"])
    return out[:N]


# ---------------------------------------------------------------------------
# Glue (layout plumbing only — no hot-path compute, fused by XLA under jit)
# ---------------------------------------------------------------------------

def _quadrant_patches(x_nhwc, kh, kw, dy, dx):
    """Patch rows for pooled output positions, pool-window corner (dy, dx).

    Returns (N, ph*pw, kh*kw*C) with
    [n, ph*pw_count+pw, (ki*kw+kj)*C + c] = x[n, 2*ph+dy+ki, 2*pw+dx+kj, c].
    """
    N, H, W, C = x_nhwc.shape
    oh, ow = H - kh + 1, W - kw + 1
    ph, pw = oh // 2, ow // 2
    cols = []
    for ki in range(kh):
        for kj in range(kw):
            s = x_nhwc[:, dy + ki:, dx + kj:, :]
            s = s[:, :2 * ph:2, :2 * pw:2, :]        # (N, ph, pw, C)
            cols.append(s)
    p = jnp.concatenate(cols, axis=-1)                # (N, ph, pw, kh*kw*C)
    return p.reshape(N, ph * pw, kh * kw * C)


# ---------------------------------------------------------------------------
# Parameters
# ---------------------------------------------------------------------------

def init_params(key):
    ks = jax.random.split(key, 10)

    def u(k, shape, fan_in):
        bound = float(fan_in) ** -0.5
        return jax.random.uniform(k, shape, jnp.float32, -bound, bound)

    return {
        "conv1_w": u(ks[0], (6, 3, 5, 5), 3 * 5 * 5),
        "conv1_b": u(ks[1], (6,), 3 * 5 * 5),
        "conv2_w": u(ks[2], (16, 6, 5, 5), 6 * 5 * 5),
        "conv2_b": u(ks[3], (16,), 6 * 5 * 5),
        "lin1_w": u(ks[4], (120, 400), 400),
        "lin1_b": u(ks[5], (120,), 400),
        "lin2_w": u(ks[6], (84, 120), 120),
        "lin2_b": u(ks[7], (84,), 120),
        "lin3_w": u(ks[8], (10, 84), 84),
        "lin3_b": u(ks[9], (10,), 84),
    }


def pack_params(p):
    """One-time repack: transpose, zero-pad to 128 lanes, fold the flatten order."""
    def pack_conv_w(w):                               # OIHW -> (KH*KW*IC, 128)
        oc, ic, kh, kw = w.shape
        a = jnp.transpose(w, (2, 3, 1, 0)).reshape(kh * kw * ic, oc)
        return _pad_to(a, (kh * kw * ic, LANES))

    def pack_bias(b):
        return _pad_to(b.reshape(1, -1), (1, LANES))

    # lin1: split per conv2 spatial position s = ph*5+pw and fold PyTorch's
    # NCHW flatten (col index = c*25 + s):  w_l1s[s, c, o] = lin1_w[o, c*25 + s].
    lw1 = p["lin1_w"].reshape(120, 16, 25)            # (out, c, s)
    lw1 = jnp.transpose(lw1, (2, 1, 0))               # (s, c, out)
    lw1 = _pad_to(lw1, (25, LANES, LANES))            # zero-pad c and out to 128

    return {
        "w_c1": pack_conv_w(p["conv1_w"]), "b_c1": pack_bias(p["conv1_b"]),
        "w_c2": pack_conv_w(p["conv2_w"]), "b_c2": pack_bias(p["conv2_b"]),
        "w_l1s": lw1,                       "b_l1": pack_bias(p["lin1_b"]),
        "w_l2": _pad_to(p["lin2_w"].T, (LANES, LANES)), "b_l2": pack_bias(p["lin2_b"]),
        "w_l3": _pad_to(p["lin3_w"].T, (LANES, LANES)), "b_l3": pack_bias(p["lin3_b"]),
    }


# ---------------------------------------------------------------------------
# Model forward
# ---------------------------------------------------------------------------

def forward(packed, x_nchw):
    N = x_nchw.shape[0]
    x = jnp.transpose(x_nchw, (0, 2, 3, 1))                     # NCHW -> NHWC (N,32,32,3)

    # stage 1: conv1 + relu + 2x2 pool (one Pallas kernel).
    # Output (N*196, 128) lane-dense; only first 6 lanes valid.  Padded rows
    # (value relu(bias)) are sliced off here before anything consumes them.
    q1 = [_quadrant_patches(x, 5, 5, dy, dx).reshape(N * 14 * 14, 75)
          for dy in (0, 1) for dx in (0, 1)]
    y1 = conv_relu_pool(q1, packed["w_c1"], packed["b_c1"])
    y1 = y1[:, :6].reshape(N, 14, 14, 6)

    # stage 2: conv2 + relu + pool + 3-layer MLP, fully fused in one Pallas
    # kernel gridded over batch tiles (conv2 output / MLP hiddens stay in VMEM).
    q2 = jnp.stack([_quadrant_patches(y1, 5, 5, dy, dx)
                    for dy in (0, 1) for dx in (0, 1)], axis=0)  # (4, N, 25, 150)
    q2 = jnp.transpose(q2, (0, 2, 1, 3))                         # (4, 25, N, 150)
    logits = conv2_pool_mlp(q2, packed)                          # (N, 128)
    return logits[:, :10]


# Pure-JAX reference (numerical validation only)
def reference(params, x_nchw):
    x = jax.lax.conv_general_dilated(
        x_nchw, params["conv1_w"], (1, 1), "VALID",
        dimension_numbers=("NCHW", "OIHW", "NCHW"),
        precision=jax.lax.Precision.HIGHEST)
    x = jax.nn.relu(x + params["conv1_b"][None, :, None, None])
    x = jax.lax.reduce_window(x, -jnp.inf, jax.lax.max,
                              (1, 1, 2, 2), (1, 1, 2, 2), "VALID")
    x = jax.lax.conv_general_dilated(
        x, params["conv2_w"], (1, 1), "VALID",
        dimension_numbers=("NCHW", "OIHW", "NCHW"),
        precision=jax.lax.Precision.HIGHEST)
    x = jax.nn.relu(x + params["conv2_b"][None, :, None, None])
    x = jax.lax.reduce_window(x, -jnp.inf, jax.lax.max,
                              (1, 1, 2, 2), (1, 1, 2, 2), "VALID")
    x = x.reshape(-1, 16 * 5 * 5)
    x = jax.nn.relu(x @ params["lin1_w"].T + params["lin1_b"])
    x = jax.nn.relu(x @ params["lin2_w"].T + params["lin2_b"])
    x = x @ params["lin3_w"].T + params["lin3_b"]
    return x


if __name__ == "__main__":
    key = jax.random.PRNGKey(0)
    pkey, xkey = jax.random.split(key)
    params = init_params(pkey)
    packed = pack_params(params)
    # Forward implies 32x32 spatial: 32 -conv5-> 28 -pool-> 14 -conv5-> 10 -pool-> 5
    x = jax.random.normal(xkey, (2, 3, 32, 32), jnp.float32)

    fwd = jax.jit(forward)
    out = jax.block_until_ready(fwd(packed, x))
    ref = jax.block_until_ready(reference(params, x))

    assert out.shape == (2, 10), out.shape
    assert bool(jnp.all(jnp.isfinite(out)))
    max_err = float(jnp.max(jnp.abs(out - ref)))
    assert bool(jnp.allclose(out, ref, rtol=1e-3, atol=1e-3)), max_err
    print("KERNEL_OK")
</pallas_src>

<mosaic_0001>
module attributes {stable_mosaic.version = 11 : i64} {
  func.func @_conv_pool_kernel(%arg0: i32, %arg1: memref<200x75xf32, #tpu.memory_space<vmem>>, %arg2: memref<200x75xf32, #tpu.memory_space<vmem>>, %arg3: memref<200x75xf32, #tpu.memory_space<vmem>>, %arg4: memref<200x75xf32, #tpu.memory_space<vmem>>, %arg5: memref<75x128xf32, #tpu.memory_space<vmem>>, %arg6: memref<1x128xf32, #tpu.memory_space<vmem>>, %arg7: memref<200x128xf32, #tpu.memory_space<vmem>>) attributes {dimension_semantics = [#tpu.dimension_semantics<parallel>], iteration_bounds = array<i64: 2>, scalar_prefetch = 0 : i64, scratch_operands = 0 : i64, tpu.core_type = #tpu.core_type<tc>, window_params = [{transform_indices = @transform_0, window_bounds = array<i64: 200, 75>}, {transform_indices = @transform_1, window_bounds = array<i64: 200, 75>}, {transform_indices = @transform_2, window_bounds = array<i64: 200, 75>}, {transform_indices = @transform_3, window_bounds = array<i64: 200, 75>}, {pipeline_mode = #tpu.pipeline_mode<synchronous>, transform_indices = @transform_4, window_bounds = array<i64: 75, 128>}, {pipeline_mode = #tpu.pipeline_mode<synchronous>, transform_indices = @transform_5, window_bounds = array<i64: 1, 128>}, {transform_indices = @transform_6, window_bounds = array<i64: 200, 128>}]} {
    %c0 = arith.constant 0 : index
    %c0_0 = arith.constant 0 : index
    %0 = vector.load %arg5[%c0, %c0_0] : memref<75x128xf32, #tpu.memory_space<vmem>>, vector<75x128xf32>
    %c0_1 = arith.constant 0 : index
    %c0_2 = arith.constant 0 : index
    %1 = vector.load %arg1[%c0_1, %c0_2] : memref<200x75xf32, #tpu.memory_space<vmem>>, vector<200x75xf32>
    %cst = arith.constant dense<0.000000e+00> : vector<200x128xf32>
    %2 = tpu.matmul %1, %0, %cst {dimension_numbers = #tpu.dot_dimension_numbers<[1], [0], [0], [1], [0, 0, 1, 1], [], []>} : vector<200x75xf32>, vector<75x128xf32>, vector<200x128xf32> -> vector<200x128xf32>
    %c0_3 = arith.constant 0 : index
    %c0_4 = arith.constant 0 : index
    %3 = vector.load %arg2[%c0_3, %c0_4] : memref<200x75xf32, #tpu.memory_space<vmem>>, vector<200x75xf32>
    %cst_5 = arith.constant dense<0.000000e+00> : vector<200x128xf32>
    %4 = tpu.matmul %3, %0, %cst_5 {dimension_numbers = #tpu.dot_dimension_numbers<[1], [0], [0], [1], [0, 0, 1, 1], [], []>} : vector<200x75xf32>, vector<75x128xf32>, vector<200x128xf32> -> vector<200x128xf32>
    %5 = arith.maximumf %2, %4 : vector<200x128xf32>
    %c0_6 = arith.constant 0 : index
    %c0_7 = arith.constant 0 : index
    %6 = vector.load %arg3[%c0_6, %c0_7] : memref<200x75xf32, #tpu.memory_space<vmem>>, vector<200x75xf32>
    %cst_8 = arith.constant dense<0.000000e+00> : vector<200x128xf32>
    %7 = tpu.matmul %6, %0, %cst_8 {dimension_numbers = #tpu.dot_dimension_numbers<[1], [0], [0], [1], [0, 0, 1, 1], [], []>} : vector<200x75xf32>, vector<75x128xf32>, vector<200x128xf32> -> vector<200x128xf32>
    %8 = arith.maximumf %5, %7 : vector<200x128xf32>
    %c0_9 = arith.constant 0 : index
    %c0_10 = arith.constant 0 : index
    %9 = vector.load %arg4[%c0_9, %c0_10] : memref<200x75xf32, #tpu.memory_space<vmem>>, vector<200x75xf32>
    %cst_11 = arith.constant dense<0.000000e+00> : vector<200x128xf32>
    %10 = tpu.matmul %9, %0, %cst_11 {dimension_numbers = #tpu.dot_dimension_numbers<[1], [0], [0], [1], [0, 0, 1, 1], [], []>} : vector<200x75xf32>, vector<75x128xf32>, vector<200x128xf32> -> vector<200x128xf32>
    %11 = arith.maximumf %8, %10 : vector<200x128xf32>
    %c0_12 = arith.constant 0 : index
    %c0_13 = arith.constant 0 : index
    %12 = vector.load %arg6[%c0_12, %c0_13] : memref<1x128xf32, #tpu.memory_space<vmem>>, vector<1x128xf32>
    %13 = vector.broadcast %12 : vector<1x128xf32> to vector<200x128xf32>
    %14 = arith.addf %11, %13 : vector<200x128xf32>
    %cst_14 = arith.constant 0.000000e+00 : f32
    %15 = vector.broadcast %cst_14 : f32 to vector<200x128xf32>
    %16 = arith.maximumf %14, %15 : vector<200x128xf32>
    %c0_15 = arith.constant 0 : index
    %c0_16 = arith.constant 0 : index
    %17 = vector.load %arg7[%c0_15, %c0_16] : memref<200x128xf32, #tpu.memory_space<vmem>>, vector<200x128xf32>
    tpu.vector_store %arg7[%c0_15, %c0_16], %16 {strides = array<i32>} : memref<200x128xf32, #tpu.memory_space<vmem>>, vector<200x128xf32>,
    return
  }
  func.func @transform_0(%arg0: i32) -> (i32, i32) {
    %c0_i32 = arith.constant 0 : i32
    %c0_i32_0 = arith.constant 0 : i32
    return %arg0, %c0_i32 : i32, i32
  }
  func.func @transform_1(%arg0: i32) -> (i32, i32) {
    %c0_i32 = arith.constant 0 : i32
    %c0_i32_0 = arith.constant 0 : i32
    return %arg0, %c0_i32 : i32, i32
  }
  func.func @transform_2(%arg0: i32) -> (i32, i32) {
    %c0_i32 = arith.constant 0 : i32
    %c0_i32_0 = arith.constant 0 : i32
    return %arg0, %c0_i32 : i32, i32
  }
  func.func @transform_3(%arg0: i32) -> (i32, i32) {
    %c0_i32 = arith.constant 0 : i32
    %c0_i32_0 = arith.constant 0 : i32
    return %arg0, %c0_i32 : i32, i32
  }
  func.func @transform_4(%arg0: i32) -> (i32, i32) {
    %c0_i32 = arith.constant 0 : i32
    %c0_i32_0 = arith.constant 0 : i32
    %c0_i32_1 = arith.constant 0 : i32
    return %c0_i32, %c0_i32_0 : i32, i32
  }
  func.func @transform_5(%arg0: i32) -> (i32, i32) {
    %c0_i32 = arith.constant 0 : i32
    %c0_i32_0 = arith.constant 0 : i32
    %c0_i32_1 = arith.constant 0 : i32
    return %c0_i32, %c0_i32_0 : i32, i32
  }
  func.func @transform_6(%arg0: i32) -> (i32, i32) {
    %c0_i32 = arith.constant 0 : i32
    %c0_i32_0 = arith.constant 0 : i32
    return %arg0, %c0_i32 : i32, i32
  }
}

module attributes {stable_mosaic.version = 11 : i64} {
  func.func @_conv2_pool_mlp_kernel(%arg0: i32, %arg1: memref<4x25x8x150xf32, #tpu.memory_space<vmem>>, %arg2: memref<150x128xf32, #tpu.memory_space<vmem>>, %arg3: memref<1x128xf32, #tpu.memory_space<vmem>>, %arg4: memref<25x128x128xf32, #tpu.memory_space<vmem>>, %arg5: memref<1x128xf32, #tpu.memory_space<vmem>>, %arg6: memref<128x128xf32, #tpu.memory_space<vmem>>, %arg7: memref<1x128xf32, #tpu.memory_space<vmem>>, %arg8: memref<128x128xf32, #tpu.memory_space<vmem>>, %arg9: memref<1x128xf32, #tpu.memory_space<vmem>>, %arg10: memref<8x128xf32, #tpu.memory_space<vmem>>, %arg11: memref<8x128xf32, #tpu.memory_space<vmem>>) attributes {dimension_semantics = [#tpu.dimension_semantics<parallel>], iteration_bounds = array<i64: 1>, scalar_prefetch = 0 : i64, scratch_operands = 1 : i64, tpu.core_type = #tpu.core_type<tc>, window_params = [{transform_indices = @transform_0, window_bounds = array<i64: 4, 25, 8, 150>}, {pipeline_mode = #tpu.pipeline_mode<synchronous>, transform_indices = @transform_1, window_bounds = array<i64: 150, 128>}, {pipeline_mode = #tpu.pipeline_mode<synchronous>, transform_indices = @transform_2, window_bounds = array<i64: 1, 128>}, {pipeline_mode = #tpu.pipeline_mode<synchronous>, transform_indices = @transform_3, window_bounds = array<i64: 25, 128, 128>}, {pipeline_mode = #tpu.pipeline_mode<synchronous>, transform_indices = @transform_4, window_bounds = array<i64: 1, 128>}, {pipeline_mode = #tpu.pipeline_mode<synchronous>, transform_indices = @transform_5, window_bounds = array<i64: 128, 128>}, {pipeline_mode = #tpu.pipeline_mode<synchronous>, transform_indices = @transform_6, window_bounds = array<i64: 1, 128>}, {pipeline_mode = #tpu.pipeline_mode<synchronous>, transform_indices = @transform_7, window_bounds = array<i64: 128, 128>}, {pipeline_mode = #tpu.pipeline_mode<synchronous>, transform_indices = @transform_8, window_bounds = array<i64: 1, 128>}, {transform_indices = @transform_9, window_bounds = array<i64: 8, 128>}]} {
    %c0 = arith.constant 0 : index
    %c0_0 = arith.constant 0 : index
    %0 = vector.load %arg2[%c0, %c0_0] : memref<150x128xf32, #tpu.memory_space<vmem>>, vector<150x128xf32>
    %c0_1 = arith.constant 0 : index
    %c0_2 = arith.constant 0 : index
    %1 = vector.load %arg3[%c0_1, %c0_2] : memref<1x128xf32, #tpu.memory_space<vmem>>, vector<1x128xf32>
    %cst = arith.constant 0.000000e+00 : f32
    %2 = vector.broadcast %cst : f32 to vector<8x128xf32>
    %c0_3 = arith.constant 0 : index
    %c0_4 = arith.constant 0 : index
    %3 = vector.load %arg11[%c0_3, %c0_4] : memref<8x128xf32, #tpu.memory_space<vmem>>, vector<8x128xf32>
    tpu.vector_store %arg11[%c0_3, %c0_4], %2 {strides = array<i32>} : memref<8x128xf32, #tpu.memory_space<vmem>>, vector<8x128xf32>,
    %c0_5 = arith.constant 0 : index
    %c0_6 = arith.constant 0 : index
    %c0_7 = arith.constant 0 : index
    %c0_8 = arith.constant 0 : index
    %4 = vector.load %arg1[%c0_5, %c0_6, %c0_7, %c0_8] : memref<4x25x8x150xf32, #tpu.memory_space<vmem>>, vector<1x1x8x150xf32>
    %5 = vector.shape_cast %4 : vector<1x1x8x150xf32> to vector<8x150xf32>
    %cst_9 = arith.constant dense<0.000000e+00> : vector<8x128xf32>
    %6 = tpu.matmul %5, %0, %cst_9 {dimension_numbers = #tpu.dot_dimension_numbers<[1], [0], [0], [1], [0, 0, 1, 1], [], []>} : vector<8x150xf32>, vector<150x128xf32>, vector<8x128xf32> -> vector<8x128xf32>
    %c1 = arith.constant 1 : index
    %c0_10 = arith.constant 0 : index
    %c0_11 = arith.constant 0 : index
    %c0_12 = arith.constant 0 : index
    %7 = vector.load %arg1[%c1, %c0_10, %c0_11, %c0_12] : memref<4x25x8x150xf32, #tpu.memory_space<vmem>>, vector<1x1x8x150xf32>
    %8 = vector.shape_cast %7 : vector<1x1x8x150xf32> to vector<8x150xf32>
    %cst_13 = arith.constant dense<0.000000e+00> : vector<8x128xf32>
    %9 = tpu.matmul %8, %0, %cst_13 {dimension_numbers = #tpu.dot_dimension_numbers<[1], [0], [0], [1], [0, 0, 1, 1], [], []>} : vector<8x150xf32>, vector<150x128xf32>, vector<8x128xf32> -> vector<8x128xf32>
    %10 = arith.maximumf %6, %9 : vector<8x128xf32>
    %c2 = arith.constant 2 : index
    %c0_14 = arith.constant 0 : index
    %c0_15 = arith.constant 0 : index
    %c0_16 = arith.constant 0 : index
    %11 = vector.load %arg1[%c2, %c0_14, %c0_15, %c0_16] : memref<4x25x8x150xf32, #tpu.memory_space<vmem>>, vector<1x1x8x150xf32>
    %12 = vector.shape_cast %11 : vector<1x1x8x150xf32> to vector<8x150xf32>
    %cst_17 = arith.constant dense<0.000000e+00> : vector<8x128xf32>
    %13 = tpu.matmul %12, %0, %cst_17 {dimension_numbers = #tpu.dot_dimension_numbers<[1], [0], [0], [1], [0, 0, 1, 1], [], []>} : vector<8x150xf32>, vector<150x128xf32>, vector<8x128xf32> -> vector<8x128xf32>
    %14 = arith.maximumf %10, %13 : vector<8x128xf32>
    %c3 = arith.constant 3 : index
    %c0_18 = arith.constant 0 : index
    %c0_19 = arith.constant 0 : index
    %c0_20 = arith.constant 0 : index
    %15 = vector.load %arg1[%c3, %c0_18, %c0_19, %c0_20] : memref<4x25x8x150xf32, #tpu.memory_space<vmem>>, vector<1x1x8x150xf32>
    %16 = vector.shape_cast %15 : vector<1x1x8x150xf32> to vector<8x150xf32>
    %cst_21 = arith.constant dense<0.000000e+00> : vector<8x128xf32>
    %17 = tpu.matmul %16, %0, %cst_21 {dimension_numbers = #tpu.dot_dimension_numbers<[1], [0], [0], [1], [0, 0, 1, 1], [], []>} : vector<8x150xf32>, vector<150x128xf32>, vector<8x128xf32> -> vector<8x128xf32>
    %18 = arith.maximumf %14, %17 : vector<8x128xf32>
    %19 = vector.broadcast %1 : vector<1x128xf32> to vector<8x128xf32>
    %20 = arith.addf %18, %19 : vector<8x128xf32>
    %cst_22 = arith.constant 0.000000e+00 : f32
    %21 = vector.broadcast %cst_22 : f32 to vector<8x128xf32>
    %22 = arith.maximumf %20, %21 : vector<8x128xf32>
    %c0_23 = arith.constant 0 : index
    %c0_24 = arith.constant 0 : index
    %23 = vector.load %arg11[%c0_23, %c0_24] : memref<8x128xf32, #tpu.memory_space<vmem>>, vector<8x128xf32>
    %c0_25 = arith.constant 0 : index
    %c0_26 = arith.constant 0 : index
    %c0_27 = arith.constant 0 : index
    %24 = vector.load %arg4[%c0_25, %c0_26, %c0_27] : memref<25x128x128xf32, #tpu.memory_space<vmem>>, vector<1x128x128xf32>
    %25 = vector.shape_cast %24 : vector<1x128x128xf32> to vector<128x128xf32>
    %cst_28 = arith.constant dense<0.000000e+00> : vector<8x128xf32>
    %26 = tpu.matmul %22, %25, %cst_28 {dimension_numbers = #tpu.dot_dimension_numbers<[1], [0], [0], [1], [0, 0, 1, 1], [], []>} : vector<8x128xf32>, vector<128x128xf32>, vector<8x128xf32> -> vector<8x128xf32>
    %27 = arith.addf %23, %26 : vector<8x128xf32>
    %c0_29 = arith.constant 0 : index
    %c0_30 = arith.constant 0 : index
    %28 = vector.load %arg11[%c0_29, %c0_30] : memref<8x128xf32, #tpu.memory_space<vmem>>, vector<8x128xf32>
    tpu.vector_store %arg11[%c0_29, %c0_30], %27 {strides = array<i32>} : memref<8x128xf32, #tpu.memory_space<vmem>>, vector<8x128xf32>,
    %c0_31 = arith.constant 0 : index
    %c1_32 = arith.constant 1 : index
    %c0_33 = arith.constant 0 : index
    %c0_34 = arith.constant 0 : index
    %29 = vector.load %arg1[%c0_31, %c1_32, %c0_33, %c0_34] : memref<4x25x8x150xf32, #tpu.memory_space<vmem>>, vector<1x1x8x150xf32>
    %30 = vector.shape_cast %29 : vector<1x1x8x150xf32> to vector<8x150xf32>
    %cst_35 = arith.constant dense<0.000000e+00> : vector<8x128xf32>
    %31 = tpu.matmul %30, %0, %cst_35 {dimension_numbers = #tpu.dot_dimension_numbers<[1], [0], [0], [1], [0, 0, 1, 1], [], []>} : vector<8x150xf32>, vector<150x128xf32>, vector<8x128xf32> -> vector<8x128xf32>
    %c1_36 = arith.constant 1 : index
    %c1_37 = arith.constant 1 : index
    %c0_38 = arith.constant 0 : index
    %c0_39 = arith.constant 0 : index
    %32 = vector.load %arg1[%c1_36, %c1_37, %c0_38, %c0_39] : memref<4x25x8x150xf32, #tpu.memory_space<vmem>>, vector<1x1x8x150xf32>
    %33 = vector.shape_cast %32 : vector<1x1x8x150xf32> to vector<8x150xf32>
    %cst_40 = arith.constant dense<0.000000e+00> : vector<8x128xf32>
    %34 = tpu.matmul %33, %0, %cst_40 {dimension_numbers = #tpu.dot_dimension_numbers<[1], [0], [0], [1], [0, 0, 1, 1], [], []>} : vector<8x150xf32>, vector<150x128xf32>, vector<8x128xf32> -> vector<8x128xf32>
    %35 = arith.maximumf %31, %34 : vector<8x128xf32>
    %c2_41 = arith.constant 2 : index
    %c1_42 = arith.constant 1 : index
    %c0_43 = arith.constant 0 : index
    %c0_44 = arith.constant 0 : index
    %36 = vector.load %arg1[%c2_41, %c1_42, %c0_43, %c0_44] : memref<4x25x8x150xf32, #tpu.memory_space<vmem>>, vector<1x1x8x150xf32>
    %37 = vector.shape_cast %36 : vector<1x1x8x150xf32> to vector<8x150xf32>
    %cst_45 = arith.constant dense<0.000000e+00> : vector<8x128xf32>
    %38 = tpu.matmul %37, %0, %cst_45 {dimension_numbers = #tpu.dot_dimension_numbers<[1], [0], [0], [1], [0, 0, 1, 1], [], []>} : vector<8x150xf32>, vector<150x128xf32>, vector<8x128xf32> -> vector<8x128xf32>
    %39 = arith.maximumf %35, %38 : vector<8x128xf32>
    %c3_46 = arith.constant 3 : index
    %c1_47 = arith.constant 1 : index
    %c0_48 = arith.constant 0 : index
    %c0_49 = arith.constant 0 : index
    %40 = vector.load %arg1[%c3_46, %c1_47, %c0_48, %c0_49] : memref<4x25x8x150xf32, #tpu.memory_space<vmem>>, vector<1x1x8x150xf32>
    %41 = vector.shape_cast %40 : vector<1x1x8x150xf32> to vector<8x150xf32>
    %cst_50 = arith.constant dense<0.000000e+00> : vector<8x128xf32>
    %42 = tpu.matmul %41, %0, %cst_50 {dimension_numbers = #tpu.dot_dimension_numbers<[1], [0], [0], [1], [0, 0, 1, 1], [], []>} : vector<8x150xf32>, vector<150x128xf32>, vector<8x128xf32> -> vector<8x128xf32>
    %43 = arith.maximumf %39, %42 : vector<8x128xf32>
    %44 = vector.broadcast %1 : vector<1x128xf32> to vector<8x128xf32>
    %45 = arith.addf %43, %44 : vector<8x128xf32>
    %cst_51 = arith.constant 0.000000e+00 : f32
    %46 = vector.broadcast %cst_51 : f32 to vector<8x128xf32>
    %47 = arith.maximumf %45, %46 : vector<8x128xf32>
    %c0_52 = arith.constant 0 : index
    %c0_53 = arith.constant 0 : index
    %48 = vector.load %arg11[%c0_52, %c0_53] : memref<8x128xf32, #tpu.memory_space<vmem>>, vector<8x128xf32>
    %c1_54 = arith.constant 1 : index
    %c0_55 = arith.constant 0 : index
    %c0_56 = arith.constant 0 : index
    %49 = vector.load %arg4[%c1_54, %c0_55, %c0_56] : memref<25x128x128xf32, #tpu.memory_space<vmem>>, vector<1x128x128xf32>
    %50 = vector.shape_cast %49 : vector<1x128x128xf32> to vector<128x128xf32>
    %cst_57 = arith.constant dense<0.000000e+00> : vector<8x128xf32>
    %51 = tpu.matmul %47, %50, %cst_57 {dimension_numbers = #tpu.dot_dimension_numbers<[1], [0], [0], [1], [0, 0, 1, 1], [], []>} : vector<8x128xf32>, vector<128x128xf32>, vector<8x128xf32> -> vector<8x128xf32>
    %52 = arith.addf %48, %51 : vector<8x128xf32>
    %c0_58 = arith.constant 0 : index
    %c0_59 = arith.constant 0 : index
    %53 = vector.load %arg11[%c0_58, %c0_59] : memref<8x128xf32, #tpu.memory_space<vmem>>, vector<8x128xf32>
    tpu.vector_store %arg11[%c0_58, %c0_59], %52 {strides = array<i32>} : memref<8x128xf32, #tpu.memory_space<vmem>>, vector<8x128xf32>,
    %c0_60 = arith.constant 0 : index
    %c2_61 = arith.constant 2 : index
    %c0_62 = arith.constant 0 : index
    %c0_63 = arith.constant 0 : index
    %54 = vector.load %arg1[%c0_60, %c2_61, %c0_62, %c0_63] : memref<4x25x8x150xf32, #tpu.memory_space<vmem>>, vector<1x1x8x150xf32>
    %55 = vector.shape_cast %54 : vector<1x1x8x150xf32> to vector<8x150xf32>
    %cst_64 = arith.constant dense<0.000000e+00> : vector<8x128xf32>
    %56 = tpu.matmul %55, %0, %cst_64 {dimension_numbers = #tpu.dot_dimension_numbers<[1], [0], [0], [1], [0, 0, 1, 1], [], []>} : vector<8x150xf32>, vector<150x128xf32>, vector<8x128xf32> -> vector<8x128xf32>
    %c1_65 = arith.constant 1 : index
    %c2_66 = arith.constant 2 : index
    %c0_67 = arith.constant 0 : index
    %c0_68 = arith.constant 0 : index
    %57 = vector.load %arg1[%c1_65, %c2_66, %c0_67, %c0_68] : memref<4x25x8x150xf32, #tpu.memory_space<vmem>>, vector<1x1x8x150xf32>
    %58 = vector.shape_cast %57 : vector<1x1x8x150xf32> to vector<8x150xf32>
    %cst_69 = arith.constant dense<0.000000e+00> : vector<8x128xf32>
    %59 = tpu.matmul %58, %0, %cst_69 {dimension_numbers = #tpu.dot_dimension_numbers<[1], [0], [0], [1], [0, 0, 1, 1], [], []>} : vector<8x150xf32>, vector<150x128xf32>, vector<8x128xf32> -> vector<8x128xf32>
    %60 = arith.maximumf %56, %59 : vector<8x128xf32>
    %c2_70 = arith.constant 2 : index
    %c2_71 = arith.constant 2 : index
    %c0_72 = arith.constant 0 : index
    %c0_73 = arith.constant 0 : index
    %61 = vector.load %arg1[%c2_70, %c2_71, %c0_72, %c0_73] : memref<4x25x8x150xf32, #tpu.memory_space<vmem>>, vector<1x1x8x150xf32>
    %62 = vector.shape_cast %61 : vector<1x1x8x150xf32> to vector<8x150xf32>
    %cst_74 = arith.constant dense<0.000000e+00> : vector<8x128xf32>
    %63 = tpu.matmul %62, %0, %cst_74 {dimension_numbers = #tpu.dot_dimension_numbers<[1], [0], [0], [1], [0, 0, 1, 1], [], []>} : vector<8x150xf32>, vector<150x128xf32>, vector<8x128xf32> -> vector<8x128xf32>
    %64 = arith.maximumf %60, %63 : vector<8x128xf32>
    %c3_75 = arith.constant 3 : index
    %c2_76 = arith.constant 2 : index
    %c0_77 = arith.constant 0 : index
    %c0_78 = arith.constant 0 : index
    %65 = vector.load %arg1[%c3_75, %c2_76, %c0_77, %c0_78] : memref<4x25x8x150xf32, #tpu.memory_space<vmem>>, vector<1x1x8x150xf32>
    %66 = vector.shape_cast %65 : vector<1x1x8x150xf32> to vector<8x150xf32>
    %cst_79 = arith.constant dense<0.000000e+00> : vector<8x128xf32>
    %67 = tpu.matmul %66, %0, %cst_79 {dimension_numbers = #tpu.dot_dimension_numbers<[1], [0], [0], [1], [0, 0, 1, 1], [], []>} : vector<8x150xf32>, vector<150x128xf32>, vector<8x128xf32> -> vector<8x128xf32>
    %68 = arith.maximumf %64, %67 : vector<8x128xf32>
    %69 = vector.broadcast %1 : vector<1x128xf32> to vector<8x128xf32>
    %70 = arith.addf %68, %69 : vector<8x128xf32>
    %cst_80 = arith.constant 0.000000e+00 : f32
    %71 = vector.broadcast %cst_80 : f32 to vector<8x128xf32>
    %72 = arith.maximumf %70, %71 : vector<8x128xf32>
    %c0_81 = arith.constant 0 : index
    %c0_82 = arith.constant 0 : index
    %73 = vector.load %arg11[%c0_81, %c0_82] : memref<8x128xf32, #tpu.memory_space<vmem>>, vector<8x128xf32>
    %c2_83 = arith.constant 2 : index
    %c0_84 = arith.constant 0 : index
    %c0_85 = arith.constant 0 : index
    %74 = vector.load %arg4[%c2_83, %c0_84, %c0_85] : memref<25x128x128xf32, #tpu.memory_space<vmem>>, vector<1x128x128xf32>
    %75 = vector.shape_cast %74 : vector<1x128x128xf32> to vector<128x128xf32>
    %cst_86 = arith.constant dense<0.000000e+00> : vector<8x128xf32>
    %76 = tpu.matmul %72, %75, %cst_86 {dimension_numbers = #tpu.dot_dimension_numbers<[1], [0], [0], [1], [0, 0, 1, 1], [], []>} : vector<8x128xf32>, vector<128x128xf32>, vector<8x128xf32> -> vector<8x128xf32>
    %77 = arith.addf %73, %76 : vector<8x128xf32>
    %c0_87 = arith.constant 0 : index
    %c0_88 = arith.constant 0 : index
    %78 = vector.load %arg11[%c0_87, %c0_88] : memref<8x128xf32, #tpu.memory_space<vmem>>, vector<8x128xf32>
    tpu.vector_store %arg11[%c0_87, %c0_88], %77 {strides = array<i32>} : memref<8x128xf32, #tpu.memory_space<vmem>>, vector<8x128xf32>,
    %c0_89 = arith.constant 0 : index
    %c3_90 = arith.constant 3 : index
    %c0_91 = arith.constant 0 : index
    %c0_92 = arith.constant 0 : index
    %79 = vector.load %arg1[%c0_89, %c3_90, %c0_91, %c0_92] : memref<4x25x8x150xf32, #tpu.memory_space<vmem>>, vector<1x1x8x150xf32>
    %80 = vector.shape_cast %79 : vector<1x1x8x150xf32> to vector<8x150xf32>
    %cst_93 = arith.constant dense<0.000000e+00> : vector<8x128xf32>
    %81 = tpu.matmul %80, %0, %cst_93 {dimension_numbers = #tpu.dot_dimension_numbers<[1], [0], [0], [1], [0, 0, 1, 1], [], []>} : vector<8x150xf32>, vector<150x128xf32>, vector<8x128xf32> -> vector<8x128xf32>
    %c1_94 = arith.constant 1 : index
    %c3_95 = arith.constant 3 : index
    %c0_96 = arith.constant 0 : index
    %c0_97 = arith.constant 0 : index
    %82 = vector.load %arg1[%c1_94, %c3_95, %c0_96, %c0_97] : memref<4x25x8x150xf32, #tpu.memory_space<vmem>>, vector<1x1x8x150xf32>
    %83 = vector.shape_cast %82 : vector<1x1x8x150xf32> to vector<8x150xf32>
    %cst_98 = arith.constant dense<0.000000e+00> : vector<8x128xf32>
    %84 = tpu.matmul %83, %0, %cst_98 {dimension_numbers = #tpu.dot_dimension_numbers<[1], [0], [0], [1], [0, 0, 1, 1], [], []>} : vector<8x150xf32>, vector<150x128xf32>, vector<8x128xf32> -> vector<8x128xf32>
    %85 = arith.maximumf %81, %84 : vector<8x128xf32>
    %c2_99 = arith.constant 2 : index
    %c3_100 = arith.constant 3 : index
    %c0_101 = arith.constant 0 : index
    %c0_102 = arith.constant 0 : index
    %86 = vector.load %arg1[%c2_99, %c3_100, %c0_101, %c0_102] : memref<4x25x8x150xf32, #tpu.memory_space<vmem>>, vector<1x1x8x150xf32>
    %87 = vector.shape_cast %86 : vector<1x1x8x150xf32> to vector<8x150xf32>
    %cst_103 = arith.constant dense<0.000000e+00> : vector<8x128xf32>
    %88 = tpu.matmul %87, %0, %cst_103 {dimension_numbers = #tpu.dot_dimension_numbers<[1], [0], [0], [1], [0, 0, 1, 1], [], []>} : vector<8x150xf32>, vector<150x128xf32>, vector<8x128xf32> -> vector<8x128xf32>
    %89 = arith.maximumf %85, %88 : vector<8x128xf32>
    %c3_104 = arith.constant 3 : index
    %c3_105 = arith.constant 3 : index
    %c0_106 = arith.constant 0 : index
    %c0_107 = arith.constant 0 : index
    %90 = vector.load %arg1[%c3_104, %c3_105, %c0_106, %c0_107] : memref<4x25x8x150xf32, #tpu.memory_space<vmem>>, vector<1x1x8x150xf32>
    %91 = vector.shape_cast %90 : vector<1x1x8x150xf32> to vector<8x150xf32>
    %cst_108 = arith.constant dense<0.000000e+00> : vector<8x128xf32>
    %92 = tpu.matmul %91, %0, %cst_108 {dimension_numbers = #tpu.dot_dimension_numbers<[1], [0], [0], [1], [0, 0, 1, 1], [], []>} : vector<8x150xf32>, vector<150x128xf32>, vector<8x128xf32> -> vector<8x128xf32>
    %93 = arith.maximumf %89, %92 : vector<8x128xf32>
    %94 = vector.broadcast %1 : vector<1x128xf32> to vector<8x128xf32>
    %95 = arith.addf %93, %94 : vector<8x128xf32>
    %cst_109 = arith.constant 0.000000e+00 : f32
    %96 = vector.broadcast %cst_109 : f32 to vector<8x128xf32>
    %97 = arith.maximumf %95, %96 : vector<8x128xf32>
    %c0_110 = arith.constant 0 : index
    %c0_111 = arith.constant 0 : index
    %98 = vector.load %arg11[%c0_110, %c0_111] : memref<8x128xf32, #tpu.memory_space<vmem>>, vector<8x128xf32>
    %c3_112 = arith.constant 3 : index
    %c0_113 = arith.constant 0 : index
    %c0_114 = arith.constant 0 : index
    %99 = vector.load %arg4[%c3_112, %c0_113, %c0_114] : memref<25x128x128xf32, #tpu.memory_space<vmem>>, vector<1x128x128xf32>
    %100 = vector.shape_cast %99 : vector<1x128x128xf32> to vector<128x128xf32>
    %cst_115 = arith.constant dense<0.000000e+00> : vector<8x128xf32>
    %101 = tpu.matmul %97, %100, %cst_115 {dimension_numbers = #tpu.dot_dimension_numbers<[1], [0], [0], [1], [0, 0, 1, 1], [], []>} : vector<8x128xf32>, vector<128x128xf32>, vector<8x128xf32> -> vector<8x128xf32>
    %102 = arith.addf %98, %101 : vector<8x128xf32>
    %c0_116 = arith.constant 0 : index
    %c0_117 = arith.constant 0 : index
    %103 = vector.load %arg11[%c0_116, %c0_117] : memref<8x128xf32, #tpu.memory_space<vmem>>, vector<8x128xf32>
    tpu.vector_store %arg11[%c0_116, %c0_117], %102 {strides = array<i32>} : memref<8x128xf32, #tpu.memory_space<vmem>>, vector<8x128xf32>,
    %c0_118 = arith.constant 0 : index
    %c4 = arith.constant 4 : index
    %c0_119 = arith.constant 0 : index
    %c0_120 = arith.constant 0 : index
    %104 = vector.load %arg1[%c0_118, %c4, %c0_119, %c0_120] : memref<4x25x8x150xf32, #tpu.memory_space<vmem>>, vector<1x1x8x150xf32>
    %105 = vector.shape_cast %104 : vector<1x1x8x150xf32> to vector<8x150xf32>
    %cst_121 = arith.constant dense<0.000000e+00> : vector<8x128xf32>
    %106 = tpu.matmul %105, %0, %cst_121 {dimension_numbers = #tpu.dot_dimension_numbers<[1], [0], [0], [1], [0, 0, 1, 1], [], []>} : vector<8x150xf32>, vector<150x128xf32>, vector<8x128xf32> -> vector<8x128xf32>
    %c1_122 = arith.constant 1 : index
    %c4_123 = arith.constant 4 : index
    %c0_124 = arith.constant 0 : index
    %c0_125 = arith.constant 0 : index
    %107 = vector.load %arg1[%c1_122, %c4_123, %c0_124, %c0_125] : memref<4x25x8x150xf32, #tpu.memory_space<vmem>>, vector<1x1x8x150xf32>
    %108 = vector.shape_cast %107 : vector<1x1x8x150xf32> to vector<8x150xf32>
    %cst_126 = arith.constant dense<0.000000e+00> : vector<8x128xf32>
    %109 = tpu.matmul %108, %0, %cst_126 {dimension_numbers = #tpu.dot_dimension_numbers<[1], [0], [0], [1], [0, 0, 1, 1], [], []>} : vector<8x150xf32>, vector<150x128xf32>, vector<8x128xf32> -> vector<8x128xf32>
    %110 = arith.maximumf %106, %109 : vector<8x128xf32>
    %c2_127 = arith.constant 2 : index
    %c4_128 = arith.constant 4 : index
    %c0_129 = arith.constant 0 : index
    %c0_130 = arith.constant 0 : index
    %111 = vector.load %arg1[%c2_127, %c4_128, %c0_129, %c0_130] : memref<4x25x8x150xf32, #tpu.memory_space<vmem>>, vector<1x1x8x150xf32>
    %112 = vector.shape_cast %111 : vector<1x1x8x150xf32> to vector<8x150xf32>
    %cst_131 = arith.constant dense<0.000000e+00> : vector<8x128xf32>
    %113 = tpu.matmul %112, %0, %cst_131 {dimension_numbers = #tpu.dot_dimension_numbers<[1], [0], [0], [1], [0, 0, 1, 1], [], []>} : vector<8x150xf32>, vector<150x128xf32>, vector<8x128xf32> -> vector<8x128xf32>
    %114 = arith.maximumf %110, %113 : vector<8x128xf32>
    %c3_132 = arith.constant 3 : index
    %c4_133 = arith.constant 4 : index
    %c0_134 = arith.constant 0 : index
    %c0_135 = arith.constant 0 : index
    %115 = vector.load %arg1[%c3_132, %c4_133, %c0_134, %c0_135] : memref<4x25x8x150xf32, #tpu.memory_space<vmem>>, vector<1x1x8x150xf32>
    %116 = vector.shape_cast %115 : vector<1x1x8x150xf32> to vector<8x150xf32>
    %cst_136 = arith.constant dense<0.000000e+00> : vector<8x128xf32>
    %117 = tpu.matmul %116, %0, %cst_136 {dimension_numbers = #tpu.dot_dimension_numbers<[1], [0], [0], [1], [0, 0, 1, 1], [], []>} : vector<8x150xf32>, vector<150x128xf32>, vector<8x128xf32> -> vector<8x128xf32>
    %118 = arith.maximumf %114, %117 : vector<8x128xf32>
    %119 = vector.broadcast %1 : vector<1x128xf32> to vector<8x128xf32>
    %120 = arith.addf %118, %119 : vector<8x128xf32>
    %cst_137 = arith.constant 0.000000e+00 : f32
    %121 = vector.broadcast %cst_137 : f32 to vector<8x128xf32>
    %122 = arith.maximumf %120, %121 : vector<8x128xf32>
    %c0_138 = arith.constant 0 : index
    %c0_139 = arith.constant 0 : index
    %123 = vector.load %arg11[%c0_138, %c0_139] : memref<8x128xf32, #tpu.memory_space<vmem>>, vector<8x128xf32>
    %c4_140 = arith.constant 4 : index
    %c0_141 = arith.constant 0 : index
    %c0_142 = arith.constant 0 : index
    %124 = vector.load %arg4[%c4_140, %c0_141, %c0_142] : memref<25x128x128xf32, #tpu.memory_space<vmem>>, vector<1x128x128xf32>
    %125 = vector.shape_cast %124 : vector<1x128x128xf32> to vector<128x128xf32>
    %cst_143 = arith.constant dense<0.000000e+00> : vector<8x128xf32>
    %126 = tpu.matmul %122, %125, %cst_143 {dimension_numbers = #tpu.dot_dimension_numbers<[1], [0], [0], [1], [0, 0, 1, 1], [], []>} : vector<8x128xf32>, vector<128x128xf32>, vector<8x128xf32> -> vector<8x128xf32>
    %127 = arith.addf %123, %126 : vector<8x128xf32>
    %c0_144 = arith.constant 0 : index
    %c0_145 = arith.constant 0 : index
    %128 = vector.load %arg11[%c0_144, %c0_145] : memref<8x128xf32, #tpu.memory_space<vmem>>, vector<8x128xf32>
    tpu.vector_store %arg11[%c0_144, %c0_145], %127 {strides = array<i32>} : memref<8x128xf32, #tpu.memory_space<vmem>>, vector<8x128xf32>,
    %c0_146 = arith.constant 0 : index
    %c5 = arith.constant 5 : index
    %c0_147 = arith.constant 0 : index
    %c0_148 = arith.constant 0 : index
    %129 = vector.load %arg1[%c0_146, %c5, %c0_147, %c0_148] : memref<4x25x8x150xf32, #tpu.memory_space<vmem>>, vector<1x1x8x150xf32>
    %130 = vector.shape_cast %129 : vector<1x1x8x150xf32> to vector<8x150xf32>
    %cst_149 = arith.constant dense<0.000000e+00> : vector<8x128xf32>
    %131 = tpu.matmul %130, %0, %cst_149 {dimension_numbers = #tpu.dot_dimension_numbers<[1], [0], [0], [1], [0, 0, 1, 1], [], []>} : vector<8x150xf32>, vector<150x128xf32>, vector<8x128xf32> -> vector<8x128xf32>
    %c1_150 = arith.constant 1 : index
    %c5_151 = arith.constant 5 : index
    %c0_152 = arith.constant 0 : index
    %c0_153 = arith.constant 0 : index
    %132 = vector.load %arg1[%c1_150, %c5_151, %c0_152, %c0_153] : memref<4x25x8x150xf32, #tpu.memory_space<vmem>>, vector<1x1x8x150xf32>
    %133 = vector.shape_cast %132 : vector<1x1x8x150xf32> to vector<8x150xf32>
    %cst_154 = arith.constant dense<0.000000e+00> : vector<8x128xf32>
    %134 = tpu.matmul %133, %0, %cst_154 {dimension_numbers = #tpu.dot_dimension_numbers<[1], [0], [0], [1], [0, 0, 1, 1], [], []>} : vector<8x150xf32>, vector<150x128xf32>, vector<8x128xf32> -> vector<8x128xf32>
    %135 = arith.maximumf %131, %134 : vector<8x128xf32>
    %c2_155 = arith.constant 2 : index
    %c5_156 = arith.constant 5 : index
    %c0_157 = arith.constant 0 : index
    %c0_158 = arith.constant 0 : index
    %136 = vector.load %arg1[%c2_155, %c5_156, %c0_157, %c0_158] : memref<4x25x8x150xf32, #tpu.memory_space<vmem>>, vector<1x1x8x150xf32>
    %137 = vector.shape_cast %136 : vector<1x1x8x150xf32> to vector<8x150xf32>
    %cst_159 = arith.constant dense<0.000000e+00> : vector<8x128xf32>
    %138 = tpu.matmul %137, %0, %cst_159 {dimension_numbers = #tpu.dot_dimension_numbers<[1], [0], [0], [1], [0, 0, 1, 1], [], []>} : vector<8x150xf32>, vector<150x128xf32>, vector<8x128xf32> -> vector<8x128xf32>
    %139 = arith.maximumf %135, %138 : vector<8x128xf32>
    %c3_160 = arith.constant 3 : index
    %c5_161 = arith.constant 5 : index
    %c0_162 = arith.constant 0 : index
    %c0_163 = arith.constant 0 : index
    %140 = vector.load %arg1[%c3_160, %c5_161, %c0_162, %c0_163] : memref<4x25x8x150xf32, #tpu.memory_space<vmem>>, vector<1x1x8x150xf32>
    %141 = vector.shape_cast %140 : vector<1x1x8x150xf32> to vector<8x150xf32>
    %cst_164 = arith.constant dense<0.000000e+00> : vector<8x128xf32>
    %142 = tpu.matmul %141, %0, %cst_164 {dimension_numbers = #tpu.dot_dimension_numbers<[1], [0], [0], [1], [0, 0, 1, 1], [], []>} : vector<8x150xf32>, vector<150x128xf32>, vector<8x128xf32> -> vector<8x128xf32>
    %143 = arith.maximumf %139, %142 : vector<8x128xf32>
    %144 = vector.broadcast %1 : vector<1x128xf32> to vector<8x128xf32>
    %145 = arith.addf %143, %144 : vector<8x128xf32>
    %cst_165 = arith.constant 0.000000e+00 : f32
    %146 = vector.broadcast %cst_165 : f32 to vector<8x128xf32>
    %147 = arith.maximumf %145, %146 : vector<8x128xf32>
    %c0_166 = arith.constant 0 : index
    %c0_167 = arith.constant 0 : index
    %148 = vector.load %arg11[%c0_166, %c0_167] : memref<8x128xf32, #tpu.memory_space<vmem>>, vector<8x128xf32>
    %c5_168 = arith.constant 5 : index
    %c0_169 = arith.constant 0 : index
    %c0_170 = arith.constant 0 : index
    %149 = vector.load %arg4[%c5_168, %c0_169, %c0_170] : memref<25x128x128xf32, #tpu.memory_space<vmem>>, vector<1x128x128xf32>
    %150 = vector.shape_cast %149 : vector<1x128x128xf32> to vector<128x128xf32>
    %cst_171 = arith.constant dense<0.000000e+00> : vector<8x128xf32>
    %151 = tpu.matmul %147, %150, %cst_171 {dimension_numbers = #tpu.dot_dimension_numbers<[1], [0], [0], [1], [0, 0, 1, 1], [], []>} : vector<8x128xf32>, vector<128x128xf32>, vector<8x128xf32> -> vector<8x128xf32>
    %152 = arith.addf %148, %151 : vector<8x128xf32>
    %c0_172 = arith.constant 0 : index
    %c0_173 = arith.constant 0 : index
    %153 = vector.load %arg11[%c0_172, %c0_173] : memref<8x128xf32, #tpu.memory_space<vmem>>, vector<8x128xf32>
    tpu.vector_store %arg11[%c0_172, %c0_173], %152 {strides = array<i32>} : memref<8x128xf32, #tpu.memory_space<vmem>>, vector<8x128xf32>,
    %c0_174 = arith.constant 0 : index
    %c6 = arith.constant 6 : index
    %c0_175 = arith.constant 0 : index
    %c0_176 = arith.constant 0 : index
    %154 = vector.load %arg1[%c0_174, %c6, %c0_175, %c0_176] : memref<4x25x8x150xf32, #tpu.memory_space<vmem>>, vector<1x1x8x150xf32>
    %155 = vector.shape_cast %154 : vector<1x1x8x150xf32> to vector<8x150xf32>
    %cst_177 = arith.constant dense<0.000000e+00> : vector<8x128xf32>
    %156 = tpu.matmul %155, %0, %cst_177 {dimension_numbers = #tpu.dot_dimension_numbers<[1], [0], [0], [1], [0, 0, 1, 1], [], []>} : vector<8x150xf32>, vector<150x128xf32>, vector<8x128xf32> -> vector<8x128xf32>
    %c1_178 = arith.constant 1 : index
    %c6_179 = arith.constant 6 : index
    %c0_180 = arith.constant 0 : index
    %c0_181 = arith.constant 0 : index
    %157 = vector.load %arg1[%c1_178, %c6_179, %c0_180, %c0_181] : memref<4x25x8x150xf32, #tpu.memory_space<vmem>>, vector<1x1x8x150xf32>
    %158 = vector.shape_cast %157 : vector<1x1x8x150xf32> to vector<8x150xf32>
    %cst_182 = arith.constant dense<0.000000e+00> : vector<8x128xf32>
    %159 = tpu.matmul %158, %0, %cst_182 {dimension_numbers = #tpu.dot_dimension_numbers<[1], [0], [0], [1], [0, 0, 1, 1], [], []>} : vector<8x150xf32>, vector<150x128xf32>, vector<8x128xf32> -> vector<8x128xf32>
    %160 = arith.maximumf %156, %159 : vector<8x128xf32>
    %c2_183 = arith.constant 2 : index
    %c6_184 = arith.constant 6 : index
    %c0_185 = arith.constant 0 : index
    %c0_186 = arith.constant 0 : index
    %161 = vector.load %arg1[%c2_183, %c6_184, %c0_185, %c0_186] : memref<4x25x8x150xf32, #tpu.memory_space<vmem>>, vector<1x1x8x150xf32>
    %162 = vector.shape_cast %161 : vector<1x1x8x150xf32> to vector<8x150xf32>
    %cst_187 = arith.constant dense<0.000000e+00> : vector<8x128xf32>
    %163 = tpu.matmul %162, %0, %cst_187 {dimension_numbers = #tpu.dot_dimension_numbers<[1], [0], [0], [1], [0, 0, 1, 1], [], []>} : vector<8x150xf32>, vector<150x128xf32>, vector<8x128xf32> -> vector<8x128xf32>
    %164 = arith.maximumf %160, %163 : vector<8x128xf32>
    %c3_188 = arith.constant 3 : index
    %c6_189 = arith.constant 6 : index
    %c0_190 = arith.constant 0 : index
    %c0_191 = arith.constant 0 : index
    %165 = vector.load %arg1[%c3_188, %c6_189, %c0_190, %c0_191] : memref<4x25x8x150xf32, #tpu.memory_space<vmem>>, vector<1x1x8x150xf32>
    %166 = vector.shape_cast %165 : vector<1x1x8x150xf32> to vector<8x150xf32>
    %cst_192 = arith.constant dense<0.000000e+00> : vector<8x128xf32>
    %167 = tpu.matmul %166, %0, %cst_192 {dimension_numbers = #tpu.dot_dimension_numbers<[1], [0], [0], [1], [0, 0, 1, 1], [], []>} : vector<8x150xf32>, vector<150x128xf32>, vector<8x128xf32> -> vector<8x128xf32>
    %168 = arith.maximumf %164, %167 : vector<8x128xf32>
    %169 = vector.broadcast %1 : vector<1x128xf32> to vector<8x128xf32>
    %170 = arith.addf %168, %169 : vector<8x128xf32>
    %cst_193 = arith.constant 0.000000e+00 : f32
    %171 = vector.broadcast %cst_193 : f32 to vector<8x128xf32>
    %172 = arith.maximumf %170, %171 : vector<8x128xf32>
    %c0_194 = arith.constant 0 : index
    %c0_195 = arith.constant 0 : index
    %173 = vector.load %arg11[%c0_194, %c0_195] : memref<8x128xf32, #tpu.memory_space<vmem>>, vector<8x128xf32>
    %c6_196 = arith.constant 6 : index
    %c0_197 = arith.constant 0 : index
    %c0_198 = arith.constant 0 : index
    %174 = vector.load %arg4[%c6_196, %c0_197, %c0_198] : memref<25x128x128xf32, #tpu.memory_space<vmem>>, vector<1x128x128xf32>
    %175 = vector.shape_cast %174 : vector<1x128x128xf32> to vector<128x128xf32>
    %cst_199 = arith.constant dense<0.000000e+00> : vector<8x128xf32>
    %176 = tpu.matmul %172, %175, %cst_199 {dimension_numbers = #tpu.dot_dimension_numbers<[1], [0], [0], [1], [0, 0, 1, 1], [], []>} : vector<8x128xf32>, vector<128x128xf32>, vector<8x128xf32> -> vector<8x128xf32>
    %177 = arith.addf %173, %176 : vector<8x128xf32>
    %c0_200 = arith.constant 0 : index
    %c0_201 = arith.constant 0 : index
    %178 = vector.load %arg11[%c0_200, %c0_201] : memref<8x128xf32, #tpu.memory_space<vmem>>, vector<8x128xf32>
    tpu.vector_store %arg11[%c0_200, %c0_201], %177 {strides = array<i32>} : memref<8x128xf32, #tpu.memory_space<vmem>>, vector<8x128xf32>,
    %c0_202 = arith.constant 0 : index
    %c7 = arith.constant 7 : index
    %c0_203 = arith.constant 0 : index
    %c0_204 = arith.constant 0 : index
    %179 = vector.load %arg1[%c0_202, %c7, %c0_203, %c0_204] : memref<4x25x8x150xf32, #tpu.memory_space<vmem>>, vector<1x1x8x150xf32>
    %180 = vector.shape_cast %179 : vector<1x1x8x150xf32> to vector<8x150xf32>
    %cst_205 = arith.constant dense<0.000000e+00> : vector<8x128xf32>
    %181 = tpu.matmul %180, %0, %cst_205 {dimension_numbers = #tpu.dot_dimension_numbers<[1], [0], [0], [1], [0, 0, 1, 1], [], []>} : vector<8x150xf32>, vector<150x128xf32>, vector<8x128xf32> -> vector<8x128xf32>
    %c1_206 = arith.constant 1 : index
    %c7_207 = arith.constant 7 : index
    %c0_208 = arith.constant 0 : index
    %c0_209 = arith.constant 0 : index
    %182 = vector.load %arg1[%c1_206, %c7_207, %c0_208, %c0_209] : memref<4x25x8x150xf32, #tpu.memory_space<vmem>>, vector<1x1x8x150xf32>
    %183 = vector.shape_cast %182 : vector<1x1x8x150xf32> to vector<8x150xf32>
    %cst_210 = arith.constant dense<0.000000e+00> : vector<8x128xf32>
    %184 = tpu.matmul %183, %0, %cst_210 {dimension_numbers = #tpu.dot_dimension_numbers<[1], [0], [0], [1], [0, 0, 1, 1], [], []>} : vector<8x150xf32>, vector<150x128xf32>, vector<8x128xf32> -> vector<8x128xf32>
    %185 = arith.maximumf %181, %184 : vector<8x128xf32>
    %c2_211 = arith.constant 2 : index
    %c7_212 = arith.constant 7 : index
    %c0_213 = arith.constant 0 : index
    %c0_214 = arith.constant 0 : index
    %186 = vector.load %arg1[%c2_211, %c7_212, %c0_213, %c0_214] : memref<4x25x8x150xf32, #tpu.memory_space<vmem>>, vector<1x1x8x150xf32>
    %187 = vector.shape_cast %186 : vector<1x1x8x150xf32> to vector<8x150xf32>
    %cst_215 = arith.constant dense<0.000000e+00> : vector<8x128xf32>
    %188 = tpu.matmul %187, %0, %cst_215 {dimension_numbers = #tpu.dot_dimension_numbers<[1], [0], [0], [1], [0, 0, 1, 1], [], []>} : vector<8x150xf32>, vector<150x128xf32>, vector<8x128xf32> -> vector<8x128xf32>
    %189 = arith.maximumf %185, %188 : vector<8x128xf32>
    %c3_216 = arith.constant 3 : index
    %c7_217 = arith.constant 7 : index
    %c0_218 = arith.constant 0 : index
    %c0_219 = arith.constant 0 : index
    %190 = vector.load %arg1[%c3_216, %c7_217, %c0_218, %c0_219] : memref<4x25x8x150xf32, #tpu.memory_space<vmem>>, vector<1x1x8x150xf32>
    %191 = vector.shape_cast %190 : vector<1x1x8x150xf32> to vector<8x150xf32>
    %cst_220 = arith.constant dense<0.000000e+00> : vector<8x128xf32>
    %192 = tpu.matmul %191, %0, %cst_220 {dimension_numbers = #tpu.dot_dimension_numbers<[1], [0], [0], [1], [0, 0, 1, 1], [], []>} : vector<8x150xf32>, vector<150x128xf32>, vector<8x128xf32> -> vector<8x128xf32>
    %193 = arith.maximumf %189, %192 : vector<8x128xf32>
    %194 = vector.broadcast %1 : vector<1x128xf32> to vector<8x128xf32>
    %195 = arith.addf %193, %194 : vector<8x128xf32>
    %cst_221 = arith.constant 0.000000e+00 : f32
    %196 = vector.broadcast %cst_221 : f32 to vector<8x128xf32>
    %197 = arith.maximumf %195, %196 : vector<8x128xf32>
    %c0_222 = arith.constant 0 : index
    %c0_223 = arith.constant 0 : index
    %198 = vector.load %arg11[%c0_222, %c0_223] : memref<8x128xf32, #tpu.memory_space<vmem>>, vector<8x128xf32>
    %c7_224 = arith.constant 7 : index
    %c0_225 = arith.constant 0 : index
    %c0_226 = arith.constant 0 : index
    %199 = vector.load %arg4[%c7_224, %c0_225, %c0_226] : memref<25x128x128xf32, #tpu.memory_space<vmem>>, vector<1x128x128xf32>
    %200 = vector.shape_cast %199 : vector<1x128x128xf32> to vector<128x128xf32>
    %cst_227 = arith.constant dense<0.000000e+00> : vector<8x128xf32>
    %201 = tpu.matmul %197, %200, %cst_227 {dimension_numbers = #tpu.dot_dimension_numbers<[1], [0], [0], [1], [0, 0, 1, 1], [], []>} : vector<8x128xf32>, vector<128x128xf32>, vector<8x128xf32> -> vector<8x128xf32>
    %202 = arith.addf %198, %201 : vector<8x128xf32>
    %c0_228 = arith.constant 0 : index
    %c0_229 = arith.constant 0 : index
    %203 = vector.load %arg11[%c0_228, %c0_229] : memref<8x128xf32, #tpu.memory_space<vmem>>, vector<8x128xf32>
    tpu.vector_store %arg11[%c0_228, %c0_229], %202 {strides = array<i32>} : memref<8x128xf32, #tpu.memory_space<vmem>>, vector<8x128xf32>,
    %c0_230 = arith.constant 0 : index
    %c8 = arith.constant 8 : index
    %c0_231 = arith.constant 0 : index
    %c0_232 = arith.constant 0 : index
    %204 = vector.load %arg1[%c0_230, %c8, %c0_231, %c0_232] : memref<4x25x8x150xf32, #tpu.memory_space<vmem>>, vector<1x1x8x150xf32>
    %205 = vector.shape_cast %204 : vector<1x1x8x150xf32> to vector<8x150xf32>
    %cst_233 = arith.constant dense<0.000000e+00> : vector<8x128xf32>
    %206 = tpu.matmul %205, %0, %cst_233 {dimension_numbers = #tpu.dot_dimension_numbers<[1], [0], [0], [1], [0, 0, 1, 1], [], []>} : vector<8x150xf32>, vector<150x128xf32>, vector<8x128xf32> -> vector<8x128xf32>
    %c1_234 = arith.constant 1 : index
    %c8_235 = arith.constant 8 : index
    %c0_236 = arith.constant 0 : index
    %c0_237 = arith.constant 0 : index
    %207 = vector.load %arg1[%c1_234, %c8_235, %c0_236, %c0_237] : memref<4x25x8x150xf32, #tpu.memory_space<vmem>>, vector<1x1x8x150xf32>
    %208 = vector.shape_cast %207 : vector<1x1x8x150xf32> to vector<8x150xf32>
    %cst_238 = arith.constant dense<0.000000e+00> : vector<8x128xf32>
    %209 = tpu.matmul %208, %0, %cst_238 {dimension_numbers = #tpu.dot_dimension_numbers<[1], [0], [0], [1], [0, 0, 1, 1], [], []>} : vector<8x150xf32>, vector<150x128xf32>, vector<8x128xf32> -> vector<8x128xf32>
    %210 = arith.maximumf %206, %209 : vector<8x128xf32>
    %c2_239 = arith.constant 2 : index
    %c8_240 = arith.constant 8 : index
    %c0_241 = arith.constant 0 : index
    %c0_242 = arith.constant 0 : index
    %211 = vector.load %arg1[%c2_239, %c8_240, %c0_241, %c0_242] : memref<4x25x8x150xf32, #tpu.memory_space<vmem>>, vector<1x1x8x150xf32>
    %212 = vector.shape_cast %211 : vector<1x1x8x150xf32> to vector<8x150xf32>
    %cst_243 = arith.constant dense<0.000000e+00> : vector<8x128xf32>
    %213 = tpu.matmul %212, %0, %cst_243 {dimension_numbers = #tpu.dot_dimension_numbers<[1], [0], [0], [1], [0, 0, 1, 1], [], []>} : vector<8x150xf32>, vector<150x128xf32>, vector<8x128xf32> -> vector<8x128xf32>
    %214 = arith.maximumf %210, %213 : vector<8x128xf32>
    %c3_244 = arith.constant 3 : index
    %c8_245 = arith.constant 8 : index
    %c0_246 = arith.constant 0 : index
    %c0_247 = arith.constant 0 : index
    %215 = vector.load %arg1[%c3_244, %c8_245, %c0_246, %c0_247] : memref<4x25x8x150xf32, #tpu.memory_space<vmem>>, vector<1x1x8x150xf32>
    %216 = vector.shape_cast %215 : vector<1x1x8x150xf32> to vector<8x150xf32>
    %cst_248 = arith.constant dense<0.000000e+00> : vector<8x128xf32>
    %217 = tpu.matmul %216, %0, %cst_248 {dimension_numbers = #tpu.dot_dimension_numbers<[1], [0], [0], [1], [0, 0, 1, 1], [], []>} : vector<8x150xf32>, vector<150x128xf32>, vector<8x128xf32> -> vector<8x128xf32>
    %218 = arith.maximumf %214, %217 : vector<8x128xf32>
    %219 = vector.broadcast %1 : vector<1x128xf32> to vector<8x128xf32>
    %220 = arith.addf %218, %219 : vector<8x128xf32>
    %cst_249 = arith.constant 0.000000e+00 : f32
    %221 = vector.broadcast %cst_249 : f32 to vector<8x128xf32>
    %222 = arith.maximumf %220, %221 : vector<8x128xf32>
    %c0_250 = arith.constant 0 : index
    %c0_251 = arith.constant 0 : index
    %223 = vector.load %arg11[%c0_250, %c0_251] : memref<8x128xf32, #tpu.memory_space<vmem>>, vector<8x128xf32>
    %c8_252 = arith.constant 8 : index
    %c0_253 = arith.constant 0 : index
    %c0_254 = arith.constant 0 : index
    %224 = vector.load %arg4[%c8_252, %c0_253, %c0_254] : memref<25x128x128xf32, #tpu.memory_space<vmem>>, vector<1x128x128xf32>
    %225 = vector.shape_cast %224 : vector<1x128x128xf32> to vector<128x128xf32>
    %cst_255 = arith.constant dense<0.000000e+00> : vector<8x128xf32>
    %226 = tpu.matmul %222, %225, %cst_255 {dimension_numbers = #tpu.dot_dimension_numbers<[1], [0], [0], [1], [0, 0, 1, 1], [], []>} : vector<8x128xf32>, vector<128x128xf32>, vector<8x128xf32> -> vector<8x128xf32>
    %227 = arith.addf %223, %226 : vector<8x128xf32>
    %c0_256 = arith.constant 0 : index
    %c0_257 = arith.constant 0 : index
    %228 = vector.load %arg11[%c0_256, %c0_257] : memref<8x128xf32, #tpu.memory_space<vmem>>, vector<8x128xf32>
    tpu.vector_store %arg11[%c0_256, %c0_257], %227 {strides = array<i32>} : memref<8x128xf32, #tpu.memory_space<vmem>>, vector<8x128xf32>,
    %c0_258 = arith.constant 0 : index
    %c9 = arith.constant 9 : index
    %c0_259 = arith.constant 0 : index
    %c0_260 = arith.constant 0 : index
    %229 = vector.load %arg1[%c0_258, %c9, %c0_259, %c0_260] : memref<4x25x8x150xf32, #tpu.memory_space<vmem>>, vector<1x1x8x150xf32>
    %230 = vector.shape_cast %229 : vector<1x1x8x150xf32> to vector<8x150xf32>
    %cst_261 = arith.constant dense<0.000000e+00> : vector<8x128xf32>
    %231 = tpu.matmul %230, %0, %cst_261 {dimension_numbers = #tpu.dot_dimension_numbers<[1], [0], [0], [1], [0, 0, 1, 1], [], []>} : vector<8x150xf32>, vector<150x128xf32>, vector<8x128xf32> -> vector<8x128xf32>
    %c1_262 = arith.constant 1 : index
    %c9_263 = arith.constant 9 : index
    %c0_264 = arith.constant 0 : index
    %c0_265 = arith.constant 0 : index
    %232 = vector.load %arg1[%c1_262, %c9_263, %c0_264, %c0_265] : memref<4x25x8x150xf32, #tpu.memory_space<vmem>>, vector<1x1x8x150xf32>
    %233 = vector.shape_cast %232 : vector<1x1x8x150xf32> to vector<8x150xf32>
    %cst_266 = arith.constant dense<0.000000e+00> : vector<8x128xf32>
    %234 = tpu.matmul %233, %0, %cst_266 {dimension_numbers = #tpu.dot_dimension_numbers<[1], [0], [0], [1], [0, 0, 1, 1], [], []>} : vector<8x150xf32>, vector<150x128xf32>, vector<8x128xf32> -> vector<8x128xf32>
    %235 = arith.maximumf %231, %234 : vector<8x128xf32>
    %c2_267 = arith.constant 2 : index
    %c9_268 = arith.constant 9 : index
    %c0_269 = arith.constant 0 : index
    %c0_270 = arith.constant 0 : index
    %236 = vector.load %arg1[%c2_267, %c9_268, %c0_269, %c0_270] : memref<4x25x8x150xf32, #tpu.memory_space<vmem>>, vector<1x1x8x150xf32>
    %237 = vector.shape_cast %236 : vector<1x1x8x150xf32> to vector<8x150xf32>
    %cst_271 = arith.constant dense<0.000000e+00> : vector<8x128xf32>
    %238 = tpu.matmul %237, %0, %cst_271 {dimension_numbers = #tpu.dot_dimension_numbers<[1], [0], [0], [1], [0, 0, 1, 1], [], []>} : vector<8x150xf32>, vector<150x128xf32>, vector<8x128xf32> -> vector<8x128xf32>
    %239 = arith.maximumf %235, %238 : vector<8x128xf32>
    %c3_272 = arith.constant 3 : index
    %c9_273 = arith.constant 9 : index
    %c0_274 = arith.constant 0 : index
    %c0_275 = arith.constant 0 : index
    %240 = vector.load %arg1[%c3_272, %c9_273, %c0_274, %c0_275] : memref<4x25x8x150xf32, #tpu.memory_space<vmem>>, vector<1x1x8x150xf32>
    %241 = vector.shape_cast %240 : vector<1x1x8x150xf32> to vector<8x150xf32>
    %cst_276 = arith.constant dense<0.000000e+00> : vector<8x128xf32>
    %242 = tpu.matmul %241, %0, %cst_276 {dimension_numbers = #tpu.dot_dimension_numbers<[1], [0], [0], [1], [0, 0, 1, 1], [], []>} : vector<8x150xf32>, vector<150x128xf32>, vector<8x128xf32> -> vector<8x128xf32>
    %243 = arith.maximumf %239, %242 : vector<8x128xf32>
    %244 = vector.broadcast %1 : vector<1x128xf32> to vector<8x128xf32>
    %245 = arith.addf %243, %244 : vector<8x128xf32>
    %cst_277 = arith.constant 0.000000e+00 : f32
    %246 = vector.broadcast %cst_277 : f32 to vector<8x128xf32>
    %247 = arith.maximumf %245, %246 : vector<8x128xf32>
    %c0_278 = arith.constant 0 : index
    %c0_279 = arith.constant 0 : index
    %248 = vector.load %arg11[%c0_278, %c0_279] : memref<8x128xf32, #tpu.memory_space<vmem>>, vector<8x128xf32>
    %c9_280 = arith.constant 9 : index
    %c0_281 = arith.constant 0 : index
    %c0_282 = arith.constant 0 : index
    %249 = vector.load %arg4[%c9_280, %c0_281, %c0_282] : memref<25x128x128xf32, #tpu.memory_space<vmem>>, vector<1x128x128xf32>
    %250 = vector.shape_cast %249 : vector<1x128x128xf32> to vector<128x128xf32>
    %cst_283 = arith.constant dense<0.000000e+00> : vector<8x128xf32>
    %251 = tpu.matmul %247, %250, %cst_283 {dimension_numbers = #tpu.dot_dimension_numbers<[1], [0], [0], [1], [0, 0, 1, 1], [], []>} : vector<8x128xf32>, vector<128x128xf32>, vector<8x128xf32> -> vector<8x128xf32>
    %252 = arith.addf %248, %251 : vector<8x128xf32>
    %c0_284 = arith.constant 0 : index
    %c0_285 = arith.constant 0 : index
    %253 = vector.load %arg11[%c0_284, %c0_285] : memref<8x128xf32, #tpu.memory_space<vmem>>, vector<8x128xf32>
    tpu.vector_store %arg11[%c0_284, %c0_285], %252 {strides = array<i32>} : memref<8x128xf32, #tpu.memory_space<vmem>>, vector<8x128xf32>,
    %c0_286 = arith.constant 0 : index
    %c10 = arith.constant 10 : index
    %c0_287 = arith.constant 0 : index
    %c0_288 = arith.constant 0 : index
    %254 = vector.load %arg1[%c0_286, %c10, %c0_287, %c0_288] : memref<4x25x8x150xf32, #tpu.memory_space<vmem>>, vector<1x1x8x150xf32>
    %255 = vector.shape_cast %254 : vector<1x1x8x150xf32> to vector<8x150xf32>
    %cst_289 = arith.constant dense<0.000000e+00> : vector<8x128xf32>
    %256 = tpu.matmul %255, %0, %cst_289 {dimension_numbers = #tpu.dot_dimension_numbers<[1], [0], [0], [1], [0, 0, 1, 1], [], []>} : vector<8x150xf32>, vector<150x128xf32>, vector<8x128xf32> -> vector<8x128xf32>
    %c1_290 = arith.constant 1 : index
    %c10_291 = arith.constant 10 : index
    %c0_292 = arith.constant 0 : index
    %c0_293 = arith.constant 0 : index
    %257 = vector.load %arg1[%c1_290, %c10_291, %c0_292, %c0_293] : memref<4x25x8x150xf32, #tpu.memory_space<vmem>>, vector<1x1x8x150xf32>
    %258 = vector.shape_cast %257 : vector<1x1x8x150xf32> to vector<8x150xf32>
    %cst_294 = arith.constant dense<0.000000e+00> : vector<8x128xf32>
    %259 = tpu.matmul %258, %0, %cst_294 {dimension_numbers = #tpu.dot_dimension_numbers<[1], [0], [0], [1], [0, 0, 1, 1], [], []>} : vector<8x150xf32>, vector<150x128xf32>, vector<8x128xf32> -> vector<8x128xf32>
    %260 = arith.maximumf %256, %259 : vector<8x128xf32>
    %c2_295 = arith.constant 2 : index
    %c10_296 = arith.constant 10 : index
    %c0_297 = arith.constant 0 : index
    %c0_298 = arith.constant 0 : index
    %261 = vector.load %arg1[%c2_295, %c10_296, %c0_297, %c0_298] : memref<4x25x8x150xf32, #tpu.memory_space<vmem>>, vector<1x1x8x150xf32>
    %262 = vector.shape_cast %261 : vector<1x1x8x150xf32> to vector<8x150xf32>
    %cst_299 = arith.constant dense<0.000000e+00> : vector<8x128xf32>
    %263 = tpu.matmul %262, %0, %cst_299 {dimension_numbers = #tpu.dot_dimension_numbers<[1], [0], [0], [1], [0, 0, 1, 1], [], []>} : vector<8x150xf32>, vector<150x128xf32>, vector<8x128xf32> -> vector<8x128xf32>
    %264 = arith.maximumf %260, %263 : vector<8x128xf32>
    %c3_300 = arith.constant 3 : index
    %c10_301 = arith.constant 10 : index
    %c0_302 = arith.constant 0 : index
    %c0_303 = arith.constant 0 : index
    %265 = vector.load %arg1[%c3_300, %c10_301, %c0_302, %c0_303] : memref<4x25x8x150xf32, #tpu.memory_space<vmem>>, vector<1x1x8x150xf32>
    %266 = vector.shape_cast %265 : vector<1x1x8x150xf32> to vector<8x150xf32>
    %cst_304 = arith.constant dense<0.000000e+00> : vector<8x128xf32>
    %267 = tpu.matmul %266, %0, %cst_304 {dimension_numbers = #tpu.dot_dimension_numbers<[1], [0], [0], [1], [0, 0, 1, 1], [], []>} : vector<8x150xf32>, vector<150x128xf32>, vector<8x128xf32> -> vector<8x128xf32>
    %268 = arith.maximumf %264, %267 : vector<8x128xf32>
    %269 = vector.broadcast %1 : vector<1x128xf32> to vector<8x128xf32>
    %270 = arith.addf %268, %269 : vector<8x128xf32>
    %cst_305 = arith.constant 0.000000e+00 : f32
    %271 = vector.broadcast %cst_305 : f32 to vector<8x128xf32>
    %272 = arith.maximumf %270, %271 : vector<8x128xf32>
    %c0_306 = arith.constant 0 : index
    %c0_307 = arith.constant 0 : index
    %273 = vector.load %arg11[%c0_306, %c0_307] : memref<8x128xf32, #tpu.memory_space<vmem>>, vector<8x128xf32>
    %c10_308 = arith.constant 10 : index
    %c0_309 = arith.constant 0 : index
    %c0_310 = arith.constant 0 : index
    %274 = vector.load %arg4[%c10_308, %c0_309, %c0_310] : memref<25x128x128xf32, #tpu.memory_space<vmem>>, vector<1x128x128xf32>
    %275 = vector.shape_cast %274 : vector<1x128x128xf32> to vector<128x128xf32>
    %cst_311 = arith.constant dense<0.000000e+00> : vector<8x128xf32>
    %276 = tpu.matmul %272, %275, %cst_311 {dimension_numbers = #tpu.dot_dimension_numbers<[1], [0], [0], [1], [0, 0, 1, 1], [], []>} : vector<8x128xf32>, vector<128x128xf32>, vector<8x128xf32> -> vector<8x128xf32>
    %277 = arith.addf %273, %276 : vector<8x128xf32>
    %c0_312 = arith.constant 0 : index
    %c0_313 = arith.constant 0 : index
    %278 = vector.load %arg11[%c0_312, %c0_313] : memref<8x128xf32, #tpu.memory_space<vmem>>, vector<8x128xf32>
    tpu.vector_store %arg11[%c0_312, %c0_313], %277 {strides = array<i32>} : memref<8x128xf32, #tpu.memory_space<vmem>>, vector<8x128xf32>,
    %c0_314 = arith.constant 0 : index
    %c11 = arith.constant 11 : index
    %c0_315 = arith.constant 0 : index
    %c0_316 = arith.constant 0 : index
    %279 = vector.load %arg1[%c0_314, %c11, %c0_315, %c0_316] : memref<4x25x8x150xf32, #tpu.memory_space<vmem>>, vector<1x1x8x150xf32>
    %280 = vector.shape_cast %279 : vector<1x1x8x150xf32> to vector<8x150xf32>
    %cst_317 = arith.constant dense<0.000000e+00> : vector<8x128xf32>
    %281 = tpu.matmul %280, %0, %cst_317 {dimension_numbers = #tpu.dot_dimension_numbers<[1], [0], [0], [1], [0, 0, 1, 1], [], []>} : vector<8x150xf32>, vector<150x128xf32>, vector<8x128xf32> -> vector<8x128xf32>
    %c1_318 = arith.constant 1 : index
    %c11_319 = arith.constant 11 : index
    %c0_320 = arith.constant 0 : index
    %c0_321 = arith.constant 0 : index
    %282 = vector.load %arg1[%c1_318, %c11_319, %c0_320, %c0_321] : memref<4x25x8x150xf32, #tpu.memory_space<vmem>>, vector<1x1x8x150xf32>
    %283 = vector.shape_cast %282 : vector<1x1x8x150xf32> to vector<8x150xf32>
    %cst_322 = arith.constant dense<0.000000e+00> : vector<8x128xf32>
    %284 = tpu.matmul %283, %0, %cst_322 {dimension_numbers = #tpu.dot_dimension_numbers<[1], [0], [0], [1], [0, 0, 1, 1], [], []>} : vector<8x150xf32>, vector<150x128xf32>, vector<8x128xf32> -> vector<8x128xf32>
    %285 = arith.maximumf %281, %284 : vector<8x128xf32>
    %c2_323 = arith.constant 2 : index
    %c11_324 = arith.constant 11 : index
    %c0_325 = arith.constant 0 : index
    %c0_326 = arith.constant 0 : index
    %286 = vector.load %arg1[%c2_323, %c11_324, %c0_325, %c0_326] : memref<4x25x8x150xf32, #tpu.memory_space<vmem>>, vector<1x1x8x150xf32>
    %287 = vector.shape_cast %286 : vector<1x1x8x150xf32> to vector<8x150xf32>
    %cst_327 = arith.constant dense<0.000000e+00> : vector<8x128xf32>
    %288 = tpu.matmul %287, %0, %cst_327 {dimension_numbers = #tpu.dot_dimension_numbers<[1], [0], [0], [1], [0, 0, 1, 1], [], []>} : vector<8x150xf32>, vector<150x128xf32>, vector<8x128xf32> -> vector<8x128xf32>
    %289 = arith.maximumf %285, %288 : vector<8x128xf32>
    %c3_328 = arith.constant 3 : index
    %c11_329 = arith.constant 11 : index
    %c0_330 = arith.constant 0 : index
    %c0_331 = arith.constant 0 : index
    %290 = vector.load %arg1[%c3_328, %c11_329, %c0_330, %c0_331] : memref<4x25x8x150xf32, #tpu.memory_space<vmem>>, vector<1x1x8x150xf32>
    %291 = vector.shape_cast %290 : vector<1x1x8x150xf32> to vector<8x150xf32>
    %cst_332 = arith.constant dense<0.000000e+00> : vector<8x128xf32>
    %292 = tpu.matmul %291, %0, %cst_332 {dimension_numbers = #tpu.dot_dimension_numbers<[1], [0], [0], [1], [0, 0, 1, 1], [], []>} : vector<8x150xf32>, vector<150x128xf32>, vector<8x128xf32> -> vector<8x128xf32>
    %293 = arith.maximumf %289, %292 : vector<8x128xf32>
    %294 = vector.broadcast %1 : vector<1x128xf32> to vector<8x128xf32>
    %295 = arith.addf %293, %294 : vector<8x128xf32>
    %cst_333 = arith.constant 0.000000e+00 : f32
    %296 = vector.broadcast %cst_333 : f32 to vector<8x128xf32>
    %297 = arith.maximumf %295, %296 : vector<8x128xf32>
    %c0_334 = arith.constant 0 : index
    %c0_335 = arith.constant 0 : index
    %298 = vector.load %arg11[%c0_334, %c0_335] : memref<8x128xf32, #tpu.memory_space<vmem>>, vector<8x128xf32>
    %c11_336 = arith.constant 11 : index
    %c0_337 = arith.constant 0 : index
    %c0_338 = arith.constant 0 : index
    %299 = vector.load %arg4[%c11_336, %c0_337, %c0_338] : memref<25x128x128xf32, #tpu.memory_space<vmem>>, vector<1x128x128xf32>
    %300 = vector.shape_cast %299 : vector<1x128x128xf32> to vector<128x128xf32>
    %cst_339 = arith.constant dense<0.000000e+00> : vector<8x128xf32>
    %301 = tpu.matmul %297, %300, %cst_339 {dimension_numbers = #tpu.dot_dimension_numbers<[1], [0], [0], [1], [0, 0, 1, 1], [], []>} : vector<8x128xf32>, vector<128x128xf32>, vector<8x128xf32> -> vector<8x128xf32>
    %302 = arith.addf %298, %301 : vector<8x128xf32>
    %c0_340 = arith.constant 0 : index
    %c0_341 = arith.constant 0 : index
    %303 = vector.load %arg11[%c0_340, %c0_341] : memref<8x128xf32, #tpu.memory_space<vmem>>, vector<8x128xf32>
    tpu.vector_store %arg11[%c0_340, %c0_341], %302 {strides = array<i32>} : memref<8x128xf32, #tpu.memory_space<vmem>>, vector<8x128xf32>,
    %c0_342 = arith.constant 0 : index
    %c12 = arith.constant 12 : index
    %c0_343 = arith.constant 0 : index
    %c0_344 = arith.constant 0 : index
    %304 = vector.load %arg1[%c0_342, %c12, %c0_343, %c0_344] : memref<4x25x8x150xf32, #tpu.memory_space<vmem>>, vector<1x1x8x150xf32>
    %305 = vector.shape_cast %304 : vector<1x1x8x150xf32> to vector<8x150xf32>
    %cst_345 = arith.constant dense<0.000000e+00> : vector<8x128xf32>
    %306 = tpu.matmul %305, %0, %cst_345 {dimension_numbers = #tpu.dot_dimension_numbers<[1], [0], [0], [1], [0, 0, 1, 1], [], []>} : vector<8x150xf32>, vector<150x128xf32>, vector<8x128xf32> -> vector<8x128xf32>
    %c1_346 = arith.constant 1 : index
    %c12_347 = arith.constant 12 : index
    %c0_348 = arith.constant 0 : index
    %c0_349 = arith.constant 0 : index
    %307 = vector.load %arg1[%c1_346, %c12_347, %c0_348, %c0_349] : memref<4x25x8x150xf32, #tpu.memory_space<vmem>>, vector<1x1x8x150xf32>
    %308 = vector.shape_cast %307 : vector<1x1x8x150xf32> to vector<8x150xf32>
    %cst_350 = arith.constant dense<0.000000e+00> : vector<8x128xf32>
    %309 = tpu.matmul %308, %0, %cst_350 {dimension_numbers = #tpu.dot_dimension_numbers<[1], [0], [0], [1], [0, 0, 1, 1], [], []>} : vector<8x150xf32>, vector<150x128xf32>, vector<8x128xf32> -> vector<8x128xf32>
    %310 = arith.maximumf %306, %309 : vector<8x128xf32>
    %c2_351 = arith.constant 2 : index
    %c12_352 = arith.constant 12 : index
    %c0_353 = arith.constant 0 : index
    %c0_354 = arith.constant 0 : index
    %311 = vector.load %arg1[%c2_351, %c12_352, %c0_353, %c0_354] : memref<4x25x8x150xf32, #tpu.memory_space<vmem>>, vector<1x1x8x150xf32>
    %312 = vector.shape_cast %311 : vector<1x1x8x150xf32> to vector<8x150xf32>
    %cst_355 = arith.constant dense<0.000000e+00> : vector<8x128xf32>
    %313 = tpu.matmul %312, %0, %cst_355 {dimension_numbers = #tpu.dot_dimension_numbers<[1], [0], [0], [1], [0, 0, 1, 1], [], []>} : vector<8x150xf32>, vector<150x128xf32>, vector<8x128xf32> -> vector<8x128xf32>
    %314 = arith.maximumf %310, %313 : vector<8x128xf32>
    %c3_356 = arith.constant 3 : index
    %c12_357 = arith.constant 12 : index
    %c0_358 = arith.constant 0 : index
    %c0_359 = arith.constant 0 : index
    %315 = vector.load %arg1[%c3_356, %c12_357, %c0_358, %c0_359] : memref<4x25x8x150xf32, #tpu.memory_space<vmem>>, vector<1x1x8x150xf32>
    %316 = vector.shape_cast %315 : vector<1x1x8x150xf32> to vector<8x150xf32>
    %cst_360 = arith.constant dense<0.000000e+00> : vector<8x128xf32>
    %317 = tpu.matmul %316, %0, %cst_360 {dimension_numbers = #tpu.dot_dimension_numbers<[1], [0], [0], [1], [0, 0, 1, 1], [], []>} : vector<8x150xf32>, vector<150x128xf32>, vector<8x128xf32> -> vector<8x128xf32>
    %318 = arith.maximumf %314, %317 : vector<8x128xf32>
    %319 = vector.broadcast %1 : vector<1x128xf32> to vector<8x128xf32>
    %320 = arith.addf %318, %319 : vector<8x128xf32>
    %cst_361 = arith.constant 0.000000e+00 : f32
    %321 = vector.broadcast %cst_361 : f32 to vector<8x128xf32>
    %322 = arith.maximumf %320, %321 : vector<8x128xf32>
    %c0_362 = arith.constant 0 : index
    %c0_363 = arith.constant 0 : index
    %323 = vector.load %arg11[%c0_362, %c0_363] : memref<8x128xf32, #tpu.memory_space<vmem>>, vector<8x128xf32>
    %c12_364 = arith.constant 12 : index
    %c0_365 = arith.constant 0 : index
    %c0_366 = arith.constant 0 : index
    %324 = vector.load %arg4[%c12_364, %c0_365, %c0_366] : memref<25x128x128xf32, #tpu.memory_space<vmem>>, vector<1x128x128xf32>
    %325 = vector.shape_cast %324 : vector<1x128x128xf32> to vector<128x128xf32>
    %cst_367 = arith.constant dense<0.000000e+00> : vector<8x128xf32>
    %326 = tpu.matmul %322, %325, %cst_367 {dimension_numbers = #tpu.dot_dimension_numbers<[1], [0], [0], [1], [0, 0, 1, 1], [], []>} : vector<8x128xf32>, vector<128x128xf32>, vector<8x128xf32> -> vector<8x128xf32>
    %327 = arith.addf %323, %326 : vector<8x128xf32>
    %c0_368 = arith.constant 0 : index
    %c0_369 = arith.constant 0 : index
    %328 = vector.load %arg11[%c0_368, %c0_369] : memref<8x128xf32, #tpu.memory_space<vmem>>, vector<8x128xf32>
    tpu.vector_store %arg11[%c0_368, %c0_369], %327 {strides = array<i32>} : memref<8x128xf32, #tpu.memory_space<vmem>>, vector<8x128xf32>,
    %c0_370 = arith.constant 0 : index
    %c13 = arith.constant 13 : index
    %c0_371 = arith.constant 0 : index
    %c0_372 = arith.constant 0 : index
    %329 = vector.load %arg1[%c0_370, %c13, %c0_371, %c0_372] : memref<4x25x8x150xf32, #tpu.memory_space<vmem>>, vector<1x1x8x150xf32>
    %330 = vector.shape_cast %329 : vector<1x1x8x150xf32> to vector<8x150xf32>
    %cst_373 = arith.constant dense<0.000000e+00> : vector<8x128xf32>
    %331 = tpu.matmul %330, %0, %cst_373 {dimension_numbers = #tpu.dot_dimension_numbers<[1], [0], [0], [1], [0, 0, 1, 1], [], []>} : vector<8x150xf32>, vector<150x128xf32>, vector<8x128xf32> -> vector<8x128xf32>
    %c1_374 = arith.constant 1 : index
    %c13_375 = arith.constant 13 : index
    %c0_376 = arith.constant 0 : index
    %c0_377 = arith.constant 0 : index
    %332 = vector.load %arg1[%c1_374, %c13_375, %c0_376, %c0_377] : memref<4x25x8x150xf32, #tpu.memory_space<vmem>>, vector<1x1x8x150xf32>
    %333 = vector.shape_cast %332 : vector<1x1x8x150xf32> to vector<8x150xf32>
    %cst_378 = arith.constant dense<0.000000e+00> : vector<8x128xf32>
    %334 = tpu.matmul %333, %0, %cst_378 {dimension_numbers = #tpu.dot_dimension_numbers<[1], [0], [0], [1], [0, 0, 1, 1], [], []>} : vector<8x150xf32>, vector<150x128xf32>, vector<8x128xf32> -> vector<8x128xf32>
    %335 = arith.maximumf %331, %334 : vector<8x128xf32>
    %c2_379 = arith.constant 2 : index
    %c13_380 = arith.constant 13 : index
    %c0_381 = arith.constant 0 : index
    %c0_382 = arith.constant 0 : index
    %336 = vector.load %arg1[%c2_379, %c13_380, %c0_381, %c0_382] : memref<4x25x8x150xf32, #tpu.memory_space<vmem>>, vector<1x1x8x150xf32>
    %337 = vector.shape_cast %336 : vector<1x1x8x150xf32> to vector<8x150xf32>
    %cst_383 = arith.constant dense<0.000000e+00> : vector<8x128xf32>
    %338 = tpu.matmul %337, %0, %cst_383 {dimension_numbers = #tpu.dot_dimension_numbers<[1], [0], [0], [1], [0, 0, 1, 1], [], []>} : vector<8x150xf32>, vector<150x128xf32>, vector<8x128xf32> -> vector<8x128xf32>
    %339 = arith.maximumf %335, %338 : vector<8x128xf32>
    %c3_384 = arith.constant 3 : index
    %c13_385 = arith.constant 13 : index
    %c0_386 = arith.constant 0 : index
    %c0_387 = arith.constant 0 : index
    %340 = vector.load %arg1[%c3_384, %c13_385, %c0_386, %c0_387] : memref<4x25x8x150xf32, #tpu.memory_space<vmem>>, vector<1x1x8x150xf32>
    %341 = vector.shape_cast %340 : vector<1x1x8x150xf32> to vector<8x150xf32>
    %cst_388 = arith.constant dense<0.000000e+00> : vector<8x128xf32>
    %342 = tpu.matmul %341, %0, %cst_388 {dimension_numbers = #tpu.dot_dimension_numbers<[1], [0], [0], [1], [0, 0, 1, 1], [], []>} : vector<8x150xf32>, vector<150x128xf32>, vector<8x128xf32> -> vector<8x128xf32>
    %343 = arith.maximumf %339, %342 : vector<8x128xf32>
    %344 = vector.broadcast %1 : vector<1x128xf32> to vector<8x128xf32>
    %345 = arith.addf %343, %344 : vector<8x128xf32>
    %cst_389 = arith.constant 0.000000e+00 : f32
    %346 = vector.broadcast %cst_389 : f32 to vector<8x128xf32>
    %347 = arith.maximumf %345, %346 : vector<8x128xf32>
    %c0_390 = arith.constant 0 : index
    %c0_391 = arith.constant 0 : index
    %348 = vector.load %arg11[%c0_390, %c0_391] : memref<8x128xf32, #tpu.memory_space<vmem>>, vector<8x128xf32>
    %c13_392 = arith.constant 13 : index
    %c0_393 = arith.constant 0 : index
    %c0_394 = arith.constant 0 : index
    %349 = vector.load %arg4[%c13_392, %c0_393, %c0_394] : memref<25x128x128xf32, #tpu.memory_space<vmem>>, vector<1x128x128xf32>
    %350 = vector.shape_cast %349 : vector<1x128x128xf32> to vector<128x128xf32>
    %cst_395 = arith.constant dense<0.000000e+00> : vector<8x128xf32>
    %351 = tpu.matmul %347, %350, %cst_395 {dimension_numbers = #tpu.dot_dimension_numbers<[1], [0], [0], [1], [0, 0, 1, 1], [], []>} : vector<8x128xf32>, vector<128x128xf32>, vector<8x128xf32> -> vector<8x128xf32>
    %352 = arith.addf %348, %351 : vector<8x128xf32>
    %c0_396 = arith.constant 0 : index
    %c0_397 = arith.constant 0 : index
    %353 = vector.load %arg11[%c0_396, %c0_397] : memref<8x128xf32, #tpu.memory_space<vmem>>, vector<8x128xf32>
    tpu.vector_store %arg11[%c0_396, %c0_397], %352 {strides = array<i32>} : memref<8x128xf32, #tpu.memory_space<vmem>>, vector<8x128xf32>,
    %c0_398 = arith.constant 0 : index
    %c14 = arith.constant 14 : index
    %c0_399 = arith.constant 0 : index
    %c0_400 = arith.constant 0 : index
    %354 = vector.load %arg1[%c0_398, %c14, %c0_399, %c0_400] : memref<4x25x8x150xf32, #tpu.memory_space<vmem>>, vector<1x1x8x150xf32>
    %355 = vector.shape_cast %354 : vector<1x1x8x150xf32> to vector<8x150xf32>
    %cst_401 = arith.constant dense<0.000000e+00> : vector<8x128xf32>
    %356 = tpu.matmul %355, %0, %cst_401 {dimension_numbers = #tpu.dot_dimension_numbers<[1], [0], [0], [1], [0, 0, 1, 1], [], []>} : vector<8x150xf32>, vector<150x128xf32>, vector<8x128xf32> -> vector<8x128xf32>
    %c1_402 = arith.constant 1 : index
    %c14_403 = arith.constant 14 : index
    %c0_404 = arith.constant 0 : index
    %c0_405 = arith.constant 0 : index
    %357 = vector.load %arg1[%c1_402, %c14_403, %c0_404, %c0_405] : memref<4x25x8x150xf32, #tpu.memory_space<vmem>>, vector<1x1x8x150xf32>
    %358 = vector.shape_cast %357 : vector<1x1x8x150xf32> to vector<8x150xf32>
    %cst_406 = arith.constant dense<0.000000e+00> : vector<8x128xf32>
    %359 = tpu.matmul %358, %0, %cst_406 {dimension_numbers = #tpu.dot_dimension_numbers<[1], [0], [0], [1], [0, 0, 1, 1], [], []>} : vector<8x150xf32>, vector<150x128xf32>, vector<8x128xf32> -> vector<8x128xf32>
    %360 = arith.maximumf %356, %359 : vector<8x128xf32>
    %c2_407 = arith.constant 2 : index
    %c14_408 = arith.constant 14 : index
    %c0_409 = arith.constant 0 : index
    %c0_410 = arith.constant 0 : index
    %361 = vector.load %arg1[%c2_407, %c14_408, %c0_409, %c0_410] : memref<4x25x8x150xf32, #tpu.memory_space<vmem>>, vector<1x1x8x150xf32>
    %362 = vector.shape_cast %361 : vector<1x1x8x150xf32> to vector<8x150xf32>
    %cst_411 = arith.constant dense<0.000000e+00> : vector<8x128xf32>
    %363 = tpu.matmul %362, %0, %cst_411 {dimension_numbers = #tpu.dot_dimension_numbers<[1], [0], [0], [1], [0, 0, 1, 1], [], []>} : vector<8x150xf32>, vector<150x128xf32>, vector<8x128xf32> -> vector<8x128xf32>
    %364 = arith.maximumf %360, %363 : vector<8x128xf32>
    %c3_412 = arith.constant 3 : index
    %c14_413 = arith.constant 14 : index
    %c0_414 = arith.constant 0 : index
    %c0_415 = arith.constant 0 : index
    %365 = vector.load %arg1[%c3_412, %c14_413, %c0_414, %c0_415] : memref<4x25x8x150xf32, #tpu.memory_space<vmem>>, vector<1x1x8x150xf32>
    %366 = vector.shape_cast %365 : vector<1x1x8x150xf32> to vector<8x150xf32>
    %cst_416 = arith.constant dense<0.000000e+00> : vector<8x128xf32>
    %367 = tpu.matmul %366, %0, %cst_416 {dimension_numbers = #tpu.dot_dimension_numbers<[1], [0], [0], [1], [0, 0, 1, 1], [], []>} : vector<8x150xf32>, vector<150x128xf32>, vector<8x128xf32> -> vector<8x128xf32>
    %368 = arith.maximumf %364, %367 : vector<8x128xf32>
    %369 = vector.broadcast %1 : vector<1x128xf32> to vector<8x128xf32>
    %370 = arith.addf %368, %369 : vector<8x128xf32>
    %cst_417 = arith.constant 0.000000e+00 : f32
    %371 = vector.broadcast %cst_417 : f32 to vector<8x128xf32>
    %372 = arith.maximumf %370, %371 : vector<8x128xf32>
    %c0_418 = arith.constant 0 : index
    %c0_419 = arith.constant 0 : index
    %373 = vector.load %arg11[%c0_418, %c0_419] : memref<8x128xf32, #tpu.memory_space<vmem>>, vector<8x128xf32>
    %c14_420 = arith.constant 14 : index
    %c0_421 = arith.constant 0 : index
    %c0_422 = arith.constant 0 : index
    %374 = vector.load %arg4[%c14_420, %c0_421, %c0_422] : memref<25x128x128xf32, #tpu.memory_space<vmem>>, vector<1x128x128xf32>
    %375 = vector.shape_cast %374 : vector<1x128x128xf32> to vector<128x128xf32>
    %cst_423 = arith.constant dense<0.000000e+00> : vector<8x128xf32>
    %376 = tpu.matmul %372, %375, %cst_423 {dimension_numbers = #tpu.dot_dimension_numbers<[1], [0], [0], [1], [0, 0, 1, 1], [], []>} : vector<8x128xf32>, vector<128x128xf32>, vector<8x128xf32> -> vector<8x128xf32>
    %377 = arith.addf %373, %376 : vector<8x128xf32>
    %c0_424 = arith.constant 0 : index
    %c0_425 = arith.constant 0 : index
    %378 = vector.load %arg11[%c0_424, %c0_425] : memref<8x128xf32, #tpu.memory_space<vmem>>, vector<8x128xf32>
    tpu.vector_store %arg11[%c0_424, %c0_425], %377 {strides = array<i32>} : memref<8x128xf32, #tpu.memory_space<vmem>>, vector<8x128xf32>,
    %c0_426 = arith.constant 0 : index
    %c15 = arith.constant 15 : index
    %c0_427 = arith.constant 0 : index
    %c0_428 = arith.constant 0 : index
    %379 = vector.load %arg1[%c0_426, %c15, %c0_427, %c0_428] : memref<4x25x8x150xf32, #tpu.memory_space<vmem>>, vector<1x1x8x150xf32>
    %380 = vector.shape_cast %379 : vector<1x1x8x150xf32> to vector<8x150xf32>
    %cst_429 = arith.constant dense<0.000000e+00> : vector<8x128xf32>
    %381 = tpu.matmul %380, %0, %cst_429 {dimension_numbers = #tpu.dot_dimension_numbers<[1], [0], [0], [1], [0, 0, 1, 1], [], []>} : vector<8x150xf32>, vector<150x128xf32>, vector<8x128xf32> -> vector<8x128xf32>
    %c1_430 = arith.constant 1 : index
    %c15_431 = arith.constant 15 : index
    %c0_432 = arith.constant 0 : index
    %c0_433 = arith.constant 0 : index
    %382 = vector.load %arg1[%c1_430, %c15_431, %c0_432, %c0_433] : memref<4x25x8x150xf32, #tpu.memory_space<vmem>>, vector<1x1x8x150xf32>
    %383 = vector.shape_cast %382 : vector<1x1x8x150xf32> to vector<8x150xf32>
    %cst_434 = arith.constant dense<0.000000e+00> : vector<8x128xf32>
    %384 = tpu.matmul %383, %0, %cst_434 {dimension_numbers = #tpu.dot_dimension_numbers<[1], [0], [0], [1], [0, 0, 1, 1], [], []>} : vector<8x150xf32>, vector<150x128xf32>, vector<8x128xf32> -> vector<8x128xf32>
    %385 = arith.maximumf %381, %384 : vector<8x128xf32>
    %c2_435 = arith.constant 2 : index
    %c15_436 = arith.constant 15 : index
    %c0_437 = arith.constant 0 : index
    %c0_438 = arith.constant 0 : index
    %386 = vector.load %arg1[%c2_435, %c15_436, %c0_437, %c0_438] : memref<4x25x8x150xf32, #tpu.memory_space<vmem>>, vector<1x1x8x150xf32>
    %387 = vector.shape_cast %386 : vector<1x1x8x150xf32> to vector<8x150xf32>
    %cst_439 = arith.constant dense<0.000000e+00> : vector<8x128xf32>
    %388 = tpu.matmul %387, %0, %cst_439 {dimension_numbers = #tpu.dot_dimension_numbers<[1], [0], [0], [1], [0, 0, 1, 1], [], []>} : vector<8x150xf32>, vector<150x128xf32>, vector<8x128xf32> -> vector<8x128xf32>
    %389 = arith.maximumf %385, %388 : vector<8x128xf32>
    %c3_440 = arith.constant 3 : index
    %c15_441 = arith.constant 15 : index
    %c0_442 = arith.constant 0 : index
    %c0_443 = arith.constant 0 : index
    %390 = vector.load %arg1[%c3_440, %c15_441, %c0_442, %c0_443] : memref<4x25x8x150xf32, #tpu.memory_space<vmem>>, vector<1x1x8x150xf32>
    %391 = vector.shape_cast %390 : vector<1x1x8x150xf32> to vector<8x150xf32>
    %cst_444 = arith.constant dense<0.000000e+00> : vector<8x128xf32>
    %392 = tpu.matmul %391, %0, %cst_444 {dimension_numbers = #tpu.dot_dimension_numbers<[1], [0], [0], [1], [0, 0, 1, 1], [], []>} : vector<8x150xf32>, vector<150x128xf32>, vector<8x128xf32> -> vector<8x128xf32>
    %393 = arith.maximumf %389, %392 : vector<8x128xf32>
    %394 = vector.broadcast %1 : vector<1x128xf32> to vector<8x128xf32>
    %395 = arith.addf %393, %394 : vector<8x128xf32>
    %cst_445 = arith.constant 0.000000e+00 : f32
    %396 = vector.broadcast %cst_445 : f32 to vector<8x128xf32>
    %397 = arith.maximumf %395, %396 : vector<8x128xf32>
    %c0_446 = arith.constant 0 : index
    %c0_447 = arith.constant 0 : index
    %398 = vector.load %arg11[%c0_446, %c0_447] : memref<8x128xf32, #tpu.memory_space<vmem>>, vector<8x128xf32>
    %c15_448 = arith.constant 15 : index
    %c0_449 = arith.constant 0 : index
    %c0_450 = arith.constant 0 : index
    %399 = vector.load %arg4[%c15_448, %c0_449, %c0_450] : memref<25x128x128xf32, #tpu.memory_space<vmem>>, vector<1x128x128xf32>
    %400 = vector.shape_cast %399 : vector<1x128x128xf32> to vector<128x128xf32>
    %cst_451 = arith.constant dense<0.000000e+00> : vector<8x128xf32>
    %401 = tpu.matmul %397, %400, %cst_451 {dimension_numbers = #tpu.dot_dimension_numbers<[1], [0], [0], [1], [0, 0, 1, 1], [], []>} : vector<8x128xf32>, vector<128x128xf32>, vector<8x128xf32> -> vector<8x128xf32>
    %402 = arith.addf %398, %401 : vector<8x128xf32>
    %c0_452 = arith.constant 0 : index
    %c0_453 = arith.constant 0 : index
    %403 = vector.load %arg11[%c0_452, %c0_453] : memref<8x128xf32, #tpu.memory_space<vmem>>, vector<8x128xf32>
    tpu.vector_store %arg11[%c0_452, %c0_453], %402 {strides = array<i32>} : memref<8x128xf32, #tpu.memory_space<vmem>>, vector<8x128xf32>,
    %c0_454 = arith.constant 0 : index
    %c16 = arith.constant 16 : index
    %c0_455 = arith.constant 0 : index
    %c0_456 = arith.constant 0 : index
    %404 = vector.load %arg1[%c0_454, %c16, %c0_455, %c0_456] : memref<4x25x8x150xf32, #tpu.memory_space<vmem>>, vector<1x1x8x150xf32>
    %405 = vector.shape_cast %404 : vector<1x1x8x150xf32> to vector<8x150xf32>
    %cst_457 = arith.constant dense<0.000000e+00> : vector<8x128xf32>
    %406 = tpu.matmul %405, %0, %cst_457 {dimension_numbers = #tpu.dot_dimension_numbers<[1], [0], [0], [1], [0, 0, 1, 1], [], []>} : vector<8x150xf32>, vector<150x128xf32>, vector<8x128xf32> -> vector<8x128xf32>
    %c1_458 = arith.constant 1 : index
    %c16_459 = arith.constant 16 : index
    %c0_460 = arith.constant 0 : index
    %c0_461 = arith.constant 0 : index
    %407 = vector.load %arg1[%c1_458, %c16_459, %c0_460, %c0_461] : memref<4x25x8x150xf32, #tpu.memory_space<vmem>>, vector<1x1x8x150xf32>
    %408 = vector.shape_cast %407 : vector<1x1x8x150xf32> to vector<8x150xf32>
    %cst_462 = arith.constant dense<0.000000e+00> : vector<8x128xf32>
    %409 = tpu.matmul %408, %0, %cst_462 {dimension_numbers = #tpu.dot_dimension_numbers<[1], [0], [0], [1], [0, 0, 1, 1], [], []>} : vector<8x150xf32>, vector<150x128xf32>, vector<8x128xf32> -> vector<8x128xf32>
    %410 = arith.maximumf %406, %409 : vector<8x128xf32>
    %c2_463 = arith.constant 2 : index
    %c16_464 = arith.constant 16 : index
    %c0_465 = arith.constant 0 : index
    %c0_466 = arith.constant 0 : index
    %411 = vector.load %arg1[%c2_463, %c16_464, %c0_465, %c0_466] : memref<4x25x8x150xf32, #tpu.memory_space<vmem>>, vector<1x1x8x150xf32>
    %412 = vector.shape_cast %411 : vector<1x1x8x150xf32> to vector<8x150xf32>
    %cst_467 = arith.constant dense<0.000000e+00> : vector<8x128xf32>
    %413 = tpu.matmul %412, %0, %cst_467 {dimension_numbers = #tpu.dot_dimension_numbers<[1], [0], [0], [1], [0, 0, 1, 1], [], []>} : vector<8x150xf32>, vector<150x128xf32>, vector<8x128xf32> -> vector<8x128xf32>
    %414 = arith.maximumf %410, %413 : vector<8x128xf32>
    %c3_468 = arith.constant 3 : index
    %c16_469 = arith.constant 16 : index
    %c0_470 = arith.constant 0 : index
    %c0_471 = arith.constant 0 : index
    %415 = vector.load %arg1[%c3_468, %c16_469, %c0_470, %c0_471] : memref<4x25x8x150xf32, #tpu.memory_space<vmem>>, vector<1x1x8x150xf32>
    %416 = vector.shape_cast %415 : vector<1x1x8x150xf32> to vector<8x150xf32>
    %cst_472 = arith.constant dense<0.000000e+00> : vector<8x128xf32>
    %417 = tpu.matmul %416, %0, %cst_472 {dimension_numbers = #tpu.dot_dimension_numbers<[1], [0], [0], [1], [0, 0, 1, 1], [], []>} : vector<8x150xf32>, vector<150x128xf32>, vector<8x128xf32> -> vector<8x128xf32>
    %418 = arith.maximumf %414, %417 : vector<8x128xf32>
    %419 = vector.broadcast %1 : vector<1x128xf32> to vector<8x128xf32>
    %420 = arith.addf %418, %419 : vector<8x128xf32>
    %cst_473 = arith.constant 0.000000e+00 : f32
    %421 = vector.broadcast %cst_473 : f32 to vector<8x128xf32>
    %422 = arith.maximumf %420, %421 : vector<8x128xf32>
    %c0_474 = arith.constant 0 : index
    %c0_475 = arith.constant 0 : index
    %423 = vector.load %arg11[%c0_474, %c0_475] : memref<8x128xf32, #tpu.memory_space<vmem>>, vector<8x128xf32>
    %c16_476 = arith.constant 16 : index
    %c0_477 = arith.constant 0 : index
    %c0_478 = arith.constant 0 : index
    %424 = vector.load %arg4[%c16_476, %c0_477, %c0_478] : memref<25x128x128xf32, #tpu.memory_space<vmem>>, vector<1x128x128xf32>
    %425 = vector.shape_cast %424 : vector<1x128x128xf32> to vector<128x128xf32>
    %cst_479 = arith.constant dense<0.000000e+00> : vector<8x128xf32>
    %426 = tpu.matmul %422, %425, %cst_479 {dimension_numbers = #tpu.dot_dimension_numbers<[1], [0], [0], [1], [0, 0, 1, 1], [], []>} : vector<8x128xf32>, vector<128x128xf32>, vector<8x128xf32> -> vector<8x128xf32>
    %427 = arith.addf %423, %426 : vector<8x128xf32>
    %c0_480 = arith.constant 0 : index
    %c0_481 = arith.constant 0 : index
    %428 = vector.load %arg11[%c0_480, %c0_481] : memref<8x128xf32, #tpu.memory_space<vmem>>, vector<8x128xf32>
    tpu.vector_store %arg11[%c0_480, %c0_481], %427 {strides = array<i32>} : memref<8x128xf32, #tpu.memory_space<vmem>>, vector<8x128xf32>,
    %c0_482 = arith.constant 0 : index
    %c17 = arith.constant 17 : index
    %c0_483 = arith.constant 0 : index
    %c0_484 = arith.constant 0 : index
    %429 = vector.load %arg1[%c0_482, %c17, %c0_483, %c0_484] : memref<4x25x8x150xf32, #tpu.memory_space<vmem>>, vector<1x1x8x150xf32>
    %430 = vector.shape_cast %429 : vector<1x1x8x150xf32> to vector<8x150xf32>
    %cst_485 = arith.constant dense<0.000000e+00> : vector<8x128xf32>
    %431 = tpu.matmul %430, %0, %cst_485 {dimension_numbers = #tpu.dot_dimension_numbers<[1], [0], [0], [1], [0, 0, 1, 1], [], []>} : vector<8x150xf32>, vector<150x128xf32>, vector<8x128xf32> -> vector<8x128xf32>
    %c1_486 = arith.constant 1 : index
    %c17_487 = arith.constant 17 : index
    %c0_488 = arith.constant 0 : index
    %c0_489 = arith.constant 0 : index
    %432 = vector.load %arg1[%c1_486, %c17_487, %c0_488, %c0_489] : memref<4x25x8x150xf32, #tpu.memory_space<vmem>>, vector<1x1x8x150xf32>
    %433 = vector.shape_cast %432 : vector<1x1x8x150xf32> to vector<8x150xf32>
    %cst_490 = arith.constant dense<0.000000e+00> : vector<8x128xf32>
    %434 = tpu.matmul %433, %0, %cst_490 {dimension_numbers = #tpu.dot_dimension_numbers<[1], [0], [0], [1], [0, 0, 1, 1], [], []>} : vector<8x150xf32>, vector<150x128xf32>, vector<8x128xf32> -> vector<8x128xf32>
    %435 = arith.maximumf %431, %434 : vector<8x128xf32>
    %c2_491 = arith.constant 2 : index
    %c17_492 = arith.constant 17 : index
    %c0_493 = arith.constant 0 : index
    %c0_494 = arith.constant 0 : index
    %436 = vector.load %arg1[%c2_491, %c17_492, %c0_493, %c0_494] : memref<4x25x8x150xf32, #tpu.memory_space<vmem>>, vector<1x1x8x150xf32>
    %437 = vector.shape_cast %436 : vector<1x1x8x150xf32> to vector<8x150xf32>
    %cst_495 = arith.constant dense<0.000000e+00> : vector<8x128xf32>
    %438 = tpu.matmul %437, %0, %cst_495 {dimension_numbers = #tpu.dot_dimension_numbers<[1], [0], [0], [1], [0, 0, 1, 1], [], []>} : vector<8x150xf32>, vector<150x128xf32>, vector<8x128xf32> -> vector<8x128xf32>
    %439 = arith.maximumf %435, %438 : vector<8x128xf32>
    %c3_496 = arith.constant 3 : index
    %c17_497 = arith.constant 17 : index
    %c0_498 = arith.constant 0 : index
    %c0_499 = arith.constant 0 : index
    %440 = vector.load %arg1[%c3_496, %c17_497, %c0_498, %c0_499] : memref<4x25x8x150xf32, #tpu.memory_space<vmem>>, vector<1x1x8x150xf32>
    %441 = vector.shape_cast %440 : vector<1x1x8x150xf32> to vector<8x150xf32>
    %cst_500 = arith.constant dense<0.000000e+00> : vector<8x128xf32>
    %442 = tpu.matmul %441, %0, %cst_500 {dimension_numbers = #tpu.dot_dimension_numbers<[1], [0], [0], [1], [0, 0, 1, 1], [], []>} : vector<8x150xf32>, vector<150x128xf32>, vector<8x128xf32> -> vector<8x128xf32>
    %443 = arith.maximumf %439, %442 : vector<8x128xf32>
    %444 = vector.broadcast %1 : vector<1x128xf32> to vector<8x128xf32>
    %445 = arith.addf %443, %444 : vector<8x128xf32>
    %cst_501 = arith.constant 0.000000e+00 : f32
    %446 = vector.broadcast %cst_501 : f32 to vector<8x128xf32>
    %447 = arith.maximumf %445, %446 : vector<8x128xf32>
    %c0_502 = arith.constant 0 : index
    %c0_503 = arith.constant 0 : index
    %448 = vector.load %arg11[%c0_502, %c0_503] : memref<8x128xf32, #tpu.memory_space<vmem>>, vector<8x128xf32>
    %c17_504 = arith.constant 17 : index
    %c0_505 = arith.constant 0 : index
    %c0_506 = arith.constant 0 : index
    %449 = vector.load %arg4[%c17_504, %c0_505, %c0_506] : memref<25x128x128xf32, #tpu.memory_space<vmem>>, vector<1x128x128xf32>
    %450 = vector.shape_cast %449 : vector<1x128x128xf32> to vector<128x128xf32>
    %cst_507 = arith.constant dense<0.000000e+00> : vector<8x128xf32>
    %451 = tpu.matmul %447, %450, %cst_507 {dimension_numbers = #tpu.dot_dimension_numbers<[1], [0], [0], [1], [0, 0, 1, 1], [], []>} : vector<8x128xf32>, vector<128x128xf32>, vector<8x128xf32> -> vector<8x128xf32>
    %452 = arith.addf %448, %451 : vector<8x128xf32>
    %c0_508 = arith.constant 0 : index
    %c0_509 = arith.constant 0 : index
    %453 = vector.load %arg11[%c0_508, %c0_509] : memref<8x128xf32, #tpu.memory_space<vmem>>, vector<8x128xf32>
    tpu.vector_store %arg11[%c0_508, %c0_509], %452 {strides = array<i32>} : memref<8x128xf32, #tpu.memory_space<vmem>>, vector<8x128xf32>,
    %c0_510 = arith.constant 0 : index
    %c18 = arith.constant 18 : index
    %c0_511 = arith.constant 0 : index
    %c0_512 = arith.constant 0 : index
    %454 = vector.load %arg1[%c0_510, %c18, %c0_511, %c0_512] : memref<4x25x8x150xf32, #tpu.memory_space<vmem>>, vector<1x1x8x150xf32>
    %455 = vector.shape_cast %454 : vector<1x1x8x150xf32> to vector<8x150xf32>
    %cst_513 = arith.constant dense<0.000000e+00> : vector<8x128xf32>
    %456 = tpu.matmul %455, %0, %cst_513 {dimension_numbers = #tpu.dot_dimension_numbers<[1], [0], [0], [1], [0, 0, 1, 1], [], []>} : vector<8x150xf32>, vector<150x128xf32>, vector<8x128xf32> -> vector<8x128xf32>
    %c1_514 = arith.constant 1 : index
    %c18_515 = arith.constant 18 : index
    %c0_516 = arith.constant 0 : index
    %c0_517 = arith.constant 0 : index
    %457 = vector.load %arg1[%c1_514, %c18_515, %c0_516, %c0_517] : memref<4x25x8x150xf32, #tpu.memory_space<vmem>>, vector<1x1x8x150xf32>
    %458 = vector.shape_cast %457 : vector<1x1x8x150xf32> to vector<8x150xf32>
    %cst_518 = arith.constant dense<0.000000e+00> : vector<8x128xf32>
    %459 = tpu.matmul %458, %0, %cst_518 {dimension_numbers = #tpu.dot_dimension_numbers<[1], [0], [0], [1], [0, 0, 1, 1], [], []>} : vector<8x150xf32>, vector<150x128xf32>, vector<8x128xf32> -> vector<8x128xf32>
    %460 = arith.maximumf %456, %459 : vector<8x128xf32>
    %c2_519 = arith.constant 2 : index
    %c18_520 = arith.constant 18 : index
    %c0_521 = arith.constant 0 : index
    %c0_522 = arith.constant 0 : index
    %461 = vector.load %arg1[%c2_519, %c18_520, %c0_521, %c0_522] : memref<4x25x8x150xf32, #tpu.memory_space<vmem>>, vector<1x1x8x150xf32>
    %462 = vector.shape_cast %461 : vector<1x1x8x150xf32> to vector<8x150xf32>
    %cst_523 = arith.constant dense<0.000000e+00> : vector<8x128xf32>
    %463 = tpu.matmul %462, %0, %cst_523 {dimension_numbers = #tpu.dot_dimension_numbers<[1], [0], [0], [1], [0, 0, 1, 1], [], []>} : vector<8x150xf32>, vector<150x128xf32>, vector<8x128xf32> -> vector<8x128xf32>
    %464 = arith.maximumf %460, %463 : vector<8x128xf32>
    %c3_524 = arith.constant 3 : index
    %c18_525 = arith.constant 18 : index
    %c0_526 = arith.constant 0 : index
    %c0_527 = arith.constant 0 : index
    %465 = vector.load %arg1[%c3_524, %c18_525, %c0_526, %c0_527] : memref<4x25x8x150xf32, #tpu.memory_space<vmem>>, vector<1x1x8x150xf32>
    %466 = vector.shape_cast %465 : vector<1x1x8x150xf32> to vector<8x150xf32>
    %cst_528 = arith.constant dense<0.000000e+00> : vector<8x128xf32>
    %467 = tpu.matmul %466, %0, %cst_528 {dimension_numbers = #tpu.dot_dimension_numbers<[1], [0], [0], [1], [0, 0, 1, 1], [], []>} : vector<8x150xf32>, vector<150x128xf32>, vector<8x128xf32> -> vector<8x128xf32>
    %468 = arith.maximumf %464, %467 : vector<8x128xf32>
    %469 = vector.broadcast %1 : vector<1x128xf32> to vector<8x128xf32>
    %470 = arith.addf %468, %469 : vector<8x128xf32>
    %cst_529 = arith.constant 0.000000e+00 : f32
    %471 = vector.broadcast %cst_529 : f32 to vector<8x128xf32>
    %472 = arith.maximumf %470, %471 : vector<8x128xf32>
    %c0_530 = arith.constant 0 : index
    %c0_531 = arith.constant 0 : index
    %473 = vector.load %arg11[%c0_530, %c0_531] : memref<8x128xf32, #tpu.memory_space<vmem>>, vector<8x128xf32>
    %c18_532 = arith.constant 18 : index
    %c0_533 = arith.constant 0 : index
    %c0_534 = arith.constant 0 : index
    %474 = vector.load %arg4[%c18_532, %c0_533, %c0_534] : memref<25x128x128xf32, #tpu.memory_space<vmem>>, vector<1x128x128xf32>
    %475 = vector.shape_cast %474 : vector<1x128x128xf32> to vector<128x128xf32>
    %cst_535 = arith.constant dense<0.000000e+00> : vector<8x128xf32>
    %476 = tpu.matmul %472, %475, %cst_535 {dimension_numbers = #tpu.dot_dimension_numbers<[1], [0], [0], [1], [0, 0, 1, 1], [], []>} : vector<8x128xf32>, vector<128x128xf32>, vector<8x128xf32> -> vector<8x128xf32>
    %477 = arith.addf %473, %476 : vector<8x128xf32>
    %c0_536 = arith.constant 0 : index
    %c0_537 = arith.constant 0 : index
    %478 = vector.load %arg11[%c0_536, %c0_537] : memref<8x128xf32, #tpu.memory_space<vmem>>, vector<8x128xf32>
    tpu.vector_store %arg11[%c0_536, %c0_537], %477 {strides = array<i32>} : memref<8x128xf32, #tpu.memory_space<vmem>>, vector<8x128xf32>,
    %c0_538 = arith.constant 0 : index
    %c19 = arith.constant 19 : index
    %c0_539 = arith.constant 0 : index
    %c0_540 = arith.constant 0 : index
    %479 = vector.load %arg1[%c0_538, %c19, %c0_539, %c0_540] : memref<4x25x8x150xf32, #tpu.memory_space<vmem>>, vector<1x1x8x150xf32>
    %480 = vector.shape_cast %479 : vector<1x1x8x150xf32> to vector<8x150xf32>
    %cst_541 = arith.constant dense<0.000000e+00> : vector<8x128xf32>
    %481 = tpu.matmul %480, %0, %cst_541 {dimension_numbers = #tpu.dot_dimension_numbers<[1], [0], [0], [1], [0, 0, 1, 1], [], []>} : vector<8x150xf32>, vector<150x128xf32>, vector<8x128xf32> -> vector<8x128xf32>
    %c1_542 = arith.constant 1 : index
    %c19_543 = arith.constant 19 : index
    %c0_544 = arith.constant 0 : index
    %c0_545 = arith.constant 0 : index
    %482 = vector.load %arg1[%c1_542, %c19_543, %c0_544, %c0_545] : memref<4x25x8x150xf32, #tpu.memory_space<vmem>>, vector<1x1x8x150xf32>
    %483 = vector.shape_cast %482 : vector<1x1x8x150xf32> to vector<8x150xf32>
    %cst_546 = arith.constant dense<0.000000e+00> : vector<8x128xf32>
    %484 = tpu.matmul %483, %0, %cst_546 {dimension_numbers = #tpu.dot_dimension_numbers<[1], [0], [0], [1], [0, 0, 1, 1], [], []>} : vector<8x150xf32>, vector<150x128xf32>, vector<8x128xf32> -> vector<8x128xf32>
    %485 = arith.maximumf %481, %484 : vector<8x128xf32>
    %c2_547 = arith.constant 2 : index
    %c19_548 = arith.constant 19 : index
    %c0_549 = arith.constant 0 : index
    %c0_550 = arith.constant 0 : index
    %486 = vector.load %arg1[%c2_547, %c19_548, %c0_549, %c0_550] : memref<4x25x8x150xf32, #tpu.memory_space<vmem>>, vector<1x1x8x150xf32>
    %487 = vector.shape_cast %486 : vector<1x1x8x150xf32> to vector<8x150xf32>
    %cst_551 = arith.constant dense<0.000000e+00> : vector<8x128xf32>
    %488 = tpu.matmul %487, %0, %cst_551 {dimension_numbers = #tpu.dot_dimension_numbers<[1], [0], [0], [1], [0, 0, 1, 1], [], []>} : vector<8x150xf32>, vector<150x128xf32>, vector<8x128xf32> -> vector<8x128xf32>
    %489 = arith.maximumf %485, %488 : vector<8x128xf32>
    %c3_552 = arith.constant 3 : index
    %c19_553 = arith.constant 19 : index
    %c0_554 = arith.constant 0 : index
    %c0_555 = arith.constant 0 : index
    %490 = vector.load %arg1[%c3_552, %c19_553, %c0_554, %c0_555] : memref<4x25x8x150xf32, #tpu.memory_space<vmem>>, vector<1x1x8x150xf32>
    %491 = vector.shape_cast %490 : vector<1x1x8x150xf32> to vector<8x150xf32>
    %cst_556 = arith.constant dense<0.000000e+00> : vector<8x128xf32>
    %492 = tpu.matmul %491, %0, %cst_556 {dimension_numbers = #tpu.dot_dimension_numbers<[1], [0], [0], [1], [0, 0, 1, 1], [], []>} : vector<8x150xf32>, vector<150x128xf32>, vector<8x128xf32> -> vector<8x128xf32>
    %493 = arith.maximumf %489, %492 : vector<8x128xf32>
    %494 = vector.broadcast %1 : vector<1x128xf32> to vector<8x128xf32>
    %495 = arith.addf %493, %494 : vector<8x128xf32>
    %cst_557 = arith.constant 0.000000e+00 : f32
    %496 = vector.broadcast %cst_557 : f32 to vector<8x128xf32>
    %497 = arith.maximumf %495, %496 : vector<8x128xf32>
    %c0_558 = arith.constant 0 : index
    %c0_559 = arith.constant 0 : index
    %498 = vector.load %arg11[%c0_558, %c0_559] : memref<8x128xf32, #tpu.memory_space<vmem>>, vector<8x128xf32>
    %c19_560 = arith.constant 19 : index
    %c0_561 = arith.constant 0 : index
    %c0_562 = arith.constant 0 : index
    %499 = vector.load %arg4[%c19_560, %c0_561, %c0_562] : memref<25x128x128xf32, #tpu.memory_space<vmem>>, vector<1x128x128xf32>
    %500 = vector.shape_cast %499 : vector<1x128x128xf32> to vector<128x128xf32>
    %cst_563 = arith.constant dense<0.000000e+00> : vector<8x128xf32>
    %501 = tpu.matmul %497, %500, %cst_563 {dimension_numbers = #tpu.dot_dimension_numbers<[1], [0], [0], [1], [0, 0, 1, 1], [], []>} : vector<8x128xf32>, vector<128x128xf32>, vector<8x128xf32> -> vector<8x128xf32>
    %502 = arith.addf %498, %501 : vector<8x128xf32>
    %c0_564 = arith.constant 0 : index
    %c0_565 = arith.constant 0 : index
    %503 = vector.load %arg11[%c0_564, %c0_565] : memref<8x128xf32, #tpu.memory_space<vmem>>, vector<8x128xf32>
    tpu.vector_store %arg11[%c0_564, %c0_565], %502 {strides = array<i32>} : memref<8x128xf32, #tpu.memory_space<vmem>>, vector<8x128xf32>,
    %c0_566 = arith.constant 0 : index
    %c20 = arith.constant 20 : index
    %c0_567 = arith.constant 0 : index
    %c0_568 = arith.constant 0 : index
    %504 = vector.load %arg1[%c0_566, %c20, %c0_567, %c0_568] : memref<4x25x8x150xf32, #tpu.memory_space<vmem>>, vector<1x1x8x150xf32>
    %505 = vector.shape_cast %504 : vector<1x1x8x150xf32> to vector<8x150xf32>
    %cst_569 = arith.constant dense<0.000000e+00> : vector<8x128xf32>
    %506 = tpu.matmul %505, %0, %cst_569 {dimension_numbers = #tpu.dot_dimension_numbers<[1], [0], [0], [1], [0, 0, 1, 1], [], []>} : vector<8x150xf32>, vector<150x128xf32>, vector<8x128xf32> -> vector<8x128xf32>
    %c1_570 = arith.constant 1 : index
    %c20_571 = arith.constant 20 : index
    %c0_572 = arith.constant 0 : index
    %c0_573 = arith.constant 0 : index
    %507 = vector.load %arg1[%c1_570, %c20_571, %c0_572, %c0_573] : memref<4x25x8x150xf32, #tpu.memory_space<vmem>>, vector<1x1x8x150xf32>
    %508 = vector.shape_cast %507 : vector<1x1x8x150xf32> to vector<8x150xf32>
    %cst_574 = arith.constant dense<0.000000e+00> : vector<8x128xf32>
    %509 = tpu.matmul %508, %0, %cst_574 {dimension_numbers = #tpu.dot_dimension_numbers<[1], [0], [0], [1], [0, 0, 1, 1], [], []>} : vector<8x150xf32>, vector<150x128xf32>, vector<8x128xf32> -> vector<8x128xf32>
    %510 = arith.maximumf %506, %509 : vector<8x128xf32>
    %c2_575 = arith.constant 2 : index
    %c20_576 = arith.constant 20 : index
    %c0_577 = arith.constant 0 : index
    %c0_578 = arith.constant 0 : index
    %511 = vector.load %arg1[%c2_575, %c20_576, %c0_577, %c0_578] : memref<4x25x8x150xf32, #tpu.memory_space<vmem>>, vector<1x1x8x150xf32>
    %512 = vector.shape_cast %511 : vector<1x1x8x150xf32> to vector<8x150xf32>
    %cst_579 = arith.constant dense<0.000000e+00> : vector<8x128xf32>
    %513 = tpu.matmul %512, %0, %cst_579 {dimension_numbers = #tpu.dot_dimension_numbers<[1], [0], [0], [1], [0, 0, 1, 1], [], []>} : vector<8x150xf32>, vector<150x128xf32>, vector<8x128xf32> -> vector<8x128xf32>
    %514 = arith.maximumf %510, %513 : vector<8x128xf32>
    %c3_580 = arith.constant 3 : index
    %c20_581 = arith.constant 20 : index
    %c0_582 = arith.constant 0 : index
    %c0_583 = arith.constant 0 : index
    %515 = vector.load %arg1[%c3_580, %c20_581, %c0_582, %c0_583] : memref<4x25x8x150xf32, #tpu.memory_space<vmem>>, vector<1x1x8x150xf32>
    %516 = vector.shape_cast %515 : vector<1x1x8x150xf32> to vector<8x150xf32>
    %cst_584 = arith.constant dense<0.000000e+00> : vector<8x128xf32>
    %517 = tpu.matmul %516, %0, %cst_584 {dimension_numbers = #tpu.dot_dimension_numbers<[1], [0], [0], [1], [0, 0, 1, 1], [], []>} : vector<8x150xf32>, vector<150x128xf32>, vector<8x128xf32> -> vector<8x128xf32>
    %518 = arith.maximumf %514, %517 : vector<8x128xf32>
    %519 = vector.broadcast %1 : vector<1x128xf32> to vector<8x128xf32>
    %520 = arith.addf %518, %519 : vector<8x128xf32>
    %cst_585 = arith.constant 0.000000e+00 : f32
    %521 = vector.broadcast %cst_585 : f32 to vector<8x128xf32>
    %522 = arith.maximumf %520, %521 : vector<8x128xf32>
    %c0_586 = arith.constant 0 : index
    %c0_587 = arith.constant 0 : index
    %523 = vector.load %arg11[%c0_586, %c0_587] : memref<8x128xf32, #tpu.memory_space<vmem>>, vector<8x128xf32>
    %c20_588 = arith.constant 20 : index
    %c0_589 = arith.constant 0 : index
    %c0_590 = arith.constant 0 : index
    %524 = vector.load %arg4[%c20_588, %c0_589, %c0_590] : memref<25x128x128xf32, #tpu.memory_space<vmem>>, vector<1x128x128xf32>
    %525 = vector.shape_cast %524 : vector<1x128x128xf32> to vector<128x128xf32>
    %cst_591 = arith.constant dense<0.000000e+00> : vector<8x128xf32>
    %526 = tpu.matmul %522, %525, %cst_591 {dimension_numbers = #tpu.dot_dimension_numbers<[1], [0], [0], [1], [0, 0, 1, 1], [], []>} : vector<8x128xf32>, vector<128x128xf32>, vector<8x128xf32> -> vector<8x128xf32>
    %527 = arith.addf %523, %526 : vector<8x128xf32>
    %c0_592 = arith.constant 0 : index
    %c0_593 = arith.constant 0 : index
    %528 = vector.load %arg11[%c0_592, %c0_593] : memref<8x128xf32, #tpu.memory_space<vmem>>, vector<8x128xf32>
    tpu.vector_store %arg11[%c0_592, %c0_593], %527 {strides = array<i32>} : memref<8x128xf32, #tpu.memory_space<vmem>>, vector<8x128xf32>,
    %c0_594 = arith.constant 0 : index
    %c21 = arith.constant 21 : index
    %c0_595 = arith.constant 0 : index
    %c0_596 = arith.constant 0 : index
    %529 = vector.load %arg1[%c0_594, %c21, %c0_595, %c0_596] : memref<4x25x8x150xf32, #tpu.memory_space<vmem>>, vector<1x1x8x150xf32>
    %530 = vector.shape_cast %529 : vector<1x1x8x150xf32> to vector<8x150xf32>
    %cst_597 = arith.constant dense<0.000000e+00> : vector<8x128xf32>
    %531 = tpu.matmul %530, %0, %cst_597 {dimension_numbers = #tpu.dot_dimension_numbers<[1], [0], [0], [1], [0, 0, 1, 1], [], []>} : vector<8x150xf32>, vector<150x128xf32>, vector<8x128xf32> -> vector<8x128xf32>
    %c1_598 = arith.constant 1 : index
    %c21_599 = arith.constant 21 : index
    %c0_600 = arith.constant 0 : index
    %c0_601 = arith.constant 0 : index
    %532 = vector.load %arg1[%c1_598, %c21_599, %c0_600, %c0_601] : memref<4x25x8x150xf32, #tpu.memory_space<vmem>>, vector<1x1x8x150xf32>
    %533 = vector.shape_cast %532 : vector<1x1x8x150xf32> to vector<8x150xf32>
    %cst_602 = arith.constant dense<0.000000e+00> : vector<8x128xf32>
    %534 = tpu.matmul %533, %0, %cst_602 {dimension_numbers = #tpu.dot_dimension_numbers<[1], [0], [0], [1], [0, 0, 1, 1], [], []>} : vector<8x150xf32>, vector<150x128xf32>, vector<8x128xf32> -> vector<8x128xf32>
    %535 = arith.maximumf %531, %534 : vector<8x128xf32>
    %c2_603 = arith.constant 2 : index
    %c21_604 = arith.constant 21 : index
    %c0_605 = arith.constant 0 : index
    %c0_606 = arith.constant 0 : index
    %536 = vector.load %arg1[%c2_603, %c21_604, %c0_605, %c0_606] : memref<4x25x8x150xf32, #tpu.memory_space<vmem>>, vector<1x1x8x150xf32>
    %537 = vector.shape_cast %536 : vector<1x1x8x150xf32> to vector<8x150xf32>
    %cst_607 = arith.constant dense<0.000000e+00> : vector<8x128xf32>
    %538 = tpu.matmul %537, %0, %cst_607 {dimension_numbers = #tpu.dot_dimension_numbers<[1], [0], [0], [1], [0, 0, 1, 1], [], []>} : vector<8x150xf32>, vector<150x128xf32>, vector<8x128xf32> -> vector<8x128xf32>
    %539 = arith.maximumf %535, %538 : vector<8x128xf32>
    %c3_608 = arith.constant 3 : index
    %c21_609 = arith.constant 21 : index
    %c0_610 = arith.constant 0 : index
    %c0_611 = arith.constant 0 : index
    %540 = vector.load %arg1[%c3_608, %c21_609, %c0_610, %c0_611] : memref<4x25x8x150xf32, #tpu.memory_space<vmem>>, vector<1x1x8x150xf32>
    %541 = vector.shape_cast %540 : vector<1x1x8x150xf32> to vector<8x150xf32>
    %cst_612 = arith.constant dense<0.000000e+00> : vector<8x128xf32>
    %542 = tpu.matmul %541, %0, %cst_612 {dimension_numbers = #tpu.dot_dimension_numbers<[1], [0], [0], [1], [0, 0, 1, 1], [], []>} : vector<8x150xf32>, vector<150x128xf32>, vector<8x128xf32> -> vector<8x128xf32>
    %543 = arith.maximumf %539, %542 : vector<8x128xf32>
    %544 = vector.broadcast %1 : vector<1x128xf32> to vector<8x128xf32>
    %545 = arith.addf %543, %544 : vector<8x128xf32>
    %cst_613 = arith.constant 0.000000e+00 : f32
    %546 = vector.broadcast %cst_613 : f32 to vector<8x128xf32>
    %547 = arith.maximumf %545, %546 : vector<8x128xf32>
    %c0_614 = arith.constant 0 : index
    %c0_615 = arith.constant 0 : index
    %548 = vector.load %arg11[%c0_614, %c0_615] : memref<8x128xf32, #tpu.memory_space<vmem>>, vector<8x128xf32>
    %c21_616 = arith.constant 21 : index
    %c0_617 = arith.constant 0 : index
    %c0_618 = arith.constant 0 : index
    %549 = vector.load %arg4[%c21_616, %c0_617, %c0_618] : memref<25x128x128xf32, #tpu.memory_space<vmem>>, vector<1x128x128xf32>
    %550 = vector.shape_cast %549 : vector<1x128x128xf32> to vector<128x128xf32>
    %cst_619 = arith.constant dense<0.000000e+00> : vector<8x128xf32>
    %551 = tpu.matmul %547, %550, %cst_619 {dimension_numbers = #tpu.dot_dimension_numbers<[1], [0], [0], [1], [0, 0, 1, 1], [], []>} : vector<8x128xf32>, vector<128x128xf32>, vector<8x128xf32> -> vector<8x128xf32>
    %552 = arith.addf %548, %551 : vector<8x128xf32>
    %c0_620 = arith.constant 0 : index
    %c0_621 = arith.constant 0 : index
    %553 = vector.load %arg11[%c0_620, %c0_621] : memref<8x128xf32, #tpu.memory_space<vmem>>, vector<8x128xf32>
    tpu.vector_store %arg11[%c0_620, %c0_621], %552 {strides = array<i32>} : memref<8x128xf32, #tpu.memory_space<vmem>>, vector<8x128xf32>,
    %c0_622 = arith.constant 0 : index
    %c22 = arith.constant 22 : index
    %c0_623 = arith.constant 0 : index
    %c0_624 = arith.constant 0 : index
    %554 = vector.load %arg1[%c0_622, %c22, %c0_623, %c0_624] : memref<4x25x8x150xf32, #tpu.memory_space<vmem>>, vector<1x1x8x150xf32>
    %555 = vector.shape_cast %554 : vector<1x1x8x150xf32> to vector<8x150xf32>
    %cst_625 = arith.constant dense<0.000000e+00> : vector<8x128xf32>
    %556 = tpu.matmul %555, %0, %cst_625 {dimension_numbers = #tpu.dot_dimension_numbers<[1], [0], [0], [1], [0, 0, 1, 1], [], []>} : vector<8x150xf32>, vector<150x128xf32>, vector<8x128xf32> -> vector<8x128xf32>
    %c1_626 = arith.constant 1 : index
    %c22_627 = arith.constant 22 : index
    %c0_628 = arith.constant 0 : index
    %c0_629 = arith.constant 0 : index
    %557 = vector.load %arg1[%c1_626, %c22_627, %c0_628, %c0_629] : memref<4x25x8x150xf32, #tpu.memory_space<vmem>>, vector<1x1x8x150xf32>
    %558 = vector.shape_cast %557 : vector<1x1x8x150xf32> to vector<8x150xf32>
    %cst_630 = arith.constant dense<0.000000e+00> : vector<8x128xf32>
    %559 = tpu.matmul %558, %0, %cst_630 {dimension_numbers = #tpu.dot_dimension_numbers<[1], [0], [0], [1], [0, 0, 1, 1], [], []>} : vector<8x150xf32>, vector<150x128xf32>, vector<8x128xf32> -> vector<8x128xf32>
    %560 = arith.maximumf %556, %559 : vector<8x128xf32>
    %c2_631 = arith.constant 2 : index
    %c22_632 = arith.constant 22 : index
    %c0_633 = arith.constant 0 : index
    %c0_634 = arith.constant 0 : index
    %561 = vector.load %arg1[%c2_631, %c22_632, %c0_633, %c0_634] : memref<4x25x8x150xf32, #tpu.memory_space<vmem>>, vector<1x1x8x150xf32>
    %562 = vector.shape_cast %561 : vector<1x1x8x150xf32> to vector<8x150xf32>
    %cst_635 = arith.constant dense<0.000000e+00> : vector<8x128xf32>
    %563 = tpu.matmul %562, %0, %cst_635 {dimension_numbers = #tpu.dot_dimension_numbers<[1], [0], [0], [1], [0, 0, 1, 1], [], []>} : vector<8x150xf32>, vector<150x128xf32>, vector<8x128xf32> -> vector<8x128xf32>
    %564 = arith.maximumf %560, %563 : vector<8x128xf32>
    %c3_636 = arith.constant 3 : index
    %c22_637 = arith.constant 22 : index
    %c0_638 = arith.constant 0 : index
    %c0_639 = arith.constant 0 : index
    %565 = vector.load %arg1[%c3_636, %c22_637, %c0_638, %c0_639] : memref<4x25x8x150xf32, #tpu.memory_space<vmem>>, vector<1x1x8x150xf32>
    %566 = vector.shape_cast %565 : vector<1x1x8x150xf32> to vector<8x150xf32>
    %cst_640 = arith.constant dense<0.000000e+00> : vector<8x128xf32>
    %567 = tpu.matmul %566, %0, %cst_640 {dimension_numbers = #tpu.dot_dimension_numbers<[1], [0], [0], [1], [0, 0, 1, 1], [], []>} : vector<8x150xf32>, vector<150x128xf32>, vector<8x128xf32> -> vector<8x128xf32>
    %568 = arith.maximumf %564, %567 : vector<8x128xf32>
    %569 = vector.broadcast %1 : vector<1x128xf32> to vector<8x128xf32>
    %570 = arith.addf %568, %569 : vector<8x128xf32>
    %cst_641 = arith.constant 0.000000e+00 : f32
    %571 = vector.broadcast %cst_641 : f32 to vector<8x128xf32>
    %572 = arith.maximumf %570, %571 : vector<8x128xf32>
    %c0_642 = arith.constant 0 : index
    %c0_643 = arith.constant 0 : index
    %573 = vector.load %arg11[%c0_642, %c0_643] : memref<8x128xf32, #tpu.memory_space<vmem>>, vector<8x128xf32>
    %c22_644 = arith.constant 22 : index
    %c0_645 = arith.constant 0 : index
    %c0_646 = arith.constant 0 : index
    %574 = vector.load %arg4[%c22_644, %c0_645, %c0_646] : memref<25x128x128xf32, #tpu.memory_space<vmem>>, vector<1x128x128xf32>
    %575 = vector.shape_cast %574 : vector<1x128x128xf32> to vector<128x128xf32>
    %cst_647 = arith.constant dense<0.000000e+00> : vector<8x128xf32>
    %576 = tpu.matmul %572, %575, %cst_647 {dimension_numbers = #tpu.dot_dimension_numbers<[1], [0], [0], [1], [0, 0, 1, 1], [], []>} : vector<8x128xf32>, vector<128x128xf32>, vector<8x128xf32> -> vector<8x128xf32>
    %577 = arith.addf %573, %576 : vector<8x128xf32>
    %c0_648 = arith.constant 0 : index
    %c0_649 = arith.constant 0 : index
    %578 = vector.load %arg11[%c0_648, %c0_649] : memref<8x128xf32, #tpu.memory_space<vmem>>, vector<8x128xf32>
    tpu.vector_store %arg11[%c0_648, %c0_649], %577 {strides = array<i32>} : memref<8x128xf32, #tpu.memory_space<vmem>>, vector<8x128xf32>,
    %c0_650 = arith.constant 0 : index
    %c23 = arith.constant 23 : index
    %c0_651 = arith.constant 0 : index
    %c0_652 = arith.constant 0 : index
    %579 = vector.load %arg1[%c0_650, %c23, %c0_651, %c0_652] : memref<4x25x8x150xf32, #tpu.memory_space<vmem>>, vector<1x1x8x150xf32>
    %580 = vector.shape_cast %579 : vector<1x1x8x150xf32> to vector<8x150xf32>
    %cst_653 = arith.constant dense<0.000000e+00> : vector<8x128xf32>
    %581 = tpu.matmul %580, %0, %cst_653 {dimension_numbers = #tpu.dot_dimension_numbers<[1], [0], [0], [1], [0, 0, 1, 1], [], []>} : vector<8x150xf32>, vector<150x128xf32>, vector<8x128xf32> -> vector<8x128xf32>
    %c1_654 = arith.constant 1 : index
    %c23_655 = arith.constant 23 : index
    %c0_656 = arith.constant 0 : index
    %c0_657 = arith.constant 0 : index
    %582 = vector.load %arg1[%c1_654, %c23_655, %c0_656, %c0_657] : memref<4x25x8x150xf32, #tpu.memory_space<vmem>>, vector<1x1x8x150xf32>
    %583 = vector.shape_cast %582 : vector<1x1x8x150xf32> to vector<8x150xf32>
    %cst_658 = arith.constant dense<0.000000e+00> : vector<8x128xf32>
    %584 = tpu.matmul %583, %0, %cst_658 {dimension_numbers = #tpu.dot_dimension_numbers<[1], [0], [0], [1], [0, 0, 1, 1], [], []>} : vector<8x150xf32>, vector<150x128xf32>, vector<8x128xf32> -> vector<8x128xf32>
    %585 = arith.maximumf %581, %584 : vector<8x128xf32>
    %c2_659 = arith.constant 2 : index
    %c23_660 = arith.constant 23 : index
    %c0_661 = arith.constant 0 : index
    %c0_662 = arith.constant 0 : index
    %586 = vector.load %arg1[%c2_659, %c23_660, %c0_661, %c0_662] : memref<4x25x8x150xf32, #tpu.memory_space<vmem>>, vector<1x1x8x150xf32>
    %587 = vector.shape_cast %586 : vector<1x1x8x150xf32> to vector<8x150xf32>
    %cst_663 = arith.constant dense<0.000000e+00> : vector<8x128xf32>
    %588 = tpu.matmul %587, %0, %cst_663 {dimension_numbers = #tpu.dot_dimension_numbers<[1], [0], [0], [1], [0, 0, 1, 1], [], []>} : vector<8x150xf32>, vector<150x128xf32>, vector<8x128xf32> -> vector<8x128xf32>
    %589 = arith.maximumf %585, %588 : vector<8x128xf32>
    %c3_664 = arith.constant 3 : index
    %c23_665 = arith.constant 23 : index
    %c0_666 = arith.constant 0 : index
    %c0_667 = arith.constant 0 : index
    %590 = vector.load %arg1[%c3_664, %c23_665, %c0_666, %c0_667] : memref<4x25x8x150xf32, #tpu.memory_space<vmem>>, vector<1x1x8x150xf32>
    %591 = vector.shape_cast %590 : vector<1x1x8x150xf32> to vector<8x150xf32>
    %cst_668 = arith.constant dense<0.000000e+00> : vector<8x128xf32>
    %592 = tpu.matmul %591, %0, %cst_668 {dimension_numbers = #tpu.dot_dimension_numbers<[1], [0], [0], [1], [0, 0, 1, 1], [], []>} : vector<8x150xf32>, vector<150x128xf32>, vector<8x128xf32> -> vector<8x128xf32>
    %593 = arith.maximumf %589, %592 : vector<8x128xf32>
    %594 = vector.broadcast %1 : vector<1x128xf32> to vector<8x128xf32>
    %595 = arith.addf %593, %594 : vector<8x128xf32>
    %cst_669 = arith.constant 0.000000e+00 : f32
    %596 = vector.broadcast %cst_669 : f32 to vector<8x128xf32>
    %597 = arith.maximumf %595, %596 : vector<8x128xf32>
    %c0_670 = arith.constant 0 : index
    %c0_671 = arith.constant 0 : index
    %598 = vector.load %arg11[%c0_670, %c0_671] : memref<8x128xf32, #tpu.memory_space<vmem>>, vector<8x128xf32>
    %c23_672 = arith.constant 23 : index
    %c0_673 = arith.constant 0 : index
    %c0_674 = arith.constant 0 : index
    %599 = vector.load %arg4[%c23_672, %c0_673, %c0_674] : memref<25x128x128xf32, #tpu.memory_space<vmem>>, vector<1x128x128xf32>
    %600 = vector.shape_cast %599 : vector<1x128x128xf32> to vector<128x128xf32>
    %cst_675 = arith.constant dense<0.000000e+00> : vector<8x128xf32>
    %601 = tpu.matmul %597, %600, %cst_675 {dimension_numbers = #tpu.dot_dimension_numbers<[1], [0], [0], [1], [0, 0, 1, 1], [], []>} : vector<8x128xf32>, vector<128x128xf32>, vector<8x128xf32> -> vector<8x128xf32>
    %602 = arith.addf %598, %601 : vector<8x128xf32>
    %c0_676 = arith.constant 0 : index
    %c0_677 = arith.constant 0 : index
    %603 = vector.load %arg11[%c0_676, %c0_677] : memref<8x128xf32, #tpu.memory_space<vmem>>, vector<8x128xf32>
    tpu.vector_store %arg11[%c0_676, %c0_677], %602 {strides = array<i32>} : memref<8x128xf32, #tpu.memory_space<vmem>>, vector<8x128xf32>,
    %c0_678 = arith.constant 0 : index
    %c24 = arith.constant 24 : index
    %c0_679 = arith.constant 0 : index
    %c0_680 = arith.constant 0 : index
    %604 = vector.load %arg1[%c0_678, %c24, %c0_679, %c0_680] : memref<4x25x8x150xf32, #tpu.memory_space<vmem>>, vector<1x1x8x150xf32>
    %605 = vector.shape_cast %604 : vector<1x1x8x150xf32> to vector<8x150xf32>
    %cst_681 = arith.constant dense<0.000000e+00> : vector<8x128xf32>
    %606 = tpu.matmul %605, %0, %cst_681 {dimension_numbers = #tpu.dot_dimension_numbers<[1], [0], [0], [1], [0, 0, 1, 1], [], []>} : vector<8x150xf32>, vector<150x128xf32>, vector<8x128xf32> -> vector<8x128xf32>
    %c1_682 = arith.constant 1 : index
    %c24_683 = arith.constant 24 : index
    %c0_684 = arith.constant 0 : index
    %c0_685 = arith.constant 0 : index
    %607 = vector.load %arg1[%c1_682, %c24_683, %c0_684, %c0_685] : memref<4x25x8x150xf32, #tpu.memory_space<vmem>>, vector<1x1x8x150xf32>
    %608 = vector.shape_cast %607 : vector<1x1x8x150xf32> to vector<8x150xf32>
    %cst_686 = arith.constant dense<0.000000e+00> : vector<8x128xf32>
    %609 = tpu.matmul %608, %0, %cst_686 {dimension_numbers = #tpu.dot_dimension_numbers<[1], [0], [0], [1], [0, 0, 1, 1], [], []>} : vector<8x150xf32>, vector<150x128xf32>, vector<8x128xf32> -> vector<8x128xf32>
    %610 = arith.maximumf %606, %609 : vector<8x128xf32>
    %c2_687 = arith.constant 2 : index
    %c24_688 = arith.constant 24 : index
    %c0_689 = arith.constant 0 : index
    %c0_690 = arith.constant 0 : index
    %611 = vector.load %arg1[%c2_687, %c24_688, %c0_689, %c0_690] : memref<4x25x8x150xf32, #tpu.memory_space<vmem>>, vector<1x1x8x150xf32>
    %612 = vector.shape_cast %611 : vector<1x1x8x150xf32> to vector<8x150xf32>
    %cst_691 = arith.constant dense<0.000000e+00> : vector<8x128xf32>
    %613 = tpu.matmul %612, %0, %cst_691 {dimension_numbers = #tpu.dot_dimension_numbers<[1], [0], [0], [1], [0, 0, 1, 1], [], []>} : vector<8x150xf32>, vector<150x128xf32>, vector<8x128xf32> -> vector<8x128xf32>
    %614 = arith.maximumf %610, %613 : vector<8x128xf32>
    %c3_692 = arith.constant 3 : index
    %c24_693 = arith.constant 24 : index
    %c0_694 = arith.constant 0 : index
    %c0_695 = arith.constant 0 : index
    %615 = vector.load %arg1[%c3_692, %c24_693, %c0_694, %c0_695] : memref<4x25x8x150xf32, #tpu.memory_space<vmem>>, vector<1x1x8x150xf32>
    %616 = vector.shape_cast %615 : vector<1x1x8x150xf32> to vector<8x150xf32>
    %cst_696 = arith.constant dense<0.000000e+00> : vector<8x128xf32>
    %617 = tpu.matmul %616, %0, %cst_696 {dimension_numbers = #tpu.dot_dimension_numbers<[1], [0], [0], [1], [0, 0, 1, 1], [], []>} : vector<8x150xf32>, vector<150x128xf32>, vector<8x128xf32> -> vector<8x128xf32>
    %618 = arith.maximumf %614, %617 : vector<8x128xf32>
    %619 = vector.broadcast %1 : vector<1x128xf32> to vector<8x128xf32>
    %620 = arith.addf %618, %619 : vector<8x128xf32>
    %cst_697 = arith.constant 0.000000e+00 : f32
    %621 = vector.broadcast %cst_697 : f32 to vector<8x128xf32>
    %622 = arith.maximumf %620, %621 : vector<8x128xf32>
    %c0_698 = arith.constant 0 : index
    %c0_699 = arith.constant 0 : index
    %623 = vector.load %arg11[%c0_698, %c0_699] : memref<8x128xf32, #tpu.memory_space<vmem>>, vector<8x128xf32>
    %c24_700 = arith.constant 24 : index
    %c0_701 = arith.constant 0 : index
    %c0_702 = arith.constant 0 : index
    %624 = vector.load %arg4[%c24_700, %c0_701, %c0_702] : memref<25x128x128xf32, #tpu.memory_space<vmem>>, vector<1x128x128xf32>
    %625 = vector.shape_cast %624 : vector<1x128x128xf32> to vector<128x128xf32>
    %cst_703 = arith.constant dense<0.000000e+00> : vector<8x128xf32>
    %626 = tpu.matmul %622, %625, %cst_703 {dimension_numbers = #tpu.dot_dimension_numbers<[1], [0], [0], [1], [0, 0, 1, 1], [], []>} : vector<8x128xf32>, vector<128x128xf32>, vector<8x128xf32> -> vector<8x128xf32>
    %627 = arith.addf %623, %626 : vector<8x128xf32>
    %c0_704 = arith.constant 0 : index
    %c0_705 = arith.constant 0 : index
    %628 = vector.load %arg11[%c0_704, %c0_705] : memref<8x128xf32, #tpu.memory_space<vmem>>, vector<8x128xf32>
    tpu.vector_store %arg11[%c0_704, %c0_705], %627 {strides = array<i32>} : memref<8x128xf32, #tpu.memory_space<vmem>>, vector<8x128xf32>,
    %c0_706 = arith.constant 0 : index
    %c0_707 = arith.constant 0 : index
    %629 = vector.load %arg11[%c0_706, %c0_707] : memref<8x128xf32, #tpu.memory_space<vmem>>, vector<8x128xf32>
    %c0_708 = arith.constant 0 : index
    %c0_709 = arith.constant 0 : index
    %630 = vector.load %arg5[%c0_708, %c0_709] : memref<1x128xf32, #tpu.memory_space<vmem>>, vector<1x128xf32>
    %631 = vector.broadcast %630 : vector<1x128xf32> to vector<8x128xf32>
    %632 = arith.addf %629, %631 : vector<8x128xf32>
    %cst_710 = arith.constant 0.000000e+00 : f32
    %633 = vector.broadcast %cst_710 : f32 to vector<8x128xf32>
    %634 = arith.maximumf %632, %633 : vector<8x128xf32>
    %c0_711 = arith.constant 0 : index
    %c0_712 = arith.constant 0 : index
    %635 = vector.load %arg6[%c0_711, %c0_712] : memref<128x128xf32, #tpu.memory_space<vmem>>, vector<128x128xf32>
    %cst_713 = arith.constant dense<0.000000e+00> : vector<8x128xf32>
    %636 = tpu.matmul %634, %635, %cst_713 {dimension_numbers = #tpu.dot_dimension_numbers<[1], [0], [0], [1], [0, 0, 1, 1], [], []>} : vector<8x128xf32>, vector<128x128xf32>, vector<8x128xf32> -> vector<8x128xf32>
    %c0_714 = arith.constant 0 : index
    %c0_715 = arith.constant 0 : index
    %637 = vector.load %arg7[%c0_714, %c0_715] : memref<1x128xf32, #tpu.memory_space<vmem>>, vector<1x128xf32>
    %638 = vector.broadcast %637 : vector<1x128xf32> to vector<8x128xf32>
    %639 = arith.addf %636, %638 : vector<8x128xf32>
    %cst_716 = arith.constant 0.000000e+00 : f32
    %640 = vector.broadcast %cst_716 : f32 to vector<8x128xf32>
    %641 = arith.maximumf %639, %640 : vector<8x128xf32>
    %c0_717 = arith.constant 0 : index
    %c0_718 = arith.constant 0 : index
    %642 = vector.load %arg8[%c0_717, %c0_718] : memref<128x128xf32, #tpu.memory_space<vmem>>, vector<128x128xf32>
    %cst_719 = arith.constant dense<0.000000e+00> : vector<8x128xf32>
    %643 = tpu.matmul %641, %642, %cst_719 {dimension_numbers = #tpu.dot_dimension_numbers<[1], [0], [0], [1], [0, 0, 1, 1], [], []>} : vector<8x128xf32>, vector<128x128xf32>, vector<8x128xf32> -> vector<8x128xf32>
    %c0_720 = arith.constant 0 : index
    %c0_721 = arith.constant 0 : index
    %644 = vector.load %arg9[%c0_720, %c0_721] : memref<1x128xf32, #tpu.memory_space<vmem>>, vector<1x128xf32>
    %645 = vector.broadcast %644 : vector<1x128xf32> to vector<8x128xf32>
    %646 = arith.addf %643, %645 : vector<8x128xf32>
    %c0_722 = arith.constant 0 : index
    %c0_723 = arith.constant 0 : index
    %647 = vector.load %arg10[%c0_722, %c0_723] : memref<8x128xf32, #tpu.memory_space<vmem>>, vector<8x128xf32>
    tpu.vector_store %arg10[%c0_722, %c0_723], %646 {strides = array<i32>} : memref<8x128xf32, #tpu.memory_space<vmem>>, vector<8x128xf32>,
    return
  }
  func.func @transform_0(%arg0: i32) -> (i32, i32, i32, i32) {
    %c0_i32 = arith.constant 0 : i32
    %c0_i32_0 = arith.constant 0 : i32
    %c0_i32_1 = arith.constant 0 : i32
    %c0_i32_2 = arith.constant 0 : i32
    return %c0_i32, %c0_i32_0, %arg0, %c0_i32_1 : i32, i32, i32, i32
  }
  func.func @transform_1(%arg0: i32) -> (i32, i32) {
    %c0_i32 = arith.constant 0 : i32
    %c0_i32_0 = arith.constant 0 : i32
    %c0_i32_1 = arith.constant 0 : i32
    return %c0_i32, %c0_i32_0 : i32, i32
  }
  func.func @transform_2(%arg0: i32) -> (i32, i32) {
    %c0_i32 = arith.constant 0 : i32
    %c0_i32_0 = arith.constant 0 : i32
    %c0_i32_1 = arith.constant 0 : i32
    return %c0_i32, %c0_i32_0 : i32, i32
  }
  func.func @transform_3(%arg0: i32) -> (i32, i32, i32) {
    %c0_i32 = arith.constant 0 : i32
    %c0_i32_0 = arith.constant 0 : i32
    %c0_i32_1 = arith.constant 0 : i32
    %c0_i32_2 = arith.constant 0 : i32
    return %c0_i32, %c0_i32_0, %c0_i32_1 : i32, i32, i32
  }
  func.func @transform_4(%arg0: i32) -> (i32, i32) {
    %c0_i32 = arith.constant 0 : i32
    %c0_i32_0 = arith.constant 0 : i32
    %c0_i32_1 = arith.constant 0 : i32
    return %c0_i32, %c0_i32_0 : i32, i32
  }
  func.func @transform_5(%arg0: i32) -> (i32, i32) {
    %c0_i32 = arith.constant 0 : i32
    %c0_i32_0 = arith.constant 0 : i32
    %c0_i32_1 = arith.constant 0 : i32
    return %c0_i32, %c0_i32_0 : i32, i32
  }
  func.func @transform_6(%arg0: i32) -> (i32, i32) {
    %c0_i32 = arith.constant 0 : i32
    %c0_i32_0 = arith.constant 0 : i32
    %c0_i32_1 = arith.constant 0 : i32
    return %c0_i32, %c0_i32_0 : i32, i32
  }
  func.func @transform_7(%arg0: i32) -> (i32, i32) {
    %c0_i32 = arith.constant 0 : i32
    %c0_i32_0 = arith.constant 0 : i32
    %c0_i32_1 = arith.constant 0 : i32
    return %c0_i32, %c0_i32_0 : i32, i32
  }
  func.func @transform_8(%arg0: i32) -> (i32, i32) {
    %c0_i32 = arith.constant 0 : i32
    %c0_i32_0 = arith.constant 0 : i32
    %c0_i32_1 = arith.constant 0 : i32
    return %c0_i32, %c0_i32_0 : i32, i32
  }
  func.func @transform_9(%arg0: i32) -> (i32, i32) {
    %c0_i32 = arith.constant 0 : i32
    %c0_i32_0 = arith.constant 0 : i32
    return %arg0, %c0_i32 : i32, i32
  }
}

</mosaic_0001>

<bundles_post_ra>
// kernel: forward.2
= control target key start
LH: loop header
LB: loop body
LE: loop exit
PB: predicated region body
PF: predicated region fallthrough
CT: control target
= control target key end

     0   :  { %s2505_s21 = smov 0   ;;  %s3290_s0 = inlined_call_operand.vmem [shape: f32[400,75], index: 0, kind: input, shape index: {}]   ;;  %s3291_s1 = inlined_call_operand.vmem [shape: f32[400,75], index: 1, kind: input, shape index: {}]   ;;  %s3292_s2 = inlined_call_operand.vmem [shape: f32[400,75], index: 2, kind: input, shape index: {}]   ;;  %s3293_s3 = inlined_call_operand.vmem [shape: f32[400,75], index: 3, kind: input, shape index: {}]   ;;  %s3294_s4 = inlined_call_operand.vmem [shape: f32[75,128], index: 4, kind: input, shape index: {}]   ;;  %s3295_s5 = inlined_call_operand.vmem [shape: f32[1,128], index: 5, kind: input, shape index: {}]   ;;  %s3296_s6 = inlined_call_operand.vmem [shape: f32[400,128], index: 6, kind: output, shape index: {}]  }
   0x1 LB: > { %s1745_s22 = sadd.s32 4294967295, %s2464_s21   ;;  %p1749_p0 = scmp.ge.s32.totalorder %s2464_s21, 1  ;;  %s2464_s21 = sphi %s2505_s21, %s16_s21  }
   0x2   : > { %p246_p1 = scmp.lt.s32.totalorder %s2464_s21, 3 }
   0x4   : > { %p247_p2 = pnand %p1749_p0, %p246_p1 }
   0x6   : > { %250 = sbr.rel (%p247_p2) target bundleno = 452 (0x1c4), region = 44 }
   0xd   : > { %v321_v0 = vld [vmem:[%s3294_s4] sm:$0xff]  ;;  %v322_v1 = vld [vmem:[%s3294_s4 + $0x8] sm:$0xff]  ;;  %v323_v2 = vld [vmem:[%s3294_s4 + $0x10] sm:$0xff]  ;;  %v2466_v3 = vmov 0.0|0.0   ;;  %s291_s7 = smul.u32 25, %s1745_s22  ;;  %vm2467_vm0 = vmmov 0  }
   0xe   : > { %2382 = vmatprep.subr.bf16.mxu0 %v2466_v3  ;;  %v2383_v4 = vpack.c.bf16 %v322_v1, %v321_v0  ;;  %2398 = vmatprep.subr.bf16.mxu1 %v2466_v3  ;;  %v324_v5 = vld [vmem:[%s3294_s4 + $0x18] sm:$0xff]  ;;  %v2468_v6 = vmov 0.0   ;;  %v325_v8 = vld [vmem:[%s3294_s4 + $0x20] sm:$0xff]  ;;  %v326_v9 = vld [vmem:[%s3294_s4 + $0x28] sm:$0xff]  ;;  %vm432_vm1 = vcmask 1042432   ;;  %vm2469_vm2 = vmmov 1  }
   0xf   : > { %2022 = vmatprep.mubr.msk.f32.mxu0 %vm2467_vm0, %v2468_v6  ;;  %2117 = vmatprep.mubr.msk.f32.mxu1 %vm2467_vm0, %v2468_v6  ;;  %v2386_v7 = vpack.c.bf16 %v324_v5, %v323_v2  ;;  %p292_p3 = scmp.lt.s32.totalorder %s291_s7, 49  ;;  %v2389_v10 = vpack.c.bf16 %v326_v9, %v325_v8  ;;  %v327_v11 = vld [vmem:[%s3294_s4 + $0x30] sm:$0xff]  ;;  %v328_v12 = vld [vmem:[%s3294_s4 + $0x38] sm:$0xff]  ;;  %v329_v14 = vld [vmem:[%s3294_s4 + $0x40] sm:$0xff]  ;;  %vm356_vm4 = vcmask 613376  }
  0x10   : > { %2384 = vmatpush3.bf16.msra.mxu0 %v2383_v4  ;;  %2400 = vmatpush3.bf16.msra.mxu1 %v2383_v4  ;;  %v2392_v13 = vpack.c.bf16 %v328_v12, %v327_v11  ;;  %v330_v15 = vld [vmem:[%s3294_s4 + $0x48] sm:$0x7]  ;;  %vm2558_vm3 = vmpackc.low %vm432_vm1, %vm2469_vm2 }
  0x11   : > { %2385 = vmatprep.subr.bf16.mxu0 %v2466_v3  ;;  %2401 = vmatprep.subr.bf16.mxu1 %v2466_v3  ;;  %s3326_s7 = smov (!%p292_p3, %s291_s7), 49  ;;  %v2395_v16 = vpack.c.bf16 %v330_v15, %v329_v14 }
  0x12   : > { %s2555_s20 = sshll.u32 %s3326_s7, 3 }
  0x13   : > { %s2567_s24 = scalar_lea.vmem %s3290_s0, %s2555_s20  ;;  %s2573_s27 = scalar_lea.vmem %s3291_s1, %s2555_s20 }
  0x14   : > { %2387 = vmatpush3.bf16.msra.mxu0 %v2386_v7  ;;  %2403 = vmatpush3.bf16.msra.mxu1 %v2386_v7  ;;  %v331_v18 = vld [vmem:[%s2567_s24] sm:$0xff]  ;;  %v332_v20 = vld [vmem:[%s2567_s24 + $0x8] sm:$0xff]  ;;  %v333_v22 = vld [vmem:[%s2567_s24 + $0x10] sm:$0xff]  ;;  %s2791_s30 = scalar_lea.vmem %s3292_s2, %s2555_s20  ;;  %s2797_s9 = scalar_lea.vmem %s3293_s3, %s2555_s20 }
  0x15   : > { %2388 = vmatprep.subr.bf16.mxu0 %v2466_v3  ;;  %2404 = vmatprep.subr.bf16.mxu1 %v2466_v3  ;;  %v626_v19 = vld [vmem:[%s2573_s27] sm:$0xff]  ;;  %v627_v21 = vld [vmem:[%s2573_s27 + $0x8] sm:$0xff]  ;;  %v628_v23 = vld [vmem:[%s2573_s27 + $0x10] sm:$0xff]  ;;  %s3167_s14 = scalar_lea.vmem %s3296_s6, %s2555_s20 }
  0x16   : > { %v334_v24 = vld [vmem:[%s2567_s24 + $0x18] sm:$0xff]  ;;  %v335_v26 = vld [vmem:[%s2567_s24 + $0x20] sm:$0xff]  ;;  %v336_v28 = vld [vmem:[%s2567_s24 + $0x28] sm:$0xff] }
  0x17   : > { %v629_v25 = vld [vmem:[%s2573_s27 + $0x18] sm:$0xff]  ;;  %v630_v27 = vld [vmem:[%s2573_s27 + $0x20] sm:$0xff]  ;;  %v631_v29 = vld [vmem:[%s2573_s27 + $0x28] sm:$0xff] }
  0x18   : > { %2390 = vmatpush3.bf16.msra.mxu0 %v2389_v10  ;;  %2406 = vmatpush3.bf16.msra.mxu1 %v2389_v10  ;;  %v337_v30 = vld [vmem:[%s2567_s24 + $0x30] sm:$0xff]  ;;  %v338_v32 = vld [vmem:[%s2567_s24 + $0x38] sm:$0xff]  ;;  %v339_v34 = vld [vmem:[%s2567_s24 + $0x40] sm:$0xff] }
  0x19   : > { %2391 = vmatprep.subr.bf16.mxu0 %v2466_v3  ;;  %2407 = vmatprep.subr.bf16.mxu1 %v2466_v3  ;;  %v632_v31 = vld [vmem:[%s2573_s27 + $0x30] sm:$0xff]  ;;  %v633_v33 = vld [vmem:[%s2573_s27 + $0x38] sm:$0xff]  ;;  %v634_v35 = vld [vmem:[%s2573_s27 + $0x40] sm:$0xff] }
  0x1a   : > { %v340_v36 = vld [vmem:[%s2567_s24 + $0x48] sm:$0xff]  ;;  %v341_v38 = vld [vmem:[%s2567_s24 + $0x50] sm:$0xff]  ;;  %v342_v40 = vld [vmem:[%s2567_s24 + $0x58] sm:$0xff] }
  0x1b   : > { %v635_v37 = vld [vmem:[%s2573_s27 + $0x48] sm:$0xff]  ;;  %v636_v39 = vld [vmem:[%s2573_s27 + $0x50] sm:$0xff]  ;;  %v637_v41 = vld [vmem:[%s2573_s27 + $0x58] sm:$0xff] }
  0x1c   : > { %2393 = vmatpush3.bf16.msra.mxu0 %v2392_v13  ;;  %2409 = vmatpush3.bf16.msra.mxu1 %v2392_v13  ;;  %v343_v42 = vld [vmem:[%s2567_s24 + $0x60] sm:$0xff]  ;;  %v344_v44 = vld [vmem:[%s2567_s24 + $0x68] sm:$0xff]  ;;  %v345_v46 = vld [vmem:[%s2567_s24 + $0x70] sm:$0xff] }
  0x1d   : > { %2394 = vmatprep.subr.bf16.mxu0 %v2466_v3  ;;  %2410 = vmatprep.subr.bf16.mxu1 %v2466_v3  ;;  %v638_v43 = vld [vmem:[%s2573_s27 + $0x60] sm:$0xff]  ;;  %v639_v45 = vld [vmem:[%s2573_s27 + $0x68] sm:$0xff]  ;;  %v640_v47 = vld [vmem:[%s2573_s27 + $0x70] sm:$0xff] }
  0x1e   : > { %v346_v48 = vld [vmem:[%s2567_s24 + $0x78] sm:$0xff]  ;;  %v347_v50 = vld [vmem:[%s2567_s24 + $0x80] sm:$0xff]  ;;  %v348_v52 = vld [vmem:[%s2567_s24 + $0x88] sm:$0xff] }
  0x1f   : > { %v641_v49 = vld [vmem:[%s2573_s27 + $0x78] sm:$0xff]  ;;  %v642_v51 = vld [vmem:[%s2573_s27 + $0x80] sm:$0xff]  ;;  %v643_v53 = vld [vmem:[%s2573_s27 + $0x88] sm:$0xff] }
  0x20   : > { %2397 = vmatpush3.bf16.msk.msra.mxu0 %vm2558_vm3, %v2395_v16  ;;  %2413 = vmatpush3.bf16.msk.msra.mxu1 %vm2558_vm3, %v2395_v16  ;;  %v349_v54 = vld [vmem:[%s2567_s24 + $0x90] sm:$0xff]  ;;  %v350_v56 = vld [vmem:[%s2567_s24 + $0x98] sm:$0xff]  ;;  %v351_v58 = vld [vmem:[%s2567_s24 + $0xa0] sm:$0xff] }
  0x21   : > { %2414 = vmatprep.subr.bf16.mxu0 %v2466_v3  ;;  %2430 = vmatprep.subr.bf16.mxu1 %v2466_v3  ;;  %v644_v55 = vld [vmem:[%s2573_s27 + $0x90] sm:$0xff]  ;;  %v645_v57 = vld [vmem:[%s2573_s27 + $0x98] sm:$0xff]  ;;  %v646_v59 = vld [vmem:[%s2573_s27 + $0xa0] sm:$0xff] }
  0x22   : > { %v352_v60 = vld [vmem:[%s2567_s24 + $0xa8] sm:$0xff]  ;;  %v353_v62 = vld [vmem:[%s2567_s24 + $0xb0] sm:$0xff]  ;;  %v354_v0 = vld [vmem:[%s2567_s24 + $0xb8] sm:$0xff] }
  0x23   : > { %2023 = vmatmul.mubr.msk.f32.vlgmr.msra.gmra.mrb[0].mxu0 %vm356_vm4, %v331_v18  ;;  %2118 = vmatmul.mubr.msk.f32.vlgmr.msra.gmra.mrb[0].mxu1 %vm356_vm4, %v626_v19  ;;  %v647_v61 = vld [vmem:[%s2573_s27 + $0xa8] sm:$0xff]  ;;  %v648_v63 = vld [vmem:[%s2573_s27 + $0xb0] sm:$0xff]  ;;  %v649_v1 = vld [vmem:[%s2573_s27 + $0xb8] sm:$0xff] }
  0x24   : > { %2416 = vmatpush3.bf16.msra.mxu0 %v2383_v4  ;;  %2025 = vmatprep.mubr.msk.f32.mxu0 %vm2467_vm0, %v2468_v6  ;;  %v355_v2 = vld [vmem:[%s2567_s24 + $0xc0] sm:$0xff]  ;;  %v1257_v8 = vld [vmem:[%s2797_s9 + $0x8] sm:$0xff]  ;;  %v943_v9 = vld [vmem:[%s2791_s30 + $0x10] sm:$0xff] }
  0x25   : > { %2432 = vmatpush3.bf16.msra.mxu1 %v2383_v4  ;;  %2120 = vmatprep.mubr.msk.f32.mxu1 %vm2467_vm0, %v2468_v6  ;;  %v941_v4 = vld [vmem:[%s2791_s30] sm:$0xff]  ;;  %v944_v11 = vld [vmem:[%s2791_s30 + $0x18] sm:$0xff]  ;;  %v946_v15 = vld [vmem:[%s2791_s30 + $0x28] sm:$0xff] }
  0x26   : > { %2417 = vmatprep.subr.bf16.mxu0 %v2466_v3  ;;  %2433 = vmatprep.subr.bf16.mxu1 %v2466_v3  ;;  %v1256_v5 = vld [vmem:[%s2797_s9] sm:$0xff]  ;;  %v1259_v12 = vld [vmem:[%s2797_s9 + $0x18] sm:$0xff]  ;;  %v947_v17 = vld [vmem:[%s2791_s30 + $0x30] sm:$0xff] }
  0x27   : > { %2026 = vmatmul.mubr.msk.f32.gmra.mrb[2].mxu0 %vm356_vm4, %v332_v20  ;;  %2121 = vmatmul.mubr.msk.f32.gmra.mrb[2].mxu1 %vm356_vm4, %v627_v21  ;;  %v1260_v14 = vld [vmem:[%s2797_s9 + $0x20] sm:$0xff]  ;;  %v1262_v18 = vld [vmem:[%s2797_s9 + $0x30] sm:$0xff]  ;;  %v948_v19 = vld [vmem:[%s2791_s30 + $0x38] sm:$0xff] }
  0x28   : > { %2028 = vmatprep.mubr.msk.f32.mxu0 %vm2467_vm0, %v2468_v6  ;;  %2123 = vmatprep.mubr.msk.f32.mxu1 %vm2467_vm0, %v2468_v6  ;;  %v1263_v20 = vld [vmem:[%s2797_s9 + $0x38] sm:$0xff]  ;;  %v949_v21 = vld [vmem:[%s2791_s30 + $0x40] sm:$0xff] }
  0x29   : > { %2419 = vmatpush3.bf16.msra.mxu0 %v2386_v7  ;;  %2435 = vmatpush3.bf16.msra.mxu1 %v2386_v7  ;;  %v942_v7 = vld [vmem:[%s2791_s30 + $0x8] sm:$0xff] }
  0x2a   : > { %2420 = vmatprep.subr.bf16.mxu0 %v2466_v3  ;;  %2436 = vmatprep.subr.bf16.mxu1 %v2466_v3 }
  0x2b   : > { %2029 = vmatmul.mubr.msk.f32.gmra.mrb[4].mxu0 %vm356_vm4, %v333_v22  ;;  %2124 = vmatmul.mubr.msk.f32.gmra.mrb[4].mxu1 %vm356_vm4, %v628_v23  ;;  %v1264_v22 = vld [vmem:[%s2797_s9 + $0x40] sm:$0xff]  ;;  %v950_v23 = vld [vmem:[%s2791_s30 + $0x48] sm:$0xff] }
  0x2c   : > { %2031 = vmatprep.mubr.msk.f32.mxu0 %vm2467_vm0, %v2468_v6  ;;  %2126 = vmatprep.mubr.msk.f32.mxu1 %vm2467_vm0, %v2468_v6 }
  0x2d   : > { %2422 = vmatpush3.bf16.msra.mxu0 %v2389_v10  ;;  %2438 = vmatpush3.bf16.msra.mxu1 %v2389_v10  ;;  %v1258_v10 = vld [vmem:[%s2797_s9 + $0x10] sm:$0xff] }
  0x2e   : > { %2423 = vmatprep.subr.bf16.mxu0 %v2466_v3  ;;  %2439 = vmatprep.subr.bf16.mxu1 %v2466_v3 }
  0x2f   : > { %2032 = vmatmul.mubr.msk.f32.gmra.mrb[6].mxu0 %vm356_vm4, %v334_v24  ;;  %2127 = vmatmul.mubr.msk.f32.gmra.mrb[6].mxu1 %vm356_vm4, %v629_v25  ;;  %v1265_v24 = vld [vmem:[%s2797_s9 + $0x48] sm:$0xff]  ;;  %v951_v25 = vld [vmem:[%s2791_s30 + $0x50] sm:$0xff] }
  0x30   : > { %2034 = vmatprep.mubr.msk.f32.mxu0 %vm2467_vm0, %v2468_v6  ;;  %2129 = vmatprep.mubr.msk.f32.mxu1 %vm2467_vm0, %v2468_v6 }
  0x31   : > { %2425 = vmatpush3.bf16.msra.mxu0 %v2392_v13  ;;  %2441 = vmatpush3.bf16.msra.mxu1 %v2392_v13  ;;  %v945_v13 = vld [vmem:[%s2791_s30 + $0x20] sm:$0xff] }
  0x32   : > { %2426 = vmatprep.subr.bf16.mxu0 %v2466_v3  ;;  %2442 = vmatprep.subr.bf16.mxu1 %v2466_v3  ;;  %v650_v3 = vld [vmem:[%s2573_s27 + $0xc0] sm:$0xff] }
  0x33   : > { %2035 = vmatmul.mubr.msk.f32.gmra.mrb[8].mxu0 %vm356_vm4, %v335_v26  ;;  %2130 = vmatmul.mubr.msk.f32.gmra.mrb[8].mxu1 %vm356_vm4, %v630_v27  ;;  %v1266_v26 = vld [vmem:[%s2797_s9 + $0x50] sm:$0xff]  ;;  %v952_v27 = vld [vmem:[%s2791_s30 + $0x58] sm:$0xff] }
  0x34   : > { %2037 = vmatprep.mubr.msk.f32.mxu0 %vm2467_vm0, %v2468_v6  ;;  %2132 = vmatprep.mubr.msk.f32.mxu1 %vm2467_vm0, %v2468_v6 }
  0x35   : > { %2429 = vmatpush3.bf16.msk.msra.mxu0 %vm2558_vm3, %v2395_v16  ;;  %2445 = vmatpush3.bf16.msk.msra.mxu1 %vm2558_vm3, %v2395_v16  ;;  %v1261_v16 = vld [vmem:[%s2797_s9 + $0x28] sm:$0xff] }
  0x37   : > { %2038 = vmatmul.mubr.msk.f32.gmra.mrb[10].mxu0 %vm356_vm4, %v336_v28  ;;  %2133 = vmatmul.mubr.msk.f32.gmra.mrb[10].mxu1 %vm356_vm4, %v631_v29  ;;  %v1267_v28 = vld [vmem:[%s2797_s9 + $0x58] sm:$0xff]  ;;  %v953_v29 = vld [vmem:[%s2791_s30 + $0x60] sm:$0xff] }
  0x38   : > { %2040 = vmatprep.mubr.msk.f32.mxu0 %vm2467_vm0, %v2468_v6  ;;  %2135 = vmatprep.mubr.msk.f32.mxu1 %vm2467_vm0, %v2468_v6 }
  0x3b   : > { %2041 = vmatmul.mubr.msk.f32.gmra.mrb[12].mxu0 %vm356_vm4, %v337_v30  ;;  %2136 = vmatmul.mubr.msk.f32.gmra.mrb[12].mxu1 %vm356_vm4, %v632_v31  ;;  %v1268_v30 = vld [vmem:[%s2797_s9 + $0x60] sm:$0xff]  ;;  %v954_v31 = vld [vmem:[%s2791_s30 + $0x68] sm:$0xff] }
  0x3c   : > { %2043 = vmatprep.mubr.msk.f32.mxu0 %vm2467_vm0, %v2468_v6  ;;  %2138 = vmatprep.mubr.msk.f32.mxu1 %vm2467_vm0, %v2468_v6 }
  0x3f   : > { %2044 = vmatmul.mubr.msk.f32.gmra.mrb[14].mxu0 %vm356_vm4, %v338_v32  ;;  %2139 = vmatmul.mubr.msk.f32.gmra.mrb[14].mxu1 %vm356_vm4, %v633_v33  ;;  %v1269_v32 = vld [vmem:[%s2797_s9 + $0x68] sm:$0xff]  ;;  %v955_v33 = vld [vmem:[%s2791_s30 + $0x70] sm:$0xff] }
  0x40   : > { %2046 = vmatprep.mubr.msk.f32.mxu0 %vm2467_vm0, %v2468_v6  ;;  %2141 = vmatprep.mubr.msk.f32.mxu1 %vm2467_vm0, %v2468_v6 }
  0x43   : > { %2047 = vmatmul.mubr.msk.f32.gmra.mrb[16].mxu0 %vm356_vm4, %v339_v34  ;;  %2142 = vmatmul.mubr.msk.f32.gmra.mrb[16].mxu1 %vm356_vm4, %v634_v35  ;;  %v1270_v34 = vld [vmem:[%s2797_s9 + $0x70] sm:$0xff]  ;;  %v956_v35 = vld [vmem:[%s2791_s30 + $0x78] sm:$0xff] }
  0x44   : > { %2049 = vmatprep.mubr.msk.f32.mxu0 %vm2467_vm0, %v2468_v6  ;;  %2144 = vmatprep.mubr.msk.f32.mxu1 %vm2467_vm0, %v2468_v6 }
  0x47   : > { %2050 = vmatmul.mubr.msk.f32.gmra.mrb[18].mxu0 %vm356_vm4, %v340_v36  ;;  %2145 = vmatmul.mubr.msk.f32.gmra.mrb[18].mxu1 %vm356_vm4, %v635_v37  ;;  %v1271_v36 = vld [vmem:[%s2797_s9 + $0x78] sm:$0xff]  ;;  %v957_v37 = vld [vmem:[%s2791_s30 + $0x80] sm:$0xff] }
  0x48   : > { %2052 = vmatprep.mubr.msk.f32.mxu0 %vm2467_vm0, %v2468_v6  ;;  %2147 = vmatprep.mubr.msk.f32.mxu1 %vm2467_vm0, %v2468_v6 }
  0x4b   : > { %2053 = vmatmul.mubr.msk.f32.gmra.mrb[20].mxu0 %vm356_vm4, %v341_v38  ;;  %2148 = vmatmul.mubr.msk.f32.gmra.mrb[20].mxu1 %vm356_vm4, %v636_v39  ;;  %v1272_v38 = vld [vmem:[%s2797_s9 + $0x80] sm:$0xff]  ;;  %v958_v39 = vld [vmem:[%s2791_s30 + $0x88] sm:$0xff] }
  0x4c   : > { %2055 = vmatprep.mubr.msk.f32.mxu0 %vm2467_vm0, %v2468_v6  ;;  %2150 = vmatprep.mubr.msk.f32.mxu1 %vm2467_vm0, %v2468_v6 }
  0x4f   : > { %2056 = vmatmul.mubr.msk.f32.gmra.mrb[22].mxu0 %vm356_vm4, %v342_v40  ;;  %2151 = vmatmul.mubr.msk.f32.gmra.mrb[22].mxu1 %vm356_vm4, %v637_v41  ;;  %v1273_v40 = vld [vmem:[%s2797_s9 + $0x88] sm:$0xff]  ;;  %v959_v41 = vld [vmem:[%s2791_s30 + $0x90] sm:$0xff] }
  0x50   : > { %2058 = vmatprep.mubr.msk.f32.mxu0 %vm2467_vm0, %v2468_v6  ;;  %2153 = vmatprep.mubr.msk.f32.mxu1 %vm2467_vm0, %v2468_v6 }
  0x53   : > { %2059 = vmatmul.mubr.msk.f32.gmra.mrb[24].mxu0 %vm356_vm4, %v343_v42  ;;  %2154 = vmatmul.mubr.msk.f32.gmra.mrb[24].mxu1 %vm356_vm4, %v638_v43  ;;  %v1274_v42 = vld [vmem:[%s2797_s9 + $0x90] sm:$0xff]  ;;  %v960_v43 = vld [vmem:[%s2791_s30 + $0x98] sm:$0xff] }
  0x54   : > { %2061 = vmatprep.mubr.msk.f32.mxu0 %vm2467_vm0, %v2468_v6  ;;  %2156 = vmatprep.mubr.msk.f32.mxu1 %vm2467_vm0, %v2468_v6 }
  0x57   : > { %2062 = vmatmul.mubr.msk.f32.gmra.mrb[26].mxu0 %vm356_vm4, %v344_v44  ;;  %2157 = vmatmul.mubr.msk.f32.gmra.mrb[26].mxu1 %vm356_vm4, %v639_v45  ;;  %v1275_v44 = vld [vmem:[%s2797_s9 + $0x98] sm:$0xff]  ;;  %v961_v45 = vld [vmem:[%s2791_s30 + $0xa0] sm:$0xff] }
  0x58   : > { %2064 = vmatprep.mubr.msk.f32.mxu0 %vm2467_vm0, %v2468_v6  ;;  %2159 = vmatprep.mubr.msk.f32.mxu1 %vm2467_vm0, %v2468_v6 }
  0x5b   : > { %2065 = vmatmul.mubr.msk.f32.gmra.mrb[28].mxu0 %vm356_vm4, %v345_v46  ;;  %2160 = vmatmul.mubr.msk.f32.gmra.mrb[28].mxu1 %vm356_vm4, %v640_v47  ;;  %v1276_v46 = vld [vmem:[%s2797_s9 + $0xa0] sm:$0xff]  ;;  %v962_v47 = vld [vmem:[%s2791_s30 + $0xa8] sm:$0xff] }
  0x5c   : > { %2067 = vmatprep.mubr.msk.f32.mxu0 %vm2467_vm0, %v2468_v6  ;;  %2162 = vmatprep.mubr.msk.f32.mxu1 %vm2467_vm0, %v2468_v6 }
  0x5f   : > { %2068 = vmatmul.mubr.msk.f32.gmra.mrb[30].mxu0 %vm356_vm4, %v346_v48  ;;  %2163 = vmatmul.mubr.msk.f32.gmra.mrb[30].mxu1 %vm356_vm4, %v641_v49  ;;  %v1277_v48 = vld [vmem:[%s2797_s9 + $0xa8] sm:$0xff]  ;;  %v963_v49 = vld [vmem:[%s2791_s30 + $0xb0] sm:$0xff] }
  0x60   : > { %2070 = vmatprep.mubr.msk.f32.mxu0 %vm2467_vm0, %v2468_v6  ;;  %2165 = vmatprep.mubr.msk.f32.mxu1 %vm2467_vm0, %v2468_v6 }
  0x63   : > { %2071 = vmatmul.mubr.msk.f32.gmra.mrb[32].mxu0 %vm356_vm4, %v347_v50  ;;  %2166 = vmatmul.mubr.msk.f32.gmra.mrb[32].mxu1 %vm356_vm4, %v642_v51  ;;  %v1278_v50 = vld [vmem:[%s2797_s9 + $0xb0] sm:$0xff]  ;;  %v964_v51 = vld [vmem:[%s2791_s30 + $0xb8] sm:$0xff] }
  0x64   : > { %2073 = vmatprep.mubr.msk.f32.mxu0 %vm2467_vm0, %v2468_v6  ;;  %2168 = vmatprep.mubr.msk.f32.mxu1 %vm2467_vm0, %v2468_v6 }
  0x67   : > { %2074 = vmatmul.mubr.msk.f32.gmra.mrb[34].mxu0 %vm356_vm4, %v348_v52  ;;  %2169 = vmatmul.mubr.msk.f32.gmra.mrb[34].mxu1 %vm356_vm4, %v643_v53  ;;  %v1279_v52 = vld [vmem:[%s2797_s9 + $0xb8] sm:$0xff]  ;;  %v965_v53 = vld [vmem:[%s2791_s30 + $0xc0] sm:$0xff] }
  0x68   : > { %2076 = vmatprep.mubr.msk.f32.mxu0 %vm2467_vm0, %v2468_v6  ;;  %2171 = vmatprep.mubr.msk.f32.mxu1 %vm2467_vm0, %v2468_v6 }
  0x6b   : > { %2077 = vmatmul.mubr.msk.f32.gmra.mrb[36].mxu0 %vm356_vm4, %v349_v54  ;;  %2172 = vmatmul.mubr.msk.f32.gmra.mrb[36].mxu1 %vm356_vm4, %v644_v55  ;;  %v1280_v54 = vld [vmem:[%s2797_s9 + $0xc0] sm:$0xff] }
  0x6c   : > { %2079 = vmatprep.mubr.msk.f32.mxu0 %vm2467_vm0, %v2468_v6  ;;  %2174 = vmatprep.mubr.msk.f32.mxu1 %vm2467_vm0, %v2468_v6 }
  0x6f   : > { %2080 = vmatmul.mubr.msk.f32.gmra.mrb[38].mxu0 %vm356_vm4, %v350_v56  ;;  %2175 = vmatmul.mubr.msk.f32.gmra.mrb[38].mxu1 %vm356_vm4, %v645_v57 }
  0x70   : > { %2082 = vmatprep.mubr.msk.f32.mxu0 %vm2467_vm0, %v2468_v6  ;;  %2177 = vmatprep.mubr.msk.f32.mxu1 %vm2467_vm0, %v2468_v6 }
  0x73   : > { %2083 = vmatmul.mubr.msk.f32.gmra.mrb[40].mxu0 %vm356_vm4, %v351_v58  ;;  %2178 = vmatmul.mubr.msk.f32.gmra.mrb[40].mxu1 %vm356_vm4, %v646_v59 }
  0x74   : > { %2085 = vmatprep.mubr.msk.f32.mxu0 %vm2467_vm0, %v2468_v6  ;;  %2180 = vmatprep.mubr.msk.f32.mxu1 %vm2467_vm0, %v2468_v6 }
  0x77   : > { %2086 = vmatmul.mubr.msk.f32.gmra.mrb[42].mxu0 %vm356_vm4, %v352_v60  ;;  %2181 = vmatmul.mubr.msk.f32.gmra.mrb[42].mxu1 %vm356_vm4, %v647_v61 }
  0x78   : > { %2088 = vmatprep.mubr.msk.f32.mxu0 %vm2467_vm0, %v2468_v6  ;;  %2183 = vmatprep.mubr.msk.f32.mxu1 %vm2467_vm0, %v2468_v6 }
  0x7b   : > { %2089 = vmatmul.mubr.msk.f32.gmra.mrb[44].mxu0 %vm356_vm4, %v353_v62  ;;  %2184 = vmatmul.mubr.msk.f32.gmra.mrb[44].mxu1 %vm356_vm4, %v648_v63 }
  0x7c   : > { %2091 = vmatprep.mubr.msk.f32.mxu0 %vm2467_vm0, %v2468_v6  ;;  %2186 = vmatprep.mubr.msk.f32.mxu1 %vm2467_vm0, %v2468_v6 }
  0x7f   : > { %2092 = vmatmul.mubr.msk.f32.gmra.mrb[46].mxu0 %vm356_vm4, %v354_v0  ;;  %2187 = vmatmul.mubr.msk.f32.gmra.mrb[46].mxu1 %vm356_vm4, %v649_v1 }
  0x80   : > { %2094 = vmatprep.mubr.msk.f32.mxu0 %vm2467_vm0, %v2468_v6  ;;  %2189 = vmatprep.mubr.msk.f32.mxu1 %vm2467_vm0, %v2468_v6 }
  0x83   : > { %2095 = vmatmul.mubr.msk.f32.gmra.mrb[48].mxu0 %vm356_vm4, %v355_v2  ;;  %2190 = vmatmul.mubr.msk.f32.gmra.mrb[48].mxu1 %vm356_vm4, %v650_v3 }
  0x84   : > { %2212 = vmatprep.mubr.msk.f32.mxu0 %vm2467_vm0, %v2468_v6  ;;  %2307 = vmatprep.mubr.msk.f32.mxu1 %vm2467_vm0, %v2468_v6 }
  0x87   : > { %2213 = vmatmul.mubr.msk.f32.vlgmr.msra.gmra.mrb[50].mxu0 %vm356_vm4, %v941_v4  ;;  %2308 = vmatmul.mubr.msk.f32.vlgmr.msra.gmra.mrb[50].mxu1 %vm356_vm4, %v1256_v5 }
  0x88   : > { %2215 = vmatprep.mubr.msk.f32.mxu0 %vm2467_vm0, %v2468_v6  ;;  %2310 = vmatprep.mubr.msk.f32.mxu1 %vm2467_vm0, %v2468_v6 }
  0x8b   : > { %2216 = vmatmul.mubr.msk.f32.gmra.mrb[52].mxu0 %vm356_vm4, %v942_v7  ;;  %2311 = vmatmul.mubr.msk.f32.gmra.mrb[52].mxu1 %vm356_vm4, %v1257_v8 }
  0x8c   : > { %2218 = vmatprep.mubr.msk.f32.mxu0 %vm2467_vm0, %v2468_v6  ;;  %2313 = vmatprep.mubr.msk.f32.mxu1 %vm2467_vm0, %v2468_v6 }
  0x8f   : > { %2219 = vmatmul.mubr.msk.f32.gmra.mrb[54].mxu0 %vm356_vm4, %v943_v9  ;;  %2314 = vmatmul.mubr.msk.f32.gmra.mrb[54].mxu1 %vm356_vm4, %v1258_v10 }
  0x90   : > { %2221 = vmatprep.mubr.msk.f32.mxu0 %vm2467_vm0, %v2468_v6  ;;  %2316 = vmatprep.mubr.msk.f32.mxu1 %vm2467_vm0, %v2468_v6 }
  0x93   : > { %2222 = vmatmul.mubr.msk.f32.gmra.mrb[56].mxu0 %vm356_vm4, %v944_v11  ;;  %2317 = vmatmul.mubr.msk.f32.gmra.mrb[56].mxu1 %vm356_vm4, %v1259_v12 }
  0x94   : > { %2224 = vmatprep.mubr.msk.f32.mxu0 %vm2467_vm0, %v2468_v6  ;;  %2319 = vmatprep.mubr.msk.f32.mxu1 %vm2467_vm0, %v2468_v6 }
  0x97   : > { %2225 = vmatmul.mubr.msk.f32.gmra.mrb[58].mxu0 %vm356_vm4, %v945_v13  ;;  %2320 = vmatmul.mubr.msk.f32.gmra.mrb[58].mxu1 %vm356_vm4, %v1260_v14 }
  0x98   : > { %2227 = vmatprep.mubr.msk.f32.mxu0 %vm2467_vm0, %v2468_v6  ;;  %2322 = vmatprep.mubr.msk.f32.mxu1 %vm2467_vm0, %v2468_v6 }
  0x9b   : > { %2228 = vmatmul.mubr.msk.f32.gmra.mrb[60].mxu0 %vm356_vm4, %v946_v15  ;;  %2323 = vmatmul.mubr.msk.f32.gmra.mrb[60].mxu1 %vm356_vm4, %v1261_v16 }
  0x9c   : > { %2230 = vmatprep.mubr.msk.f32.mxu0 %vm2467_vm0, %v2468_v6  ;;  %2325 = vmatprep.mubr.msk.f32.mxu1 %vm2467_vm0, %v2468_v6 }
  0x9f   : > { %2231 = vmatmul.mubr.msk.f32.gmra.mrb[62].mxu0 %vm356_vm4, %v947_v17  ;;  %2326 = vmatmul.mubr.msk.f32.gmra.mrb[62].mxu1 %vm356_vm4, %v1262_v18 }
  0xa0   : > { %2233 = vmatprep.mubr.msk.f32.mxu0 %vm2467_vm0, %v2468_v6  ;;  %2328 = vmatprep.mubr.msk.f32.mxu1 %vm2467_vm0, %v2468_v6 }
  0xa3   : > { %2234 = vmatmul.mubr.msk.f32.gmra.mrb[64].mxu0 %vm356_vm4, %v948_v19  ;;  %2329 = vmatmul.mubr.msk.f32.gmra.mrb[64].mxu1 %vm356_vm4, %v1263_v20 }
  0xa4   : > { %2236 = vmatprep.mubr.msk.f32.mxu0 %vm2467_vm0, %v2468_v6  ;;  %2331 = vmatprep.mubr.msk.f32.mxu1 %vm2467_vm0, %v2468_v6 }
  0xa7   : > { %2237 = vmatmul.mubr.msk.f32.gmra.mrb[66].mxu0 %vm356_vm4, %v949_v21  ;;  %2332 = vmatmul.mubr.msk.f32.gmra.mrb[66].mxu1 %vm356_vm4, %v1264_v22 }
  0xa8   : > { %2239 = vmatprep.mubr.msk.f32.mxu0 %vm2467_vm0, %v2468_v6  ;;  %2334 = vmatprep.mubr.msk.f32.mxu1 %vm2467_vm0, %v2468_v6 }
  0xab   : > { %2240 = vmatmul.mubr.msk.f32.gmra.mrb[68].mxu0 %vm356_vm4, %v950_v23  ;;  %2335 = vmatmul.mubr.msk.f32.gmra.mrb[68].mxu1 %vm356_vm4, %v1265_v24 }
  0xac   : > { %2242 = vmatprep.mubr.msk.f32.mxu0 %vm2467_vm0, %v2468_v6  ;;  %2337 = vmatprep.mubr.msk.f32.mxu1 %vm2467_vm0, %v2468_v6 }
  0xaf   : > { %2243 = vmatmul.mubr.msk.f32.gmra.mrb[70].mxu0 %vm356_vm4, %v951_v25  ;;  %2338 = vmatmul.mubr.msk.f32.gmra.mrb[70].mxu1 %vm356_vm4, %v1266_v26 }
  0xb0   : > { %2245 = vmatprep.mubr.msk.f32.mxu0 %vm2467_vm0, %v2468_v6  ;;  %2340 = vmatprep.mubr.msk.f32.mxu1 %vm2467_vm0, %v2468_v6 }
  0xb3   : > { %2246 = vmatmul.mubr.msk.f32.gmra.mrb[72].mxu0 %vm356_vm4, %v952_v27  ;;  %2341 = vmatmul.mubr.msk.f32.gmra.mrb[72].mxu1 %vm356_vm4, %v1267_v28 }
  0xb4   : > { %2248 = vmatprep.mubr.msk.f32.mxu0 %vm2467_vm0, %v2468_v6  ;;  %2343 = vmatprep.mubr.msk.f32.mxu1 %vm2467_vm0, %v2468_v6 }
  0xb7   : > { %2249 = vmatmul.mubr.msk.f32.gmra.mrb[74].mxu0 %vm356_vm4, %v953_v29  ;;  %2344 = vmatmul.mubr.msk.f32.gmra.mrb[74].mxu1 %vm356_vm4, %v1268_v30 }
  0xb8   : > { %2251 = vmatprep.mubr.msk.f32.mxu0 %vm2467_vm0, %v2468_v6  ;;  %2346 = vmatprep.mubr.msk.f32.mxu1 %vm2467_vm0, %v2468_v6 }
  0xbb   : > { %2252 = vmatmul.mubr.msk.f32.gmra.mrb[76].mxu0 %vm356_vm4, %v954_v31  ;;  %2347 = vmatmul.mubr.msk.f32.gmra.mrb[76].mxu1 %vm356_vm4, %v1269_v32 }
  0xbc   : > { %2254 = vmatprep.mubr.msk.f32.mxu0 %vm2467_vm0, %v2468_v6  ;;  %2349 = vmatprep.mubr.msk.f32.mxu1 %vm2467_vm0, %v2468_v6 }
  0xbf   : > { %2255 = vmatmul.mubr.msk.f32.gmra.mrb[78].mxu0 %vm356_vm4, %v955_v33  ;;  %2350 = vmatmul.mubr.msk.f32.gmra.mrb[78].mxu1 %vm356_vm4, %v1270_v34 }
  0xc0   : > { %2257 = vmatprep.mubr.msk.f32.mxu0 %vm2467_vm0, %v2468_v6  ;;  %2352 = vmatprep.mubr.msk.f32.mxu1 %vm2467_vm0, %v2468_v6 }
  0xc3   : > { %2258 = vmatmul.mubr.msk.f32.gmra.mrb[80].mxu0 %vm356_vm4, %v956_v35  ;;  %2353 = vmatmul.mubr.msk.f32.gmra.mrb[80].mxu1 %vm356_vm4, %v1271_v36 }
  0xc4   : > { %2260 = vmatprep.mubr.msk.f32.mxu0 %vm2467_vm0, %v2468_v6  ;;  %2355 = vmatprep.mubr.msk.f32.mxu1 %vm2467_vm0, %v2468_v6 }
  0xc7   : > { %2261 = vmatmul.mubr.msk.f32.gmra.mrb[82].mxu0 %vm356_vm4, %v957_v37  ;;  %2356 = vmatmul.mubr.msk.f32.gmra.mrb[82].mxu1 %vm356_vm4, %v1272_v38 }
  0xc8   : > { %2263 = vmatprep.mubr.msk.f32.mxu0 %vm2467_vm0, %v2468_v6  ;;  %2358 = vmatprep.mubr.msk.f32.mxu1 %vm2467_vm0, %v2468_v6 }
  0xcb   : > { %2264 = vmatmul.mubr.msk.f32.gmra.mrb[84].mxu0 %vm356_vm4, %v958_v39  ;;  %2359 = vmatmul.mubr.msk.f32.gmra.mrb[84].mxu1 %vm356_vm4, %v1273_v40 }
  0xcc   : > { %2266 = vmatprep.mubr.msk.f32.mxu0 %vm2467_vm0, %v2468_v6  ;;  %2361 = vmatprep.mubr.msk.f32.mxu1 %vm2467_vm0, %v2468_v6 }
  0xcf   : > { %2267 = vmatmul.mubr.msk.f32.gmra.mrb[86].mxu0 %vm356_vm4, %v959_v41  ;;  %2362 = vmatmul.mubr.msk.f32.gmra.mrb[86].mxu1 %vm356_vm4, %v1274_v42 }
  0xd0   : > { %2269 = vmatprep.mubr.msk.f32.mxu0 %vm2467_vm0, %v2468_v6  ;;  %2364 = vmatprep.mubr.msk.f32.mxu1 %vm2467_vm0, %v2468_v6 }
  0xd3   : > { %2270 = vmatmul.mubr.msk.f32.gmra.mrb[88].mxu0 %vm356_vm4, %v960_v43  ;;  %2365 = vmatmul.mubr.msk.f32.gmra.mrb[88].mxu1 %vm356_vm4, %v1275_v44 }
  0xd4   : > { %2272 = vmatprep.mubr.msk.f32.mxu0 %vm2467_vm0, %v2468_v6  ;;  %2367 = vmatprep.mubr.msk.f32.mxu1 %vm2467_vm0, %v2468_v6 }
  0xd7   : > { %2273 = vmatmul.mubr.msk.f32.gmra.mrb[90].mxu0 %vm356_vm4, %v961_v45  ;;  %2368 = vmatmul.mubr.msk.f32.gmra.mrb[90].mxu1 %vm356_vm4, %v1276_v46 }
  0xd8   : > { %2275 = vmatprep.mubr.msk.f32.mxu0 %vm2467_vm0, %v2468_v6  ;;  %2370 = vmatprep.mubr.msk.f32.mxu1 %vm2467_vm0, %v2468_v6 }
  0xdb   : > { %2276 = vmatmul.mubr.msk.f32.gmra.mrb[92].mxu0 %vm356_vm4, %v962_v47  ;;  %2371 = vmatmul.mubr.msk.f32.gmra.mrb[92].mxu1 %vm356_vm4, %v1277_v48 }
  0xdc   : > { %2278 = vmatprep.mubr.msk.f32.mxu0 %vm2467_vm0, %v2468_v6  ;;  %2373 = vmatprep.mubr.msk.f32.mxu1 %vm2467_vm0, %v2468_v6 }
  0xdf   : > { %2279 = vmatmul.mubr.msk.f32.gmra.mrb[94].mxu0 %vm356_vm4, %v963_v49  ;;  %2374 = vmatmul.mubr.msk.f32.gmra.mrb[94].mxu1 %vm356_vm4, %v1278_v50 }
  0xe0   : > { %2281 = vmatprep.mubr.msk.f32.mxu0 %vm2467_vm0, %v2468_v6  ;;  %2376 = vmatprep.mubr.msk.f32.mxu1 %vm2467_vm0, %v2468_v6 }
  0xe3   : > { %2282 = vmatmul.mubr.msk.f32.gmra.mrb[96].mxu0 %vm356_vm4, %v964_v51  ;;  %2377 = vmatmul.mubr.msk.f32.gmra.mrb[96].mxu1 %vm356_vm4, %v1279_v52 }
  0xe4   : > { %2284 = vmatprep.mubr.msk.f32.mxu0 %vm2467_vm0, %v2468_v6  ;;  %2379 = vmatprep.mubr.msk.f32.mxu1 %vm2467_vm0, %v2468_v6 }
  0xe7   : > { %2285 = vmatmul.mubr.msk.f32.gmra.mrb[98].mxu0 %vm356_vm4, %v965_v53  ;;  %2380 = vmatmul.mubr.msk.f32.gmra.mrb[98].mxu1 %vm356_vm4, %v1280_v54 }
  0xf6   : > { %v3001_v55 = vpop.f32.mrb[0].mxu0  ;;  %v3003_v56 = vpop.f32.mrb[0].mxu1 }
  0xf7   : > { %v2024_v57 = vpop.f32.mrb[1].mxu0  ;;  %v916_v58 = vmax.f32 %v3001_v55, %v3003_v56  ;;  %v2119_v59 = vpop.f32.mrb[1].mxu1 }
  0xfa   : > { %v3007_v60 = vpop.f32.mrb[2].mxu0  ;;  %v3009_v61 = vpop.f32.mrb[2].mxu1 }
  0xfb   : > { %v2027_v62 = vpop.f32.mrb[3].mxu0  ;;  %v917_v6 = vmax.f32 %v3007_v60, %v3009_v61  ;;  %v2122_v63 = vpop.f32.mrb[3].mxu1 }
  0xfe   : > { %v3013_v0 = vpop.f32.mrb[4].mxu0  ;;  %v3015_v1 = vpop.f32.mrb[4].mxu1 }
  0xff   : > { %v2030_v2 = vpop.f32.mrb[5].mxu0  ;;  %v2125_v4 = vpop.f32.mrb[5].mxu1  ;;  %v3301_v60 = vmax.f32 %v3013_v0, %v3015_v1 }
 0x102   : > { %v3019_v5 = vpop.f32.mrb[6].mxu0  ;;  %v3021_v7 = vpop.f32.mrb[6].mxu1 }
 0x103   : > { %v2033_v8 = vpop.f32.mrb[7].mxu0  ;;  %v2128_v10 = vpop.f32.mrb[7].mxu1 }
 0x106   : > { %v3025_v11 = vpop.f32.mrb[8].mxu0  ;;  %v3027_v12 = vpop.f32.mrb[8].mxu1 }
 0x107   : > { %v2036_v13 = vpop.f32.mrb[9].mxu0  ;;  %v2131_v15 = vpop.f32.mrb[9].mxu1 }
 0x10a   : > { %v3031_v16 = vpop.f32.mrb[10].mxu0  ;;  %v3033_v17 = vpop.f32.mrb[10].mxu1 }
 0x10b   : > { %v2039_v18 = vpop.f32.mrb[11].mxu0  ;;  %v2134_v20 = vpop.f32.mrb[11].mxu1 }
 0x10e   : > { %v3037_v21 = vpop.f32.mrb[12].mxu0  ;;  %v3039_v22 = vpop.f32.mrb[12].mxu1 }
 0x10f   : > { %v2042_v23 = vpop.f32.mrb[13].mxu0  ;;  %v2137_v25 = vpop.f32.mrb[13].mxu1 }
 0x112   : > { %v3043_v26 = vpop.f32.mrb[14].mxu0  ;;  %v3045_v27 = vpop.f32.mrb[14].mxu1 }
 0x113   : > { %v2045_v28 = vpop.f32.mrb[15].mxu0  ;;  %v2140_v30 = vpop.f32.mrb[15].mxu1 }
 0x116   : > { %v3049_v31 = vpop.f32.mrb[16].mxu0  ;;  %v3051_v32 = vpop.f32.mrb[16].mxu1 }
 0x117   : > { %v2048_v33 = vpop.f32.mrb[17].mxu0  ;;  %v2143_v35 = vpop.f32.mrb[17].mxu1 }
 0x11a   : > { %v3055_v36 = vpop.f32.mrb[18].mxu0  ;;  %v3057_v37 = vpop.f32.mrb[18].mxu1 }
 0x11b   : > { %v2051_v38 = vpop.f32.mrb[19].mxu0  ;;  %v2146_v40 = vpop.f32.mrb[19].mxu1 }
 0x11e   : > { %v3061_v41 = vpop.f32.mrb[20].mxu0  ;;  %v3063_v42 = vpop.f32.mrb[20].mxu1 }
 0x11f   : > { %v2054_v43 = vpop.f32.mrb[21].mxu0  ;;  %v2149_v45 = vpop.f32.mrb[21].mxu1 }
 0x122   : > { %v3067_v46 = vpop.f32.mrb[22].mxu0  ;;  %v3069_v47 = vpop.f32.mrb[22].mxu1 }
 0x123   : > { %v2057_v48 = vpop.f32.mrb[23].mxu0  ;;  %v2152_v50 = vpop.f32.mrb[23].mxu1 }
 0x126   : > { %v3073_v51 = vpop.f32.mrb[24].mxu0  ;;  %v3075_v52 = vpop.f32.mrb[24].mxu1 }
 0x127   : > { %v2060_v53 = vpop.f32.mrb[25].mxu0  ;;  %v2155_v57 = vpop.f32.mrb[25].mxu1 }
 0x12a   : > { %v3079_v59 = vpop.f32.mrb[26].mxu0  ;;  %v3081_v62 = vpop.f32.mrb[26].mxu1 }
 0x12b   : > { %v2063_v63 = vpop.f32.mrb[27].mxu0  ;;  %v2158_v4 = vpop.f32.mrb[27].mxu1 }
 0x12e   : > { %v3085_v8 = vpop.f32.mrb[28].mxu0  ;;  %v3087_v10 = vpop.f32.mrb[28].mxu1 }
 0x12f   : > { %v2066_v13 = vpop.f32.mrb[29].mxu0  ;;  %v2161_v18 = vpop.f32.mrb[29].mxu1 }
 0x132   : > { %v3091_v20 = vpop.f32.mrb[30].mxu0  ;;  %v3093_v23 = vpop.f32.mrb[30].mxu1 }
 0x133   : > { %v2069_v25 = vpop.f32.mrb[31].mxu0  ;;  %v2164_v30 = vpop.f32.mrb[31].mxu1 }
 0x136   : > { %v3097_v33 = vpop.f32.mrb[32].mxu0  ;;  %v3099_v35 = vpop.f32.mrb[32].mxu1 }
 0x137   : > { %v2072_v38 = vpop.f32.mrb[33].mxu0  ;;  %v2167_v43 = vpop.f32.mrb[33].mxu1 }
 0x13a   : > { %v3103_v45 = vpop.f32.mrb[34].mxu0  ;;  %v3105_v48 = vpop.f32.mrb[34].mxu1 }
 0x13b   : > { %v2075_v50 = vpop.f32.mrb[35].mxu0  ;;  %v2170_v57 = vpop.f32.mrb[35].mxu1 }
 0x13e   : > { %v3109_v63 = vpop.f32.mrb[36].mxu0  ;;  %v3111_v4 = vpop.f32.mrb[36].mxu1 }
 0x13f   : > { %v2078_v13 = vpop.f32.mrb[37].mxu0  ;;  %v2173_v25 = vpop.f32.mrb[37].mxu1 }
 0x142   : > { %v3115_v30 = vpop.f32.mrb[38].mxu0  ;;  %v3117_v38 = vpop.f32.mrb[38].mxu1 }
 0x143   : > { %v2081_v43 = vpop.f32.mrb[39].mxu0  ;;  %v2176_v40 = vpop.f32.mrb[39].mxu1 }
 0x146   : > { %v3121_v53 = vpop.f32.mrb[40].mxu0  ;;  %v3123_v57 = vpop.f32.mrb[40].mxu1 }
 0x147   : > { %v2084_v28 = vpop.f32.mrb[41].mxu0  ;;  %v2179_v15 = vpop.f32.mrb[41].mxu1 }
 0x14a   : > { %v3127_v18 = vpop.f32.mrb[42].mxu0  ;;  %v3129_v25 = vpop.f32.mrb[42].mxu1 }
 0x14b   : > { %v2087_v2 = vpop.f32.mrb[43].mxu0  ;;  %v2182_v54 = vpop.f32.mrb[43].mxu1 }
 0x14e   : > { %v3133_v50 = vpop.f32.mrb[44].mxu0  ;;  %v3135_v40 = vpop.f32.mrb[44].mxu1 }
 0x14f   : > { %v2090_v49 = vpop.f32.mrb[45].mxu0  ;;  %v2185_v44 = vpop.f32.mrb[45].mxu1 }
 0x152   : > { %v3139_v13 = vpop.f32.mrb[46].mxu0  ;;  %v3141_v15 = vpop.f32.mrb[46].mxu1 }
 0x153   : > { %v2093_v39 = vpop.f32.mrb[47].mxu0  ;;  %v2188_v34 = vpop.f32.mrb[47].mxu1 }
 0x154   : > { %v3157_v34 = vld [vmem:[%s3295_s5] ss:$0 sm:$0xff] }
 0x156   : > { %v3145_v43 = vpop.f32.mrb[48].mxu0  ;;  %v3147_v54 = vpop.f32.mrb[48].mxu1 }
 0x157   : > { %3300 = vst [vmem:[#allocation2_spill] sm:$0xff] %v3147_v54  ;;  %v2096_v29 = vpop.f32.mrb[49].mxu0  ;;  %v2191_v28 = vpop.f32.mrb[49].mxu1 }
 0x15a   : > { %v1107_v44 = vpop.f32.mrb[50].mxu0  ;;  %v1422_v24 = vpop.f32.mrb[50].mxu1 }
 0x15b   : > { %v1231_v39 = vmax.f32 %v916_v58, %v1107_v44  ;;  %v2214_v19 = vpop.f32.mrb[51].mxu0  ;;  %v2309_v14 = vpop.f32.mrb[51].mxu1 }
 0x15d   : > { %v1546_v2 = vmax.f32 %v1231_v39, %v1422_v24 }
 0x15e   : > { %v1112_v29 = vpop.f32.mrb[52].mxu0  ;;  %v1427_v9 = vpop.f32.mrb[52].mxu1 }
 0x15f   : > { %v1578_v3 = vadd.f32 %v3157_v34, %v1546_v2  ;;  %v1232_v28 = vmax.f32 %v917_v6, %v1112_v29  ;;  %v2217_v49 = vpop.f32.mrb[53].mxu0  ;;  %v2312_v54 = vpop.f32.mrb[53].mxu1 }
 0x161   : > { %v1603_v55 = vmax.f32 %v1578_v3, 0.0  ;;  %v1547_v56 = vmax.f32 %v1232_v28, %v1427_v9  ;;  %v3302_v9 = vmax.f32 %v3019_v5, %v3021_v7 }
 0x162   : > { %v1117_v58 = vpop.f32.mrb[54].mxu0  ;;  %v1432_v14 = vpop.f32.mrb[54].mxu1 }
 0x163   : > { %1628 = vst [vmem:[%s3167_s14] sm:$0xff] %v1603_v55  ;;  %v1579_v19 = vadd.f32 %v3157_v34, %v1547_v56  ;;  %v1233_v61 = vmax.f32 %v3301_v60, %v1117_v58  ;;  %v2220_v6 = vpop.f32.mrb[55].mxu0  ;;  %v2315_v24 = vpop.f32.mrb[55].mxu1 }
 0x165   : > { %v1604_v2 = vmax.f32 %v1579_v19, 0.0  ;;  %v1548_v54 = vmax.f32 %v1233_v61, %v1432_v14  ;;  %v3303_v14 = vmax.f32 %v3025_v11, %v3027_v12 }
 0x166   : > { %v1122_v49 = vpop.f32.mrb[56].mxu0  ;;  %v1437_v44 = vpop.f32.mrb[56].mxu1 }
 0x167   : > { %1629 = vst [vmem:[%s3167_s14 + $0x8] sm:$0xff] %v1604_v2  ;;  %v1580_v3 = vadd.f32 %v3157_v34, %v1548_v54  ;;  %v1234_v39 = vmax.f32 %v3302_v9, %v1122_v49  ;;  %v2223_v29 = vpop.f32.mrb[57].mxu0  ;;  %v2318_v28 = vpop.f32.mrb[57].mxu1  ;;  %v3304_v54 = vmax.f32 %v3031_v16, %v3033_v17 }
 0x168   : > { %v3305_v28 = vmax.f32 %v3037_v21, %v3039_v22 }
 0x169   : > { %v1605_v55 = vmax.f32 %v1580_v3, 0.0  ;;  %v1549_v0 = vmax.f32 %v1234_v39, %v1437_v44 }
 0x16a   : > { %v1127_v1 = vpop.f32.mrb[58].mxu0  ;;  %v1442_v56 = vpop.f32.mrb[58].mxu1 }
 0x16b   : > { %1630 = vst [vmem:[%s3167_s14 + $0x10] sm:$0xff] %v1605_v55  ;;  %v1581_v58 = vadd.f32 %v3157_v34, %v1549_v0  ;;  %v1235_v19 = vmax.f32 %v3303_v14, %v1127_v1  ;;  %v2226_v60 = vpop.f32.mrb[59].mxu0  ;;  %v2321_v61 = vpop.f32.mrb[59].mxu1 }
 0x16d   : > { %v1606_v6 = vmax.f32 %v1581_v58, 0.0  ;;  %v1550_v5 = vmax.f32 %v1235_v19, %v1442_v56  ;;  %v3306_v19 = vmax.f32 %v3043_v26, %v3045_v27 }
 0x16e   : > { %v1132_v7 = vpop.f32.mrb[60].mxu0  ;;  %v1447_v24 = vpop.f32.mrb[60].mxu1 }
 0x16f   : > { %1631 = vst [vmem:[%s3167_s14 + $0x18] sm:$0xff] %v1606_v6  ;;  %v1582_v2 = vadd.f32 %v3157_v34, %v1550_v5  ;;  %v1236_v49 = vmax.f32 %v3304_v54, %v1132_v7  ;;  %v2229_v44 = vpop.f32.mrb[61].mxu0  ;;  %v2324_v3 = vpop.f32.mrb[61].mxu1 }
 0x171   : > { %v1607_v9 = vmax.f32 %v1582_v2, 0.0  ;;  %v1551_v11 = vmax.f32 %v1236_v49, %v1447_v24  ;;  %v3307_v2 = vmax.f32 %v3049_v31, %v3051_v32 }
 0x172   : > { %v1137_v12 = vpop.f32.mrb[62].mxu0  ;;  %v1452_v39 = vpop.f32.mrb[62].mxu1 }
 0x173   : > { %1632 = vst [vmem:[%s3167_s14 + $0x20] sm:$0xff] %v1607_v9  ;;  %v1583_v29 = vadd.f32 %v3157_v34, %v1551_v11  ;;  %v1237_v55 = vmax.f32 %v3305_v28, %v1137_v12  ;;  %v2232_v0 = vpop.f32.mrb[63].mxu0  ;;  %v2327_v1 = vpop.f32.mrb[63].mxu1  ;;  %v3308_v12 = vmax.f32 %v3055_v36, %v3057_v37 }
 0x175   : > { %v1608_v56 = vmax.f32 %v1583_v29, 0.0  ;;  %v1552_v16 = vmax.f32 %v1237_v55, %v1452_v39 }
 0x176   : > { %v1142_v17 = vpop.f32.mrb[64].mxu0  ;;  %v1457_v58 = vpop.f32.mrb[64].mxu1 }
 0x177   : > { %1633 = vst [vmem:[%s3167_s14 + $0x28] sm:$0xff] %v1608_v56  ;;  %v1584_v14 = vadd.f32 %v3157_v34, %v1552_v16  ;;  %v1238_v60 = vmax.f32 %v3306_v19, %v1142_v17  ;;  %v2235_v61 = vpop.f32.mrb[65].mxu0  ;;  %v2330_v6 = vpop.f32.mrb[65].mxu1  ;;  %v3309_v56 = vmax.f32 %v3061_v41, %v3063_v42 }
 0x178   : > { %v3310_v61 = vmax.f32 %v3067_v46, %v3069_v47 }
 0x179   : > { %v1609_v5 = vmax.f32 %v1584_v14, 0.0  ;;  %v1553_v21 = vmax.f32 %v1238_v60, %v1457_v58 }
 0x17a   : > { %v1147_v22 = vpop.f32.mrb[66].mxu0  ;;  %v1462_v7 = vpop.f32.mrb[66].mxu1 }
 0x17b   : > { %1634 = vst [vmem:[%s3167_s14 + $0x30] sm:$0xff] %v1609_v5  ;;  %v1585_v24 = vadd.f32 %v3157_v34, %v1553_v21  ;;  %v1239_v54 = vmax.f32 %v3307_v2, %v1147_v22  ;;  %v2238_v49 = vpop.f32.mrb[67].mxu0  ;;  %v2333_v44 = vpop.f32.mrb[67].mxu1  ;;  %v3311_v2 = vmax.f32 %v3073_v51, %v3075_v52 }
 0x17d   : > { %v1610_v3 = vmax.f32 %v1585_v24, 0.0  ;;  %v1554_v26 = vmax.f32 %v1239_v54, %v1462_v7 }
 0x17e   : > { %v1152_v27 = vpop.f32.mrb[68].mxu0  ;;  %v1467_v9 = vpop.f32.mrb[68].mxu1 }
 0x17f   : > { %1635 = vst [vmem:[%s3167_s14 + $0x38] sm:$0xff] %v1610_v3  ;;  %v1586_v11 = vadd.f32 %v3157_v34, %v1554_v26  ;;  %v1240_v39 = vmax.f32 %v3308_v12, %v1152_v27  ;;  %v2241_v29 = vpop.f32.mrb[69].mxu0  ;;  %v2336_v28 = vpop.f32.mrb[69].mxu1 }
 0x181   : > { %v1611_v55 = vmax.f32 %v1586_v11, 0.0  ;;  %v1555_v31 = vmax.f32 %v1240_v39, %v1467_v9  ;;  %v3312_v9 = vmax.f32 %v3079_v59, %v3081_v62 }
 0x182   : > { %v1157_v32 = vpop.f32.mrb[70].mxu0  ;;  %v1472_v0 = vpop.f32.mrb[70].mxu1 }
 0x183   : > { %1636 = vst [vmem:[%s3167_s14 + $0x40] sm:$0xff] %v1611_v55  ;;  %v1587_v1 = vadd.f32 %v3157_v34, %v1555_v31  ;;  %v1241_v16 = vmax.f32 %v3309_v56, %v1157_v32  ;;  %v2244_v17 = vpop.f32.mrb[71].mxu0  ;;  %v2339_v58 = vpop.f32.mrb[71].mxu1  ;;  %v3313_v31 = vmax.f32 %v3085_v8, %v3087_v10 }
 0x184   : > { %v3314_v58 = vmax.f32 %v3091_v20, %v3093_v23 }
 0x185   : > { %v1612_v14 = vmax.f32 %v1587_v1, 0.0  ;;  %v1556_v36 = vmax.f32 %v1241_v16, %v1472_v0 }
 0x186   : > { %v1162_v37 = vpop.f32.mrb[72].mxu0  ;;  %v1477_v19 = vpop.f32.mrb[72].mxu1 }
 0x187   : > { %1637 = vst [vmem:[%s3167_s14 + $0x48] sm:$0xff] %v1612_v14  ;;  %v1588_v60 = vadd.f32 %v3157_v34, %v1556_v36  ;;  %v1242_v6 = vmax.f32 %v3310_v61, %v1162_v37  ;;  %v2247_v5 = vpop.f32.mrb[73].mxu0  ;;  %v2342_v21 = vpop.f32.mrb[73].mxu1 }
 0x189   : > { %v1613_v22 = vmax.f32 %v1588_v60, 0.0  ;;  %v1557_v41 = vmax.f32 %v1242_v6, %v1477_v19  ;;  %v3315_v6 = vmax.f32 %v3097_v33, %v3099_v35 }
 0x18a   : > { %v1167_v42 = vpop.f32.mrb[74].mxu0  ;;  %v1482_v7 = vpop.f32.mrb[74].mxu1 }
 0x18b   : > { %1638 = vst [vmem:[%s3167_s14 + $0x50] sm:$0xff] %v1613_v22  ;;  %v1589_v24 = vadd.f32 %v3157_v34, %v1557_v41  ;;  %v1243_v54 = vmax.f32 %v3311_v2, %v1167_v42  ;;  %v2250_v49 = vpop.f32.mrb[75].mxu0  ;;  %v2345_v44 = vpop.f32.mrb[75].mxu1 }
 0x18d   : > { %v1614_v3 = vmax.f32 %v1589_v24, 0.0  ;;  %v1558_v46 = vmax.f32 %v1243_v54, %v1482_v7  ;;  %v3316_v24 = vmax.f32 %v3103_v45, %v3105_v48 }
 0x18e   : > { %v1172_v47 = vpop.f32.mrb[76].mxu0  ;;  %v1487_v26 = vpop.f32.mrb[76].mxu1 }
 0x18f   : > { %1639 = vst [vmem:[%s3167_s14 + $0x58] sm:$0xff] %v1614_v3  ;;  %v1590_v27 = vadd.f32 %v3157_v34, %v1558_v46  ;;  %v1244_v11 = vmax.f32 %v3312_v9, %v1172_v47  ;;  %v2253_v12 = vpop.f32.mrb[77].mxu0  ;;  %v2348_v39 = vpop.f32.mrb[77].mxu1  ;;  %v3317_v47 = vmax.f32 %v3109_v63, %v3111_v4 }
 0x191   : > { %v1615_v29 = vmax.f32 %v1590_v27, 0.0  ;;  %v1559_v51 = vmax.f32 %v1244_v11, %v1487_v26 }
 0x192   : > { %v1177_v52 = vpop.f32.mrb[78].mxu0  ;;  %v1492_v28 = vpop.f32.mrb[78].mxu1 }
 0x193   : > { %1640 = vst [vmem:[%s3167_s14 + $0x60] sm:$0xff] %v1615_v29  ;;  %v1591_v55 = vadd.f32 %v3157_v34, %v1559_v51  ;;  %v1245_v32 = vmax.f32 %v3313_v31, %v1177_v52  ;;  %v2256_v0 = vpop.f32.mrb[79].mxu0  ;;  %v2351_v1 = vpop.f32.mrb[79].mxu1  ;;  %v3318_v29 = vmax.f32 %v3115_v30, %v3117_v38 }
 0x194   : > { %v3319_v0 = vmax.f32 %v3121_v53, %v3123_v57 }
 0x195   : > { %v1616_v56 = vmax.f32 %v1591_v55, 0.0  ;;  %v1560_v59 = vmax.f32 %v1245_v32, %v1492_v28 }
 0x196   : > { %v1182_v62 = vpop.f32.mrb[80].mxu0  ;;  %v1497_v16 = vpop.f32.mrb[80].mxu1 }
 0x197   : > { %1641 = vst [vmem:[%s3167_s14 + $0x68] sm:$0xff] %v1616_v56  ;;  %v1592_v17 = vadd.f32 %v3157_v34, %v1560_v59  ;;  %v1246_v14 = vmax.f32 %v3314_v58, %v1182_v62  ;;  %v2259_v36 = vpop.f32.mrb[81].mxu0  ;;  %v2354_v37 = vpop.f32.mrb[81].mxu1  ;;  %v3320_v58 = vmax.f32 %v3127_v18, %v3129_v25 }
 0x199   : > { %v1617_v19 = vmax.f32 %v1592_v17, 0.0  ;;  %v1561_v8 = vmax.f32 %v1246_v14, %v1497_v16 }
 0x19a   : > { %v1187_v10 = vpop.f32.mrb[82].mxu0  ;;  %v1502_v60 = vpop.f32.mrb[82].mxu1 }
 0x19b   : > { %1642 = vst [vmem:[%s3167_s14 + $0x70] sm:$0xff] %v1617_v19  ;;  %v1593_v61 = vadd.f32 %v3157_v34, %v1561_v8  ;;  %v1247_v5 = vmax.f32 %v3315_v6, %v1187_v10  ;;  %v2262_v21 = vpop.f32.mrb[83].mxu0  ;;  %v2357_v22 = vpop.f32.mrb[83].mxu1 }
 0x19d   : > { %v1618_v41 = vmax.f32 %v1593_v61, 0.0  ;;  %v1562_v20 = vmax.f32 %v1247_v5, %v1502_v60  ;;  %v3321_v60 = vmax.f32 %v3133_v50, %v3135_v40 }
 0x19e   : > { %v1192_v23 = vpop.f32.mrb[84].mxu0  ;;  %v1507_v42 = vpop.f32.mrb[84].mxu1 }
 0x19f   : > { %1643 = vst [vmem:[%s3167_s14 + $0x78] sm:$0xff] %v1618_v41  ;;  %v1594_v7 = vadd.f32 %v3157_v34, %v1562_v20  ;;  %v1248_v2 = vmax.f32 %v3316_v24, %v1192_v23  ;;  %v2265_v54 = vpop.f32.mrb[85].mxu0  ;;  %v2360_v49 = vpop.f32.mrb[85].mxu1  ;;  %v3322_v20 = vmax.f32 %v3139_v13, %v3141_v15 }
 0x1a0   : > { %v3323_v49 = vld [vmem:[#allocation2_spill] sm:$0xff] }
 0x1a1   : > { %v1619_v44 = vmax.f32 %v1594_v7, 0.0  ;;  %v1563_v33 = vmax.f32 %v1248_v2, %v1507_v42 }
 0x1a2   : > { %v1197_v35 = vpop.f32.mrb[86].mxu0  ;;  %v1512_v3 = vpop.f32.mrb[86].mxu1 }
 0x1a3   : > { %1644 = vst [vmem:[%s3167_s14 + $0x80] sm:$0xff] %v1619_v44  ;;  %v1595_v46 = vadd.f32 %v3157_v34, %v1563_v33  ;;  %v1249_v26 = vmax.f32 %v3317_v47, %v1197_v35  ;;  %v2268_v27 = vpop.f32.mrb[87].mxu0  ;;  %v2363_v9 = vpop.f32.mrb[87].mxu1  ;;  %v3324_v44 = vmax.f32 %v3145_v43, %v3323_v49 }
 0x1a5   : > { %v1620_v11 = vmax.f32 %v1595_v46, 0.0  ;;  %v1564_v45 = vmax.f32 %v1249_v26, %v1512_v3 }
 0x1a6   : > { %v1202_v48 = vpop.f32.mrb[88].mxu0  ;;  %v1517_v12 = vpop.f32.mrb[88].mxu1 }
 0x1a7   : > { %1645 = vst [vmem:[%s3167_s14 + $0x88] sm:$0xff] %v1620_v11  ;;  %v1596_v39 = vadd.f32 %v3157_v34, %v1564_v45  ;;  %v1250_v51 = vmax.f32 %v3318_v29, %v1202_v48  ;;  %v2271_v52 = vpop.f32.mrb[89].mxu0  ;;  %v2366_v28 = vpop.f32.mrb[89].mxu1 }
 0x1a9   : > { %v1621_v55 = vmax.f32 %v1596_v39, 0.0  ;;  %v1565_v63 = vmax.f32 %v1250_v51, %v1517_v12 }
 0x1aa   : > { %v1207_v4 = vpop.f32.mrb[90].mxu0  ;;  %v1522_v31 = vpop.f32.mrb[90].mxu1 }
 0x1ab   : > { %1646 = vst [vmem:[%s3167_s14 + $0x90] sm:$0xff] %v1621_v55  ;;  %v1597_v32 = vadd.f32 %v3157_v34, %v1565_v63  ;;  %v1251_v1 = vmax.f32 %v3319_v0, %v1207_v4  ;;  %v2274_v56 = vpop.f32.mrb[91].mxu0  ;;  %v2369_v59 = vpop.f32.mrb[91].mxu1 }
 0x1ad   : > { %v1622_v62 = vmax.f32 %v1597_v32, 0.0  ;;  %v1566_v30 = vmax.f32 %v1251_v1, %v1522_v31 }
 0x1ae   : > { %v1212_v38 = vpop.f32.mrb[92].mxu0  ;;  %v1527_v16 = vpop.f32.mrb[92].mxu1 }
 0x1af   : > { %1647 = vst [vmem:[%s3167_s14 + $0x98] sm:$0xff] %v1622_v62  ;;  %v1598_v17 = vadd.f32 %v3157_v34, %v1566_v30  ;;  %v1252_v14 = vmax.f32 %v3320_v58, %v1212_v38  ;;  %v2277_v36 = vpop.f32.mrb[93].mxu0  ;;  %v2372_v37 = vpop.f32.mrb[93].mxu1 }
 0x1b1   : > { %v1623_v19 = vmax.f32 %v1598_v17, 0.0  ;;  %v1567_v53 = vmax.f32 %v1252_v14, %v1527_v16 }
 0x1b2   : > { %v1217_v57 = vpop.f32.mrb[94].mxu0  ;;  %v1532_v8 = vpop.f32.mrb[94].mxu1 }
 0x1b3   : > { %1648 = vst [vmem:[%s3167_s14 + $0xa0] sm:$0xff] %v1623_v19  ;;  %v1599_v10 = vadd.f32 %v3157_v34, %v1567_v53  ;;  %v1253_v61 = vmax.f32 %v3321_v60, %v1217_v57  ;;  %v2280_v6 = vpop.f32.mrb[95].mxu0  ;;  %v2375_v5 = vpop.f32.mrb[95].mxu1 }
 0x1b5   : > { %v1624_v21 = vmax.f32 %v1599_v10, 0.0  ;;  %v1568_v18 = vmax.f32 %v1253_v61, %v1532_v8 }
 0x1b6   : > { %v1222_v25 = vpop.f32.mrb[96].mxu0  ;;  %v1537_v22 = vpop.f32.mrb[96].mxu1 }
 0x1b7   : > { %1649 = vst [vmem:[%s3167_s14 + $0xa8] sm:$0xff] %v1624_v21  ;;  %v1600_v41 = vadd.f32 %v3157_v34, %v1568_v18  ;;  %v1254_v23 = vmax.f32 %v3322_v20, %v1222_v25  ;;  %v2283_v42 = vpop.f32.mrb[97].mxu0  ;;  %v2378_v7 = vpop.f32.mrb[97].mxu1 }
 0x1b9   : > { %v1625_v50 = vmax.f32 %v1600_v41, 0.0  ;;  %v1569_v40 = vmax.f32 %v1254_v23, %v1537_v22 }
 0x1ba   : > { %v1227_v24 = vpop.f32.mrb[98].mxu0  ;;  %v1542_v2 = vpop.f32.mrb[98].mxu1 }
 0x1bb   : > { %1650 = vst [vmem:[%s3167_s14 + $0xb0] sm:$0xff] %v1625_v50  ;;  %v1601_v54 = vadd.f32 %v3157_v34, %v1569_v40  ;;  %v1255_v33 = vmax.f32 %v3324_v44, %v1227_v24  ;;  %v2286_v35 = vpop.f32.mrb[99].mxu0  ;;  %v2381_v3 = vpop.f32.mrb[99].mxu1 }
 0x1bd   : > { %v1626_v46 = vmax.f32 %v1601_v54, 0.0  ;;  %v1570_v47 = vmax.f32 %v1255_v33, %v1542_v2 }
 0x1bf   : > { %1651 = vst [vmem:[%s3167_s14 + $0xb8] sm:$0xff] %v1626_v46  ;;  %v1602_v13 = vadd.f32 %v3157_v34, %v1570_v47 }
 0x1c1   : > { %v1627_v15 = vmax.f32 %v1602_v13, 0.0 }
 0x1c3   : > { %1652 = vst [vmem:[%s3167_s14 + $0xc0] sm:$0xff] %v1627_v15 }
 0x1c4 PF: > { %s16_s21 = sadd.s32 1, %s2464_s21  }
 0x1c5   : > { %p13_p4 = scmp.ge.s32.totalorder %s16_s21, 4  }
 0x1c7   :  { %15 = sbr.rel (!%p13_p4) target bundleno = 1 (0x1), region = 83 }

// kernel: forward.3
= control target key start
LH: loop header
LB: loop body
LE: loop exit
PB: predicated region body
PF: predicated region fallthrough
CT: control target
= control target key end

     0   :  { %v15793_v0 = vmov 0.0|0.0   ;;  %vm55_vm0 = vcmask 179200   ;;  %v15794_v30 = vmov 0.0   ;;  %vm59_vm1 = vcmask 1045504   ;;  %s20603_s1 = inlined_call_operand.vmem [shape: f32[150,128], index: 1, kind: input, shape index: {}]   ;;  %s20604_s0 = inlined_call_operand.vmem [shape: f32[4,25,8,150], index: 0, kind: input, shape index: {}]   ;;  %s20605_s3 = inlined_call_operand.vmem [shape: f32[25,128,128], index: 3, kind: input, shape index: {}]   ;;  %s20606_s2 = inlined_call_operand.vmem [shape: f32[1,128], index: 2, kind: input, shape index: {}]   ;;  %s20607_s5 = inlined_call_operand.vmem [shape: f32[128,128], index: 5, kind: input, shape index: {}]   ;;  %s20608_s7 = inlined_call_operand.vmem [shape: f32[128,128], index: 7, kind: input, shape index: {}]   ;;  %s20609_s4 = inlined_call_operand.vmem [shape: f32[1,128], index: 4, kind: input, shape index: {}]   ;;  %s20610_s6 = inlined_call_operand.vmem [shape: f32[1,128], index: 6, kind: input, shape index: {}]   ;;  %s20611_s8 = inlined_call_operand.vmem [shape: f32[1,128], index: 8, kind: input, shape index: {}]   ;;  %s20612_s9 = inlined_call_operand.vmem [shape: f32[8,128], index: 9, kind: output, shape index: {}]  }
   0x1   :  { %12429 = vmatprep.subr.bf16.mxu0 %v15793_v0  ;;  %v32_v1 = vld [vmem:[%s20603_s1] sm:$0xff]  ;;  %v33_v2 = vld [vmem:[%s20603_s1 + $0x8] sm:$0xff]  ;;  %12456 = vmatprep.subr.bf16.mxu1 %v15793_v0  ;;  %v34_v3 = vld [vmem:[%s20603_s1 + $0x10] sm:$0xff]  ;;  %vm15795_vm2 = vmmov 0  }
   0x2   :  { %v15857_v4 = vpack.c.bf16 %v33_v2, %v32_v1  ;;  %v35_v5 = vld [vmem:[%s20603_s1 + $0x18] sm:$0xff]  ;;  %v36_v7 = vld [vmem:[%s20603_s1 + $0x20] sm:$0xff]  ;;  %v37_v8 = vld [vmem:[%s20603_s1 + $0x28] sm:$0xff] }
   0x3   :  { %v15864_v6 = vpack.c.bf16 %v35_v5, %v34_v3  ;;  %v54_v9 = vld [vmem:[%s20604_s0 + $0x8] sm:$0xff]  ;;  %v15879_v10 = vpack.c.bf16 %v37_v8, %v36_v7  ;;  %v10242_v11 = vld [vmem:[%s20604_s0 + $0x198] sm:$0xff]  ;;  %v38_v12 = vld [vmem:[%s20603_s1 + $0x30] sm:$0xff] }
   0x4   :  { %12431 = vmatpush1.bf16.msra.mxu0 %v15857_v4  ;;  %12458 = vmatpush1.bf16.msra.mxu1 %v15857_v4  ;;  %v39_v13 = vld [vmem:[%s20603_s1 + $0x38] sm:$0xff]  ;;  %v40_v15 = vld [vmem:[%s20603_s1 + $0x40] sm:$0xff]  ;;  %v41_v16 = vld [vmem:[%s20603_s1 + $0x48] sm:$0xff] }
   0x5   :  { %12432 = vmatprep.subr.bf16.mxu0 %v15793_v0  ;;  %12459 = vmatprep.subr.bf16.mxu1 %v15793_v0  ;;  %v15896_v14 = vpack.c.bf16 %v39_v13, %v38_v12  ;;  %v15908_v17 = vpack.c.bf16 %v41_v16, %v40_v15  ;;  %v42_v18 = vld [vmem:[%s20603_s1 + $0x50] sm:$0xff]  ;;  %v43_v19 = vld [vmem:[%s20603_s1 + $0x58] sm:$0xff]  ;;  %v44_v21 = vld [vmem:[%s20603_s1 + $0x60] sm:$0xff] }
   0x6   :  { %10240 = vmatprep.mubr.msk.f32.mxu0 %vm55_vm0, %v54_v9  ;;  %10244 = vmatprep.mubr.msk.f32.mxu1 %vm55_vm0, %v10242_v11  ;;  %v15920_v20 = vpack.c.bf16 %v43_v19, %v42_v18  ;;  %v45_v22 = vld [vmem:[%s20603_s1 + $0x68] sm:$0xff]  ;;  %v46_v24 = vld [vmem:[%s20603_s1 + $0x70] sm:$0xff]  ;;  %v47_v25 = vld [vmem:[%s20603_s1 + $0x78] sm:$0xff] }
   0x7   :  { %v15932_v23 = vpack.c.bf16 %v45_v22, %v44_v21  ;;  %v15944_v26 = vpack.c.bf16 %v47_v25, %v46_v24  ;;  %v48_v27 = vld [vmem:[%s20603_s1 + $0x80] sm:$0xff]  ;;  %v49_v28 = vld [vmem:[%s20603_s1 + $0x88] sm:$0xff]  ;;  %v15966_v31 = vld [vmem:[%s20603_s1 + $0x90] sm:$0x3f] }
   0x8   :  { %12434 = vmatpush1.bf16.msra.mxu0 %v15864_v6  ;;  %12461 = vmatpush1.bf16.msra.mxu1 %v15864_v6  ;;  %v15956_v29 = vpack.c.bf16 %v49_v28, %v48_v27  ;;  %v53_v32 = vld [vmem:[%s20604_s0] sm:$0xff]  ;;  %v10241_v33 = vld [vmem:[%s20604_s0 + $0x190] sm:$0xff]  ;;  %v10246_v34 = vld [vmem:[%s20604_s0 + $0x328] sm:$0xff] }
   0x9   :  { %12435 = vmatprep.subr.bf16.mxu0 %v15793_v0  ;;  %12462 = vmatprep.subr.bf16.mxu1 %v15793_v0  ;;  %v10250_v35 = vld [vmem:[%s20604_s0 + $0x4b8] sm:$0xff]  ;;  %v10245_v36 = vld [vmem:[%s20604_s0 + $0x320] sm:$0xff]  ;;  %v10249_v37 = vld [vmem:[%s20604_s0 + $0x4b0] sm:$0xff] }
   0xa   :  { %v373_v38 = vld [vmem:[%s20605_s3] sm:$0xff]  ;;  %v374_v39 = vld [vmem:[%s20605_s3 + $0x8] sm:$0xff]  ;;  %v375_v40 = vld [vmem:[%s20605_s3 + $0x10] sm:$0xff] }
   0xb   :  { %v12538_v41 = vpack.c.bf16 %v374_v39, %v373_v38  ;;  %v376_v42 = vld [vmem:[%s20605_s3 + $0x18] sm:$0xff]  ;;  %v377_v44 = vld [vmem:[%s20605_s3 + $0x20] sm:$0xff]  ;;  %v378_v45 = vld [vmem:[%s20605_s3 + $0x28] sm:$0xff] }
   0xc   :  { %12437 = vmatpush1.bf16.msra.mxu0 %v15879_v10  ;;  %12464 = vmatpush1.bf16.msra.mxu1 %v15879_v10  ;;  %v12541_v43 = vpack.c.bf16 %v376_v42, %v375_v40  ;;  %v12544_v46 = vpack.c.bf16 %v378_v45, %v377_v44  ;;  %v379_v47 = vld [vmem:[%s20605_s3 + $0x30] sm:$0xff]  ;;  %v380_v48 = vld [vmem:[%s20605_s3 + $0x38] sm:$0xff]  ;;  %v381_v50 = vld [vmem:[%s20605_s3 + $0x40] sm:$0xff] }
   0xd   :  { %12438 = vmatprep.subr.bf16.mxu0 %v15793_v0  ;;  %12465 = vmatprep.subr.bf16.mxu1 %v15793_v0  ;;  %v12547_v49 = vpack.c.bf16 %v380_v48, %v379_v47  ;;  %v382_v51 = vld [vmem:[%s20605_s3 + $0x48] sm:$0xff]  ;;  %v383_v53 = vld [vmem:[%s20605_s3 + $0x50] sm:$0xff]  ;;  %v384_v54 = vld [vmem:[%s20605_s3 + $0x58] sm:$0xff] }
   0xe   :  { %v12550_v52 = vpack.c.bf16 %v382_v51, %v381_v50  ;;  %v12553_v55 = vpack.c.bf16 %v384_v54, %v383_v53  ;;  %v385_v56 = vld [vmem:[%s20605_s3 + $0x60] sm:$0xff]  ;;  %v386_v57 = vld [vmem:[%s20605_s3 + $0x68] sm:$0xff]  ;;  %v387_v59 = vld [vmem:[%s20605_s3 + $0x70] sm:$0xff] }
   0xf   :  { %v12556_v58 = vpack.c.bf16 %v386_v57, %v385_v56  ;;  %v388_v60 = vld [vmem:[%s20605_s3 + $0x78] sm:$0xff]  ;;  %v10254_v63 = vld [vmem:[%s20604_s0 + $0x10] sm:$0xff]  ;;  %v16156_v15 = vld [vmem:[%s20606_s2] ss:$0 sm:$0xff] }
  0x10   :  { %12440 = vmatpush1.bf16.msra.mxu0 %v15896_v14  ;;  %12467 = vmatpush1.bf16.msra.mxu1 %v15896_v14  ;;  %v12559_v61 = vpack.c.bf16 %v388_v60, %v387_v59  ;;  %v10255_v62 = vld [vmem:[%s20604_s0 + $0x18] sm:$0xff]  ;;  %v10262_v2 = vld [vmem:[%s20604_s0 + $0x330] sm:$0xff]  ;;  %v10259_v24 = vld [vmem:[%s20604_s0 + $0x1a8] sm:$0xff] }
  0x11   :  { %12441 = vmatprep.subr.bf16.mxu0 %v15793_v0  ;;  %12468 = vmatprep.subr.bf16.mxu1 %v15793_v0  ;;  %v10263_v1 = vld [vmem:[%s20604_s0 + $0x338] sm:$0xff]  ;;  %v10258_v25 = vld [vmem:[%s20604_s0 + $0x1a0] sm:$0xff]  ;;  %v10267_v27 = vld [vmem:[%s20604_s0 + $0x4c8] sm:$0xff] }
  0x12   :  { %v10266_v28 = vld [vmem:[%s20604_s0 + $0x4c0] sm:$0xff]  ;;  %v10273_v39 = vld [vmem:[%s20605_s3 + $0x98] sm:$0xff]  ;;  %v10276_v45 = vld [vmem:[%s20605_s3 + $0xb0] sm:$0xff] }
  0x13   :  { %v10274_v42 = vld [vmem:[%s20605_s3 + $0xa0] sm:$0xff]  ;;  %v10280_v51 = vld [vmem:[%s20605_s3 + $0xd0] sm:$0xff]  ;;  %v10287_v60 = vld [vmem:[%s20604_s0 + $0x28] sm:$0xff] }
  0x14   :  { %12443 = vmatpush1.bf16.msra.mxu0 %v15908_v17  ;;  %12470 = vmatpush1.bf16.msra.mxu1 %v15908_v17  ;;  %v10278_v48 = vld [vmem:[%s20605_s3 + $0xc0] sm:$0xff]  ;;  %v10284_v57 = vld [vmem:[%s20605_s3 + $0xf0] sm:$0xff] }
  0x15   :  { %12444 = vmatprep.subr.bf16.mxu0 %v15793_v0  ;;  %12471 = vmatprep.subr.bf16.mxu1 %v15793_v0  ;;  %v10282_v54 = vld [vmem:[%s20605_s3 + $0xe0] sm:$0xff] }
  0x18   :  { %12446 = vmatpush1.bf16.msra.mxu0 %v15920_v20  ;;  %12473 = vmatpush1.bf16.msra.mxu1 %v15920_v20 }
  0x19   :  { %12447 = vmatprep.subr.bf16.mxu0 %v15793_v0  ;;  %12474 = vmatprep.subr.bf16.mxu1 %v15793_v0 }
  0x1c   :  { %12449 = vmatpush1.bf16.msra.mxu0 %v15932_v23  ;;  %12476 = vmatpush1.bf16.msra.mxu1 %v15932_v23 }
  0x1d   :  { %12450 = vmatprep.subr.bf16.mxu0 %v15793_v0  ;;  %12477 = vmatprep.subr.bf16.mxu1 %v15793_v0 }
  0x20   :  { %12452 = vmatpush1.bf16.msra.mxu0 %v15944_v26  ;;  %12479 = vmatpush1.bf16.msra.mxu1 %v15944_v26 }
  0x21   :  { %12453 = vmatprep.subr.bf16.mxu0 %v15793_v0  ;;  %12480 = vmatprep.subr.bf16.mxu1 %v15793_v0 }
  0x24   :  { %12455 = vmatpush1.bf16.msra.mxu0 %v15956_v29  ;;  %12482 = vmatpush1.bf16.msra.mxu1 %v15956_v29 }
  0x25   :  { %99 = vmatprep.subr.mxu0 %v15794_v30  ;;  %175 = vmatprep.subr.mxu1 %v15794_v30 }
  0x28   :  { %10239 = vmatpush1.msk.msra.mxu0 %vm59_vm1, %v15966_v31  ;;  %10243 = vmatpush1.msk.msra.mxu1 %vm59_vm1, %v15966_v31 }
  0x29   :  { %128 = vmatmul.mubr.f32.vlgmr.msra.gmra.mrb[0].mxu0 %v53_v32  ;;  %12483 = vmatprep.subr.bf16.mxu0 %v15793_v0 }
  0x2a   :  { %204 = vmatmul.mubr.f32.vlgmr.msra.gmra.mrb[0].mxu1 %v10241_v33  ;;  %12485 = vmatpush1.bf16.msra.mxu0 %v15857_v4 }
  0x2b   :  { %12510 = vmatprep.subr.bf16.mxu1 %v15793_v0  ;;  %12486 = vmatprep.subr.bf16.mxu0 %v15793_v0 }
  0x2c   :  { %12512 = vmatpush1.bf16.msra.mxu1 %v15857_v4  ;;  %10248 = vmatprep.mubr.msk.f32.mxu0 %vm55_vm0, %v10246_v34 }
  0x2d   :  { %12513 = vmatprep.subr.bf16.mxu1 %v15793_v0  ;;  %10252 = vmatprep.mubr.msk.f32.mxu1 %vm55_vm0, %v10250_v35  ;;  %v10270_v35 = vld [vmem:[%s20605_s3 + $0x80] sm:$0xff] }
  0x2e   :  { %12488 = vmatpush1.bf16.msra.mxu0 %v15864_v6 }
  0x2f   :  { %12489 = vmatprep.subr.bf16.mxu0 %v15793_v0 }
  0x30   :  { %12515 = vmatpush1.bf16.msra.mxu1 %v15864_v6 }
  0x31   :  { %12516 = vmatprep.subr.bf16.mxu1 %v15793_v0 }
  0x32   :  { %12491 = vmatpush1.bf16.msra.mxu0 %v15879_v10 }
  0x33   :  { %12492 = vmatprep.subr.bf16.mxu0 %v15793_v0 }
  0x34   :  { %12518 = vmatpush1.bf16.msra.mxu1 %v15879_v10 }
  0x35   :  { %12519 = vmatprep.subr.bf16.mxu1 %v15793_v0 }
  0x36   :  { %12494 = vmatpush1.bf16.msra.mxu0 %v15896_v14 }
  0x37   :  { %12495 = vmatprep.subr.bf16.mxu0 %v15793_v0 }
  0x38   :  { %12521 = vmatpush1.bf16.msra.mxu1 %v15896_v14 }
  0x39   :  { %12522 = vmatprep.subr.bf16.mxu1 %v15793_v0 }
  0x3a   :  { %12497 = vmatpush1.bf16.msra.mxu0 %v15908_v17 }
  0x3b   :  { %12498 = vmatprep.subr.bf16.mxu0 %v15793_v0 }
  0x3c   :  { %12524 = vmatpush1.bf16.msra.mxu1 %v15908_v17 }
  0x3d   :  { %12525 = vmatprep.subr.bf16.mxu1 %v15793_v0 }
  0x3e   :  { %12500 = vmatpush1.bf16.msra.mxu0 %v15920_v20 }
  0x3f   :  { %12501 = vmatprep.subr.bf16.mxu0 %v15793_v0 }
  0x40   :  { %12527 = vmatpush1.bf16.msra.mxu1 %v15920_v20 }
  0x41   :  { %12528 = vmatprep.subr.bf16.mxu1 %v15793_v0 }
  0x42   :  { %12503 = vmatpush1.bf16.msra.mxu0 %v15932_v23 }
  0x43   :  { %12504 = vmatprep.subr.bf16.mxu0 %v15793_v0 }
  0x44   :  { %12530 = vmatpush1.bf16.msra.mxu1 %v15932_v23 }
  0x45   :  { %12531 = vmatprep.subr.bf16.mxu1 %v15793_v0 }
  0x46   :  { %12506 = vmatpush1.bf16.msra.mxu0 %v15944_v26 }
  0x47   :  { %12507 = vmatprep.subr.bf16.mxu0 %v15793_v0 }
  0x48   :  { %12533 = vmatpush1.bf16.msra.mxu1 %v15944_v26 }
  0x49   :  { %12534 = vmatprep.subr.bf16.mxu1 %v15793_v0 }
  0x4a   :  { %12509 = vmatpush1.bf16.msra.mxu0 %v15956_v29 }
  0x4b   :  { %252 = vmatprep.subr.mxu0 %v15794_v30 }
  0x4c   :  { %12536 = vmatpush1.bf16.msra.mxu1 %v15956_v29 }
  0x4d   :  { %329 = vmatprep.subr.mxu1 %v15794_v30 }
  0x4e   :  { %10247 = vmatpush1.msk.msra.mxu0 %vm59_vm1, %v15966_v31 }
  0x4f   :  { %281 = vmatmul.mubr.f32.vlgmr.msra.gmra.mrb[2].mxu0 %v10245_v36  ;;  %12537 = vmatprep.subr.bf16.mxu0 %v15793_v0  ;;  %v10271_v36 = vld [vmem:[%s20605_s3 + $0x88] sm:$0xff] }
  0x50   :  { %10251 = vmatpush1.msk.msra.mxu1 %vm59_vm1, %v15966_v31  ;;  %12539 = vmatpush3.bf16.msra.mxu0 %v12538_v41  ;;  %v12670_v38 = vpack.c.bf16 %v10271_v36, %v10270_v35  ;;  %v10305_v35 = vld [vmem:[%s20605_s3 + $0x118] sm:$0xff] }
  0x51   :  { %358 = vmatmul.mubr.f32.vlgmr.msra.gmra.mrb[2].mxu1 %v10249_v37  ;;  %12561 = vmatprep.subr.bf16.mxu1 %v15793_v0  ;;  %v10272_v37 = vld [vmem:[%s20605_s3 + $0x90] sm:$0xff] }
  0x52   :  { %12563 = vmatpush1.bf16.msra.mxu1 %v15857_v4  ;;  %12540 = vmatprep.subr.bf16.mxu0 %v15793_v0  ;;  %v12673_v41 = vpack.c.bf16 %v10273_v39, %v10272_v37  ;;  %v10307_v39 = vld [vmem:[%s20605_s3 + $0x128] sm:$0xff] }
  0x53   :  { %12564 = vmatprep.subr.bf16.mxu1 %v15793_v0  ;;  %11516 = vmatprep.mubr.msk.f32.mxu0 %vm15795_vm2, %v15794_v30 }
  0x54   :  { %12542 = vmatpush3.bf16.msra.mxu0 %v12541_v43  ;;  %10257 = vmatprep.mubr.msk.f32.mxu1 %vm55_vm0, %v10255_v62  ;;  %v10275_v43 = vld [vmem:[%s20605_s3 + $0xa8] sm:$0xff] }
  0x55   :  { %12543 = vmatprep.subr.bf16.mxu0 %v15793_v0  ;;  %v12676_v44 = vpack.c.bf16 %v10275_v43, %v10274_v42  ;;  %v10295_v62 = vld [vmem:[%s20604_s0 + $0x348] sm:$0xff]  ;;  %v10309_v42 = vld [vmem:[%s20605_s3 + $0x138] sm:$0xff] }
  0x56   :  { %12566 = vmatpush1.bf16.msra.mxu1 %v15864_v6 }
  0x57   :  { %12567 = vmatprep.subr.bf16.mxu1 %v15793_v0 }
  0x58   :  { %12545 = vmatpush3.bf16.msra.mxu0 %v12544_v46  ;;  %v10277_v46 = vld [vmem:[%s20605_s3 + $0xb8] sm:$0xff] }
  0x59   :  { %12546 = vmatprep.subr.bf16.mxu0 %v15793_v0  ;;  %v12679_v47 = vpack.c.bf16 %v10277_v46, %v10276_v45  ;;  %v10311_v45 = vld [vmem:[%s20605_s3 + $0x148] sm:$0xff] }
  0x5a   :  { %12569 = vmatpush1.bf16.msra.mxu1 %v15879_v10 }
  0x5b   :  { %12570 = vmatprep.subr.bf16.mxu1 %v15793_v0 }
  0x5c   :  { %12548 = vmatpush3.bf16.msra.mxu0 %v12547_v49  ;;  %v10279_v49 = vld [vmem:[%s20605_s3 + $0xc8] sm:$0xff] }
  0x5d   :  { %12549 = vmatprep.subr.bf16.mxu0 %v15793_v0  ;;  %v12682_v50 = vpack.c.bf16 %v10279_v49, %v10278_v48  ;;  %v10313_v48 = vld [vmem:[%s20605_s3 + $0x158] sm:$0xff] }
  0x5e   :  { %12572 = vmatpush1.bf16.msra.mxu1 %v15896_v14 }
  0x5f   :  { %12573 = vmatprep.subr.bf16.mxu1 %v15793_v0 }
  0x60   :  { %12551 = vmatpush3.bf16.msra.mxu0 %v12550_v52  ;;  %v10281_v52 = vld [vmem:[%s20605_s3 + $0xd8] sm:$0xff] }
  0x61   :  { %12552 = vmatprep.subr.bf16.mxu0 %v15793_v0  ;;  %v12685_v53 = vpack.c.bf16 %v10281_v52, %v10280_v51  ;;  %v10315_v51 = vld [vmem:[%s20605_s3 + $0x168] sm:$0xff] }
  0x62   :  { %12575 = vmatpush1.bf16.msra.mxu1 %v15908_v17 }
  0x63   :  { %12576 = vmatprep.subr.bf16.mxu1 %v15793_v0 }
  0x64   :  { %12554 = vmatpush3.bf16.msra.mxu0 %v12553_v55  ;;  %v10283_v55 = vld [vmem:[%s20605_s3 + $0xe8] sm:$0xff] }
  0x65   :  { %12555 = vmatprep.subr.bf16.mxu0 %v15793_v0  ;;  %v12688_v56 = vpack.c.bf16 %v10283_v55, %v10282_v54  ;;  %v10317_v54 = vld [vmem:[%s20605_s3 + $0x178] sm:$0xff] }
  0x66   :  { %12578 = vmatpush1.bf16.msra.mxu1 %v15920_v20 }
  0x67   :  { %12579 = vmatprep.subr.bf16.mxu1 %v15793_v0 }
  0x68   :  { %12557 = vmatpush3.bf16.msra.mxu0 %v12556_v58  ;;  %v10285_v58 = vld [vmem:[%s20605_s3 + $0xf8] sm:$0xff] }
  0x69   :  { %12558 = vmatprep.subr.bf16.mxu0 %v15793_v0  ;;  %v12691_v59 = vpack.c.bf16 %v10285_v58, %v10284_v57  ;;  %v10318_v57 = vld [vmem:[%s20604_s0 + $0x30] sm:$0xff]  ;;  %v10327_v58 = vld [vmem:[%s20604_s0 + $0x358] sm:$0xff] }
  0x6a   :  { %12581 = vmatpush1.bf16.msra.mxu1 %v15932_v23 }
  0x6b   :  { %12582 = vmatprep.subr.bf16.mxu1 %v15793_v0 }
  0x6c   :  { %12560 = vmatpush3.bf16.msra.mxu0 %v12559_v61  ;;  %v10286_v61 = vld [vmem:[%s20604_s0 + $0x20] sm:$0xff] }
  0x6d   :  { %12588 = vmatprep.subr.bf16.mxu0 %v15793_v0 }
  0x6e   :  { %12584 = vmatpush1.bf16.msra.mxu1 %v15944_v26 }
  0x6f   :  { %12585 = vmatprep.subr.bf16.mxu1 %v15793_v0 }
  0x72   :  { %12587 = vmatpush1.bf16.msra.mxu1 %v15956_v29 }
  0x73   :  { %503 = vmatprep.subr.mxu1 %v15794_v30 }
  0x76   :  { %10256 = vmatpush1.msk.msra.mxu1 %vm59_vm1, %v15966_v31 }
  0x77   :  { %12615 = vmatprep.subr.bf16.mxu1 %v15793_v0  ;;  %532 = vmatmul.mubr.f32.vlgmr.msra.gmra.mrb[4].mxu1 %v10254_v63  ;;  %v10294_v63 = vld [vmem:[%s20604_s0 + $0x340] sm:$0xff] }
  0x78   :  { %12617 = vmatpush1.bf16.msra.mxu1 %v15857_v4  ;;  %10265 = vmatprep.mubr.msk.f32.mxu1 %vm55_vm0, %v10263_v1 }
  0x79   :  { %12618 = vmatprep.subr.bf16.mxu1 %v15793_v0 }
  0x7c   :  { %12620 = vmatpush1.bf16.msra.mxu1 %v15864_v6 }
  0x7d   :  { %12621 = vmatprep.subr.bf16.mxu1 %v15793_v0 }
  0x80   :  { %12623 = vmatpush1.bf16.msra.mxu1 %v15879_v10 }
  0x81   :  { %12624 = vmatprep.subr.bf16.mxu1 %v15793_v0 }
  0x84   :  { %12626 = vmatpush1.bf16.msra.mxu1 %v15896_v14 }
  0x85   :  { %12627 = vmatprep.subr.bf16.mxu1 %v15793_v0 }
  0x88   :  { %12629 = vmatpush1.bf16.msra.mxu1 %v15908_v17 }
  0x89   :  { %12630 = vmatprep.subr.bf16.mxu1 %v15793_v0 }
  0x8c   :  { %12632 = vmatpush1.bf16.msra.mxu1 %v15920_v20 }
  0x8d   :  { %12633 = vmatprep.subr.bf16.mxu1 %v15793_v0 }
  0x90   :  { %12635 = vmatpush1.bf16.msra.mxu1 %v15932_v23 }
  0x91   :  { %12636 = vmatprep.subr.bf16.mxu1 %v15793_v0 }
  0x94   :  { %12638 = vmatpush1.bf16.msra.mxu1 %v15944_v26 }
  0x95   :  { %12639 = vmatprep.subr.bf16.mxu1 %v15793_v0 }
  0x98   :  { %12641 = vmatpush1.bf16.msra.mxu1 %v15956_v29 }
  0x99   :  { %656 = vmatprep.subr.mxu1 %v15794_v30 }
  0x9c   :  { %10264 = vmatpush1.msk.msra.mxu1 %vm59_vm1, %v15966_v31 }
  0x9d   :  { %685 = vmatmul.mubr.f32.vlgmr.msra.gmra.mrb[6].mxu1 %v10262_v2  ;;  %12669 = vmatprep.subr.bf16.mxu1 %v15793_v0 }
  0x9e   :  { %11551 = vmatprep.mubr.msk.f32.mxu1 %vm15795_vm2, %v15794_v30  ;;  %12671 = vmatpush3.bf16.msra.mxu1 %v12670_v38  ;;  %v10306_v38 = vld [vmem:[%s20605_s3 + $0x120] sm:$0xff] }
  0x9f   :  { %12672 = vmatprep.subr.bf16.mxu1 %v15793_v0 }
  0xa2   :  { %12674 = vmatpush3.bf16.msra.mxu1 %v12673_v41  ;;  %v10308_v41 = vld [vmem:[%s20605_s3 + $0x130] sm:$0xff] }
  0xa3   :  { %12675 = vmatprep.subr.bf16.mxu1 %v15793_v0  ;;  %v12811_v43 = vpack.c.bf16 %v10309_v42, %v10308_v41  ;;  %v10342_v41 = vld [vmem:[%s20605_s3 + $0x1c0] sm:$0xff]  ;;  %v10343_v42 = vld [vmem:[%s20605_s3 + $0x1c8] sm:$0xff] }
  0xa6   :  { %12677 = vmatpush3.bf16.msra.mxu1 %v12676_v44  ;;  %v10310_v44 = vld [vmem:[%s20605_s3 + $0x140] sm:$0xff] }
  0xa7   :  { %12678 = vmatprep.subr.bf16.mxu1 %v15793_v0  ;;  %v12814_v46 = vpack.c.bf16 %v10311_v45, %v10310_v44  ;;  %v10344_v44 = vld [vmem:[%s20605_s3 + $0x1d0] sm:$0xff]  ;;  %v10345_v45 = vld [vmem:[%s20605_s3 + $0x1d8] sm:$0xff] }
  0xaa   :  { %12680 = vmatpush3.bf16.msra.mxu1 %v12679_v47  ;;  %v10312_v47 = vld [vmem:[%s20605_s3 + $0x150] sm:$0xff] }
  0xab   :  { %12681 = vmatprep.subr.bf16.mxu1 %v15793_v0  ;;  %v12817_v49 = vpack.c.bf16 %v10313_v48, %v10312_v47  ;;  %v10346_v47 = vld [vmem:[%s20605_s3 + $0x1e0] sm:$0xff]  ;;  %v10347_v48 = vld [vmem:[%s20605_s3 + $0x1e8] sm:$0xff] }
  0xae   :  { %12683 = vmatpush3.bf16.msra.mxu1 %v12682_v50  ;;  %v10314_v50 = vld [vmem:[%s20605_s3 + $0x160] sm:$0xff] }
  0xaf   :  { %12684 = vmatprep.subr.bf16.mxu1 %v15793_v0  ;;  %v12820_v52 = vpack.c.bf16 %v10315_v51, %v10314_v50  ;;  %v10348_v50 = vld [vmem:[%s20605_s3 + $0x1f0] sm:$0xff]  ;;  %v10349_v51 = vld [vmem:[%s20605_s3 + $0x1f8] sm:$0xff] }
  0xb2   :  { %12686 = vmatpush3.bf16.msra.mxu1 %v12685_v53  ;;  %v10316_v53 = vld [vmem:[%s20605_s3 + $0x170] sm:$0xff] }
  0xb3   :  { %12687 = vmatprep.subr.bf16.mxu1 %v15793_v0  ;;  %v12823_v55 = vpack.c.bf16 %v10317_v54, %v10316_v53  ;;  %v10351_v53 = vld [vmem:[%s20604_s0 + $0x48] sm:$0xff]  ;;  %v10350_v54 = vld [vmem:[%s20604_s0 + $0x40] sm:$0xff] }
  0xb6   :  { %12689 = vmatpush3.bf16.msra.mxu1 %v12688_v56  ;;  %v10319_v56 = vld [vmem:[%s20604_s0 + $0x38] sm:$0xff] }
  0xb7   :  { %12690 = vmatprep.subr.bf16.mxu1 %v15793_v0 }
  0xba   :  { %12692 = vmatpush3.bf16.msra.mxu1 %v12691_v59  ;;  %v10326_v59 = vld [vmem:[%s20604_s0 + $0x350] sm:$0xff] }
  0xbb   :  { %12720 = vmatprep.subr.bf16.mxu1 %v15793_v0 }
  0xfc   :  { %v129_v3 = vpop.f32.mrb[0].mxu0 }
  0xfd   :  { %v131_v5 = vpop.f32.mrb[1].mxu0  ;;  %v205_v7 = vpop.f32.mrb[0].mxu1 }
  0xfe   :  { %v209_v8 = vmax.f32 %v129_v3, %v205_v7  ;;  %v207_v9 = vpop.f32.mrb[1].mxu1 }
 0x122   :  { %v282_v11 = vpop.f32.mrb[2].mxu0 }
 0x123   :  { %v286_v12 = vmax.f32 %v209_v8, %v282_v11  ;;  %v284_v13 = vpop.f32.mrb[3].mxu0 }
 0x124   :  { %v359_v16 = vpop.f32.mrb[2].mxu1 }
 0x125   :  { %v363_v18 = vmax.f32 %v286_v12, %v359_v16  ;;  %v361_v19 = vpop.f32.mrb[3].mxu1 }
 0x126   :  { %v10290_v19 = vld [vmem:[%s20604_s0 + $0x1b0] sm:$0xff] }
 0x127   :  { %v370_v21 = vadd.f32 %v16156_v15, %v363_v18  ;;  %v10291_v18 = vld [vmem:[%s20604_s0 + $0x1b8] sm:$0xff] }
 0x129   :  { %v371_v22 = vmax.f32 %v370_v21, 0.0  ;;  %v10299_v21 = vld [vmem:[%s20604_s0 + $0x4d8] sm:$0xff] }
 0x12b   :  { %11517 = vmatmul.mubr.f32.vlgmr.msra.gmra.mrb[4].mxu0 %v371_v22  ;;  %v10298_v22 = vld [vmem:[%s20604_s0 + $0x4d0] sm:$0xff] }
 0x12c   :  { %12590 = vmatpush1.bf16.msra.mxu0 %v15857_v4  ;;  %10261 = vmatprep.mubr.msk.f32.mxu0 %vm55_vm0, %v10259_v24 }
 0x12d   :  { %12591 = vmatprep.subr.bf16.mxu0 %v15793_v0 }
 0x130   :  { %12593 = vmatpush1.bf16.msra.mxu0 %v15864_v6 }
 0x131   :  { %12594 = vmatprep.subr.bf16.mxu0 %v15793_v0 }
 0x134   :  { %12596 = vmatpush1.bf16.msra.mxu0 %v15879_v10 }
 0x135   :  { %12597 = vmatprep.subr.bf16.mxu0 %v15793_v0 }
 0x138   :  { %12599 = vmatpush1.bf16.msra.mxu0 %v15896_v14 }
 0x139   :  { %12600 = vmatprep.subr.bf16.mxu0 %v15793_v0 }
 0x13c   :  { %12602 = vmatpush1.bf16.msra.mxu0 %v15908_v17 }
 0x13d   :  { %12603 = vmatprep.subr.bf16.mxu0 %v15793_v0 }
 0x140   :  { %12605 = vmatpush1.bf16.msra.mxu0 %v15920_v20 }
 0x141   :  { %12606 = vmatprep.subr.bf16.mxu0 %v15793_v0 }
 0x144   :  { %12608 = vmatpush1.bf16.msra.mxu0 %v15932_v23 }
 0x145   :  { %12609 = vmatprep.subr.bf16.mxu0 %v15793_v0 }
 0x148   :  { %12611 = vmatpush1.bf16.msra.mxu0 %v15944_v26 }
 0x149   :  { %12612 = vmatprep.subr.bf16.mxu0 %v15793_v0 }
 0x14a   :  { %v16220_v32 = vpop.f32.mrb[4].mxu1 }
 0x14b   :  { %v535_v33 = vpop.f32.mrb[5].mxu1 }
 0x14c   :  { %12614 = vmatpush1.bf16.msra.mxu0 %v15956_v29  ;;  %v10304_v33 = vld [vmem:[%s20605_s3 + $0x110] sm:$0xff] }
 0x14d   :  { %579 = vmatprep.subr.mxu0 %v15794_v30  ;;  %v12805_v37 = vpack.c.bf16 %v10305_v35, %v10304_v33  ;;  %v10338_v35 = vld [vmem:[%s20605_s3 + $0x1a0] sm:$0xff] }
 0x150   :  { %10260 = vmatpush1.msk.msra.mxu0 %vm59_vm1, %v15966_v31 }
 0x151   :  { %608 = vmatmul.mubr.f32.vlgmr.msra.gmra.mrb[6].mxu0 %v10258_v25  ;;  %12642 = vmatprep.subr.bf16.mxu0 %v15793_v0 }
 0x152   :  { %12644 = vmatpush1.bf16.msra.mxu0 %v15857_v4  ;;  %10269 = vmatprep.mubr.msk.f32.mxu0 %vm55_vm0, %v10267_v27 }
 0x153   :  { %12645 = vmatprep.subr.bf16.mxu0 %v15793_v0 }
 0x156   :  { %12647 = vmatpush1.bf16.msra.mxu0 %v15864_v6 }
 0x157   :  { %12648 = vmatprep.subr.bf16.mxu0 %v15793_v0 }
 0x15a   :  { %12650 = vmatpush1.bf16.msra.mxu0 %v15879_v10 }
 0x15b   :  { %12651 = vmatprep.subr.bf16.mxu0 %v15793_v0 }
 0x15e   :  { %12653 = vmatpush1.bf16.msra.mxu0 %v15896_v14 }
 0x15f   :  { %12654 = vmatprep.subr.bf16.mxu0 %v15793_v0 }
 0x162   :  { %12656 = vmatpush1.bf16.msra.mxu0 %v15908_v17 }
 0x163   :  { %12657 = vmatprep.subr.bf16.mxu0 %v15793_v0 }
 0x166   :  { %12659 = vmatpush1.bf16.msra.mxu0 %v15920_v20 }
 0x167   :  { %12660 = vmatprep.subr.bf16.mxu0 %v15793_v0 }
 0x16a   :  { %12662 = vmatpush1.bf16.msra.mxu0 %v15932_v23 }
 0x16b   :  { %12663 = vmatprep.subr.bf16.mxu0 %v15793_v0 }
 0x16e   :  { %12665 = vmatpush1.bf16.msra.mxu0 %v15944_v26 }
 0x16f   :  { %12666 = vmatprep.subr.bf16.mxu0 %v15793_v0 }
 0x170   :  { %v16238_v34 = vpop.f32.mrb[6].mxu1 }
 0x171   :  { %v688_v40 = vpop.f32.mrb[7].mxu1 }
 0x172   :  { %12668 = vmatpush1.bf16.msra.mxu0 %v15956_v29  ;;  %v12808_v40 = vpack.c.bf16 %v10307_v39, %v10306_v38  ;;  %v10340_v38 = vld [vmem:[%s20605_s3 + $0x1b0] sm:$0xff]  ;;  %v10341_v39 = vld [vmem:[%s20605_s3 + $0x1b8] sm:$0xff] }
 0x173   :  { %733 = vmatprep.subr.mxu0 %v15794_v30 }
 0x176   :  { %10268 = vmatpush1.msk.msra.mxu0 %vm59_vm1, %v15966_v31 }
 0x177   :  { %762 = vmatmul.mubr.f32.vlgmr.msra.gmra.mrb[8].mxu0 %v10266_v28  ;;  %12693 = vmatprep.subr.bf16.mxu0 %v15793_v0  ;;  %v10302_v28 = vld [vmem:[%s20605_s3 + $0x100] sm:$0xff] }
 0x178   :  { %12695 = vmatpush1.bf16.msra.mxu0 %v15857_v4  ;;  %10289 = vmatprep.mubr.msk.f32.mxu0 %vm55_vm0, %v10287_v60 }
 0x179   :  { %12696 = vmatprep.subr.bf16.mxu0 %v15793_v0 }
 0x17c   :  { %12698 = vmatpush1.bf16.msra.mxu0 %v15864_v6 }
 0x17d   :  { %12699 = vmatprep.subr.bf16.mxu0 %v15793_v0 }
 0x180   :  { %12701 = vmatpush1.bf16.msra.mxu0 %v15879_v10 }
 0x181   :  { %12702 = vmatprep.subr.bf16.mxu0 %v15793_v0 }
 0x184   :  { %12704 = vmatpush1.bf16.msra.mxu0 %v15896_v14 }
 0x185   :  { %12705 = vmatprep.subr.bf16.mxu0 %v15793_v0 }
 0x188   :  { %12707 = vmatpush1.bf16.msra.mxu0 %v15908_v17 }
 0x189   :  { %12708 = vmatprep.subr.bf16.mxu0 %v15793_v0 }
 0x18c   :  { %12710 = vmatpush1.bf16.msra.mxu0 %v15920_v20 }
 0x18d   :  { %12711 = vmatprep.subr.bf16.mxu0 %v15793_v0 }
 0x190   :  { %12713 = vmatpush1.bf16.msra.mxu0 %v15932_v23 }
 0x191   :  { %12714 = vmatprep.subr.bf16.mxu0 %v15793_v0 }
 0x194   :  { %12716 = vmatpush1.bf16.msra.mxu0 %v15944_v26 }
 0x195   :  { %12717 = vmatprep.subr.bf16.mxu0 %v15793_v0 }
 0x198   :  { %12719 = vmatpush1.bf16.msra.mxu0 %v15956_v29 }
 0x199   :  { %902 = vmatprep.subr.mxu0 %v15794_v30 }
 0x19c   :  { %10288 = vmatpush1.msk.msra.mxu0 %vm59_vm1, %v15966_v31 }
 0x19d   :  { %12747 = vmatprep.subr.bf16.mxu0 %v15793_v0  ;;  %931 = vmatmul.mubr.f32.vlgmr.msra.gmra.mrb[10].mxu0 %v10286_v61 }
 0x19e   :  { %12749 = vmatpush1.bf16.msra.mxu0 %v15857_v4  ;;  %10297 = vmatprep.mubr.msk.f32.mxu0 %vm55_vm0, %v10295_v62 }
 0x19f   :  { %12750 = vmatprep.subr.bf16.mxu0 %v15793_v0 }
 0x1a2   :  { %12752 = vmatpush1.bf16.msra.mxu0 %v15864_v6 }
 0x1a3   :  { %12753 = vmatprep.subr.bf16.mxu0 %v15793_v0 }
 0x1a6   :  { %12755 = vmatpush1.bf16.msra.mxu0 %v15879_v10 }
 0x1a7   :  { %12756 = vmatprep.subr.bf16.mxu0 %v15793_v0 }
 0x1aa   :  { %12758 = vmatpush1.bf16.msra.mxu0 %v15896_v14 }
 0x1ab   :  { %12759 = vmatprep.subr.bf16.mxu0 %v15793_v0 }
 0x1ae   :  { %12761 = vmatpush1.bf16.msra.mxu0 %v15908_v17 }
 0x1af   :  { %12762 = vmatprep.subr.bf16.mxu0 %v15793_v0 }
 0x1b2   :  { %12764 = vmatpush1.bf16.msra.mxu0 %v15920_v20 }
 0x1b3   :  { %12765 = vmatprep.subr.bf16.mxu0 %v15793_v0 }
 0x1b6   :  { %12767 = vmatpush1.bf16.msra.mxu0 %v15932_v23 }
 0x1b7   :  { %12768 = vmatprep.subr.bf16.mxu0 %v15793_v0 }
 0x1ba   :  { %12770 = vmatpush1.bf16.msra.mxu0 %v15944_v26 }
 0x1bb   :  { %12771 = vmatprep.subr.bf16.mxu0 %v15793_v0 }
 0x1be   :  { %12773 = vmatpush1.bf16.msra.mxu0 %v15956_v29 }
 0x1bf   :  { %1055 = vmatprep.subr.mxu0 %v15794_v30 }
 0x1c2   :  { %10296 = vmatpush1.msk.msra.mxu0 %vm59_vm1, %v15966_v31 }
 0x1c3   :  { %1084 = vmatmul.mubr.f32.vlgmr.msra.gmra.mrb[12].mxu0 %v10294_v63  ;;  %12801 = vmatprep.subr.bf16.mxu0 %v15793_v0 }
 0x1c4   :  { %11586 = vmatprep.mubr.msk.f32.mxu0 %vm15795_vm2, %v15794_v30 }
 0x1fe   :  { %v16333_v1 = vpop.f32.mrb[4].mxu0 }
 0x1ff   :  { %v11518_v2 = vpop.f32.mrb[5].mxu0 }
 0x224   :  { %v609_v3 = vpop.f32.mrb[6].mxu0 }
 0x225   :  { %v613_v5 = vmax.f32 %v16220_v32, %v609_v3  ;;  %v611_v7 = vpop.f32.mrb[7].mxu0  ;;  %v10303_v32 = vld [vmem:[%s20605_s3 + $0x108] sm:$0xff] }
 0x227   :  { %v690_v8 = vmax.f32 %v613_v5, %v16238_v34  ;;  %v12802_v34 = vpack.c.bf16 %v10303_v32, %v10302_v28  ;;  %v10337_v32 = vld [vmem:[%s20605_s3 + $0x198] sm:$0xff] }
 0x229   :  { %12803 = vmatpush3.bf16.msra.mxu0 %v12802_v34 }
 0x22a   :  { %12804 = vmatprep.subr.bf16.mxu0 %v15793_v0 }
 0x22d   :  { %12806 = vmatpush3.bf16.msra.mxu0 %v12805_v37 }
 0x22e   :  { %12807 = vmatprep.subr.bf16.mxu0 %v15793_v0 }
 0x231   :  { %12809 = vmatpush3.bf16.msra.mxu0 %v12808_v40  ;;  %v12943_v40 = vpack.c.bf16 %v10341_v39, %v10340_v38  ;;  %v10375_v38 = vld [vmem:[%s20605_s3 + $0x248] sm:$0xff] }
 0x232   :  { %12810 = vmatprep.subr.bf16.mxu0 %v15793_v0 }
 0x235   :  { %12812 = vmatpush3.bf16.msra.mxu0 %v12811_v43  ;;  %v12946_v43 = vpack.c.bf16 %v10343_v42, %v10342_v41  ;;  %v10377_v41 = vld [vmem:[%s20605_s3 + $0x258] sm:$0xff] }
 0x236   :  { %12813 = vmatprep.subr.bf16.mxu0 %v15793_v0 }
 0x239   :  { %12815 = vmatpush3.bf16.msra.mxu0 %v12814_v46  ;;  %v12949_v46 = vpack.c.bf16 %v10345_v45, %v10344_v44  ;;  %v10379_v44 = vld [vmem:[%s20605_s3 + $0x268] sm:$0xff] }
 0x23a   :  { %12816 = vmatprep.subr.bf16.mxu0 %v15793_v0 }
 0x23d   :  { %12818 = vmatpush3.bf16.msra.mxu0 %v12817_v49  ;;  %v12952_v49 = vpack.c.bf16 %v10347_v48, %v10346_v47  ;;  %v10381_v47 = vld [vmem:[%s20605_s3 + $0x278] sm:$0xff] }
 0x23e   :  { %12819 = vmatprep.subr.bf16.mxu0 %v15793_v0 }
 0x241   :  { %12821 = vmatpush3.bf16.msra.mxu0 %v12820_v52  ;;  %v12955_v52 = vpack.c.bf16 %v10349_v51, %v10348_v50  ;;  %v10382_v50 = vld [vmem:[%s20604_s0 + $0x50] sm:$0xff]  ;;  %v10391_v51 = vld [vmem:[%s20604_s0 + $0x378] sm:$0xff] }
 0x242   :  { %12822 = vmatprep.subr.bf16.mxu0 %v15793_v0 }
 0x245   :  { %12824 = vmatpush3.bf16.msra.mxu0 %v12823_v55  ;;  %v10359_v55 = vld [vmem:[%s20604_s0 + $0x368] sm:$0xff] }
 0x246   :  { %12852 = vmatprep.subr.bf16.mxu0 %v15793_v0 }
 0x24a   :  { %v763_v9 = vpop.f32.mrb[8].mxu0 }
 0x24b   :  { %v767_v11 = vmax.f32 %v690_v8, %v763_v9  ;;  %v765_v12 = vpop.f32.mrb[9].mxu0 }
 0x24d   :  { %v768_v13 = vadd.f32 %v16156_v15, %v767_v11 }
 0x24f   :  { %v769_v16 = vmax.f32 %v768_v13, 0.0  ;;  %v10323_v13 = vld [vmem:[%s20604_s0 + $0x1c8] sm:$0xff] }
 0x251   :  { %11552 = vmatmul.mubr.f32.vlgmr.msra.gmra.mrb[8].mxu1 %v769_v16  ;;  %v10331_v16 = vld [vmem:[%s20604_s0 + $0x4e8] sm:$0xff] }
 0x252   :  { %12722 = vmatpush1.bf16.msra.mxu1 %v15857_v4  ;;  %10293 = vmatprep.mubr.msk.f32.mxu1 %vm55_vm0, %v10291_v18  ;;  %v16574_v18 = vld [vmem:[%s20603_s1 + $0x90] sm:$0x3f] }
 0x253   :  { %12723 = vmatprep.subr.bf16.mxu1 %v15793_v0 }
 0x256   :  { %12725 = vmatpush1.bf16.msra.mxu1 %v15864_v6 }
 0x257   :  { %12726 = vmatprep.subr.bf16.mxu1 %v15793_v0 }
 0x25a   :  { %12728 = vmatpush1.bf16.msra.mxu1 %v15879_v10 }
 0x25b   :  { %12729 = vmatprep.subr.bf16.mxu1 %v15793_v0 }
 0x25e   :  { %12731 = vmatpush1.bf16.msra.mxu1 %v15896_v14 }
 0x25f   :  { %12732 = vmatprep.subr.bf16.mxu1 %v15793_v0 }
 0x262   :  { %12734 = vmatpush1.bf16.msra.mxu1 %v15908_v17 }
 0x263   :  { %12735 = vmatprep.subr.bf16.mxu1 %v15793_v0 }
 0x266   :  { %12737 = vmatpush1.bf16.msra.mxu1 %v15920_v20 }
 0x267   :  { %12738 = vmatprep.subr.bf16.mxu1 %v15793_v0 }
 0x26a   :  { %12740 = vmatpush1.bf16.msra.mxu1 %v15932_v23 }
 0x26b   :  { %12741 = vmatprep.subr.bf16.mxu1 %v15793_v0 }
 0x26e   :  { %12743 = vmatpush1.bf16.msra.mxu1 %v15944_v26 }
 0x26f   :  { %12744 = vmatprep.subr.bf16.mxu1 %v15793_v0 }
 0x270   :  { %v16399_v24 = vpop.f32.mrb[10].mxu0 }
 0x271   :  { %v934_v25 = vpop.f32.mrb[11].mxu0 }
 0x272   :  { %12746 = vmatpush1.bf16.msra.mxu1 %v15956_v29  ;;  %v10335_v25 = vld [vmem:[%s20605_s3 + $0x188] sm:$0xff] }
 0x273   :  { %978 = vmatprep.subr.mxu1 %v15794_v30 }
 0x276   :  { %10292 = vmatpush1.msk.msra.mxu1 %vm59_vm1, %v15966_v31 }
 0x277   :  { %1007 = vmatmul.mubr.f32.vlgmr.msra.gmra.mrb[10].mxu1 %v10290_v19  ;;  %12774 = vmatprep.subr.bf16.mxu1 %v15793_v0 }
 0x278   :  { %12776 = vmatpush1.bf16.msra.mxu1 %v15857_v4  ;;  %10301 = vmatprep.mubr.msk.f32.mxu1 %vm55_vm0, %v10299_v21 }
 0x279   :  { %12777 = vmatprep.subr.bf16.mxu1 %v15793_v0 }
 0x27c   :  { %12779 = vmatpush1.bf16.msra.mxu1 %v15864_v6 }
 0x27d   :  { %12780 = vmatprep.subr.bf16.mxu1 %v15793_v0 }
 0x280   :  { %12782 = vmatpush1.bf16.msra.mxu1 %v15879_v10 }
 0x281   :  { %12783 = vmatprep.subr.bf16.mxu1 %v15793_v0 }
 0x284   :  { %12785 = vmatpush1.bf16.msra.mxu1 %v15896_v14 }
 0x285   :  { %12786 = vmatprep.subr.bf16.mxu1 %v15793_v0 }
 0x288   :  { %12788 = vmatpush1.bf16.msra.mxu1 %v15908_v17 }
 0x289   :  { %12789 = vmatprep.subr.bf16.mxu1 %v15793_v0 }
 0x28c   :  { %12791 = vmatpush1.bf16.msra.mxu1 %v15920_v20 }
 0x28d   :  { %12792 = vmatprep.subr.bf16.mxu1 %v15793_v0 }
 0x290   :  { %12794 = vmatpush1.bf16.msra.mxu1 %v15932_v23 }
 0x291   :  { %12795 = vmatprep.subr.bf16.mxu1 %v15793_v0 }
 0x294   :  { %12797 = vmatpush1.bf16.msra.mxu1 %v15944_v26 }
 0x295   :  { %12798 = vmatprep.subr.bf16.mxu1 %v15793_v0 }
 0x296   :  { %v16417_v27 = vpop.f32.mrb[12].mxu0 }
 0x297   :  { %v1087_v36 = vpop.f32.mrb[13].mxu0 }
 0x298   :  { %12800 = vmatpush1.bf16.msra.mxu1 %v15956_v29  ;;  %v10339_v36 = vld [vmem:[%s20605_s3 + $0x1a8] sm:$0xff] }
 0x299   :  { %1132 = vmatprep.subr.mxu1 %v15794_v30  ;;  %v12940_v37 = vpack.c.bf16 %v10339_v36, %v10338_v35  ;;  %v10373_v35 = vld [vmem:[%s20605_s3 + $0x238] sm:$0xff] }
 0x29c   :  { %10300 = vmatpush1.msk.msra.mxu1 %vm59_vm1, %v15966_v31 }
 0x29d   :  { %1161 = vmatmul.mubr.f32.vlgmr.msra.gmra.mrb[12].mxu1 %v10298_v22  ;;  %12825 = vmatprep.subr.bf16.mxu1 %v15793_v0 }
 0x29e   :  { %12827 = vmatpush1.bf16.msra.mxu1 %v15857_v4  ;;  %10321 = vmatprep.mubr.msk.f32.mxu1 %vm55_vm0, %v10319_v56  ;;  %v10358_v56 = vld [vmem:[%s20604_s0 + $0x360] sm:$0xff] }
 0x29f   :  { %12828 = vmatprep.subr.bf16.mxu1 %v15793_v0 }
 0x2a2   :  { %12830 = vmatpush1.bf16.msra.mxu1 %v15864_v6 }
 0x2a3   :  { %12831 = vmatprep.subr.bf16.mxu1 %v15793_v0 }
 0x2a6   :  { %12833 = vmatpush1.bf16.msra.mxu1 %v15879_v10 }
 0x2a7   :  { %12834 = vmatprep.subr.bf16.mxu1 %v15793_v0 }
 0x2aa   :  { %12836 = vmatpush1.bf16.msra.mxu1 %v15896_v14 }
 0x2ab   :  { %12837 = vmatprep.subr.bf16.mxu1 %v15793_v0 }
 0x2ae   :  { %12839 = vmatpush1.bf16.msra.mxu1 %v15908_v17 }
 0x2af   :  { %12840 = vmatprep.subr.bf16.mxu1 %v15793_v0 }
 0x2b2   :  { %12842 = vmatpush1.bf16.msra.mxu1 %v15920_v20 }
 0x2b3   :  { %12843 = vmatprep.subr.bf16.mxu1 %v15793_v0 }
 0x2b6   :  { %12845 = vmatpush1.bf16.msra.mxu1 %v15932_v23 }
 0x2b7   :  { %12846 = vmatprep.subr.bf16.mxu1 %v15793_v0 }
 0x2ba   :  { %12848 = vmatpush1.bf16.msra.mxu1 %v15944_v26 }
 0x2bb   :  { %12849 = vmatprep.subr.bf16.mxu1 %v15793_v0 }
 0x2be   :  { %12851 = vmatpush1.bf16.msra.mxu1 %v15956_v29 }
 0x2bf   :  { %1301 = vmatprep.subr.mxu1 %v15794_v30 }
 0x2c2   :  { %10320 = vmatpush1.msk.msra.mxu1 %vm59_vm1, %v15966_v31 }
 0x2c3   :  { %12879 = vmatprep.subr.bf16.mxu1 %v15793_v0  ;;  %1330 = vmatmul.mubr.f32.vlgmr.msra.gmra.mrb[14].mxu1 %v10318_v57 }
 0x2c4   :  { %12881 = vmatpush1.bf16.msra.mxu1 %v15857_v4  ;;  %10329 = vmatprep.mubr.msk.f32.mxu1 %vm55_vm0, %v10327_v58 }
 0x2c5   :  { %12882 = vmatprep.subr.bf16.mxu1 %v15793_v0 }
 0x2c8   :  { %12884 = vmatpush1.bf16.msra.mxu1 %v15864_v6 }
 0x2c9   :  { %12885 = vmatprep.subr.bf16.mxu1 %v15793_v0 }
 0x2cc   :  { %12887 = vmatpush1.bf16.msra.mxu1 %v15879_v10 }
 0x2cd   :  { %12888 = vmatprep.subr.bf16.mxu1 %v15793_v0 }
 0x2d0   :  { %12890 = vmatpush1.bf16.msra.mxu1 %v15896_v14 }
 0x2d1   :  { %12891 = vmatprep.subr.bf16.mxu1 %v15793_v0 }
 0x2d4   :  { %12893 = vmatpush1.bf16.msra.mxu1 %v15908_v17 }
 0x2d5   :  { %12894 = vmatprep.subr.bf16.mxu1 %v15793_v0 }
 0x2d8   :  { %12896 = vmatpush1.bf16.msra.mxu1 %v15920_v20 }
 0x2d9   :  { %12897 = vmatprep.subr.bf16.mxu1 %v15793_v0 }
 0x2dc   :  { %12899 = vmatpush1.bf16.msra.mxu1 %v15932_v23 }
 0x2dd   :  { %12900 = vmatprep.subr.bf16.mxu1 %v15793_v0 }
 0x2e0   :  { %12902 = vmatpush1.bf16.msra.mxu1 %v15944_v26 }
 0x2e1   :  { %12903 = vmatprep.subr.bf16.mxu1 %v15793_v0 }
 0x2e4   :  { %12905 = vmatpush1.bf16.msra.mxu1 %v15956_v29 }
 0x2e5   :  { %1454 = vmatprep.subr.mxu1 %v15794_v30 }
 0x2e8   :  { %10328 = vmatpush1.msk.msra.mxu1 %vm59_vm1, %v15966_v31 }
 0x2e9   :  { %1483 = vmatmul.mubr.f32.vlgmr.msra.gmra.mrb[16].mxu1 %v10326_v59  ;;  %12933 = vmatprep.subr.bf16.mxu1 %v15793_v0 }
 0x2ea   :  { %11621 = vmatprep.mubr.msk.f32.mxu1 %vm15795_vm2, %v15794_v30 }
 0x324   :  { %v854_v60 = vpop.f32.mrb[8].mxu1 }
 0x325   :  { %v16513_v61 = vadd.f32 %v854_v60, %v16333_v1  ;;  %v11553_v62 = vpop.f32.mrb[9].mxu1  ;;  %v10322_v1 = vld [vmem:[%s20604_s0 + $0x1c0] sm:$0xff] }
 0x34a   :  { %v1008_v63 = vpop.f32.mrb[10].mxu1 }
 0x34b   :  { %v1012_v2 = vmax.f32 %v16399_v24, %v1008_v63  ;;  %v1010_v3 = vpop.f32.mrb[11].mxu1  ;;  %v10334_v24 = vld [vmem:[%s20605_s3 + $0x180] sm:$0xff] }
 0x34c   :  { %v12934_v28 = vpack.c.bf16 %v10335_v25, %v10334_v24  ;;  %v10369_v24 = vld [vmem:[%s20605_s3 + $0x218] sm:$0xff] }
 0x34d   :  { %v1089_v5 = vmax.f32 %v1012_v2, %v16417_v27  ;;  %v10336_v27 = vld [vmem:[%s20605_s3 + $0x190] sm:$0xff] }
 0x34e   :  { %12935 = vmatpush3.bf16.msra.mxu1 %v12934_v28  ;;  %v12937_v34 = vpack.c.bf16 %v10337_v32, %v10336_v27  ;;  %v10370_v28 = vld [vmem:[%s20605_s3 + $0x220] sm:$0xff]  ;;  %v10371_v32 = vld [vmem:[%s20605_s3 + $0x228] sm:$0xff] }
 0x34f   :  { %12936 = vmatprep.subr.bf16.mxu1 %v15793_v0 }
 0x352   :  { %12938 = vmatpush3.bf16.msra.mxu1 %v12937_v34  ;;  %v10372_v34 = vld [vmem:[%s20605_s3 + $0x230] sm:$0xff] }
 0x353   :  { %12939 = vmatprep.subr.bf16.mxu1 %v15793_v0  ;;  %v13075_v36 = vpack.c.bf16 %v10373_v35, %v10372_v34  ;;  %v10406_v34 = vld [vmem:[%s20605_s3 + $0x2c0] sm:$0xff]  ;;  %v10407_v35 = vld [vmem:[%s20605_s3 + $0x2c8] sm:$0xff] }
 0x356   :  { %12941 = vmatpush3.bf16.msra.mxu1 %v12940_v37  ;;  %v10374_v37 = vld [vmem:[%s20605_s3 + $0x240] sm:$0xff] }
 0x357   :  { %12942 = vmatprep.subr.bf16.mxu1 %v15793_v0  ;;  %v13078_v39 = vpack.c.bf16 %v10375_v38, %v10374_v37  ;;  %v10408_v37 = vld [vmem:[%s20605_s3 + $0x2d0] sm:$0xff]  ;;  %v10409_v38 = vld [vmem:[%s20605_s3 + $0x2d8] sm:$0xff] }
 0x35a   :  { %12944 = vmatpush3.bf16.msra.mxu1 %v12943_v40  ;;  %v10376_v40 = vld [vmem:[%s20605_s3 + $0x250] sm:$0xff] }
 0x35b   :  { %12945 = vmatprep.subr.bf16.mxu1 %v15793_v0  ;;  %v13081_v42 = vpack.c.bf16 %v10377_v41, %v10376_v40  ;;  %v10410_v40 = vld [vmem:[%s20605_s3 + $0x2e0] sm:$0xff]  ;;  %v10411_v41 = vld [vmem:[%s20605_s3 + $0x2e8] sm:$0xff] }
 0x35e   :  { %12947 = vmatpush3.bf16.msra.mxu1 %v12946_v43  ;;  %v10378_v43 = vld [vmem:[%s20605_s3 + $0x260] sm:$0xff] }
 0x35f   :  { %12948 = vmatprep.subr.bf16.mxu1 %v15793_v0  ;;  %v13084_v45 = vpack.c.bf16 %v10379_v44, %v10378_v43  ;;  %v10412_v43 = vld [vmem:[%s20605_s3 + $0x2f0] sm:$0xff]  ;;  %v10413_v44 = vld [vmem:[%s20605_s3 + $0x2f8] sm:$0xff] }
 0x362   :  { %12950 = vmatpush3.bf16.msra.mxu1 %v12949_v46  ;;  %v10380_v46 = vld [vmem:[%s20605_s3 + $0x270] sm:$0xff] }
 0x363   :  { %12951 = vmatprep.subr.bf16.mxu1 %v15793_v0  ;;  %v13087_v48 = vpack.c.bf16 %v10381_v47, %v10380_v46  ;;  %v10415_v46 = vld [vmem:[%s20604_s0 + $0x68] sm:$0xff]  ;;  %v10414_v47 = vld [vmem:[%s20604_s0 + $0x60] sm:$0xff] }
 0x366   :  { %12953 = vmatpush3.bf16.msra.mxu1 %v12952_v49  ;;  %v10383_v49 = vld [vmem:[%s20604_s0 + $0x58] sm:$0xff] }
 0x367   :  { %12954 = vmatprep.subr.bf16.mxu1 %v15793_v0 }
 0x36a   :  { %12956 = vmatpush3.bf16.msra.mxu1 %v12955_v52  ;;  %v10390_v52 = vld [vmem:[%s20604_s0 + $0x370] sm:$0xff] }
 0x36b   :  { %12984 = vmatprep.subr.bf16.mxu1 %v15793_v0 }
 0x370   :  { %v1162_v7 = vpop.f32.mrb[12].mxu1 }
 0x371   :  { %v1166_v8 = vmax.f32 %v1089_v5, %v1162_v7  ;;  %v1164_v9 = vpop.f32.mrb[13].mxu1 }
 0x373   :  { %v1167_v11 = vadd.f32 %v16156_v15, %v1166_v8 }
 0x375   :  { %v1168_v12 = vmax.f32 %v1167_v11, 0.0  ;;  %v10355_v11 = vld [vmem:[%s20604_s0 + $0x1d8] sm:$0xff] }
 0x377   :  { %11587 = vmatmul.mubr.f32.vlgmr.msra.gmra.mrb[14].mxu0 %v1168_v12  ;;  %v10362_v12 = vld [vmem:[%s20604_s0 + $0x4f0] sm:$0xff] }
 0x378   :  { %12854 = vmatpush1.bf16.msra.mxu0 %v15857_v4  ;;  %10325 = vmatprep.mubr.msk.f32.mxu0 %vm55_vm0, %v10323_v13 }
 0x379   :  { %12855 = vmatprep.subr.bf16.mxu0 %v15793_v0 }
 0x37c   :  { %12857 = vmatpush1.bf16.msra.mxu0 %v15864_v6 }
 0x37d   :  { %12858 = vmatprep.subr.bf16.mxu0 %v15793_v0 }
 0x380   :  { %12860 = vmatpush1.bf16.msra.mxu0 %v15879_v10 }
 0x381   :  { %12861 = vmatprep.subr.bf16.mxu0 %v15793_v0 }
 0x384   :  { %12863 = vmatpush1.bf16.msra.mxu0 %v15896_v14 }
 0x385   :  { %12864 = vmatprep.subr.bf16.mxu0 %v15793_v0 }
 0x388   :  { %12866 = vmatpush1.bf16.msra.mxu0 %v15908_v17 }
 0x389   :  { %12867 = vmatprep.subr.bf16.mxu0 %v15793_v0 }
 0x38c   :  { %12869 = vmatpush1.bf16.msra.mxu0 %v15920_v20 }
 0x38d   :  { %12870 = vmatprep.subr.bf16.mxu0 %v15793_v0 }
 0x390   :  { %12872 = vmatpush1.bf16.msra.mxu0 %v15932_v23 }
 0x391   :  { %12873 = vmatprep.subr.bf16.mxu0 %v15793_v0 }
 0x394   :  { %12875 = vmatpush1.bf16.msra.mxu0 %v15944_v26 }
 0x395   :  { %12876 = vmatprep.subr.bf16.mxu0 %v15793_v0 }
 0x396   :  { %v16584_v19 = vpop.f32.mrb[14].mxu1 }
 0x397   :  { %v1333_v21 = vpop.f32.mrb[15].mxu1 }
 0x398   :  { %12878 = vmatpush1.bf16.msra.mxu0 %v15956_v29  ;;  %v10368_v21 = vld [vmem:[%s20605_s3 + $0x210] sm:$0xff] }
 0x399   :  { %1377 = vmatprep.subr.mxu0 %v15794_v30  ;;  %v13069_v27 = vpack.c.bf16 %v10369_v24, %v10368_v21  ;;  %v10402_v24 = vld [vmem:[%s20605_s3 + $0x2a0] sm:$0xff] }
 0x39c   :  { %10324 = vmatpush1.msk.msra.mxu0 %vm59_vm1, %v15966_v31  ;;  %v10330_v31 = vld [vmem:[%s20604_s0 + $0x4e0] sm:$0xff] }
 0x39d   :  { %1406 = vmatmul.mubr.f32.vlgmr.msra.gmra.mrb[16].mxu0 %v10322_v1  ;;  %12906 = vmatprep.subr.bf16.mxu0 %v15793_v0 }
 0x39e   :  { %12908 = vmatpush1.bf16.msra.mxu0 %v15857_v4  ;;  %10333 = vmatprep.mubr.msk.f32.mxu0 %vm55_vm0, %v10331_v16 }
 0x39f   :  { %12909 = vmatprep.subr.bf16.mxu0 %v15793_v0 }
 0x3a2   :  { %12911 = vmatpush1.bf16.msra.mxu0 %v15864_v6 }
 0x3a3   :  { %12912 = vmatprep.subr.bf16.mxu0 %v15793_v0 }
 0x3a6   :  { %12914 = vmatpush1.bf16.msra.mxu0 %v15879_v10 }
 0x3a7   :  { %12915 = vmatprep.subr.bf16.mxu0 %v15793_v0 }
 0x3aa   :  { %12917 = vmatpush1.bf16.msra.mxu0 %v15896_v14 }
 0x3ab   :  { %12918 = vmatprep.subr.bf16.mxu0 %v15793_v0 }
 0x3ae   :  { %12920 = vmatpush1.bf16.msra.mxu0 %v15908_v17 }
 0x3af   :  { %12921 = vmatprep.subr.bf16.mxu0 %v15793_v0 }
 0x3b2   :  { %12923 = vmatpush1.bf16.msra.mxu0 %v15920_v20 }
 0x3b3   :  { %12924 = vmatprep.subr.bf16.mxu0 %v15793_v0 }
 0x3b6   :  { %12926 = vmatpush1.bf16.msra.mxu0 %v15932_v23 }
 0x3b7   :  { %12927 = vmatprep.subr.bf16.mxu0 %v15793_v0 }
 0x3ba   :  { %12929 = vmatpush1.bf16.msra.mxu0 %v15944_v26 }
 0x3bb   :  { %12930 = vmatprep.subr.bf16.mxu0 %v15793_v0 }
 0x3bc   :  { %v16602_v22 = vpop.f32.mrb[16].mxu1 }
 0x3bd   :  { %v1486_v33 = vpop.f32.mrb[17].mxu1 }
 0x3be   :  { %12932 = vmatpush1.bf16.msra.mxu0 %v15956_v29  ;;  %v13072_v33 = vpack.c.bf16 %v10371_v32, %v10370_v28  ;;  %v10404_v28 = vld [vmem:[%s20605_s3 + $0x2b0] sm:$0xff]  ;;  %v10405_v32 = vld [vmem:[%s20605_s3 + $0x2b8] sm:$0xff] }
 0x3bf   :  { %1531 = vmatprep.subr.mxu0 %v15794_v30 }
 0x3c2   :  { %10332 = vmatpush1.msk.msra.mxu0 %vm59_vm1, %v16574_v18 }
 0x3c3   :  { %1560 = vmatmul.mubr.f32.vlgmr.msra.gmra.mrb[18].mxu0 %v10330_v31  ;;  %12957 = vmatprep.subr.bf16.mxu0 %v15793_v0  ;;  %v10366_v31 = vld [vmem:[%s20605_s3 + $0x200] sm:$0xff] }
 0x3c4   :  { %12959 = vmatpush1.bf16.msra.mxu0 %v15857_v4  ;;  %10353 = vmatprep.mubr.msk.f32.mxu0 %vm55_vm0, %v10351_v53 }
 0x3c5   :  { %12960 = vmatprep.subr.bf16.mxu0 %v15793_v0 }
 0x3c8   :  { %12962 = vmatpush1.bf16.msra.mxu0 %v15864_v6 }
 0x3c9   :  { %12963 = vmatprep.subr.bf16.mxu0 %v15793_v0 }
 0x3cc   :  { %12965 = vmatpush1.bf16.msra.mxu0 %v15879_v10 }
 0x3cd   :  { %12966 = vmatprep.subr.bf16.mxu0 %v15793_v0 }
 0x3d0   :  { %12968 = vmatpush1.bf16.msra.mxu0 %v15896_v14 }
 0x3d1   :  { %12969 = vmatprep.subr.bf16.mxu0 %v15793_v0 }
 0x3d4   :  { %12971 = vmatpush1.bf16.msra.mxu0 %v15908_v17 }
 0x3d5   :  { %12972 = vmatprep.subr.bf16.mxu0 %v15793_v0 }
 0x3d8   :  { %12974 = vmatpush1.bf16.msra.mxu0 %v15920_v20 }
 0x3d9   :  { %12975 = vmatprep.subr.bf16.mxu0 %v15793_v0 }
 0x3dc   :  { %12977 = vmatpush1.bf16.msra.mxu0 %v15932_v23 }
 0x3dd   :  { %12978 = vmatprep.subr.bf16.mxu0 %v15793_v0 }
 0x3e0   :  { %12980 = vmatpush1.bf16.msra.mxu0 %v15944_v26 }
 0x3e1   :  { %12981 = vmatprep.subr.bf16.mxu0 %v15793_v0 }
 0x3e4   :  { %12983 = vmatpush1.bf16.msra.mxu0 %v15956_v29 }
 0x3e5   :  { %1700 = vmatprep.subr.mxu0 %v15794_v30 }
 0x3e8   :  { %10352 = vmatpush1.msk.msra.mxu0 %vm59_vm1, %v16574_v18 }
 0x3e9   :  { %13011 = vmatprep.subr.bf16.mxu0 %v15793_v0  ;;  %1729 = vmatmul.mubr.f32.vlgmr.msra.gmra.mrb[20].mxu0 %v10350_v54 }
 0x3ea   :  { %13013 = vmatpush1.bf16.msra.mxu0 %v15857_v4  ;;  %10361 = vmatprep.mubr.msk.f32.mxu0 %vm55_vm0, %v10359_v55 }
 0x3eb   :  { %13014 = vmatprep.subr.bf16.mxu0 %v15793_v0 }
 0x3ee   :  { %13016 = vmatpush1.bf16.msra.mxu0 %v15864_v6 }
 0x3ef   :  { %13017 = vmatprep.subr.bf16.mxu0 %v15793_v0 }
 0x3f2   :  { %13019 = vmatpush1.bf16.msra.mxu0 %v15879_v10 }
 0x3f3   :  { %13020 = vmatprep.subr.bf16.mxu0 %v15793_v0 }
 0x3f6   :  { %13022 = vmatpush1.bf16.msra.mxu0 %v15896_v14 }
 0x3f7   :  { %13023 = vmatprep.subr.bf16.mxu0 %v15793_v0 }
 0x3fa   :  { %13025 = vmatpush1.bf16.msra.mxu0 %v15908_v17 }
 0x3fb   :  { %13026 = vmatprep.subr.bf16.mxu0 %v15793_v0 }
 0x3fe   :  { %13028 = vmatpush1.bf16.msra.mxu0 %v15920_v20 }
 0x3ff   :  { %13029 = vmatprep.subr.bf16.mxu0 %v15793_v0 }
 0x402   :  { %13031 = vmatpush1.bf16.msra.mxu0 %v15932_v23 }
 0x403   :  { %13032 = vmatprep.subr.bf16.mxu0 %v15793_v0 }
 0x406   :  { %13034 = vmatpush1.bf16.msra.mxu0 %v15944_v26 }
 0x407   :  { %13035 = vmatprep.subr.bf16.mxu0 %v15793_v0 }
 0x40a   :  { %13037 = vmatpush1.bf16.msra.mxu0 %v15956_v29 }
 0x40b   :  { %1853 = vmatprep.subr.mxu0 %v15794_v30 }
 0x40e   :  { %10360 = vmatpush1.msk.msra.mxu0 %vm59_vm1, %v16574_v18 }
 0x40f   :  { %1882 = vmatmul.mubr.f32.vlgmr.msra.gmra.mrb[22].mxu0 %v10358_v56  ;;  %13065 = vmatprep.subr.bf16.mxu0 %v15793_v0 }
 0x410   :  { %11656 = vmatprep.mubr.msk.f32.mxu0 %vm15795_vm2, %v15794_v30 }
 0x44a   :  { %v1253_v57 = vpop.f32.mrb[14].mxu0 }
 0x44b   :  { %v16698_v58 = vadd.f32 %v1253_v57, %v16513_v61  ;;  %v11588_v59 = vpop.f32.mrb[15].mxu0  ;;  %v10363_v61 = vld [vmem:[%s20604_s0 + $0x4f8] sm:$0xff] }
 0x470   :  { %v1407_v60 = vpop.f32.mrb[16].mxu0 }
 0x471   :  { %v1411_v62 = vmax.f32 %v16584_v19, %v1407_v60  ;;  %v1409_v63 = vpop.f32.mrb[17].mxu0  ;;  %v10367_v19 = vld [vmem:[%s20605_s3 + $0x208] sm:$0xff] }
 0x473   :  { %v1488_v2 = vmax.f32 %v1411_v62, %v16602_v22  ;;  %v13066_v22 = vpack.c.bf16 %v10367_v19, %v10366_v31  ;;  %v10401_v19 = vld [vmem:[%s20605_s3 + $0x298] sm:$0xff] }
 0x475   :  { %13067 = vmatpush3.bf16.msra.mxu0 %v13066_v22 }
 0x476   :  { %13068 = vmatprep.subr.bf16.mxu0 %v15793_v0 }
 0x479   :  { %13070 = vmatpush3.bf16.msra.mxu0 %v13069_v27 }
 0x47a   :  { %13071 = vmatprep.subr.bf16.mxu0 %v15793_v0 }
 0x47d   :  { %13073 = vmatpush3.bf16.msra.mxu0 %v13072_v33  ;;  %v13207_v33 = vpack.c.bf16 %v10405_v32, %v10404_v28  ;;  %v10439_v28 = vld [vmem:[%s20605_s3 + $0x348] sm:$0xff] }
 0x47e   :  { %13074 = vmatprep.subr.bf16.mxu0 %v15793_v0 }
 0x481   :  { %13076 = vmatpush3.bf16.msra.mxu0 %v13075_v36  ;;  %v13210_v36 = vpack.c.bf16 %v10407_v35, %v10406_v34  ;;  %v10441_v34 = vld [vmem:[%s20605_s3 + $0x358] sm:$0xff] }
 0x482   :  { %13077 = vmatprep.subr.bf16.mxu0 %v15793_v0 }
 0x485   :  { %13079 = vmatpush3.bf16.msra.mxu0 %v13078_v39  ;;  %v13213_v39 = vpack.c.bf16 %v10409_v38, %v10408_v37  ;;  %v10443_v37 = vld [vmem:[%s20605_s3 + $0x368] sm:$0xff] }
 0x486   :  { %13080 = vmatprep.subr.bf16.mxu0 %v15793_v0 }
 0x489   :  { %13082 = vmatpush3.bf16.msra.mxu0 %v13081_v42  ;;  %v13216_v42 = vpack.c.bf16 %v10411_v41, %v10410_v40  ;;  %v10445_v40 = vld [vmem:[%s20605_s3 + $0x378] sm:$0xff] }
 0x48a   :  { %13083 = vmatprep.subr.bf16.mxu0 %v15793_v0 }
 0x48d   :  { %13085 = vmatpush3.bf16.msra.mxu0 %v13084_v45  ;;  %v13219_v45 = vpack.c.bf16 %v10413_v44, %v10412_v43  ;;  %v10446_v43 = vld [vmem:[%s20604_s0 + $0x70] sm:$0xff]  ;;  %v10455_v44 = vld [vmem:[%s20604_s0 + $0x398] sm:$0xff] }
 0x48e   :  { %13086 = vmatprep.subr.bf16.mxu0 %v15793_v0 }
 0x491   :  { %13088 = vmatpush3.bf16.msra.mxu0 %v13087_v48  ;;  %v10423_v48 = vld [vmem:[%s20604_s0 + $0x388] sm:$0xff] }
 0x492   :  { %13116 = vmatprep.subr.bf16.mxu0 %v15793_v0 }
 0x496   :  { %v1561_v3 = vpop.f32.mrb[18].mxu0 }
 0x497   :  { %v1565_v5 = vmax.f32 %v1488_v2, %v1561_v3  ;;  %v1563_v7 = vpop.f32.mrb[19].mxu0  ;;  %v16885_v3 = vld [vmem:[%s20606_s2] ss:$0 sm:$0xff] }
 0x499   :  { %v1566_v8 = vadd.f32 %v16156_v15, %v1565_v5  ;;  %v10354_v15 = vld [vmem:[%s20604_s0 + $0x1d0] sm:$0xff] }
 0x49b   :  { %v1567_v9 = vmax.f32 %v1566_v8, 0.0  ;;  %v10386_v8 = vld [vmem:[%s20604_s0 + $0x1e0] sm:$0xff] }
 0x49d   :  { %11622 = vmatmul.mubr.f32.vlgmr.msra.gmra.mrb[18].mxu1 %v1567_v9  ;;  %v10395_v9 = vld [vmem:[%s20604_s0 + $0x508] sm:$0xff] }
 0x49e   :  { %12986 = vmatpush1.bf16.msra.mxu1 %v15857_v4  ;;  %10357 = vmatprep.mubr.msk.f32.mxu1 %vm55_vm0, %v10355_v11  ;;  %v10394_v11 = vld [vmem:[%s20604_s0 + $0x500] sm:$0xff] }
 0x49f   :  { %12987 = vmatprep.subr.bf16.mxu1 %v15793_v0 }
 0x4a2   :  { %12989 = vmatpush1.bf16.msra.mxu1 %v15864_v6 }
 0x4a3   :  { %12990 = vmatprep.subr.bf16.mxu1 %v15793_v0 }
 0x4a6   :  { %12992 = vmatpush1.bf16.msra.mxu1 %v15879_v10 }
 0x4a7   :  { %12993 = vmatprep.subr.bf16.mxu1 %v15793_v0 }
 0x4aa   :  { %12995 = vmatpush1.bf16.msra.mxu1 %v15896_v14 }
 0x4ab   :  { %12996 = vmatprep.subr.bf16.mxu1 %v15793_v0 }
 0x4ae   :  { %12998 = vmatpush1.bf16.msra.mxu1 %v15908_v17 }
 0x4af   :  { %12999 = vmatprep.subr.bf16.mxu1 %v15793_v0 }
 0x4b2   :  { %13001 = vmatpush1.bf16.msra.mxu1 %v15920_v20 }
 0x4b3   :  { %13002 = vmatprep.subr.bf16.mxu1 %v15793_v0 }
 0x4b6   :  { %13004 = vmatpush1.bf16.msra.mxu1 %v15932_v23 }
 0x4b7   :  { %13005 = vmatprep.subr.bf16.mxu1 %v15793_v0 }
 0x4ba   :  { %13007 = vmatpush1.bf16.msra.mxu1 %v15944_v26 }
 0x4bb   :  { %13008 = vmatprep.subr.bf16.mxu1 %v15793_v0 }
 0x4bc   :  { %v16764_v13 = vpop.f32.mrb[20].mxu0 }
 0x4bd   :  { %v1732_v1 = vpop.f32.mrb[21].mxu0 }
 0x4be   :  { %13010 = vmatpush1.bf16.msra.mxu1 %v15956_v29  ;;  %v10399_v1 = vld [vmem:[%s20605_s3 + $0x288] sm:$0xff] }
 0x4bf   :  { %1776 = vmatprep.subr.mxu1 %v15794_v30 }
 0x4c2   :  { %10356 = vmatpush1.msk.msra.mxu1 %vm59_vm1, %v16574_v18 }
 0x4c3   :  { %1805 = vmatmul.mubr.f32.vlgmr.msra.gmra.mrb[20].mxu1 %v10354_v15  ;;  %13038 = vmatprep.subr.bf16.mxu1 %v15793_v0 }
 0x4c4   :  { %13040 = vmatpush1.bf16.msra.mxu1 %v15857_v4  ;;  %10365 = vmatprep.mubr.msk.f32.mxu1 %vm55_vm0, %v10363_v61 }
 0x4c5   :  { %13041 = vmatprep.subr.bf16.mxu1 %v15793_v0 }
 0x4c8   :  { %13043 = vmatpush1.bf16.msra.mxu1 %v15864_v6 }
 0x4c9   :  { %13044 = vmatprep.subr.bf16.mxu1 %v15793_v0 }
 0x4cc   :  { %13046 = vmatpush1.bf16.msra.mxu1 %v15879_v10 }
 0x4cd   :  { %13047 = vmatprep.subr.bf16.mxu1 %v15793_v0 }
 0x4d0   :  { %13049 = vmatpush1.bf16.msra.mxu1 %v15896_v14 }
 0x4d1   :  { %13050 = vmatprep.subr.bf16.mxu1 %v15793_v0 }
 0x4d4   :  { %13052 = vmatpush1.bf16.msra.mxu1 %v15908_v17 }
 0x4d5   :  { %13053 = vmatprep.subr.bf16.mxu1 %v15793_v0 }
 0x4d8   :  { %13055 = vmatpush1.bf16.msra.mxu1 %v15920_v20 }
 0x4d9   :  { %13056 = vmatprep.subr.bf16.mxu1 %v15793_v0 }
 0x4dc   :  { %13058 = vmatpush1.bf16.msra.mxu1 %v15932_v23 }
 0x4dd   :  { %13059 = vmatprep.subr.bf16.mxu1 %v15793_v0 }
 0x4e0   :  { %13061 = vmatpush1.bf16.msra.mxu1 %v15944_v26 }
 0x4e1   :  { %13062 = vmatprep.subr.bf16.mxu1 %v15793_v0 }
 0x4e2   :  { %v16782_v16 = vpop.f32.mrb[22].mxu0 }
 0x4e3   :  { %v1885_v25 = vpop.f32.mrb[23].mxu0 }
 0x4e4   :  { %13064 = vmatpush1.bf16.msra.mxu1 %v15956_v29  ;;  %v10403_v25 = vld [vmem:[%s20605_s3 + $0x2a8] sm:$0xff] }
 0x4e5   :  { %1930 = vmatprep.subr.mxu1 %v15794_v30  ;;  %v13204_v27 = vpack.c.bf16 %v10403_v25, %v10402_v24  ;;  %v10437_v24 = vld [vmem:[%s20605_s3 + $0x338] sm:$0xff] }
 0x4e8   :  { %10364 = vmatpush1.msk.msra.mxu1 %vm59_vm1, %v16574_v18 }
 0x4e9   :  { %1959 = vmatmul.mubr.f32.vlgmr.msra.gmra.mrb[22].mxu1 %v10362_v12  ;;  %13089 = vmatprep.subr.bf16.mxu1 %v15793_v0 }
 0x4ea   :  { %13091 = vmatpush1.bf16.msra.mxu1 %v15857_v4  ;;  %10385 = vmatprep.mubr.msk.f32.mxu1 %vm55_vm0, %v10383_v49  ;;  %v10422_v49 = vld [vmem:[%s20604_s0 + $0x380] sm:$0xff] }
 0x4eb   :  { %13092 = vmatprep.subr.bf16.mxu1 %v15793_v0 }
 0x4ee   :  { %13094 = vmatpush1.bf16.msra.mxu1 %v15864_v6 }
 0x4ef   :  { %13095 = vmatprep.subr.bf16.mxu1 %v15793_v0 }
 0x4f2   :  { %13097 = vmatpush1.bf16.msra.mxu1 %v15879_v10 }
 0x4f3   :  { %13098 = vmatprep.subr.bf16.mxu1 %v15793_v0 }
 0x4f6   :  { %13100 = vmatpush1.bf16.msra.mxu1 %v15896_v14 }
 0x4f7   :  { %13101 = vmatprep.subr.bf16.mxu1 %v15793_v0 }
 0x4fa   :  { %13103 = vmatpush1.bf16.msra.mxu1 %v15908_v17 }
 0x4fb   :  { %13104 = vmatprep.subr.bf16.mxu1 %v15793_v0 }
 0x4fe   :  { %13106 = vmatpush1.bf16.msra.mxu1 %v15920_v20 }
 0x4ff   :  { %13107 = vmatprep.subr.bf16.mxu1 %v15793_v0 }
 0x502   :  { %13109 = vmatpush1.bf16.msra.mxu1 %v15932_v23 }
 0x503   :  { %13110 = vmatprep.subr.bf16.mxu1 %v15793_v0 }
 0x506   :  { %13112 = vmatpush1.bf16.msra.mxu1 %v15944_v26 }
 0x507   :  { %13113 = vmatprep.subr.bf16.mxu1 %v15793_v0 }
 0x50a   :  { %13115 = vmatpush1.bf16.msra.mxu1 %v15956_v29 }
 0x50b   :  { %2099 = vmatprep.subr.mxu1 %v15794_v30 }
 0x50e   :  { %10384 = vmatpush1.msk.msra.mxu1 %vm59_vm1, %v16574_v18 }
 0x50f   :  { %13143 = vmatprep.subr.bf16.mxu1 %v15793_v0  ;;  %2128 = vmatmul.mubr.f32.vlgmr.msra.gmra.mrb[24].mxu1 %v10382_v50 }
 0x510   :  { %13145 = vmatpush1.bf16.msra.mxu1 %v15857_v4  ;;  %10393 = vmatprep.mubr.msk.f32.mxu1 %vm55_vm0, %v10391_v51 }
 0x511   :  { %13146 = vmatprep.subr.bf16.mxu1 %v15793_v0 }
 0x514   :  { %13148 = vmatpush1.bf16.msra.mxu1 %v15864_v6 }
 0x515   :  { %13149 = vmatprep.subr.bf16.mxu1 %v15793_v0 }
 0x518   :  { %13151 = vmatpush1.bf16.msra.mxu1 %v15879_v10 }
 0x519   :  { %13152 = vmatprep.subr.bf16.mxu1 %v15793_v0 }
 0x51c   :  { %13154 = vmatpush1.bf16.msra.mxu1 %v15896_v14 }
 0x51d   :  { %13155 = vmatprep.subr.bf16.mxu1 %v15793_v0 }
 0x520   :  { %13157 = vmatpush1.bf16.msra.mxu1 %v15908_v17 }
 0x521   :  { %13158 = vmatprep.subr.bf16.mxu1 %v15793_v0 }
 0x524   :  { %13160 = vmatpush1.bf16.msra.mxu1 %v15920_v20 }
 0x525   :  { %13161 = vmatprep.subr.bf16.mxu1 %v15793_v0 }
 0x528   :  { %13163 = vmatpush1.bf16.msra.mxu1 %v15932_v23 }
 0x529   :  { %13164 = vmatprep.subr.bf16.mxu1 %v15793_v0 }
 0x52c   :  { %13166 = vmatpush1.bf16.msra.mxu1 %v15944_v26 }
 0x52d   :  { %13167 = vmatprep.subr.bf16.mxu1 %v15793_v0 }
 0x530   :  { %13169 = vmatpush1.bf16.msra.mxu1 %v15956_v29 }
 0x531   :  { %2252 = vmatprep.subr.mxu1 %v15794_v30 }
 0x534   :  { %10392 = vmatpush1.msk.msra.mxu1 %vm59_vm1, %v16574_v18 }
 0x535   :  { %2281 = vmatmul.mubr.f32.vlgmr.msra.gmra.mrb[26].mxu1 %v10390_v52  ;;  %13197 = vmatprep.subr.bf16.mxu1 %v15793_v0 }
 0x536   :  { %11691 = vmatprep.mubr.msk.f32.mxu1 %vm15795_vm2, %v15794_v30 }
 0x570   :  { %v1652_v53 = vpop.f32.mrb[18].mxu1 }
 0x571   :  { %v16878_v54 = vadd.f32 %v1652_v53, %v16698_v58  ;;  %v11623_v55 = vpop.f32.mrb[19].mxu1  ;;  %v10387_v58 = vld [vmem:[%s20604_s0 + $0x1e8] sm:$0xff] }
 0x596   :  { %v1806_v56 = vpop.f32.mrb[20].mxu1 }
 0x597   :  { %v1810_v57 = vmax.f32 %v16764_v13, %v1806_v56  ;;  %v1808_v59 = vpop.f32.mrb[21].mxu1  ;;  %v10398_v13 = vld [vmem:[%s20605_s3 + $0x280] sm:$0xff] }
 0x598   :  { %v13198_v31 = vpack.c.bf16 %v10399_v1, %v10398_v13 }
 0x599   :  { %v1887_v60 = vmax.f32 %v1810_v57, %v16782_v16  ;;  %v10400_v16 = vld [vmem:[%s20605_s3 + $0x290] sm:$0xff] }
 0x59a   :  { %13199 = vmatpush3.bf16.msra.mxu1 %v13198_v31  ;;  %v13201_v22 = vpack.c.bf16 %v10401_v19, %v10400_v16  ;;  %v10434_v31 = vld [vmem:[%s20605_s3 + $0x320] sm:$0xff]  ;;  %v10435_v19 = vld [vmem:[%s20605_s3 + $0x328] sm:$0xff] }
 0x59b   :  { %13200 = vmatprep.subr.bf16.mxu1 %v15793_v0 }
 0x59e   :  { %13202 = vmatpush3.bf16.msra.mxu1 %v13201_v22  ;;  %v10436_v22 = vld [vmem:[%s20605_s3 + $0x330] sm:$0xff] }
 0x59f   :  { %13203 = vmatprep.subr.bf16.mxu1 %v15793_v0  ;;  %v13339_v25 = vpack.c.bf16 %v10437_v24, %v10436_v22  ;;  %v10470_v22 = vld [vmem:[%s20605_s3 + $0x3c0] sm:$0xff]  ;;  %v10471_v24 = vld [vmem:[%s20605_s3 + $0x3c8] sm:$0xff] }
 0x5a2   :  { %13205 = vmatpush3.bf16.msra.mxu1 %v13204_v27  ;;  %v10438_v27 = vld [vmem:[%s20605_s3 + $0x340] sm:$0xff] }
 0x5a3   :  { %13206 = vmatprep.subr.bf16.mxu1 %v15793_v0  ;;  %v13342_v32 = vpack.c.bf16 %v10439_v28, %v10438_v27  ;;  %v10472_v27 = vld [vmem:[%s20605_s3 + $0x3d0] sm:$0xff]  ;;  %v10473_v28 = vld [vmem:[%s20605_s3 + $0x3d8] sm:$0xff] }
 0x5a6   :  { %13208 = vmatpush3.bf16.msra.mxu1 %v13207_v33  ;;  %v10440_v33 = vld [vmem:[%s20605_s3 + $0x350] sm:$0xff] }
 0x5a7   :  { %13209 = vmatprep.subr.bf16.mxu1 %v15793_v0  ;;  %v13345_v35 = vpack.c.bf16 %v10441_v34, %v10440_v33  ;;  %v10474_v33 = vld [vmem:[%s20605_s3 + $0x3e0] sm:$0xff]  ;;  %v10475_v34 = vld [vmem:[%s20605_s3 + $0x3e8] sm:$0xff] }
 0x5aa   :  { %13211 = vmatpush3.bf16.msra.mxu1 %v13210_v36  ;;  %v10442_v36 = vld [vmem:[%s20605_s3 + $0x360] sm:$0xff] }
 0x5ab   :  { %13212 = vmatprep.subr.bf16.mxu1 %v15793_v0  ;;  %v13348_v38 = vpack.c.bf16 %v10443_v37, %v10442_v36  ;;  %v10476_v36 = vld [vmem:[%s20605_s3 + $0x3f0] sm:$0xff]  ;;  %v10477_v37 = vld [vmem:[%s20605_s3 + $0x3f8] sm:$0xff] }
 0x5ae   :  { %13214 = vmatpush3.bf16.msra.mxu1 %v13213_v39  ;;  %v10444_v39 = vld [vmem:[%s20605_s3 + $0x370] sm:$0xff] }
 0x5af   :  { %13215 = vmatprep.subr.bf16.mxu1 %v15793_v0  ;;  %v13351_v41 = vpack.c.bf16 %v10445_v40, %v10444_v39  ;;  %v10479_v39 = vld [vmem:[%s20604_s0 + $0x88] sm:$0xff]  ;;  %v10478_v40 = vld [vmem:[%s20604_s0 + $0x80] sm:$0xff] }
 0x5b2   :  { %13217 = vmatpush3.bf16.msra.mxu1 %v13216_v42  ;;  %v10447_v42 = vld [vmem:[%s20604_s0 + $0x78] sm:$0xff] }
 0x5b3   :  { %13218 = vmatprep.subr.bf16.mxu1 %v15793_v0 }
 0x5b6   :  { %13220 = vmatpush3.bf16.msra.mxu1 %v13219_v45  ;;  %v10454_v45 = vld [vmem:[%s20604_s0 + $0x390] sm:$0xff] }
 0x5b7   :  { %13248 = vmatprep.subr.bf16.mxu1 %v15793_v0 }
 0x5bc   :  { %v1960_v62 = vpop.f32.mrb[22].mxu1 }
 0x5bd   :  { %v1964_v63 = vmax.f32 %v1887_v60, %v1960_v62  ;;  %v1962_v2 = vpop.f32.mrb[23].mxu1 }
 0x5bf   :  { %v1965_v5 = vadd.f32 %v16885_v3, %v1964_v63 }
 0x5c1   :  { %v1966_v7 = vmax.f32 %v1965_v5, 0.0  ;;  %v10419_v5 = vld [vmem:[%s20604_s0 + $0x1f8] sm:$0xff] }
 0x5c3   :  { %11657 = vmatmul.mubr.f32.vlgmr.msra.gmra.mrb[24].mxu0 %v1966_v7  ;;  %v10427_v7 = vld [vmem:[%s20604_s0 + $0x518] sm:$0xff] }
 0x5c4   :  { %13118 = vmatpush1.bf16.msra.mxu0 %v15857_v4  ;;  %10389 = vmatprep.mubr.msk.f32.mxu0 %vm55_vm0, %v10387_v58  ;;  %v10426_v58 = vld [vmem:[%s20604_s0 + $0x510] sm:$0xff] }
 0x5c5   :  { %13119 = vmatprep.subr.bf16.mxu0 %v15793_v0 }
 0x5c8   :  { %13121 = vmatpush1.bf16.msra.mxu0 %v15864_v6 }
 0x5c9   :  { %13122 = vmatprep.subr.bf16.mxu0 %v15793_v0 }
 0x5cc   :  { %13124 = vmatpush1.bf16.msra.mxu0 %v15879_v10 }
 0x5cd   :  { %13125 = vmatprep.subr.bf16.mxu0 %v15793_v0 }
 0x5d0   :  { %13127 = vmatpush1.bf16.msra.mxu0 %v15896_v14 }
 0x5d1   :  { %13128 = vmatprep.subr.bf16.mxu0 %v15793_v0 }
 0x5d4   :  { %13130 = vmatpush1.bf16.msra.mxu0 %v15908_v17 }
 0x5d5   :  { %13131 = vmatprep.subr.bf16.mxu0 %v15793_v0 }
 0x5d8   :  { %13133 = vmatpush1.bf16.msra.mxu0 %v15920_v20 }
 0x5d9   :  { %13134 = vmatprep.subr.bf16.mxu0 %v15793_v0 }
 0x5dc   :  { %13136 = vmatpush1.bf16.msra.mxu0 %v15932_v23 }
 0x5dd   :  { %13137 = vmatprep.subr.bf16.mxu0 %v15793_v0 }
 0x5e0   :  { %13139 = vmatpush1.bf16.msra.mxu0 %v15944_v26 }
 0x5e1   :  { %13140 = vmatprep.subr.bf16.mxu0 %v15793_v0 }
 0x5e2   :  { %v16949_v15 = vpop.f32.mrb[24].mxu1 }
 0x5e3   :  { %v2131_v61 = vpop.f32.mrb[25].mxu1 }
 0x5e4   :  { %13142 = vmatpush1.bf16.msra.mxu0 %v15956_v29  ;;  %v10431_v61 = vld [vmem:[%s20605_s3 + $0x308] sm:$0xff] }
 0x5e5   :  { %2175 = vmatprep.subr.mxu0 %v15794_v30 }
 0x5e8   :  { %10388 = vmatpush1.msk.msra.mxu0 %vm59_vm1, %v16574_v18 }
 0x5e9   :  { %2204 = vmatmul.mubr.f32.vlgmr.msra.gmra.mrb[26].mxu0 %v10386_v8  ;;  %13170 = vmatprep.subr.bf16.mxu0 %v15793_v0 }
 0x5ea   :  { %13172 = vmatpush1.bf16.msra.mxu0 %v15857_v4  ;;  %10397 = vmatprep.mubr.msk.f32.mxu0 %vm55_vm0, %v10395_v9 }
 0x5eb   :  { %13173 = vmatprep.subr.bf16.mxu0 %v15793_v0 }
 0x5ee   :  { %13175 = vmatpush1.bf16.msra.mxu0 %v15864_v6 }
 0x5ef   :  { %13176 = vmatprep.subr.bf16.mxu0 %v15793_v0 }
 0x5f2   :  { %13178 = vmatpush1.bf16.msra.mxu0 %v15879_v10 }
 0x5f3   :  { %13179 = vmatprep.subr.bf16.mxu0 %v15793_v0 }
 0x5f6   :  { %13181 = vmatpush1.bf16.msra.mxu0 %v15896_v14 }
 0x5f7   :  { %13182 = vmatprep.subr.bf16.mxu0 %v15793_v0 }
 0x5fa   :  { %13184 = vmatpush1.bf16.msra.mxu0 %v15908_v17 }
 0x5fb   :  { %13185 = vmatprep.subr.bf16.mxu0 %v15793_v0 }
 0x5fe   :  { %13187 = vmatpush1.bf16.msra.mxu0 %v15920_v20 }
 0x5ff   :  { %13188 = vmatprep.subr.bf16.mxu0 %v15793_v0 }
 0x602   :  { %13190 = vmatpush1.bf16.msra.mxu0 %v15932_v23 }
 0x603   :  { %13191 = vmatprep.subr.bf16.mxu0 %v15793_v0 }
 0x606   :  { %13193 = vmatpush1.bf16.msra.mxu0 %v15944_v26 }
 0x607   :  { %13194 = vmatprep.subr.bf16.mxu0 %v15793_v0 }
 0x608   :  { %v16967_v12 = vpop.f32.mrb[26].mxu1 }
 0x609   :  { %v2284_v21 = vpop.f32.mrb[27].mxu1 }
 0x60a   :  { %13196 = vmatpush1.bf16.msra.mxu0 %v15956_v29  ;;  %v13336_v21 = vpack.c.bf16 %v10435_v19, %v10434_v31  ;;  %v10468_v31 = vld [vmem:[%s20605_s3 + $0x3b0] sm:$0xff]  ;;  %v10469_v19 = vld [vmem:[%s20605_s3 + $0x3b8] sm:$0xff] }
 0x60b   :  { %2329 = vmatprep.subr.mxu0 %v15794_v30 }
 0x60e   :  { %10396 = vmatpush1.msk.msra.mxu0 %vm59_vm1, %v16574_v18 }
 0x60f   :  { %2358 = vmatmul.mubr.f32.vlgmr.msra.gmra.mrb[28].mxu0 %v10394_v11  ;;  %13221 = vmatprep.subr.bf16.mxu0 %v15793_v0 }
 0x610   :  { %13223 = vmatpush1.bf16.msra.mxu0 %v15857_v4  ;;  %10417 = vmatprep.mubr.msk.f32.mxu0 %vm55_vm0, %v10415_v46  ;;  %v17240_v46 = vld [vmem:[%s20603_s1 + $0x90] sm:$0x3f] }
 0x611   :  { %13224 = vmatprep.subr.bf16.mxu0 %v15793_v0 }
 0x614   :  { %13226 = vmatpush1.bf16.msra.mxu0 %v15864_v6 }
 0x615   :  { %13227 = vmatprep.subr.bf16.mxu0 %v15793_v0 }
 0x618   :  { %13229 = vmatpush1.bf16.msra.mxu0 %v15879_v10 }
 0x619   :  { %13230 = vmatprep.subr.bf16.mxu0 %v15793_v0 }
 0x61c   :  { %13232 = vmatpush1.bf16.msra.mxu0 %v15896_v14 }
 0x61d   :  { %13233 = vmatprep.subr.bf16.mxu0 %v15793_v0 }
 0x620   :  { %13235 = vmatpush1.bf16.msra.mxu0 %v15908_v17 }
 0x621   :  { %13236 = vmatprep.subr.bf16.mxu0 %v15793_v0 }
 0x624   :  { %13238 = vmatpush1.bf16.msra.mxu0 %v15920_v20 }
 0x625   :  { %13239 = vmatprep.subr.bf16.mxu0 %v15793_v0 }
 0x628   :  { %13241 = vmatpush1.bf16.msra.mxu0 %v15932_v23 }
 0x629   :  { %13242 = vmatprep.subr.bf16.mxu0 %v15793_v0 }
 0x62c   :  { %13244 = vmatpush1.bf16.msra.mxu0 %v15944_v26 }
 0x62d   :  { %13245 = vmatprep.subr.bf16.mxu0 %v15793_v0 }
 0x630   :  { %13247 = vmatpush1.bf16.msra.mxu0 %v15956_v29 }
 0x631   :  { %2498 = vmatprep.subr.mxu0 %v15794_v30 }
 0x634   :  { %10416 = vmatpush1.msk.msra.mxu0 %vm59_vm1, %v16574_v18 }
 0x635   :  { %13275 = vmatprep.subr.bf16.mxu0 %v15793_v0  ;;  %2527 = vmatmul.mubr.f32.vlgmr.msra.gmra.mrb[30].mxu0 %v10414_v47 }
 0x636   :  { %13277 = vmatpush1.bf16.msra.mxu0 %v15857_v4  ;;  %10425 = vmatprep.mubr.msk.f32.mxu0 %vm55_vm0, %v10423_v48 }
 0x637   :  { %13278 = vmatprep.subr.bf16.mxu0 %v15793_v0 }
 0x63a   :  { %13280 = vmatpush1.bf16.msra.mxu0 %v15864_v6 }
 0x63b   :  { %13281 = vmatprep.subr.bf16.mxu0 %v15793_v0 }
 0x63e   :  { %13283 = vmatpush1.bf16.msra.mxu0 %v15879_v10 }
 0x63f   :  { %13284 = vmatprep.subr.bf16.mxu0 %v15793_v0 }
 0x642   :  { %13286 = vmatpush1.bf16.msra.mxu0 %v15896_v14 }
 0x643   :  { %13287 = vmatprep.subr.bf16.mxu0 %v15793_v0 }
 0x646   :  { %13289 = vmatpush1.bf16.msra.mxu0 %v15908_v17 }
 0x647   :  { %13290 = vmatprep.subr.bf16.mxu0 %v15793_v0 }
 0x64a   :  { %13292 = vmatpush1.bf16.msra.mxu0 %v15920_v20 }
 0x64b   :  { %13293 = vmatprep.subr.bf16.mxu0 %v15793_v0 }
 0x64e   :  { %13295 = vmatpush1.bf16.msra.mxu0 %v15932_v23 }
 0x64f   :  { %13296 = vmatprep.subr.bf16.mxu0 %v15793_v0 }
 0x652   :  { %13298 = vmatpush1.bf16.msra.mxu0 %v15944_v26 }
 0x653   :  { %13299 = vmatprep.subr.bf16.mxu0 %v15793_v0 }
 0x656   :  { %13301 = vmatpush1.bf16.msra.mxu0 %v15956_v29 }
 0x657   :  { %2651 = vmatprep.subr.mxu0 %v15794_v30 }
 0x65a   :  { %10424 = vmatpush1.msk.msra.mxu0 %vm59_vm1, %v16574_v18 }
 0x65b   :  { %2680 = vmatmul.mubr.f32.vlgmr.msra.gmra.mrb[32].mxu0 %v10422_v49  ;;  %13329 = vmatprep.subr.bf16.mxu0 %v15793_v0 }
 0x65c   :  { %11726 = vmatprep.mubr.msk.f32.mxu0 %vm15795_vm2, %v15794_v30 }
 0x696   :  { %v2051_v50 = vpop.f32.mrb[24].mxu0 }
 0x697   :  { %v17063_v51 = vadd.f32 %v2051_v50, %v16878_v54  ;;  %v11658_v52 = vpop.f32.mrb[25].mxu0  ;;  %v10418_v54 = vld [vmem:[%s20604_s0 + $0x1f0] sm:$0xff] }
 0x6bc   :  { %v2205_v53 = vpop.f32.mrb[26].mxu0 }
 0x6bd   :  { %v2209_v55 = vmax.f32 %v16949_v15, %v2205_v53  ;;  %v2207_v56 = vpop.f32.mrb[27].mxu0  ;;  %v10430_v15 = vld [vmem:[%s20605_s3 + $0x300] sm:$0xff] }
 0x6be   :  { %v13330_v13 = vpack.c.bf16 %v10431_v61, %v10430_v15  ;;  %v10465_v61 = vld [vmem:[%s20605_s3 + $0x398] sm:$0xff] }
 0x6bf   :  { %v2286_v57 = vmax.f32 %v2209_v55, %v16967_v12  ;;  %v10432_v12 = vld [vmem:[%s20605_s3 + $0x310] sm:$0xff] }
 0x6c0   :  { %13331 = vmatpush3.bf16.msra.mxu0 %v13330_v13 }
 0x6c1   :  { %13332 = vmatprep.subr.bf16.mxu0 %v15793_v0 }
 0x6e2   :  { %v2359_v59 = vpop.f32.mrb[28].mxu0 }
 0x6e3   :  { %v2363_v60 = vmax.f32 %v2286_v57, %v2359_v59  ;;  %v2361_v62 = vpop.f32.mrb[29].mxu0 }
 0x6e5   :  { %v2364_v63 = vadd.f32 %v16885_v3, %v2363_v60 }
 0x6e7   :  { %v2365_v2 = vmax.f32 %v2364_v63, 0.0  ;;  %v10451_v63 = vld [vmem:[%s20604_s0 + $0x208] sm:$0xff] }
 0x6e9   :  { %11692 = vmatmul.mubr.f32.vlgmr.msra.gmra.mrb[28].mxu1 %v2365_v2  ;;  %v10459_v2 = vld [vmem:[%s20604_s0 + $0x528] sm:$0xff] }
 0x6ea   :  { %13250 = vmatpush1.bf16.msra.mxu1 %v15857_v4  ;;  %10421 = vmatprep.mubr.msk.f32.mxu1 %vm55_vm0, %v10419_v5  ;;  %v10458_v5 = vld [vmem:[%s20604_s0 + $0x520] sm:$0xff] }
 0x6eb   :  { %13251 = vmatprep.subr.bf16.mxu1 %v15793_v0 }
 0x6ee   :  { %13253 = vmatpush1.bf16.msra.mxu1 %v15864_v6 }
 0x6ef   :  { %13254 = vmatprep.subr.bf16.mxu1 %v15793_v0 }
 0x6f2   :  { %13256 = vmatpush1.bf16.msra.mxu1 %v15879_v10 }
 0x6f3   :  { %13257 = vmatprep.subr.bf16.mxu1 %v15793_v0 }
 0x6f6   :  { %13259 = vmatpush1.bf16.msra.mxu1 %v15896_v14 }
 0x6f7   :  { %13260 = vmatprep.subr.bf16.mxu1 %v15793_v0 }
 0x6fa   :  { %13262 = vmatpush1.bf16.msra.mxu1 %v15908_v17 }
 0x6fb   :  { %13263 = vmatprep.subr.bf16.mxu1 %v15793_v0 }
 0x6fe   :  { %13265 = vmatpush1.bf16.msra.mxu1 %v15920_v20 }
 0x6ff   :  { %13266 = vmatprep.subr.bf16.mxu1 %v15793_v0 }
 0x702   :  { %13268 = vmatpush1.bf16.msra.mxu1 %v15932_v23 }
 0x703   :  { %13269 = vmatprep.subr.bf16.mxu1 %v15793_v0 }
 0x706   :  { %13271 = vmatpush1.bf16.msra.mxu1 %v15944_v26 }
 0x707   :  { %13272 = vmatprep.subr.bf16.mxu1 %v15793_v0 }
 0x708   :  { %v17129_v8 = vpop.f32.mrb[30].mxu0 }
 0x709   :  { %v2530_v9 = vpop.f32.mrb[31].mxu0 }
 0x70a   :  { %13274 = vmatpush1.bf16.msra.mxu1 %v15956_v29  ;;  %v10463_v9 = vld [vmem:[%s20605_s3 + $0x388] sm:$0xff] }
 0x70b   :  { %2574 = vmatprep.subr.mxu1 %v15794_v30 }
 0x70e   :  { %10420 = vmatpush1.msk.msra.mxu1 %vm59_vm1, %v16574_v18 }
 0x70f   :  { %2603 = vmatmul.mubr.f32.vlgmr.msra.gmra.mrb[30].mxu1 %v10418_v54  ;;  %13302 = vmatprep.subr.bf16.mxu1 %v15793_v0 }
 0x710   :  { %13304 = vmatpush1.bf16.msra.mxu1 %v15857_v4  ;;  %10429 = vmatprep.mubr.msk.f32.mxu1 %vm55_vm0, %v10427_v7 }
 0x711   :  { %13305 = vmatprep.subr.bf16.mxu1 %v15793_v0 }
 0x714   :  { %13307 = vmatpush1.bf16.msra.mxu1 %v15864_v6 }
 0x715   :  { %13308 = vmatprep.subr.bf16.mxu1 %v15793_v0 }
 0x718   :  { %13310 = vmatpush1.bf16.msra.mxu1 %v15879_v10 }
 0x719   :  { %13311 = vmatprep.subr.bf16.mxu1 %v15793_v0 }
 0x71c   :  { %13313 = vmatpush1.bf16.msra.mxu1 %v15896_v14 }
 0x71d   :  { %13314 = vmatprep.subr.bf16.mxu1 %v15793_v0 }
 0x720   :  { %13316 = vmatpush1.bf16.msra.mxu1 %v15908_v17 }
 0x721   :  { %13317 = vmatprep.subr.bf16.mxu1 %v15793_v0 }
 0x724   :  { %13319 = vmatpush1.bf16.msra.mxu1 %v15920_v20 }
 0x725   :  { %13320 = vmatprep.subr.bf16.mxu1 %v15793_v0 }
 0x728   :  { %13322 = vmatpush1.bf16.msra.mxu1 %v15932_v23 }
 0x729   :  { %13323 = vmatprep.subr.bf16.mxu1 %v15793_v0 }
 0x72c   :  { %13325 = vmatpush1.bf16.msra.mxu1 %v15944_v26 }
 0x72d   :  { %13326 = vmatprep.subr.bf16.mxu1 %v15793_v0 }
 0x72e   :  { %v17147_v11 = vpop.f32.mrb[32].mxu0 }
 0x72f   :  { %v2683_v1 = vpop.f32.mrb[33].mxu0 }
 0x730   :  { %13328 = vmatpush1.bf16.msra.mxu1 %v15956_v29  ;;  %v10467_v1 = vld [vmem:[%s20605_s3 + $0x3a8] sm:$0xff] }
 0x731   :  { %2728 = vmatprep.subr.mxu1 %v15794_v30 }
 0x734   :  { %10428 = vmatpush1.msk.msra.mxu1 %vm59_vm1, %v16574_v18 }
 0x735   :  { %2757 = vmatmul.mubr.f32.vlgmr.msra.gmra.mrb[32].mxu1 %v10426_v58  ;;  %13353 = vmatprep.subr.bf16.mxu1 %v15793_v0 }
 0x736   :  { %13355 = vmatpush1.bf16.msra.mxu1 %v15857_v4  ;;  %10449 = vmatprep.mubr.msk.f32.mxu1 %vm55_vm0, %v10447_v42  ;;  %v10486_v42 = vld [vmem:[%s20604_s0 + $0x3a0] sm:$0xff] }
 0x737   :  { %13356 = vmatprep.subr.bf16.mxu1 %v15793_v0 }
 0x73a   :  { %13358 = vmatpush1.bf16.msra.mxu1 %v15864_v6 }
 0x73b   :  { %13359 = vmatprep.subr.bf16.mxu1 %v15793_v0 }
 0x73e   :  { %13361 = vmatpush1.bf16.msra.mxu1 %v15879_v10 }
 0x73f   :  { %13362 = vmatprep.subr.bf16.mxu1 %v15793_v0 }
 0x742   :  { %13364 = vmatpush1.bf16.msra.mxu1 %v15896_v14 }
 0x743   :  { %13365 = vmatprep.subr.bf16.mxu1 %v15793_v0 }
 0x746   :  { %13367 = vmatpush1.bf16.msra.mxu1 %v15908_v17 }
 0x747   :  { %13368 = vmatprep.subr.bf16.mxu1 %v15793_v0 }
 0x74a   :  { %13370 = vmatpush1.bf16.msra.mxu1 %v15920_v20 }
 0x74b   :  { %13371 = vmatprep.subr.bf16.mxu1 %v15793_v0 }
 0x74e   :  { %13373 = vmatpush1.bf16.msra.mxu1 %v15932_v23 }
 0x74f   :  { %13374 = vmatprep.subr.bf16.mxu1 %v15793_v0 }
 0x752   :  { %13376 = vmatpush1.bf16.msra.mxu1 %v15944_v26 }
 0x753   :  { %13377 = vmatprep.subr.bf16.mxu1 %v15793_v0 }
 0x756   :  { %13379 = vmatpush1.bf16.msra.mxu1 %v15956_v29 }
 0x757   :  { %2897 = vmatprep.subr.mxu1 %v15794_v30 }
 0x75a   :  { %10448 = vmatpush1.msk.msra.mxu1 %vm59_vm1, %v16574_v18  ;;  %v10433_v18 = vld [vmem:[%s20605_s3 + $0x318] sm:$0xff] }
 0x75b   :  { %13407 = vmatprep.subr.bf16.mxu1 %v15793_v0  ;;  %v13333_v16 = vpack.c.bf16 %v10433_v18, %v10432_v12  ;;  %2926 = vmatmul.mubr.f32.vlgmr.msra.gmra.mrb[34].mxu1 %v10446_v43  ;;  %v10466_v18 = vld [vmem:[%s20605_s3 + $0x3a0] sm:$0xff] }
 0x75c   :  { %13409 = vmatpush1.bf16.msra.mxu1 %v15857_v4  ;;  %10457 = vmatprep.mubr.msk.f32.mxu1 %vm55_vm0, %v10455_v44 }
 0x75d   :  { %13334 = vmatpush3.bf16.msra.mxu0 %v13333_v16  ;;  %13410 = vmatprep.subr.bf16.mxu1 %v15793_v0  ;;  %v13468_v16 = vpack.c.bf16 %v10467_v1, %v10466_v18  ;;  %v10501_v18 = vld [vmem:[%s20605_s3 + $0x438] sm:$0xff] }
 0x75e   :  { %13335 = vmatprep.subr.bf16.mxu0 %v15793_v0 }
 0x760   :  { %13412 = vmatpush1.bf16.msra.mxu1 %v15864_v6 }
 0x761   :  { %13337 = vmatpush3.bf16.msra.mxu0 %v13336_v21  ;;  %13413 = vmatprep.subr.bf16.mxu1 %v15793_v0  ;;  %v13471_v21 = vpack.c.bf16 %v10469_v19, %v10468_v31  ;;  %v10503_v31 = vld [vmem:[%s20605_s3 + $0x448] sm:$0xff] }
 0x762   :  { %13338 = vmatprep.subr.bf16.mxu0 %v15793_v0 }
 0x764   :  { %13415 = vmatpush1.bf16.msra.mxu1 %v15879_v10 }
 0x765   :  { %13340 = vmatpush3.bf16.msra.mxu0 %v13339_v25  ;;  %13416 = vmatprep.subr.bf16.mxu1 %v15793_v0  ;;  %v13474_v25 = vpack.c.bf16 %v10471_v24, %v10470_v22  ;;  %v10505_v22 = vld [vmem:[%s20605_s3 + $0x458] sm:$0xff] }
 0x766   :  { %13341 = vmatprep.subr.bf16.mxu0 %v15793_v0 }
 0x768   :  { %13418 = vmatpush1.bf16.msra.mxu1 %v15896_v14 }
 0x769   :  { %13343 = vmatpush3.bf16.msra.mxu0 %v13342_v32  ;;  %13419 = vmatprep.subr.bf16.mxu1 %v15793_v0  ;;  %v13477_v32 = vpack.c.bf16 %v10473_v28, %v10472_v27  ;;  %v10507_v27 = vld [vmem:[%s20605_s3 + $0x468] sm:$0xff] }
 0x76a   :  { %13344 = vmatprep.subr.bf16.mxu0 %v15793_v0 }
 0x76c   :  { %13421 = vmatpush1.bf16.msra.mxu1 %v15908_v17 }
 0x76d   :  { %13346 = vmatpush3.bf16.msra.mxu0 %v13345_v35  ;;  %13422 = vmatprep.subr.bf16.mxu1 %v15793_v0  ;;  %v13480_v35 = vpack.c.bf16 %v10475_v34, %v10474_v33  ;;  %v10509_v33 = vld [vmem:[%s20605_s3 + $0x478] sm:$0xff] }
 0x76e   :  { %13347 = vmatprep.subr.bf16.mxu0 %v15793_v0 }
 0x770   :  { %13424 = vmatpush1.bf16.msra.mxu1 %v15920_v20 }
 0x771   :  { %13349 = vmatpush3.bf16.msra.mxu0 %v13348_v38  ;;  %13425 = vmatprep.subr.bf16.mxu1 %v15793_v0  ;;  %v13483_v38 = vpack.c.bf16 %v10477_v37, %v10476_v36  ;;  %v10510_v36 = vld [vmem:[%s20604_s0 + $0x90] sm:$0xff]  ;;  %v10519_v37 = vld [vmem:[%s20604_s0 + $0x3b8] sm:$0xff] }
 0x772   :  { %13350 = vmatprep.subr.bf16.mxu0 %v15793_v0 }
 0x774   :  { %13427 = vmatpush1.bf16.msra.mxu1 %v15932_v23 }
 0x775   :  { %13352 = vmatpush3.bf16.msra.mxu0 %v13351_v41  ;;  %13428 = vmatprep.subr.bf16.mxu1 %v15793_v0  ;;  %v10487_v41 = vld [vmem:[%s20604_s0 + $0x3a8] sm:$0xff] }
 0x776   :  { %13380 = vmatprep.subr.bf16.mxu0 %v15793_v0 }
 0x778   :  { %13430 = vmatpush1.bf16.msra.mxu1 %v15944_v26 }
 0x779   :  { %13431 = vmatprep.subr.bf16.mxu1 %v15793_v0 }
 0x77c   :  { %13433 = vmatpush1.bf16.msra.mxu1 %v15956_v29 }
 0x77d   :  { %3050 = vmatprep.subr.mxu1 %v15794_v30 }
 0x780   :  { %10456 = vmatpush1.msk.msra.mxu1 %vm59_vm1, %v17240_v46 }
 0x781   :  { %3079 = vmatmul.mubr.f32.vlgmr.msra.gmra.mrb[36].mxu1 %v10454_v45  ;;  %13461 = vmatprep.subr.bf16.mxu1 %v15793_v0 }
 0x782   :  { %11761 = vmatprep.mubr.msk.f32.mxu1 %vm15795_vm2, %v15794_v30 }
 0x7bc   :  { %v2450_v47 = vpop.f32.mrb[28].mxu1 }
 0x7bd   :  { %v17248_v48 = vadd.f32 %v2450_v47, %v17063_v51  ;;  %v11693_v49 = vpop.f32.mrb[29].mxu1  ;;  %v10450_v51 = vld [vmem:[%s20604_s0 + $0x200] sm:$0xff] }
 0x7e2   :  { %v2604_v50 = vpop.f32.mrb[30].mxu1 }
 0x7e3   :  { %v2608_v52 = vmax.f32 %v17129_v8, %v2604_v50  ;;  %v2606_v53 = vpop.f32.mrb[31].mxu1  ;;  %v10462_v8 = vld [vmem:[%s20605_s3 + $0x380] sm:$0xff] }
 0x7e4   :  { %v13462_v15 = vpack.c.bf16 %v10463_v9, %v10462_v8  ;;  %v10497_v8 = vld [vmem:[%s20605_s3 + $0x418] sm:$0xff] }
 0x7e5   :  { %v2685_v55 = vmax.f32 %v2608_v52, %v17147_v11  ;;  %v10464_v11 = vld [vmem:[%s20605_s3 + $0x390] sm:$0xff] }
 0x7e6   :  { %13463 = vmatpush3.bf16.msra.mxu1 %v13462_v15  ;;  %v13465_v13 = vpack.c.bf16 %v10465_v61, %v10464_v11  ;;  %v10498_v15 = vld [vmem:[%s20605_s3 + $0x420] sm:$0xff]  ;;  %v10499_v61 = vld [vmem:[%s20605_s3 + $0x428] sm:$0xff] }
 0x7e7   :  { %13464 = vmatprep.subr.bf16.mxu1 %v15793_v0 }
 0x7ea   :  { %13466 = vmatpush3.bf16.msra.mxu1 %v13465_v13  ;;  %v10500_v13 = vld [vmem:[%s20605_s3 + $0x430] sm:$0xff] }
 0x7eb   :  { %13467 = vmatprep.subr.bf16.mxu1 %v15793_v0  ;;  %v13603_v1 = vpack.c.bf16 %v10501_v18, %v10500_v13  ;;  %v10534_v13 = vld [vmem:[%s20605_s3 + $0x4c0] sm:$0xff]  ;;  %v10535_v18 = vld [vmem:[%s20605_s3 + $0x4c8] sm:$0xff] }
 0x7ee   :  { %13469 = vmatpush3.bf16.msra.mxu1 %v13468_v16  ;;  %v10502_v16 = vld [vmem:[%s20605_s3 + $0x440] sm:$0xff] }
 0x7ef   :  { %13470 = vmatprep.subr.bf16.mxu1 %v15793_v0  ;;  %v13606_v19 = vpack.c.bf16 %v10503_v31, %v10502_v16  ;;  %v10536_v16 = vld [vmem:[%s20605_s3 + $0x4d0] sm:$0xff]  ;;  %v10537_v31 = vld [vmem:[%s20605_s3 + $0x4d8] sm:$0xff] }
 0x7f2   :  { %13472 = vmatpush3.bf16.msra.mxu1 %v13471_v21  ;;  %v10504_v21 = vld [vmem:[%s20605_s3 + $0x450] sm:$0xff] }
 0x7f3   :  { %13473 = vmatprep.subr.bf16.mxu1 %v15793_v0  ;;  %v13609_v24 = vpack.c.bf16 %v10505_v22, %v10504_v21  ;;  %v10538_v21 = vld [vmem:[%s20605_s3 + $0x4e0] sm:$0xff]  ;;  %v10539_v22 = vld [vmem:[%s20605_s3 + $0x4e8] sm:$0xff] }
 0x7f6   :  { %13475 = vmatpush3.bf16.msra.mxu1 %v13474_v25  ;;  %v10506_v25 = vld [vmem:[%s20605_s3 + $0x460] sm:$0xff] }
 0x7f7   :  { %13476 = vmatprep.subr.bf16.mxu1 %v15793_v0  ;;  %v13612_v28 = vpack.c.bf16 %v10507_v27, %v10506_v25  ;;  %v10540_v25 = vld [vmem:[%s20605_s3 + $0x4f0] sm:$0xff]  ;;  %v10541_v27 = vld [vmem:[%s20605_s3 + $0x4f8] sm:$0xff] }
 0x7fa   :  { %13478 = vmatpush3.bf16.msra.mxu1 %v13477_v32  ;;  %v10508_v32 = vld [vmem:[%s20605_s3 + $0x470] sm:$0xff] }
 0x7fb   :  { %13479 = vmatprep.subr.bf16.mxu1 %v15793_v0  ;;  %v13615_v34 = vpack.c.bf16 %v10509_v33, %v10508_v32  ;;  %v10543_v32 = vld [vmem:[%s20604_s0 + $0xa8] sm:$0xff]  ;;  %v10542_v33 = vld [vmem:[%s20604_s0 + $0xa0] sm:$0xff] }
 0x7fe   :  { %13481 = vmatpush3.bf16.msra.mxu1 %v13480_v35  ;;  %v10511_v35 = vld [vmem:[%s20604_s0 + $0x98] sm:$0xff] }
 0x7ff   :  { %13482 = vmatprep.subr.bf16.mxu1 %v15793_v0 }
 0x802   :  { %13484 = vmatpush3.bf16.msra.mxu1 %v13483_v38  ;;  %v10518_v38 = vld [vmem:[%s20604_s0 + $0x3b0] sm:$0xff] }
 0x803   :  { %13512 = vmatprep.subr.bf16.mxu1 %v15793_v0 }
 0x808   :  { %v2758_v56 = vpop.f32.mrb[32].mxu1 }
 0x809   :  { %v2762_v57 = vmax.f32 %v2685_v55, %v2758_v56  ;;  %v2760_v59 = vpop.f32.mrb[33].mxu1 }
 0x80b   :  { %v2763_v60 = vadd.f32 %v16885_v3, %v2762_v57 }
 0x80d   :  { %v2764_v62 = vmax.f32 %v2763_v60, 0.0  ;;  %v10483_v60 = vld [vmem:[%s20604_s0 + $0x218] sm:$0xff] }
 0x80f   :  { %11727 = vmatmul.mubr.f32.vlgmr.msra.gmra.mrb[34].mxu0 %v2764_v62  ;;  %v10490_v62 = vld [vmem:[%s20604_s0 + $0x530] sm:$0xff] }
 0x810   :  { %13382 = vmatpush1.bf16.msra.mxu0 %v15857_v4  ;;  %10453 = vmatprep.mubr.msk.f32.mxu0 %vm55_vm0, %v10451_v63 }
 0x811   :  { %13383 = vmatprep.subr.bf16.mxu0 %v15793_v0 }
 0x814   :  { %13385 = vmatpush1.bf16.msra.mxu0 %v15864_v6 }
 0x815   :  { %13386 = vmatprep.subr.bf16.mxu0 %v15793_v0 }
 0x818   :  { %13388 = vmatpush1.bf16.msra.mxu0 %v15879_v10 }
 0x819   :  { %13389 = vmatprep.subr.bf16.mxu0 %v15793_v0 }
 0x81c   :  { %13391 = vmatpush1.bf16.msra.mxu0 %v15896_v14 }
 0x81d   :  { %13392 = vmatprep.subr.bf16.mxu0 %v15793_v0 }
 0x820   :  { %13394 = vmatpush1.bf16.msra.mxu0 %v15908_v17 }
 0x821   :  { %13395 = vmatprep.subr.bf16.mxu0 %v15793_v0 }
 0x824   :  { %13397 = vmatpush1.bf16.msra.mxu0 %v15920_v20 }
 0x825   :  { %13398 = vmatprep.subr.bf16.mxu0 %v15793_v0 }
 0x828   :  { %13400 = vmatpush1.bf16.msra.mxu0 %v15932_v23 }
 0x829   :  { %13401 = vmatprep.subr.bf16.mxu0 %v15793_v0 }
 0x82c   :  { %13403 = vmatpush1.bf16.msra.mxu0 %v15944_v26 }
 0x82d   :  { %13404 = vmatprep.subr.bf16.mxu0 %v15793_v0 }
 0x82e   :  { %v17314_v54 = vpop.f32.mrb[34].mxu1 }
 0x82f   :  { %v2929_v7 = vpop.f32.mrb[35].mxu1 }
 0x830   :  { %13406 = vmatpush1.bf16.msra.mxu0 %v15956_v29  ;;  %v10496_v7 = vld [vmem:[%s20605_s3 + $0x410] sm:$0xff] }
 0x831   :  { %2973 = vmatprep.subr.mxu0 %v15794_v30  ;;  %v13597_v11 = vpack.c.bf16 %v10497_v8, %v10496_v7  ;;  %v10530_v8 = vld [vmem:[%s20605_s3 + $0x4a0] sm:$0xff] }
 0x834   :  { %10452 = vmatpush1.msk.msra.mxu0 %vm59_vm1, %v17240_v46 }
 0x835   :  { %3002 = vmatmul.mubr.f32.vlgmr.msra.gmra.mrb[36].mxu0 %v10450_v51  ;;  %13434 = vmatprep.subr.bf16.mxu0 %v15793_v0 }
 0x836   :  { %13436 = vmatpush1.bf16.msra.mxu0 %v15857_v4  ;;  %10461 = vmatprep.mubr.msk.f32.mxu0 %vm55_vm0, %v10459_v2 }
 0x837   :  { %13437 = vmatprep.subr.bf16.mxu0 %v15793_v0 }
 0x83a   :  { %13439 = vmatpush1.bf16.msra.mxu0 %v15864_v6 }
 0x83b   :  { %13440 = vmatprep.subr.bf16.mxu0 %v15793_v0 }
 0x83e   :  { %13442 = vmatpush1.bf16.msra.mxu0 %v15879_v10 }
 0x83f   :  { %13443 = vmatprep.subr.bf16.mxu0 %v15793_v0 }
 0x842   :  { %13445 = vmatpush1.bf16.msra.mxu0 %v15896_v14 }
 0x843   :  { %13446 = vmatprep.subr.bf16.mxu0 %v15793_v0 }
 0x846   :  { %13448 = vmatpush1.bf16.msra.mxu0 %v15908_v17 }
 0x847   :  { %13449 = vmatprep.subr.bf16.mxu0 %v15793_v0 }
 0x84a   :  { %13451 = vmatpush1.bf16.msra.mxu0 %v15920_v20 }
 0x84b   :  { %13452 = vmatprep.subr.bf16.mxu0 %v15793_v0 }
 0x84e   :  { %13454 = vmatpush1.bf16.msra.mxu0 %v15932_v23 }
 0x84f   :  { %13455 = vmatprep.subr.bf16.mxu0 %v15793_v0 }
 0x852   :  { %13457 = vmatpush1.bf16.msra.mxu0 %v15944_v26 }
 0x853   :  { %13458 = vmatprep.subr.bf16.mxu0 %v15793_v0 }
 0x854   :  { %v17332_v58 = vpop.f32.mrb[36].mxu1 }
 0x855   :  { %v3082_v12 = vpop.f32.mrb[37].mxu1 }
 0x856   :  { %13460 = vmatpush1.bf16.msra.mxu0 %v15956_v29  ;;  %v13600_v12 = vpack.c.bf16 %v10499_v61, %v10498_v15  ;;  %v10532_v15 = vld [vmem:[%s20605_s3 + $0x4b0] sm:$0xff]  ;;  %v10533_v61 = vld [vmem:[%s20605_s3 + $0x4b8] sm:$0xff] }
 0x857   :  { %3127 = vmatprep.subr.mxu0 %v15794_v30 }
 0x85a   :  { %10460 = vmatpush1.msk.msra.mxu0 %vm59_vm1, %v17240_v46 }
 0x85b   :  { %3156 = vmatmul.mubr.f32.vlgmr.msra.gmra.mrb[38].mxu0 %v10458_v5  ;;  %13485 = vmatprep.subr.bf16.mxu0 %v15793_v0  ;;  %v10494_v5 = vld [vmem:[%s20605_s3 + $0x400] sm:$0xff] }
 0x85c   :  { %13487 = vmatpush1.bf16.msra.mxu0 %v15857_v4  ;;  %10481 = vmatprep.mubr.msk.f32.mxu0 %vm55_vm0, %v10479_v39 }
 0x85d   :  { %13488 = vmatprep.subr.bf16.mxu0 %v15793_v0 }
 0x860   :  { %13490 = vmatpush1.bf16.msra.mxu0 %v15864_v6 }
 0x861   :  { %13491 = vmatprep.subr.bf16.mxu0 %v15793_v0 }
 0x864   :  { %13493 = vmatpush1.bf16.msra.mxu0 %v15879_v10 }
 0x865   :  { %13494 = vmatprep.subr.bf16.mxu0 %v15793_v0 }
 0x868   :  { %13496 = vmatpush1.bf16.msra.mxu0 %v15896_v14 }
 0x869   :  { %13497 = vmatprep.subr.bf16.mxu0 %v15793_v0 }
 0x86c   :  { %13499 = vmatpush1.bf16.msra.mxu0 %v15908_v17 }
 0x86d   :  { %13500 = vmatprep.subr.bf16.mxu0 %v15793_v0 }
 0x870   :  { %13502 = vmatpush1.bf16.msra.mxu0 %v15920_v20 }
 0x871   :  { %13503 = vmatprep.subr.bf16.mxu0 %v15793_v0 }
 0x874   :  { %13505 = vmatpush1.bf16.msra.mxu0 %v15932_v23 }
 0x875   :  { %13506 = vmatprep.subr.bf16.mxu0 %v15793_v0 }
 0x878   :  { %13508 = vmatpush1.bf16.msra.mxu0 %v15944_v26 }
 0x879   :  { %13509 = vmatprep.subr.bf16.mxu0 %v15793_v0 }
 0x87c   :  { %13511 = vmatpush1.bf16.msra.mxu0 %v15956_v29 }
 0x87d   :  { %3296 = vmatprep.subr.mxu0 %v15794_v30 }
 0x880   :  { %10480 = vmatpush1.msk.msra.mxu0 %vm59_vm1, %v17240_v46 }
 0x881   :  { %13539 = vmatprep.subr.bf16.mxu0 %v15793_v0  ;;  %3325 = vmatmul.mubr.f32.vlgmr.msra.gmra.mrb[40].mxu0 %v10478_v40 }
 0x882   :  { %13541 = vmatpush1.bf16.msra.mxu0 %v15857_v4  ;;  %10489 = vmatprep.mubr.msk.f32.mxu0 %vm55_vm0, %v10487_v41 }
 0x883   :  { %13542 = vmatprep.subr.bf16.mxu0 %v15793_v0 }
 0x886   :  { %13544 = vmatpush1.bf16.msra.mxu0 %v15864_v6 }
 0x887   :  { %13545 = vmatprep.subr.bf16.mxu0 %v15793_v0 }
 0x88a   :  { %13547 = vmatpush1.bf16.msra.mxu0 %v15879_v10 }
 0x88b   :  { %13548 = vmatprep.subr.bf16.mxu0 %v15793_v0 }
 0x88e   :  { %13550 = vmatpush1.bf16.msra.mxu0 %v15896_v14 }
 0x88f   :  { %13551 = vmatprep.subr.bf16.mxu0 %v15793_v0 }
 0x892   :  { %13553 = vmatpush1.bf16.msra.mxu0 %v15908_v17 }
 0x893   :  { %13554 = vmatprep.subr.bf16.mxu0 %v15793_v0 }
 0x896   :  { %13556 = vmatpush1.bf16.msra.mxu0 %v15920_v20 }
 0x897   :  { %13557 = vmatprep.subr.bf16.mxu0 %v15793_v0 }
 0x89a   :  { %13559 = vmatpush1.bf16.msra.mxu0 %v15932_v23 }
 0x89b   :  { %13560 = vmatprep.subr.bf16.mxu0 %v15793_v0 }
 0x89e   :  { %13562 = vmatpush1.bf16.msra.mxu0 %v15944_v26 }
 0x89f   :  { %13563 = vmatprep.subr.bf16.mxu0 %v15793_v0 }
 0x8a2   :  { %13565 = vmatpush1.bf16.msra.mxu0 %v15956_v29 }
 0x8a3   :  { %3449 = vmatprep.subr.mxu0 %v15794_v30 }
 0x8a6   :  { %10488 = vmatpush1.msk.msra.mxu0 %vm59_vm1, %v17240_v46 }
 0x8a7   :  { %3478 = vmatmul.mubr.f32.vlgmr.msra.gmra.mrb[42].mxu0 %v10486_v42  ;;  %13593 = vmatprep.subr.bf16.mxu0 %v15793_v0 }
 0x8a8   :  { %11796 = vmatprep.mubr.msk.f32.mxu0 %vm15795_vm2, %v15794_v30 }
 0x8e2   :  { %v2849_v43 = vpop.f32.mrb[34].mxu0 }
 0x8e3   :  { %v17428_v44 = vadd.f32 %v2849_v43, %v17248_v48  ;;  %v11728_v45 = vpop.f32.mrb[35].mxu0  ;;  %v10491_v48 = vld [vmem:[%s20604_s0 + $0x538] sm:$0xff] }
 0x908   :  { %v3003_v47 = vpop.f32.mrb[36].mxu0 }
 0x909   :  { %v3007_v49 = vmax.f32 %v17314_v54, %v3003_v47  ;;  %v3005_v50 = vpop.f32.mrb[37].mxu0  ;;  %v10495_v54 = vld [vmem:[%s20605_s3 + $0x408] sm:$0xff] }
 0x90b   :  { %v3084_v52 = vmax.f32 %v3007_v49, %v17332_v58  ;;  %v13594_v58 = vpack.c.bf16 %v10495_v54, %v10494_v5  ;;  %v10529_v54 = vld [vmem:[%s20605_s3 + $0x498] sm:$0xff] }
 0x90d   :  { %13595 = vmatpush3.bf16.msra.mxu0 %v13594_v58 }
 0x90e   :  { %13596 = vmatprep.subr.bf16.mxu0 %v15793_v0 }
 0x911   :  { %13598 = vmatpush3.bf16.msra.mxu0 %v13597_v11 }
 0x912   :  { %13599 = vmatprep.subr.bf16.mxu0 %v15793_v0 }
 0x915   :  { %13601 = vmatpush3.bf16.msra.mxu0 %v13600_v12  ;;  %v13735_v12 = vpack.c.bf16 %v10533_v61, %v10532_v15  ;;  %v10566_v15 = vld [vmem:[%s20605_s3 + $0x540] sm:$0xff]  ;;  %v10567_v61 = vld [vmem:[%s20605_s3 + $0x548] sm:$0xff] }
 0x916   :  { %13602 = vmatprep.subr.bf16.mxu0 %v15793_v0 }
 0x919   :  { %13604 = vmatpush3.bf16.msra.mxu0 %v13603_v1  ;;  %v13738_v1 = vpack.c.bf16 %v10535_v18, %v10534_v13  ;;  %v10568_v13 = vld [vmem:[%s20605_s3 + $0x550] sm:$0xff]  ;;  %v10569_v18 = vld [vmem:[%s20605_s3 + $0x558] sm:$0xff] }
 0x91a   :  { %13605 = vmatprep.subr.bf16.mxu0 %v15793_v0 }
 0x91d   :  { %13607 = vmatpush3.bf16.msra.mxu0 %v13606_v19  ;;  %v13741_v19 = vpack.c.bf16 %v10537_v31, %v10536_v16  ;;  %v10570_v16 = vld [vmem:[%s20605_s3 + $0x560] sm:$0xff]  ;;  %v10571_v31 = vld [vmem:[%s20605_s3 + $0x568] sm:$0xff] }
 0x91e   :  { %13608 = vmatprep.subr.bf16.mxu0 %v15793_v0 }
 0x921   :  { %13610 = vmatpush3.bf16.msra.mxu0 %v13609_v24  ;;  %v13744_v24 = vpack.c.bf16 %v10539_v22, %v10538_v21  ;;  %v10572_v21 = vld [vmem:[%s20605_s3 + $0x570] sm:$0xff]  ;;  %v10573_v22 = vld [vmem:[%s20605_s3 + $0x578] sm:$0xff] }
 0x922   :  { %13611 = vmatprep.subr.bf16.mxu0 %v15793_v0 }
 0x925   :  { %13613 = vmatpush3.bf16.msra.mxu0 %v13612_v28  ;;  %v13747_v28 = vpack.c.bf16 %v10541_v27, %v10540_v25  ;;  %v10575_v25 = vld [vmem:[%s20604_s0 + $0xb8] sm:$0xff]  ;;  %v10574_v27 = vld [vmem:[%s20604_s0 + $0xb0] sm:$0xff] }
 0x926   :  { %13614 = vmatprep.subr.bf16.mxu0 %v15793_v0 }
 0x929   :  { %13616 = vmatpush3.bf16.msra.mxu0 %v13615_v34  ;;  %v10551_v34 = vld [vmem:[%s20604_s0 + $0x3c8] sm:$0xff] }
 0x92a   :  { %13644 = vmatprep.subr.bf16.mxu0 %v15793_v0 }
 0x92e   :  { %v3157_v53 = vpop.f32.mrb[38].mxu0 }
 0x92f   :  { %v3161_v55 = vmax.f32 %v3084_v52, %v3157_v53  ;;  %v3159_v56 = vpop.f32.mrb[39].mxu0  ;;  %v17615_v53 = vld [vmem:[%s20606_s2] ss:$0 sm:$0xff] }
 0x931   :  { %v3162_v57 = vadd.f32 %v16885_v3, %v3161_v55  ;;  %v10482_v3 = vld [vmem:[%s20604_s0 + $0x210] sm:$0xff] }
 0x933   :  { %v3163_v59 = vmax.f32 %v3162_v57, 0.0  ;;  %v10514_v57 = vld [vmem:[%s20604_s0 + $0x220] sm:$0xff] }
 0x935   :  { %11762 = vmatmul.mubr.f32.vlgmr.msra.gmra.mrb[38].mxu1 %v3163_v59  ;;  %v10523_v59 = vld [vmem:[%s20604_s0 + $0x548] sm:$0xff] }
 0x936   :  { %13514 = vmatpush1.bf16.msra.mxu1 %v15857_v4  ;;  %10485 = vmatprep.mubr.msk.f32.mxu1 %vm55_vm0, %v10483_v60  ;;  %v10522_v60 = vld [vmem:[%s20604_s0 + $0x540] sm:$0xff] }
 0x937   :  { %13515 = vmatprep.subr.bf16.mxu1 %v15793_v0 }
 0x93a   :  { %13517 = vmatpush1.bf16.msra.mxu1 %v15864_v6 }
 0x93b   :  { %13518 = vmatprep.subr.bf16.mxu1 %v15793_v0 }
 0x93e   :  { %13520 = vmatpush1.bf16.msra.mxu1 %v15879_v10 }
 0x93f   :  { %13521 = vmatprep.subr.bf16.mxu1 %v15793_v0 }
 0x942   :  { %13523 = vmatpush1.bf16.msra.mxu1 %v15896_v14 }
 0x943   :  { %13524 = vmatprep.subr.bf16.mxu1 %v15793_v0 }
 0x946   :  { %13526 = vmatpush1.bf16.msra.mxu1 %v15908_v17 }
 0x947   :  { %13527 = vmatprep.subr.bf16.mxu1 %v15793_v0 }
 0x94a   :  { %13529 = vmatpush1.bf16.msra.mxu1 %v15920_v20 }
 0x94b   :  { %13530 = vmatprep.subr.bf16.mxu1 %v15793_v0 }
 0x94e   :  { %13532 = vmatpush1.bf16.msra.mxu1 %v15932_v23 }
 0x94f   :  { %13533 = vmatprep.subr.bf16.mxu1 %v15793_v0 }
 0x952   :  { %13535 = vmatpush1.bf16.msra.mxu1 %v15944_v26 }
 0x953   :  { %13536 = vmatprep.subr.bf16.mxu1 %v15793_v0 }
 0x954   :  { %v17494_v63 = vpop.f32.mrb[40].mxu0 }
 0x955   :  { %v3328_v51 = vpop.f32.mrb[41].mxu0 }
 0x956   :  { %13538 = vmatpush1.bf16.msra.mxu1 %v15956_v29  ;;  %v10527_v51 = vld [vmem:[%s20605_s3 + $0x488] sm:$0xff] }
 0x957   :  { %3372 = vmatprep.subr.mxu1 %v15794_v30 }
 0x95a   :  { %10484 = vmatpush1.msk.msra.mxu1 %vm59_vm1, %v17240_v46 }
 0x95b   :  { %3401 = vmatmul.mubr.f32.vlgmr.msra.gmra.mrb[40].mxu1 %v10482_v3  ;;  %13566 = vmatprep.subr.bf16.mxu1 %v15793_v0 }
 0x95c   :  { %13568 = vmatpush1.bf16.msra.mxu1 %v15857_v4  ;;  %10493 = vmatprep.mubr.msk.f32.mxu1 %vm55_vm0, %v10491_v48 }
 0x95d   :  { %13569 = vmatprep.subr.bf16.mxu1 %v15793_v0 }
 0x960   :  { %13571 = vmatpush1.bf16.msra.mxu1 %v15864_v6 }
 0x961   :  { %13572 = vmatprep.subr.bf16.mxu1 %v15793_v0 }
 0x964   :  { %13574 = vmatpush1.bf16.msra.mxu1 %v15879_v10 }
 0x965   :  { %13575 = vmatprep.subr.bf16.mxu1 %v15793_v0 }
 0x968   :  { %13577 = vmatpush1.bf16.msra.mxu1 %v15896_v14 }
 0x969   :  { %13578 = vmatprep.subr.bf16.mxu1 %v15793_v0 }
 0x96c   :  { %13580 = vmatpush1.bf16.msra.mxu1 %v15908_v17 }
 0x96d   :  { %13581 = vmatprep.subr.bf16.mxu1 %v15793_v0 }
 0x970   :  { %13583 = vmatpush1.bf16.msra.mxu1 %v15920_v20 }
 0x971   :  { %13584 = vmatprep.subr.bf16.mxu1 %v15793_v0 }
 0x974   :  { %13586 = vmatpush1.bf16.msra.mxu1 %v15932_v23 }
 0x975   :  { %13587 = vmatprep.subr.bf16.mxu1 %v15793_v0 }
 0x978   :  { %13589 = vmatpush1.bf16.msra.mxu1 %v15944_v26 }
 0x979   :  { %13590 = vmatprep.subr.bf16.mxu1 %v15793_v0 }
 0x97a   :  { %v17512_v2 = vpop.f32.mrb[42].mxu0 }
 0x97b   :  { %v3481_v9 = vpop.f32.mrb[43].mxu0 }
 0x97c   :  { %13592 = vmatpush1.bf16.msra.mxu1 %v15956_v29  ;;  %v10531_v9 = vld [vmem:[%s20605_s3 + $0x4a8] sm:$0xff] }
 0x97d   :  { %3526 = vmatprep.subr.mxu1 %v15794_v30  ;;  %v13732_v11 = vpack.c.bf16 %v10531_v9, %v10530_v8  ;;  %v10564_v8 = vld [vmem:[%s20605_s3 + $0x530] sm:$0xff]  ;;  %v10565_v9 = vld [vmem:[%s20605_s3 + $0x538] sm:$0xff] }
 0x980   :  { %10492 = vmatpush1.msk.msra.mxu1 %vm59_vm1, %v17240_v46 }
 0x981   :  { %3555 = vmatmul.mubr.f32.vlgmr.msra.gmra.mrb[42].mxu1 %v10490_v62  ;;  %13617 = vmatprep.subr.bf16.mxu1 %v15793_v0 }
 0x982   :  { %13619 = vmatpush1.bf16.msra.mxu1 %v15857_v4  ;;  %10513 = vmatprep.mubr.msk.f32.mxu1 %vm55_vm0, %v10511_v35  ;;  %v10550_v35 = vld [vmem:[%s20604_s0 + $0x3c0] sm:$0xff] }
 0x983   :  { %13620 = vmatprep.subr.bf16.mxu1 %v15793_v0 }
 0x986   :  { %13622 = vmatpush1.bf16.msra.mxu1 %v15864_v6 }
 0x987   :  { %13623 = vmatprep.subr.bf16.mxu1 %v15793_v0 }
 0x98a   :  { %13625 = vmatpush1.bf16.msra.mxu1 %v15879_v10 }
 0x98b   :  { %13626 = vmatprep.subr.bf16.mxu1 %v15793_v0 }
 0x98e   :  { %13628 = vmatpush1.bf16.msra.mxu1 %v15896_v14 }
 0x98f   :  { %13629 = vmatprep.subr.bf16.mxu1 %v15793_v0 }
 0x992   :  { %13631 = vmatpush1.bf16.msra.mxu1 %v15908_v17 }
 0x993   :  { %13632 = vmatprep.subr.bf16.mxu1 %v15793_v0 }
 0x996   :  { %13634 = vmatpush1.bf16.msra.mxu1 %v15920_v20 }
 0x997   :  { %13635 = vmatprep.subr.bf16.mxu1 %v15793_v0 }
 0x99a   :  { %13637 = vmatpush1.bf16.msra.mxu1 %v15932_v23 }
 0x99b   :  { %13638 = vmatprep.subr.bf16.mxu1 %v15793_v0 }
 0x99e   :  { %13640 = vmatpush1.bf16.msra.mxu1 %v15944_v26 }
 0x99f   :  { %13641 = vmatprep.subr.bf16.mxu1 %v15793_v0 }
 0x9a2   :  { %13643 = vmatpush1.bf16.msra.mxu1 %v15956_v29 }
 0x9a3   :  { %3695 = vmatprep.subr.mxu1 %v15794_v30 }
 0x9a6   :  { %10512 = vmatpush1.msk.msra.mxu1 %vm59_vm1, %v17240_v46 }
 0x9a7   :  { %13671 = vmatprep.subr.bf16.mxu1 %v15793_v0  ;;  %3724 = vmatmul.mubr.f32.vlgmr.msra.gmra.mrb[44].mxu1 %v10510_v36 }
 0x9a8   :  { %13673 = vmatpush1.bf16.msra.mxu1 %v15857_v4  ;;  %10521 = vmatprep.mubr.msk.f32.mxu1 %vm55_vm0, %v10519_v37 }
 0x9a9   :  { %13674 = vmatprep.subr.bf16.mxu1 %v15793_v0 }
 0x9ac   :  { %13676 = vmatpush1.bf16.msra.mxu1 %v15864_v6 }
 0x9ad   :  { %13677 = vmatprep.subr.bf16.mxu1 %v15793_v0 }
 0x9b0   :  { %13679 = vmatpush1.bf16.msra.mxu1 %v15879_v10 }
 0x9b1   :  { %13680 = vmatprep.subr.bf16.mxu1 %v15793_v0 }
 0x9b4   :  { %13682 = vmatpush1.bf16.msra.mxu1 %v15896_v14 }
 0x9b5   :  { %13683 = vmatprep.subr.bf16.mxu1 %v15793_v0 }
 0x9b8   :  { %13685 = vmatpush1.bf16.msra.mxu1 %v15908_v17 }
 0x9b9   :  { %13686 = vmatprep.subr.bf16.mxu1 %v15793_v0 }
 0x9bc   :  { %13688 = vmatpush1.bf16.msra.mxu1 %v15920_v20 }
 0x9bd   :  { %13689 = vmatprep.subr.bf16.mxu1 %v15793_v0 }
 0x9c0   :  { %13691 = vmatpush1.bf16.msra.mxu1 %v15932_v23 }
 0x9c1   :  { %13692 = vmatprep.subr.bf16.mxu1 %v15793_v0 }
 0x9c4   :  { %13694 = vmatpush1.bf16.msra.mxu1 %v15944_v26 }
 0x9c5   :  { %13695 = vmatprep.subr.bf16.mxu1 %v15793_v0 }
 0x9c8   :  { %13697 = vmatpush1.bf16.msra.mxu1 %v15956_v29 }
 0x9c9   :  { %3848 = vmatprep.subr.mxu1 %v15794_v30 }
 0x9cc   :  { %10520 = vmatpush1.msk.msra.mxu1 %vm59_vm1, %v17240_v46 }
 0x9cd   :  { %3877 = vmatmul.mubr.f32.vlgmr.msra.gmra.mrb[46].mxu1 %v10518_v38  ;;  %13725 = vmatprep.subr.bf16.mxu1 %v15793_v0 }
 0x9ce   :  { %11831 = vmatprep.mubr.msk.f32.mxu1 %vm15795_vm2, %v15794_v30 }
 0xa08   :  { %v3248_v39 = vpop.f32.mrb[38].mxu1 }
 0xa09   :  { %v17608_v40 = vadd.f32 %v3248_v39, %v17428_v44  ;;  %v11763_v41 = vpop.f32.mrb[39].mxu1  ;;  %v10515_v44 = vld [vmem:[%s20604_s0 + $0x228] sm:$0xff] }
 0xa2e   :  { %v3402_v42 = vpop.f32.mrb[40].mxu1 }
 0xa2f   :  { %v3406_v43 = vmax.f32 %v17494_v63, %v3402_v42  ;;  %v3404_v45 = vpop.f32.mrb[41].mxu1  ;;  %v10526_v63 = vld [vmem:[%s20605_s3 + $0x480] sm:$0xff] }
 0xa30   :  { %v13726_v5 = vpack.c.bf16 %v10527_v51, %v10526_v63  ;;  %v10561_v51 = vld [vmem:[%s20605_s3 + $0x518] sm:$0xff] }
 0xa31   :  { %v3483_v47 = vmax.f32 %v3406_v43, %v17512_v2  ;;  %v10528_v2 = vld [vmem:[%s20605_s3 + $0x490] sm:$0xff] }
 0xa32   :  { %13727 = vmatpush3.bf16.msra.mxu1 %v13726_v5  ;;  %v13729_v58 = vpack.c.bf16 %v10529_v54, %v10528_v2  ;;  %v10562_v54 = vld [vmem:[%s20605_s3 + $0x520] sm:$0xff] }
 0xa33   :  { %13728 = vmatprep.subr.bf16.mxu1 %v15793_v0 }
 0xa36   :  { %13730 = vmatpush3.bf16.msra.mxu1 %v13729_v58 }
 0xa37   :  { %13731 = vmatprep.subr.bf16.mxu1 %v15793_v0 }
 0xa3a   :  { %13733 = vmatpush3.bf16.msra.mxu1 %v13732_v11  ;;  %v13867_v11 = vpack.c.bf16 %v10565_v9, %v10564_v8  ;;  %v10598_v8 = vld [vmem:[%s20605_s3 + $0x5c0] sm:$0xff]  ;;  %v10599_v9 = vld [vmem:[%s20605_s3 + $0x5c8] sm:$0xff] }
 0xa3b   :  { %13734 = vmatprep.subr.bf16.mxu1 %v15793_v0 }
 0xa3e   :  { %13736 = vmatpush3.bf16.msra.mxu1 %v13735_v12  ;;  %v13870_v12 = vpack.c.bf16 %v10567_v61, %v10566_v15  ;;  %v10600_v15 = vld [vmem:[%s20605_s3 + $0x5d0] sm:$0xff]  ;;  %v10601_v61 = vld [vmem:[%s20605_s3 + $0x5d8] sm:$0xff] }
 0xa3f   :  { %13737 = vmatprep.subr.bf16.mxu1 %v15793_v0 }
 0xa42   :  { %13739 = vmatpush3.bf16.msra.mxu1 %v13738_v1  ;;  %v13873_v1 = vpack.c.bf16 %v10569_v18, %v10568_v13  ;;  %v10602_v13 = vld [vmem:[%s20605_s3 + $0x5e0] sm:$0xff]  ;;  %v10603_v18 = vld [vmem:[%s20605_s3 + $0x5e8] sm:$0xff] }
 0xa43   :  { %13740 = vmatprep.subr.bf16.mxu1 %v15793_v0 }
 0xa46   :  { %13742 = vmatpush3.bf16.msra.mxu1 %v13741_v19  ;;  %v13876_v19 = vpack.c.bf16 %v10571_v31, %v10570_v16  ;;  %v10604_v16 = vld [vmem:[%s20605_s3 + $0x5f0] sm:$0xff]  ;;  %v10605_v31 = vld [vmem:[%s20605_s3 + $0x5f8] sm:$0xff] }
 0xa47   :  { %13743 = vmatprep.subr.bf16.mxu1 %v15793_v0 }
 0xa4a   :  { %13745 = vmatpush3.bf16.msra.mxu1 %v13744_v24  ;;  %v13879_v24 = vpack.c.bf16 %v10573_v22, %v10572_v21  ;;  %v10607_v21 = vld [vmem:[%s20604_s0 + $0xc8] sm:$0xff]  ;;  %v10606_v22 = vld [vmem:[%s20604_s0 + $0xc0] sm:$0xff] }
 0xa4b   :  { %13746 = vmatprep.subr.bf16.mxu1 %v15793_v0 }
 0xa4e   :  { %13748 = vmatpush3.bf16.msra.mxu1 %v13747_v28  ;;  %v10583_v28 = vld [vmem:[%s20604_s0 + $0x3d8] sm:$0xff] }
 0xa4f   :  { %13776 = vmatprep.subr.bf16.mxu1 %v15793_v0 }
 0xa54   :  { %v3556_v49 = vpop.f32.mrb[42].mxu1 }
 0xa55   :  { %v3560_v50 = vmax.f32 %v3483_v47, %v3556_v49  ;;  %v3558_v52 = vpop.f32.mrb[43].mxu1 }
 0xa57   :  { %v3561_v55 = vadd.f32 %v17615_v53, %v3560_v50 }
 0xa59   :  { %v3562_v56 = vmax.f32 %v3561_v55, 0.0  ;;  %v10547_v55 = vld [vmem:[%s20604_s0 + $0x238] sm:$0xff] }
 0xa5b   :  { %11797 = vmatmul.mubr.f32.vlgmr.msra.gmra.mrb[44].mxu0 %v3562_v56  ;;  %v10555_v56 = vld [vmem:[%s20604_s0 + $0x558] sm:$0xff] }
 0xa5c   :  { %13646 = vmatpush1.bf16.msra.mxu0 %v15857_v4  ;;  %10517 = vmatprep.mubr.msk.f32.mxu0 %vm55_vm0, %v10515_v44  ;;  %v17854_v44 = vld [vmem:[%s20603_s1 + $0x90] sm:$0x3f] }
 0xa5d   :  { %13647 = vmatprep.subr.bf16.mxu0 %v15793_v0 }
 0xa60   :  { %13649 = vmatpush1.bf16.msra.mxu0 %v15864_v6 }
 0xa61   :  { %13650 = vmatprep.subr.bf16.mxu0 %v15793_v0 }
 0xa64   :  { %13652 = vmatpush1.bf16.msra.mxu0 %v15879_v10 }
 0xa65   :  { %13653 = vmatprep.subr.bf16.mxu0 %v15793_v0 }
 0xa68   :  { %13655 = vmatpush1.bf16.msra.mxu0 %v15896_v14 }
 0xa69   :  { %13656 = vmatprep.subr.bf16.mxu0 %v15793_v0 }
 0xa6c   :  { %13658 = vmatpush1.bf16.msra.mxu0 %v15908_v17 }
 0xa6d   :  { %13659 = vmatprep.subr.bf16.mxu0 %v15793_v0 }
 0xa70   :  { %13661 = vmatpush1.bf16.msra.mxu0 %v15920_v20 }
 0xa71   :  { %13662 = vmatprep.subr.bf16.mxu0 %v15793_v0 }
 0xa74   :  { %13664 = vmatpush1.bf16.msra.mxu0 %v15932_v23 }
 0xa75   :  { %13665 = vmatprep.subr.bf16.mxu0 %v15793_v0 }
 0xa78   :  { %13667 = vmatpush1.bf16.msra.mxu0 %v15944_v26 }
 0xa79   :  { %13668 = vmatprep.subr.bf16.mxu0 %v15793_v0 }
 0xa7a   :  { %v17679_v3 = vpop.f32.mrb[44].mxu1 }
 0xa7b   :  { %v3727_v48 = vpop.f32.mrb[45].mxu1 }
 0xa7c   :  { %13670 = vmatpush1.bf16.msra.mxu0 %v15956_v29  ;;  %v10559_v48 = vld [vmem:[%s20605_s3 + $0x508] sm:$0xff] }
 0xa7d   :  { %3771 = vmatprep.subr.mxu0 %v15794_v30 }
 0xa80   :  { %10516 = vmatpush1.msk.msra.mxu0 %vm59_vm1, %v17240_v46 }
 0xa81   :  { %3800 = vmatmul.mubr.f32.vlgmr.msra.gmra.mrb[46].mxu0 %v10514_v57  ;;  %13698 = vmatprep.subr.bf16.mxu0 %v15793_v0 }
 0xa82   :  { %13700 = vmatpush1.bf16.msra.mxu0 %v15857_v4  ;;  %10525 = vmatprep.mubr.msk.f32.mxu0 %vm55_vm0, %v10523_v59 }
 0xa83   :  { %13701 = vmatprep.subr.bf16.mxu0 %v15793_v0 }
 0xa86   :  { %13703 = vmatpush1.bf16.msra.mxu0 %v15864_v6 }
 0xa87   :  { %13704 = vmatprep.subr.bf16.mxu0 %v15793_v0 }
 0xa8a   :  { %13706 = vmatpush1.bf16.msra.mxu0 %v15879_v10 }
 0xa8b   :  { %13707 = vmatprep.subr.bf16.mxu0 %v15793_v0 }
 0xa8e   :  { %13709 = vmatpush1.bf16.msra.mxu0 %v15896_v14 }
 0xa8f   :  { %13710 = vmatprep.subr.bf16.mxu0 %v15793_v0 }
 0xa92   :  { %13712 = vmatpush1.bf16.msra.mxu0 %v15908_v17 }
 0xa93   :  { %13713 = vmatprep.subr.bf16.mxu0 %v15793_v0 }
 0xa96   :  { %13715 = vmatpush1.bf16.msra.mxu0 %v15920_v20 }
 0xa97   :  { %13716 = vmatprep.subr.bf16.mxu0 %v15793_v0 }
 0xa9a   :  { %13718 = vmatpush1.bf16.msra.mxu0 %v15932_v23 }
 0xa9b   :  { %13719 = vmatprep.subr.bf16.mxu0 %v15793_v0 }
 0xa9e   :  { %13721 = vmatpush1.bf16.msra.mxu0 %v15944_v26 }
 0xa9f   :  { %13722 = vmatprep.subr.bf16.mxu0 %v15793_v0 }
 0xaa0   :  { %v17697_v62 = vpop.f32.mrb[46].mxu1 }
 0xaa1   :  { %v3880_v7 = vpop.f32.mrb[47].mxu1 }
 0xaa2   :  { %13724 = vmatpush1.bf16.msra.mxu0 %v15956_v29  ;;  %v10563_v7 = vld [vmem:[%s20605_s3 + $0x528] sm:$0xff] }
 0xaa3   :  { %3925 = vmatprep.subr.mxu0 %v15794_v30  ;;  %v13864_v58 = vpack.c.bf16 %v10563_v7, %v10562_v54  ;;  %v10596_v54 = vld [vmem:[%s20605_s3 + $0x5b0] sm:$0xff]  ;;  %v10597_v7 = vld [vmem:[%s20605_s3 + $0x5b8] sm:$0xff] }
 0xaa6   :  { %10524 = vmatpush1.msk.msra.mxu0 %vm59_vm1, %v17240_v46 }
 0xaa7   :  { %3954 = vmatmul.mubr.f32.vlgmr.msra.gmra.mrb[48].mxu0 %v10522_v60  ;;  %13749 = vmatprep.subr.bf16.mxu0 %v15793_v0 }
 0xaa8   :  { %13751 = vmatpush1.bf16.msra.mxu0 %v15857_v4  ;;  %10545 = vmatprep.mubr.msk.f32.mxu0 %vm55_vm0, %v10543_v32  ;;  %v10582_v32 = vld [vmem:[%s20604_s0 + $0x3d0] sm:$0xff] }
 0xaa9   :  { %13752 = vmatprep.subr.bf16.mxu0 %v15793_v0 }
 0xaac   :  { %13754 = vmatpush1.bf16.msra.mxu0 %v15864_v6 }
 0xaad   :  { %13755 = vmatprep.subr.bf16.mxu0 %v15793_v0 }
 0xab0   :  { %13757 = vmatpush1.bf16.msra.mxu0 %v15879_v10 }
 0xab1   :  { %13758 = vmatprep.subr.bf16.mxu0 %v15793_v0 }
 0xab4   :  { %13760 = vmatpush1.bf16.msra.mxu0 %v15896_v14 }
 0xab5   :  { %13761 = vmatprep.subr.bf16.mxu0 %v15793_v0 }
 0xab8   :  { %13763 = vmatpush1.bf16.msra.mxu0 %v15908_v17 }
 0xab9   :  { %13764 = vmatprep.subr.bf16.mxu0 %v15793_v0 }
 0xabc   :  { %13766 = vmatpush1.bf16.msra.mxu0 %v15920_v20 }
 0xabd   :  { %13767 = vmatprep.subr.bf16.mxu0 %v15793_v0 }
 0xac0   :  { %13769 = vmatpush1.bf16.msra.mxu0 %v15932_v23 }
 0xac1   :  { %13770 = vmatprep.subr.bf16.mxu0 %v15793_v0 }
 0xac4   :  { %13772 = vmatpush1.bf16.msra.mxu0 %v15944_v26 }
 0xac5   :  { %13773 = vmatprep.subr.bf16.mxu0 %v15793_v0 }
 0xac8   :  { %13775 = vmatpush1.bf16.msra.mxu0 %v15956_v29 }
 0xac9   :  { %4094 = vmatprep.subr.mxu0 %v15794_v30 }
 0xacc   :  { %10544 = vmatpush1.msk.msra.mxu0 %vm59_vm1, %v17240_v46 }
 0xacd   :  { %13803 = vmatprep.subr.bf16.mxu0 %v15793_v0  ;;  %4123 = vmatmul.mubr.f32.vlgmr.msra.gmra.mrb[50].mxu0 %v10542_v33 }
 0xace   :  { %13805 = vmatpush1.bf16.msra.mxu0 %v15857_v4  ;;  %10553 = vmatprep.mubr.msk.f32.mxu0 %vm55_vm0, %v10551_v34 }
 0xacf   :  { %13806 = vmatprep.subr.bf16.mxu0 %v15793_v0 }
 0xad2   :  { %13808 = vmatpush1.bf16.msra.mxu0 %v15864_v6 }
 0xad3   :  { %13809 = vmatprep.subr.bf16.mxu0 %v15793_v0 }
 0xad6   :  { %13811 = vmatpush1.bf16.msra.mxu0 %v15879_v10 }
 0xad7   :  { %13812 = vmatprep.subr.bf16.mxu0 %v15793_v0 }
 0xada   :  { %13814 = vmatpush1.bf16.msra.mxu0 %v15896_v14 }
 0xadb   :  { %13815 = vmatprep.subr.bf16.mxu0 %v15793_v0 }
 0xade   :  { %13817 = vmatpush1.bf16.msra.mxu0 %v15908_v17 }
 0xadf   :  { %13818 = vmatprep.subr.bf16.mxu0 %v15793_v0 }
 0xae2   :  { %13820 = vmatpush1.bf16.msra.mxu0 %v15920_v20 }
 0xae3   :  { %13821 = vmatprep.subr.bf16.mxu0 %v15793_v0 }
 0xae6   :  { %13823 = vmatpush1.bf16.msra.mxu0 %v15932_v23 }
 0xae7   :  { %13824 = vmatprep.subr.bf16.mxu0 %v15793_v0 }
 0xaea   :  { %13826 = vmatpush1.bf16.msra.mxu0 %v15944_v26 }
 0xaeb   :  { %13827 = vmatprep.subr.bf16.mxu0 %v15793_v0 }
 0xaee   :  { %13829 = vmatpush1.bf16.msra.mxu0 %v15956_v29 }
 0xaef   :  { %4247 = vmatprep.subr.mxu0 %v15794_v30 }
 0xaf2   :  { %10552 = vmatpush1.msk.msra.mxu0 %vm59_vm1, %v17240_v46 }
 0xaf3   :  { %4276 = vmatmul.mubr.f32.vlgmr.msra.gmra.mrb[52].mxu0 %v10550_v35  ;;  %13857 = vmatprep.subr.bf16.mxu0 %v15793_v0 }
 0xaf4   :  { %11866 = vmatprep.mubr.msk.f32.mxu0 %vm15795_vm2, %v15794_v30 }
 0xb2e   :  { %v3647_v36 = vpop.f32.mrb[44].mxu0 }
 0xb2f   :  { %v17793_v37 = vadd.f32 %v3647_v36, %v17608_v40  ;;  %v11798_v38 = vpop.f32.mrb[45].mxu0  ;;  %v10546_v40 = vld [vmem:[%s20604_s0 + $0x230] sm:$0xff] }
 0xb54   :  { %v3801_v39 = vpop.f32.mrb[46].mxu0 }
 0xb55   :  { %v3805_v41 = vmax.f32 %v17679_v3, %v3801_v39  ;;  %v3803_v42 = vpop.f32.mrb[47].mxu0  ;;  %v10558_v3 = vld [vmem:[%s20605_s3 + $0x500] sm:$0xff] }
 0xb56   :  { %v13858_v63 = vpack.c.bf16 %v10559_v48, %v10558_v3  ;;  %v10593_v48 = vld [vmem:[%s20605_s3 + $0x598] sm:$0xff] }
 0xb57   :  { %v3882_v43 = vmax.f32 %v3805_v41, %v17697_v62  ;;  %v10560_v62 = vld [vmem:[%s20605_s3 + $0x510] sm:$0xff] }
 0xb58   :  { %13859 = vmatpush3.bf16.msra.mxu0 %v13858_v63  ;;  %v13861_v5 = vpack.c.bf16 %v10561_v51, %v10560_v62  ;;  %v10594_v51 = vld [vmem:[%s20605_s3 + $0x5a0] sm:$0xff] }
 0xb59   :  { %13860 = vmatprep.subr.bf16.mxu0 %v15793_v0 }
 0xb5c   :  { %13862 = vmatpush3.bf16.msra.mxu0 %v13861_v5 }
 0xb5d   :  { %13863 = vmatprep.subr.bf16.mxu0 %v15793_v0 }
 0xb60   :  { %13865 = vmatpush3.bf16.msra.mxu0 %v13864_v58  ;;  %v13999_v58 = vpack.c.bf16 %v10597_v7, %v10596_v54  ;;  %v10631_v54 = vld [vmem:[%s20605_s3 + $0x648] sm:$0xff] }
 0xb61   :  { %13866 = vmatprep.subr.bf16.mxu0 %v15793_v0 }
 0xb64   :  { %13868 = vmatpush3.bf16.msra.mxu0 %v13867_v11  ;;  %v14002_v11 = vpack.c.bf16 %v10599_v9, %v10598_v8  ;;  %v10633_v8 = vld [vmem:[%s20605_s3 + $0x658] sm:$0xff] }
 0xb65   :  { %13869 = vmatprep.subr.bf16.mxu0 %v15793_v0 }
 0xb68   :  { %13871 = vmatpush3.bf16.msra.mxu0 %v13870_v12  ;;  %v14005_v12 = vpack.c.bf16 %v10601_v61, %v10600_v15  ;;  %v10635_v15 = vld [vmem:[%s20605_s3 + $0x668] sm:$0xff] }
 0xb69   :  { %13872 = vmatprep.subr.bf16.mxu0 %v15793_v0 }
 0xb6c   :  { %13874 = vmatpush3.bf16.msra.mxu0 %v13873_v1  ;;  %v14008_v1 = vpack.c.bf16 %v10603_v18, %v10602_v13  ;;  %v10637_v13 = vld [vmem:[%s20605_s3 + $0x678] sm:$0xff] }
 0xb6d   :  { %13875 = vmatprep.subr.bf16.mxu0 %v15793_v0 }
 0xb70   :  { %13877 = vmatpush3.bf16.msra.mxu0 %v13876_v19  ;;  %v14011_v19 = vpack.c.bf16 %v10605_v31, %v10604_v16  ;;  %v10638_v16 = vld [vmem:[%s20604_s0 + $0xd0] sm:$0xff]  ;;  %v10647_v31 = vld [vmem:[%s20604_s0 + $0x3f8] sm:$0xff] }
 0xb71   :  { %13878 = vmatprep.subr.bf16.mxu0 %v15793_v0 }
 0xb74   :  { %13880 = vmatpush3.bf16.msra.mxu0 %v13879_v24  ;;  %v10615_v24 = vld [vmem:[%s20604_s0 + $0x3e8] sm:$0xff] }
 0xb75   :  { %13908 = vmatprep.subr.bf16.mxu0 %v15793_v0 }
 0xb7a   :  { %v3955_v45 = vpop.f32.mrb[48].mxu0 }
 0xb7b   :  { %v3959_v47 = vmax.f32 %v3882_v43, %v3955_v45  ;;  %v3957_v49 = vpop.f32.mrb[49].mxu0 }
 0xb7d   :  { %v3960_v50 = vadd.f32 %v17615_v53, %v3959_v47 }
 0xb7f   :  { %v3961_v52 = vmax.f32 %v3960_v50, 0.0  ;;  %v10579_v50 = vld [vmem:[%s20604_s0 + $0x248] sm:$0xff] }
 0xb81   :  { %11832 = vmatmul.mubr.f32.vlgmr.msra.gmra.mrb[48].mxu1 %v3961_v52  ;;  %v10587_v52 = vld [vmem:[%s20604_s0 + $0x568] sm:$0xff] }
 0xb82   :  { %13778 = vmatpush1.bf16.msra.mxu1 %v15857_v4  ;;  %10549 = vmatprep.mubr.msk.f32.mxu1 %vm55_vm0, %v10547_v55  ;;  %v10586_v55 = vld [vmem:[%s20604_s0 + $0x560] sm:$0xff] }
 0xb83   :  { %13779 = vmatprep.subr.bf16.mxu1 %v15793_v0 }
 0xb86   :  { %13781 = vmatpush1.bf16.msra.mxu1 %v15864_v6 }
 0xb87   :  { %13782 = vmatprep.subr.bf16.mxu1 %v15793_v0 }
 0xb8a   :  { %13784 = vmatpush1.bf16.msra.mxu1 %v15879_v10 }
 0xb8b   :  { %13785 = vmatprep.subr.bf16.mxu1 %v15793_v0 }
 0xb8e   :  { %13787 = vmatpush1.bf16.msra.mxu1 %v15896_v14 }
 0xb8f   :  { %13788 = vmatprep.subr.bf16.mxu1 %v15793_v0 }
 0xb92   :  { %13790 = vmatpush1.bf16.msra.mxu1 %v15908_v17 }
 0xb93   :  { %13791 = vmatprep.subr.bf16.mxu1 %v15793_v0 }
 0xb96   :  { %13793 = vmatpush1.bf16.msra.mxu1 %v15920_v20 }
 0xb97   :  { %13794 = vmatprep.subr.bf16.mxu1 %v15793_v0 }
 0xb9a   :  { %13796 = vmatpush1.bf16.msra.mxu1 %v15932_v23 }
 0xb9b   :  { %13797 = vmatprep.subr.bf16.mxu1 %v15793_v0 }
 0xb9e   :  { %13799 = vmatpush1.bf16.msra.mxu1 %v15944_v26 }
 0xb9f   :  { %13800 = vmatprep.subr.bf16.mxu1 %v15793_v0 }
 0xba0   :  { %v17864_v57 = vpop.f32.mrb[50].mxu0 }
 0xba1   :  { %v4126_v59 = vpop.f32.mrb[51].mxu0 }
 0xba2   :  { %13802 = vmatpush1.bf16.msra.mxu1 %v15956_v29  ;;  %v10591_v59 = vld [vmem:[%s20605_s3 + $0x588] sm:$0xff] }
 0xba3   :  { %4170 = vmatprep.subr.mxu1 %v15794_v30 }
 0xba6   :  { %10548 = vmatpush1.msk.msra.mxu1 %vm59_vm1, %v17240_v46  ;;  %v10554_v46 = vld [vmem:[%s20604_s0 + $0x550] sm:$0xff] }
 0xba7   :  { %4199 = vmatmul.mubr.f32.vlgmr.msra.gmra.mrb[50].mxu1 %v10546_v40  ;;  %13830 = vmatprep.subr.bf16.mxu1 %v15793_v0 }
 0xba8   :  { %13832 = vmatpush1.bf16.msra.mxu1 %v15857_v4  ;;  %10557 = vmatprep.mubr.msk.f32.mxu1 %vm55_vm0, %v10555_v56 }
 0xba9   :  { %13833 = vmatprep.subr.bf16.mxu1 %v15793_v0 }
 0xbac   :  { %13835 = vmatpush1.bf16.msra.mxu1 %v15864_v6 }
 0xbad   :  { %13836 = vmatprep.subr.bf16.mxu1 %v15793_v0 }
 0xbb0   :  { %13838 = vmatpush1.bf16.msra.mxu1 %v15879_v10 }
 0xbb1   :  { %13839 = vmatprep.subr.bf16.mxu1 %v15793_v0 }
 0xbb4   :  { %13841 = vmatpush1.bf16.msra.mxu1 %v15896_v14 }
 0xbb5   :  { %13842 = vmatprep.subr.bf16.mxu1 %v15793_v0 }
 0xbb8   :  { %13844 = vmatpush1.bf16.msra.mxu1 %v15908_v17 }
 0xbb9   :  { %13845 = vmatprep.subr.bf16.mxu1 %v15793_v0 }
 0xbbc   :  { %13847 = vmatpush1.bf16.msra.mxu1 %v15920_v20 }
 0xbbd   :  { %13848 = vmatprep.subr.bf16.mxu1 %v15793_v0 }
 0xbc0   :  { %13850 = vmatpush1.bf16.msra.mxu1 %v15932_v23 }
 0xbc1   :  { %13851 = vmatprep.subr.bf16.mxu1 %v15793_v0 }
 0xbc4   :  { %13853 = vmatpush1.bf16.msra.mxu1 %v15944_v26 }
 0xbc5   :  { %13854 = vmatprep.subr.bf16.mxu1 %v15793_v0 }
 0xbc6   :  { %v17882_v60 = vpop.f32.mrb[52].mxu0 }
 0xbc7   :  { %v4279_v2 = vpop.f32.mrb[53].mxu0 }
 0xbc8   :  { %13856 = vmatpush1.bf16.msra.mxu1 %v15956_v29  ;;  %v10595_v2 = vld [vmem:[%s20605_s3 + $0x5a8] sm:$0xff] }
 0xbc9   :  { %4324 = vmatprep.subr.mxu1 %v15794_v30  ;;  %v13996_v5 = vpack.c.bf16 %v10595_v2, %v10594_v51  ;;  %v10629_v51 = vld [vmem:[%s20605_s3 + $0x638] sm:$0xff] }
 0xbcc   :  { %10556 = vmatpush1.msk.msra.mxu1 %vm59_vm1, %v17854_v44 }
 0xbcd   :  { %4353 = vmatmul.mubr.f32.vlgmr.msra.gmra.mrb[52].mxu1 %v10554_v46  ;;  %13881 = vmatprep.subr.bf16.mxu1 %v15793_v0 }
 0xbce   :  { %13883 = vmatpush1.bf16.msra.mxu1 %v15857_v4  ;;  %10577 = vmatprep.mubr.msk.f32.mxu1 %vm55_vm0, %v10575_v25  ;;  %v10614_v25 = vld [vmem:[%s20604_s0 + $0x3e0] sm:$0xff] }
 0xbcf   :  { %13884 = vmatprep.subr.bf16.mxu1 %v15793_v0 }
 0xbd2   :  { %13886 = vmatpush1.bf16.msra.mxu1 %v15864_v6 }
 0xbd3   :  { %13887 = vmatprep.subr.bf16.mxu1 %v15793_v0 }
 0xbd6   :  { %13889 = vmatpush1.bf16.msra.mxu1 %v15879_v10 }
 0xbd7   :  { %13890 = vmatprep.subr.bf16.mxu1 %v15793_v0 }
 0xbda   :  { %13892 = vmatpush1.bf16.msra.mxu1 %v15896_v14 }
 0xbdb   :  { %13893 = vmatprep.subr.bf16.mxu1 %v15793_v0 }
 0xbde   :  { %13895 = vmatpush1.bf16.msra.mxu1 %v15908_v17 }
 0xbdf   :  { %13896 = vmatprep.subr.bf16.mxu1 %v15793_v0 }
 0xbe2   :  { %13898 = vmatpush1.bf16.msra.mxu1 %v15920_v20 }
 0xbe3   :  { %13899 = vmatprep.subr.bf16.mxu1 %v15793_v0 }
 0xbe6   :  { %13901 = vmatpush1.bf16.msra.mxu1 %v15932_v23 }
 0xbe7   :  { %13902 = vmatprep.subr.bf16.mxu1 %v15793_v0 }
 0xbea   :  { %13904 = vmatpush1.bf16.msra.mxu1 %v15944_v26 }
 0xbeb   :  { %13905 = vmatprep.subr.bf16.mxu1 %v15793_v0 }
 0xbee   :  { %13907 = vmatpush1.bf16.msra.mxu1 %v15956_v29 }
 0xbef   :  { %4493 = vmatprep.subr.mxu1 %v15794_v30 }
 0xbf2   :  { %10576 = vmatpush1.msk.msra.mxu1 %vm59_vm1, %v17854_v44 }
 0xbf3   :  { %13935 = vmatprep.subr.bf16.mxu1 %v15793_v0  ;;  %4522 = vmatmul.mubr.f32.vlgmr.msra.gmra.mrb[54].mxu1 %v10574_v27 }
 0xbf4   :  { %13937 = vmatpush1.bf16.msra.mxu1 %v15857_v4  ;;  %10585 = vmatprep.mubr.msk.f32.mxu1 %vm55_vm0, %v10583_v28 }
 0xbf5   :  { %13938 = vmatprep.subr.bf16.mxu1 %v15793_v0 }
 0xbf8   :  { %13940 = vmatpush1.bf16.msra.mxu1 %v15864_v6 }
 0xbf9   :  { %13941 = vmatprep.subr.bf16.mxu1 %v15793_v0 }
 0xbfc   :  { %13943 = vmatpush1.bf16.msra.mxu1 %v15879_v10 }
 0xbfd   :  { %13944 = vmatprep.subr.bf16.mxu1 %v15793_v0 }
 0xc00   :  { %13946 = vmatpush1.bf16.msra.mxu1 %v15896_v14 }
 0xc01   :  { %13947 = vmatprep.subr.bf16.mxu1 %v15793_v0 }
 0xc04   :  { %13949 = vmatpush1.bf16.msra.mxu1 %v15908_v17 }
 0xc05   :  { %13950 = vmatprep.subr.bf16.mxu1 %v15793_v0 }
 0xc08   :  { %13952 = vmatpush1.bf16.msra.mxu1 %v15920_v20 }
 0xc09   :  { %13953 = vmatprep.subr.bf16.mxu1 %v15793_v0 }
 0xc0c   :  { %13955 = vmatpush1.bf16.msra.mxu1 %v15932_v23 }
 0xc0d   :  { %13956 = vmatprep.subr.bf16.mxu1 %v15793_v0 }
 0xc10   :  { %13958 = vmatpush1.bf16.msra.mxu1 %v15944_v26 }
 0xc11   :  { %13959 = vmatprep.subr.bf16.mxu1 %v15793_v0 }
 0xc14   :  { %13961 = vmatpush1.bf16.msra.mxu1 %v15956_v29 }
 0xc15   :  { %4646 = vmatprep.subr.mxu1 %v15794_v30 }
 0xc18   :  { %10584 = vmatpush1.msk.msra.mxu1 %vm59_vm1, %v17854_v44 }
 0xc19   :  { %4675 = vmatmul.mubr.f32.vlgmr.msra.gmra.mrb[56].mxu1 %v10582_v32  ;;  %13989 = vmatprep.subr.bf16.mxu1 %v15793_v0 }
 0xc1a   :  { %11901 = vmatprep.mubr.msk.f32.mxu1 %vm15795_vm2, %v15794_v30 }
 0xc54   :  { %v4046_v33 = vpop.f32.mrb[48].mxu1 }
 0xc55   :  { %v17978_v34 = vadd.f32 %v4046_v33, %v17793_v37  ;;  %v11833_v35 = vpop.f32.mrb[49].mxu1  ;;  %v10578_v37 = vld [vmem:[%s20604_s0 + $0x240] sm:$0xff] }
 0xc7a   :  { %v4200_v36 = vpop.f32.mrb[50].mxu1 }
 0xc7b   :  { %v4204_v38 = vmax.f32 %v17864_v57, %v4200_v36  ;;  %v4202_v39 = vpop.f32.mrb[51].mxu1  ;;  %v10590_v57 = vld [vmem:[%s20605_s3 + $0x580] sm:$0xff] }
 0xc7c   :  { %v13990_v3 = vpack.c.bf16 %v10591_v59, %v10590_v57  ;;  %v10625_v57 = vld [vmem:[%s20605_s3 + $0x618] sm:$0xff] }
 0xc7d   :  { %v4281_v41 = vmax.f32 %v4204_v38, %v17882_v60  ;;  %v10592_v60 = vld [vmem:[%s20605_s3 + $0x590] sm:$0xff] }
 0xc7e   :  { %13991 = vmatpush3.bf16.msra.mxu1 %v13990_v3  ;;  %v13993_v63 = vpack.c.bf16 %v10593_v48, %v10592_v60  ;;  %v10626_v3 = vld [vmem:[%s20605_s3 + $0x620] sm:$0xff]  ;;  %v10627_v48 = vld [vmem:[%s20605_s3 + $0x628] sm:$0xff] }
 0xc7f   :  { %13992 = vmatprep.subr.bf16.mxu1 %v15793_v0 }
 0xc82   :  { %13994 = vmatpush3.bf16.msra.mxu1 %v13993_v63  ;;  %v10628_v63 = vld [vmem:[%s20605_s3 + $0x630] sm:$0xff] }
 0xc83   :  { %13995 = vmatprep.subr.bf16.mxu1 %v15793_v0  ;;  %v14131_v2 = vpack.c.bf16 %v10629_v51, %v10628_v63  ;;  %v10663_v63 = vld [vmem:[%s20605_s3 + $0x6c8] sm:$0xff] }
 0xc86   :  { %13997 = vmatpush3.bf16.msra.mxu1 %v13996_v5  ;;  %v10630_v5 = vld [vmem:[%s20605_s3 + $0x640] sm:$0xff] }
 0xc87   :  { %13998 = vmatprep.subr.bf16.mxu1 %v15793_v0  ;;  %v14134_v7 = vpack.c.bf16 %v10631_v54, %v10630_v5  ;;  %v10665_v5 = vld [vmem:[%s20605_s3 + $0x6d8] sm:$0xff] }
 0xc8a   :  { %14000 = vmatpush3.bf16.msra.mxu1 %v13999_v58  ;;  %v10632_v58 = vld [vmem:[%s20605_s3 + $0x650] sm:$0xff] }
 0xc8b   :  { %14001 = vmatprep.subr.bf16.mxu1 %v15793_v0  ;;  %v14137_v9 = vpack.c.bf16 %v10633_v8, %v10632_v58  ;;  %v10667_v58 = vld [vmem:[%s20605_s3 + $0x6e8] sm:$0xff] }
 0xc8e   :  { %14003 = vmatpush3.bf16.msra.mxu1 %v14002_v11  ;;  %v10634_v11 = vld [vmem:[%s20605_s3 + $0x660] sm:$0xff] }
 0xc8f   :  { %14004 = vmatprep.subr.bf16.mxu1 %v15793_v0  ;;  %v14140_v61 = vpack.c.bf16 %v10635_v15, %v10634_v11  ;;  %v10669_v11 = vld [vmem:[%s20605_s3 + $0x6f8] sm:$0xff] }
 0xc92   :  { %14006 = vmatpush3.bf16.msra.mxu1 %v14005_v12  ;;  %v10636_v12 = vld [vmem:[%s20605_s3 + $0x670] sm:$0xff] }
 0xc93   :  { %14007 = vmatprep.subr.bf16.mxu1 %v15793_v0  ;;  %v14143_v18 = vpack.c.bf16 %v10637_v13, %v10636_v12  ;;  %v10670_v12 = vld [vmem:[%s20604_s0 + $0xe0] sm:$0xff]  ;;  %v10679_v13 = vld [vmem:[%s20604_s0 + $0x408] sm:$0xff] }
 0xc96   :  { %14009 = vmatpush3.bf16.msra.mxu1 %v14008_v1  ;;  %v10639_v1 = vld [vmem:[%s20604_s0 + $0xd8] sm:$0xff] }
 0xc97   :  { %14010 = vmatprep.subr.bf16.mxu1 %v15793_v0 }
 0xc9a   :  { %14012 = vmatpush3.bf16.msra.mxu1 %v14011_v19  ;;  %v10646_v19 = vld [vmem:[%s20604_s0 + $0x3f0] sm:$0xff] }
 0xc9b   :  { %14040 = vmatprep.subr.bf16.mxu1 %v15793_v0 }
 0xca0   :  { %v4354_v42 = vpop.f32.mrb[52].mxu1 }
 0xca1   :  { %v4358_v43 = vmax.f32 %v4281_v41, %v4354_v42  ;;  %v4356_v45 = vpop.f32.mrb[53].mxu1 }
 0xca3   :  { %v4359_v47 = vadd.f32 %v17615_v53, %v4358_v43 }
 0xca5   :  { %v4360_v49 = vmax.f32 %v4359_v47, 0.0  ;;  %v10611_v47 = vld [vmem:[%s20604_s0 + $0x258] sm:$0xff] }
 0xca7   :  { %11867 = vmatmul.mubr.f32.vlgmr.msra.gmra.mrb[54].mxu0 %v4360_v49  ;;  %v10618_v49 = vld [vmem:[%s20604_s0 + $0x570] sm:$0xff] }
 0xca8   :  { %13910 = vmatpush1.bf16.msra.mxu0 %v15857_v4  ;;  %10581 = vmatprep.mubr.msk.f32.mxu0 %vm55_vm0, %v10579_v50 }
 0xca9   :  { %13911 = vmatprep.subr.bf16.mxu0 %v15793_v0 }
 0xcac   :  { %13913 = vmatpush1.bf16.msra.mxu0 %v15864_v6 }
 0xcad   :  { %13914 = vmatprep.subr.bf16.mxu0 %v15793_v0 }
 0xcb0   :  { %13916 = vmatpush1.bf16.msra.mxu0 %v15879_v10 }
 0xcb1   :  { %13917 = vmatprep.subr.bf16.mxu0 %v15793_v0 }
 0xcb4   :  { %13919 = vmatpush1.bf16.msra.mxu0 %v15896_v14 }
 0xcb5   :  { %13920 = vmatprep.subr.bf16.mxu0 %v15793_v0 }
 0xcb8   :  { %13922 = vmatpush1.bf16.msra.mxu0 %v15908_v17 }
 0xcb9   :  { %13923 = vmatprep.subr.bf16.mxu0 %v15793_v0 }
 0xcbc   :  { %13925 = vmatpush1.bf16.msra.mxu0 %v15920_v20 }
 0xcbd   :  { %13926 = vmatprep.subr.bf16.mxu0 %v15793_v0 }
 0xcc0   :  { %13928 = vmatpush1.bf16.msra.mxu0 %v15932_v23 }
 0xcc1   :  { %13929 = vmatprep.subr.bf16.mxu0 %v15793_v0 }
 0xcc4   :  { %13931 = vmatpush1.bf16.msra.mxu0 %v15944_v26 }
 0xcc5   :  { %13932 = vmatprep.subr.bf16.mxu0 %v15793_v0 }
 0xcc6   :  { %v18044_v40 = vpop.f32.mrb[54].mxu1 }
 0xcc7   :  { %v4525_v56 = vpop.f32.mrb[55].mxu1 }
 0xcc8   :  { %13934 = vmatpush1.bf16.msra.mxu0 %v15956_v29  ;;  %v10624_v56 = vld [vmem:[%s20605_s3 + $0x610] sm:$0xff] }
 0xcc9   :  { %4569 = vmatprep.subr.mxu0 %v15794_v30  ;;  %v14125_v60 = vpack.c.bf16 %v10625_v57, %v10624_v56  ;;  %v10659_v57 = vld [vmem:[%s20605_s3 + $0x6a8] sm:$0xff] }
 0xccc   :  { %10580 = vmatpush1.msk.msra.mxu0 %vm59_vm1, %v17854_v44 }
 0xccd   :  { %4598 = vmatmul.mubr.f32.vlgmr.msra.gmra.mrb[56].mxu0 %v10578_v37  ;;  %13962 = vmatprep.subr.bf16.mxu0 %v15793_v0 }
 0xcce   :  { %13964 = vmatpush1.bf16.msra.mxu0 %v15857_v4  ;;  %10589 = vmatprep.mubr.msk.f32.mxu0 %vm55_vm0, %v10587_v52 }
 0xccf   :  { %13965 = vmatprep.subr.bf16.mxu0 %v15793_v0 }
 0xcd2   :  { %13967 = vmatpush1.bf16.msra.mxu0 %v15864_v6 }
 0xcd3   :  { %13968 = vmatprep.subr.bf16.mxu0 %v15793_v0 }
 0xcd6   :  { %13970 = vmatpush1.bf16.msra.mxu0 %v15879_v10 }
 0xcd7   :  { %13971 = vmatprep.subr.bf16.mxu0 %v15793_v0 }
 0xcda   :  { %13973 = vmatpush1.bf16.msra.mxu0 %v15896_v14 }
 0xcdb   :  { %13974 = vmatprep.subr.bf16.mxu0 %v15793_v0 }
 0xcde   :  { %13976 = vmatpush1.bf16.msra.mxu0 %v15908_v17 }
 0xcdf   :  { %13977 = vmatprep.subr.bf16.mxu0 %v15793_v0 }
 0xce2   :  { %13979 = vmatpush1.bf16.msra.mxu0 %v15920_v20 }
 0xce3   :  { %13980 = vmatprep.subr.bf16.mxu0 %v15793_v0 }
 0xce6   :  { %13982 = vmatpush1.bf16.msra.mxu0 %v15932_v23 }
 0xce7   :  { %13983 = vmatprep.subr.bf16.mxu0 %v15793_v0 }
 0xcea   :  { %13985 = vmatpush1.bf16.msra.mxu0 %v15944_v26 }
 0xceb   :  { %13986 = vmatprep.subr.bf16.mxu0 %v15793_v0 }
 0xcec   :  { %v18062_v46 = vpop.f32.mrb[56].mxu1 }
 0xced   :  { %v4678_v62 = vpop.f32.mrb[57].mxu1 }
 0xcee   :  { %13988 = vmatpush1.bf16.msra.mxu0 %v15956_v29  ;;  %v14128_v62 = vpack.c.bf16 %v10627_v48, %v10626_v3  ;;  %v10661_v3 = vld [vmem:[%s20605_s3 + $0x6b8] sm:$0xff] }
 0xcef   :  { %4723 = vmatprep.subr.mxu0 %v15794_v30 }
 0xcf2   :  { %10588 = vmatpush1.msk.msra.mxu0 %vm59_vm1, %v17854_v44 }
 0xcf3   :  { %4752 = vmatmul.mubr.f32.vlgmr.msra.gmra.mrb[58].mxu0 %v10586_v55  ;;  %14013 = vmatprep.subr.bf16.mxu0 %v15793_v0  ;;  %v10622_v55 = vld [vmem:[%s20605_s3 + $0x600] sm:$0xff] }
 0xcf4   :  { %14015 = vmatpush1.bf16.msra.mxu0 %v15857_v4  ;;  %10609 = vmatprep.mubr.msk.f32.mxu0 %vm55_vm0, %v10607_v21 }
 0xcf5   :  { %14016 = vmatprep.subr.bf16.mxu0 %v15793_v0 }
 0xcf8   :  { %14018 = vmatpush1.bf16.msra.mxu0 %v15864_v6 }
 0xcf9   :  { %14019 = vmatprep.subr.bf16.mxu0 %v15793_v0 }
 0xcfc   :  { %14021 = vmatpush1.bf16.msra.mxu0 %v15879_v10 }
 0xcfd   :  { %14022 = vmatprep.subr.bf16.mxu0 %v15793_v0 }
 0xd00   :  { %14024 = vmatpush1.bf16.msra.mxu0 %v15896_v14 }
 0xd01   :  { %14025 = vmatprep.subr.bf16.mxu0 %v15793_v0 }
 0xd04   :  { %14027 = vmatpush1.bf16.msra.mxu0 %v15908_v17 }
 0xd05   :  { %14028 = vmatprep.subr.bf16.mxu0 %v15793_v0 }
 0xd08   :  { %14030 = vmatpush1.bf16.msra.mxu0 %v15920_v20 }
 0xd09   :  { %14031 = vmatprep.subr.bf16.mxu0 %v15793_v0 }
 0xd0c   :  { %14033 = vmatpush1.bf16.msra.mxu0 %v15932_v23 }
 0xd0d   :  { %14034 = vmatprep.subr.bf16.mxu0 %v15793_v0 }
 0xd10   :  { %14036 = vmatpush1.bf16.msra.mxu0 %v15944_v26 }
 0xd11   :  { %14037 = vmatprep.subr.bf16.mxu0 %v15793_v0 }
 0xd14   :  { %14039 = vmatpush1.bf16.msra.mxu0 %v15956_v29 }
 0xd15   :  { %4892 = vmatprep.subr.mxu0 %v15794_v30 }
 0xd18   :  { %10608 = vmatpush1.msk.msra.mxu0 %vm59_vm1, %v17854_v44 }
 0xd19   :  { %14067 = vmatprep.subr.bf16.mxu0 %v15793_v0  ;;  %4921 = vmatmul.mubr.f32.vlgmr.msra.gmra.mrb[60].mxu0 %v10606_v22 }
 0xd1a   :  { %14069 = vmatpush1.bf16.msra.mxu0 %v15857_v4  ;;  %10617 = vmatprep.mubr.msk.f32.mxu0 %vm55_vm0, %v10615_v24 }
 0xd1b   :  { %14070 = vmatprep.subr.bf16.mxu0 %v15793_v0 }
 0xd1e   :  { %14072 = vmatpush1.bf16.msra.mxu0 %v15864_v6 }
 0xd1f   :  { %14073 = vmatprep.subr.bf16.mxu0 %v15793_v0 }
 0xd22   :  { %14075 = vmatpush1.bf16.msra.mxu0 %v15879_v10 }
 0xd23   :  { %14076 = vmatprep.subr.bf16.mxu0 %v15793_v0 }
 0xd26   :  { %14078 = vmatpush1.bf16.msra.mxu0 %v15896_v14 }
 0xd27   :  { %14079 = vmatprep.subr.bf16.mxu0 %v15793_v0 }
 0xd2a   :  { %14081 = vmatpush1.bf16.msra.mxu0 %v15908_v17 }
 0xd2b   :  { %14082 = vmatprep.subr.bf16.mxu0 %v15793_v0 }
 0xd2e   :  { %14084 = vmatpush1.bf16.msra.mxu0 %v15920_v20 }
 0xd2f   :  { %14085 = vmatprep.subr.bf16.mxu0 %v15793_v0 }
 0xd32   :  { %14087 = vmatpush1.bf16.msra.mxu0 %v15932_v23 }
 0xd33   :  { %14088 = vmatprep.subr.bf16.mxu0 %v15793_v0 }
 0xd36   :  { %14090 = vmatpush1.bf16.msra.mxu0 %v15944_v26 }
 0xd37   :  { %14091 = vmatprep.subr.bf16.mxu0 %v15793_v0 }
 0xd3a   :  { %14093 = vmatpush1.bf16.msra.mxu0 %v15956_v29 }
 0xd3b   :  { %5045 = vmatprep.subr.mxu0 %v15794_v30 }
 0xd3e   :  { %10616 = vmatpush1.msk.msra.mxu0 %vm59_vm1, %v17854_v44 }
 0xd3f   :  { %5074 = vmatmul.mubr.f32.vlgmr.msra.gmra.mrb[62].mxu0 %v10614_v25  ;;  %14121 = vmatprep.subr.bf16.mxu0 %v15793_v0 }
 0xd40   :  { %11936 = vmatprep.mubr.msk.f32.mxu0 %vm15795_vm2, %v15794_v30 }
 0xd7a   :  { %v4445_v27 = vpop.f32.mrb[54].mxu0 }
 0xd7b   :  { %v18158_v28 = vadd.f32 %v4445_v27, %v17978_v34  ;;  %v11868_v32 = vpop.f32.mrb[55].mxu0  ;;  %v10619_v34 = vld [vmem:[%s20604_s0 + $0x578] sm:$0xff] }
 0xda0   :  { %v4599_v33 = vpop.f32.mrb[56].mxu0 }
 0xda1   :  { %v4603_v35 = vmax.f32 %v18044_v40, %v4599_v33  ;;  %v4601_v36 = vpop.f32.mrb[57].mxu0  ;;  %v10623_v40 = vld [vmem:[%s20605_s3 + $0x608] sm:$0xff] }
 0xda3   :  { %v4680_v38 = vmax.f32 %v4603_v35, %v18062_v46  ;;  %v14122_v46 = vpack.c.bf16 %v10623_v40, %v10622_v55 }
 0xda5   :  { %14123 = vmatpush3.bf16.msra.mxu0 %v14122_v46  ;;  %v10658_v46 = vld [vmem:[%s20605_s3 + $0x6a0] sm:$0xff] }
 0xda6   :  { %14124 = vmatprep.subr.bf16.mxu0 %v15793_v0 }
 0xda9   :  { %14126 = vmatpush3.bf16.msra.mxu0 %v14125_v60  ;;  %v10660_v60 = vld [vmem:[%s20605_s3 + $0x6b0] sm:$0xff] }
 0xdaa   :  { %14127 = vmatprep.subr.bf16.mxu0 %v15793_v0  ;;  %v14263_v48 = vpack.c.bf16 %v10661_v3, %v10660_v60  ;;  %v10694_v60 = vld [vmem:[%s20605_s3 + $0x740] sm:$0xff]  ;;  %v10695_v3 = vld [vmem:[%s20605_s3 + $0x748] sm:$0xff] }
 0xdad   :  { %14129 = vmatpush3.bf16.msra.mxu0 %v14128_v62  ;;  %v10662_v62 = vld [vmem:[%s20605_s3 + $0x6c0] sm:$0xff] }
 0xdae   :  { %14130 = vmatprep.subr.bf16.mxu0 %v15793_v0  ;;  %v14266_v51 = vpack.c.bf16 %v10663_v63, %v10662_v62  ;;  %v10696_v62 = vld [vmem:[%s20605_s3 + $0x750] sm:$0xff]  ;;  %v10697_v63 = vld [vmem:[%s20605_s3 + $0x758] sm:$0xff] }
 0xdb1   :  { %14132 = vmatpush3.bf16.msra.mxu0 %v14131_v2  ;;  %v10664_v2 = vld [vmem:[%s20605_s3 + $0x6d0] sm:$0xff] }
 0xdb2   :  { %14133 = vmatprep.subr.bf16.mxu0 %v15793_v0  ;;  %v14269_v54 = vpack.c.bf16 %v10665_v5, %v10664_v2  ;;  %v10698_v2 = vld [vmem:[%s20605_s3 + $0x760] sm:$0xff]  ;;  %v10699_v5 = vld [vmem:[%s20605_s3 + $0x768] sm:$0xff] }
 0xdb5   :  { %14135 = vmatpush3.bf16.msra.mxu0 %v14134_v7  ;;  %v10666_v7 = vld [vmem:[%s20605_s3 + $0x6e0] sm:$0xff] }
 0xdb6   :  { %14136 = vmatprep.subr.bf16.mxu0 %v15793_v0  ;;  %v14272_v8 = vpack.c.bf16 %v10667_v58, %v10666_v7  ;;  %v10700_v7 = vld [vmem:[%s20605_s3 + $0x770] sm:$0xff]  ;;  %v10701_v58 = vld [vmem:[%s20605_s3 + $0x778] sm:$0xff] }
 0xdb9   :  { %14138 = vmatpush3.bf16.msra.mxu0 %v14137_v9  ;;  %v10668_v9 = vld [vmem:[%s20605_s3 + $0x6f0] sm:$0xff] }
 0xdba   :  { %14139 = vmatprep.subr.bf16.mxu0 %v15793_v0  ;;  %v14275_v15 = vpack.c.bf16 %v10669_v11, %v10668_v9  ;;  %v10703_v9 = vld [vmem:[%s20604_s0 + $0xf8] sm:$0xff]  ;;  %v10702_v11 = vld [vmem:[%s20604_s0 + $0xf0] sm:$0xff] }
 0xdbd   :  { %14141 = vmatpush3.bf16.msra.mxu0 %v14140_v61  ;;  %v10671_v61 = vld [vmem:[%s20604_s0 + $0xe8] sm:$0xff] }
 0xdbe   :  { %14142 = vmatprep.subr.bf16.mxu0 %v15793_v0 }
 0xdc1   :  { %14144 = vmatpush3.bf16.msra.mxu0 %v14143_v18  ;;  %v10678_v18 = vld [vmem:[%s20604_s0 + $0x400] sm:$0xff] }
 0xdc2   :  { %14172 = vmatprep.subr.bf16.mxu0 %v15793_v0 }
 0xdc6   :  { %v4753_v39 = vpop.f32.mrb[58].mxu0 }
 0xdc7   :  { %v4757_v41 = vmax.f32 %v4680_v38, %v4753_v39  ;;  %v4755_v42 = vpop.f32.mrb[59].mxu0  ;;  %v18345_v39 = vld [vmem:[%s20606_s2] ss:$0 sm:$0xff] }
 0xdc9   :  { %v4758_v43 = vadd.f32 %v17615_v53, %v4757_v41  ;;  %v10610_v53 = vld [vmem:[%s20604_s0 + $0x250] sm:$0xff] }
 0xdcb   :  { %v4759_v45 = vmax.f32 %v4758_v43, 0.0  ;;  %v10642_v43 = vld [vmem:[%s20604_s0 + $0x260] sm:$0xff] }
 0xdcd   :  { %11902 = vmatmul.mubr.f32.vlgmr.msra.gmra.mrb[58].mxu1 %v4759_v45  ;;  %v10651_v45 = vld [vmem:[%s20604_s0 + $0x588] sm:$0xff] }
 0xdce   :  { %14042 = vmatpush1.bf16.msra.mxu1 %v15857_v4  ;;  %10613 = vmatprep.mubr.msk.f32.mxu1 %vm55_vm0, %v10611_v47  ;;  %v10650_v47 = vld [vmem:[%s20604_s0 + $0x580] sm:$0xff] }
 0xdcf   :  { %14043 = vmatprep.subr.bf16.mxu1 %v15793_v0 }
 0xdd2   :  { %14045 = vmatpush1.bf16.msra.mxu1 %v15864_v6 }
 0xdd3   :  { %14046 = vmatprep.subr.bf16.mxu1 %v15793_v0 }
 0xdd6   :  { %14048 = vmatpush1.bf16.msra.mxu1 %v15879_v10 }
 0xdd7   :  { %14049 = vmatprep.subr.bf16.mxu1 %v15793_v0 }
 0xdda   :  { %14051 = vmatpush1.bf16.msra.mxu1 %v15896_v14 }
 0xddb   :  { %14052 = vmatprep.subr.bf16.mxu1 %v15793_v0 }
 0xdde   :  { %14054 = vmatpush1.bf16.msra.mxu1 %v15908_v17 }
 0xddf   :  { %14055 = vmatprep.subr.bf16.mxu1 %v15793_v0 }
 0xde2   :  { %14057 = vmatpush1.bf16.msra.mxu1 %v15920_v20 }
 0xde3   :  { %14058 = vmatprep.subr.bf16.mxu1 %v15793_v0 }
 0xde6   :  { %14060 = vmatpush1.bf16.msra.mxu1 %v15932_v23 }
 0xde7   :  { %14061 = vmatprep.subr.bf16.mxu1 %v15793_v0 }
 0xdea   :  { %14063 = vmatpush1.bf16.msra.mxu1 %v15944_v26 }
 0xdeb   :  { %14064 = vmatprep.subr.bf16.mxu1 %v15793_v0 }
 0xdec   :  { %v18224_v50 = vpop.f32.mrb[60].mxu0 }
 0xded   :  { %v4924_v37 = vpop.f32.mrb[61].mxu0 }
 0xdee   :  { %14066 = vmatpush1.bf16.msra.mxu1 %v15956_v29  ;;  %v10655_v37 = vld [vmem:[%s20605_s3 + $0x688] sm:$0xff] }
 0xdef   :  { %4968 = vmatprep.subr.mxu1 %v15794_v30 }
 0xdf2   :  { %10612 = vmatpush1.msk.msra.mxu1 %vm59_vm1, %v17854_v44 }
 0xdf3   :  { %4997 = vmatmul.mubr.f32.vlgmr.msra.gmra.mrb[60].mxu1 %v10610_v53  ;;  %14094 = vmatprep.subr.bf16.mxu1 %v15793_v0 }
 0xdf4   :  { %14096 = vmatpush1.bf16.msra.mxu1 %v15857_v4  ;;  %10621 = vmatprep.mubr.msk.f32.mxu1 %vm55_vm0, %v10619_v34 }
 0xdf5   :  { %14097 = vmatprep.subr.bf16.mxu1 %v15793_v0 }
 0xdf8   :  { %14099 = vmatpush1.bf16.msra.mxu1 %v15864_v6 }
 0xdf9   :  { %14100 = vmatprep.subr.bf16.mxu1 %v15793_v0 }
 0xdfc   :  { %14102 = vmatpush1.bf16.msra.mxu1 %v15879_v10 }
 0xdfd   :  { %14103 = vmatprep.subr.bf16.mxu1 %v15793_v0 }
 0xe00   :  { %14105 = vmatpush1.bf16.msra.mxu1 %v15896_v14 }
 0xe01   :  { %14106 = vmatprep.subr.bf16.mxu1 %v15793_v0 }
 0xe04   :  { %14108 = vmatpush1.bf16.msra.mxu1 %v15908_v17 }
 0xe05   :  { %14109 = vmatprep.subr.bf16.mxu1 %v15793_v0 }
 0xe08   :  { %14111 = vmatpush1.bf16.msra.mxu1 %v15920_v20 }
 0xe09   :  { %14112 = vmatprep.subr.bf16.mxu1 %v15793_v0 }
 0xe0c   :  { %14114 = vmatpush1.bf16.msra.mxu1 %v15932_v23 }
 0xe0d   :  { %14115 = vmatprep.subr.bf16.mxu1 %v15793_v0 }
 0xe10   :  { %14117 = vmatpush1.bf16.msra.mxu1 %v15944_v26 }
 0xe11   :  { %14118 = vmatprep.subr.bf16.mxu1 %v15793_v0 }
 0xe12   :  { %v18242_v52 = vpop.f32.mrb[62].mxu0 }
 0xe13   :  { %v5077_v59 = vpop.f32.mrb[63].mxu0 }
 0xe14   :  { %14120 = vmatpush1.bf16.msra.mxu1 %v15956_v29  ;;  %v14260_v59 = vpack.c.bf16 %v10659_v57, %v10658_v46  ;;  %v10692_v46 = vld [vmem:[%s20605_s3 + $0x730] sm:$0xff]  ;;  %v10693_v57 = vld [vmem:[%s20605_s3 + $0x738] sm:$0xff] }
 0xe15   :  { %5122 = vmatprep.subr.mxu1 %v15794_v30 }
 0xe18   :  { %10620 = vmatpush1.msk.msra.mxu1 %vm59_vm1, %v17854_v44 }
 0xe19   :  { %5151 = vmatmul.mubr.f32.vlgmr.msra.gmra.mrb[62].mxu1 %v10618_v49  ;;  %14145 = vmatprep.subr.bf16.mxu1 %v15793_v0 }
 0xe1a   :  { %14147 = vmatpush1.bf16.msra.mxu1 %v15857_v4  ;;  %10641 = vmatprep.mubr.msk.f32.mxu1 %vm55_vm0, %v10639_v1  ;;  %v18520_v1 = vld [vmem:[%s20603_s1 + $0x90] sm:$0x3f] }
 0xe1b   :  { %14148 = vmatprep.subr.bf16.mxu1 %v15793_v0 }
 0xe1e   :  { %14150 = vmatpush1.bf16.msra.mxu1 %v15864_v6 }
 0xe1f   :  { %14151 = vmatprep.subr.bf16.mxu1 %v15793_v0 }
 0xe22   :  { %14153 = vmatpush1.bf16.msra.mxu1 %v15879_v10 }
 0xe23   :  { %14154 = vmatprep.subr.bf16.mxu1 %v15793_v0 }
 0xe26   :  { %14156 = vmatpush1.bf16.msra.mxu1 %v15896_v14 }
 0xe27   :  { %14157 = vmatprep.subr.bf16.mxu1 %v15793_v0 }
 0xe2a   :  { %14159 = vmatpush1.bf16.msra.mxu1 %v15908_v17 }
 0xe2b   :  { %14160 = vmatprep.subr.bf16.mxu1 %v15793_v0 }
 0xe2e   :  { %14162 = vmatpush1.bf16.msra.mxu1 %v15920_v20 }
 0xe2f   :  { %14163 = vmatprep.subr.bf16.mxu1 %v15793_v0 }
 0xe32   :  { %14165 = vmatpush1.bf16.msra.mxu1 %v15932_v23 }
 0xe33   :  { %14166 = vmatprep.subr.bf16.mxu1 %v15793_v0 }
 0xe36   :  { %14168 = vmatpush1.bf16.msra.mxu1 %v15944_v26 }
 0xe37   :  { %14169 = vmatprep.subr.bf16.mxu1 %v15793_v0 }
 0xe3a   :  { %14171 = vmatpush1.bf16.msra.mxu1 %v15956_v29 }
 0xe3b   :  { %5291 = vmatprep.subr.mxu1 %v15794_v30 }
 0xe3e   :  { %10640 = vmatpush1.msk.msra.mxu1 %vm59_vm1, %v17854_v44 }
 0xe3f   :  { %14199 = vmatprep.subr.bf16.mxu1 %v15793_v0  ;;  %5320 = vmatmul.mubr.f32.vlgmr.msra.gmra.mrb[64].mxu1 %v10638_v16 }
 0xe40   :  { %14201 = vmatpush1.bf16.msra.mxu1 %v15857_v4  ;;  %10649 = vmatprep.mubr.msk.f32.mxu1 %vm55_vm0, %v10647_v31 }
 0xe41   :  { %14202 = vmatprep.subr.bf16.mxu1 %v15793_v0 }
 0xe44   :  { %14204 = vmatpush1.bf16.msra.mxu1 %v15864_v6 }
 0xe45   :  { %14205 = vmatprep.subr.bf16.mxu1 %v15793_v0 }
 0xe48   :  { %14207 = vmatpush1.bf16.msra.mxu1 %v15879_v10 }
 0xe49   :  { %14208 = vmatprep.subr.bf16.mxu1 %v15793_v0 }
 0xe4c   :  { %14210 = vmatpush1.bf16.msra.mxu1 %v15896_v14 }
 0xe4d   :  { %14211 = vmatprep.subr.bf16.mxu1 %v15793_v0 }
 0xe50   :  { %14213 = vmatpush1.bf16.msra.mxu1 %v15908_v17 }
 0xe51   :  { %14214 = vmatprep.subr.bf16.mxu1 %v15793_v0 }
 0xe54   :  { %14216 = vmatpush1.bf16.msra.mxu1 %v15920_v20 }
 0xe55   :  { %14217 = vmatprep.subr.bf16.mxu1 %v15793_v0 }
 0xe58   :  { %14219 = vmatpush1.bf16.msra.mxu1 %v15932_v23 }
 0xe59   :  { %14220 = vmatprep.subr.bf16.mxu1 %v15793_v0 }
 0xe5c   :  { %14222 = vmatpush1.bf16.msra.mxu1 %v15944_v26 }
 0xe5d   :  { %14223 = vmatprep.subr.bf16.mxu1 %v15793_v0 }
 0xe60   :  { %14225 = vmatpush1.bf16.msra.mxu1 %v15956_v29 }
 0xe61   :  { %5444 = vmatprep.subr.mxu1 %v15794_v30 }
 0xe64   :  { %10648 = vmatpush1.msk.msra.mxu1 %vm59_vm1, %v17854_v44 }
 0xe65   :  { %5473 = vmatmul.mubr.f32.vlgmr.msra.gmra.mrb[66].mxu1 %v10646_v19  ;;  %14253 = vmatprep.subr.bf16.mxu1 %v15793_v0 }
 0xe66   :  { %11971 = vmatprep.mubr.msk.f32.mxu1 %vm15795_vm2, %v15794_v30 }
 0xea0   :  { %v4844_v21 = vpop.f32.mrb[58].mxu1 }
 0xea1   :  { %v18338_v22 = vadd.f32 %v4844_v21, %v18158_v28  ;;  %v11903_v24 = vpop.f32.mrb[59].mxu1  ;;  %v10643_v28 = vld [vmem:[%s20604_s0 + $0x268] sm:$0xff] }
 0xec6   :  { %v4998_v25 = vpop.f32.mrb[60].mxu1 }
 0xec7   :  { %v5002_v27 = vmax.f32 %v18224_v50, %v4998_v25  ;;  %v5000_v32 = vpop.f32.mrb[61].mxu1  ;;  %v10654_v50 = vld [vmem:[%s20605_s3 + $0x680] sm:$0xff] }
 0xec8   :  { %v14254_v55 = vpack.c.bf16 %v10655_v37, %v10654_v50  ;;  %v10689_v37 = vld [vmem:[%s20605_s3 + $0x718] sm:$0xff] }
 0xec9   :  { %v5079_v33 = vmax.f32 %v5002_v27, %v18242_v52  ;;  %v10656_v52 = vld [vmem:[%s20605_s3 + $0x690] sm:$0xff] }
 0xeca   :  { %14255 = vmatpush3.bf16.msra.mxu1 %v14254_v55 }
 0xecb   :  { %14256 = vmatprep.subr.bf16.mxu1 %v15793_v0 }
 0xeec   :  { %v5152_v35 = vpop.f32.mrb[62].mxu1 }
 0xeed   :  { %v5156_v36 = vmax.f32 %v5079_v33, %v5152_v35  ;;  %v5154_v38 = vpop.f32.mrb[63].mxu1 }
 0xeef   :  { %v5157_v41 = vadd.f32 %v18345_v39, %v5156_v36 }
 0xef1   :  { %v5158_v42 = vmax.f32 %v5157_v41, 0.0  ;;  %v10675_v41 = vld [vmem:[%s20604_s0 + $0x278] sm:$0xff] }
 0xef3   :  { %11937 = vmatmul.mubr.f32.vlgmr.msra.gmra.mrb[64].mxu0 %v5158_v42  ;;  %v10683_v42 = vld [vmem:[%s20604_s0 + $0x598] sm:$0xff] }
 0xef4   :  { %14174 = vmatpush1.bf16.msra.mxu0 %v15857_v4  ;;  %10645 = vmatprep.mubr.msk.f32.mxu0 %vm55_vm0, %v10643_v28  ;;  %v10682_v28 = vld [vmem:[%s20604_s0 + $0x590] sm:$0xff] }
 0xef5   :  { %14175 = vmatprep.subr.bf16.mxu0 %v15793_v0 }
 0xef8   :  { %14177 = vmatpush1.bf16.msra.mxu0 %v15864_v6 }
 0xef9   :  { %14178 = vmatprep.subr.bf16.mxu0 %v15793_v0 }
 0xefc   :  { %14180 = vmatpush1.bf16.msra.mxu0 %v15879_v10 }
 0xefd   :  { %14181 = vmatprep.subr.bf16.mxu0 %v15793_v0 }
 0xf00   :  { %14183 = vmatpush1.bf16.msra.mxu0 %v15896_v14 }
 0xf01   :  { %14184 = vmatprep.subr.bf16.mxu0 %v15793_v0 }
 0xf04   :  { %14186 = vmatpush1.bf16.msra.mxu0 %v15908_v17 }
 0xf05   :  { %14187 = vmatprep.subr.bf16.mxu0 %v15793_v0 }
 0xf08   :  { %14189 = vmatpush1.bf16.msra.mxu0 %v15920_v20 }
 0xf09   :  { %14190 = vmatprep.subr.bf16.mxu0 %v15793_v0 }
 0xf0c   :  { %14192 = vmatpush1.bf16.msra.mxu0 %v15932_v23 }
 0xf0d   :  { %14193 = vmatprep.subr.bf16.mxu0 %v15793_v0 }
 0xf10   :  { %14195 = vmatpush1.bf16.msra.mxu0 %v15944_v26 }
 0xf11   :  { %14196 = vmatprep.subr.bf16.mxu0 %v15793_v0 }
 0xf12   :  { %v18409_v53 = vpop.f32.mrb[64].mxu1 }
 0xf13   :  { %v5323_v34 = vpop.f32.mrb[65].mxu1 }
 0xf14   :  { %14198 = vmatpush1.bf16.msra.mxu0 %v15956_v29  ;;  %v10687_v34 = vld [vmem:[%s20605_s3 + $0x708] sm:$0xff] }
 0xf15   :  { %5367 = vmatprep.subr.mxu0 %v15794_v30 }
 0xf18   :  { %10644 = vmatpush1.msk.msra.mxu0 %vm59_vm1, %v17854_v44 }
 0xf19   :  { %5396 = vmatmul.mubr.f32.vlgmr.msra.gmra.mrb[66].mxu0 %v10642_v43  ;;  %14226 = vmatprep.subr.bf16.mxu0 %v15793_v0 }
 0xf1a   :  { %14228 = vmatpush1.bf16.msra.mxu0 %v15857_v4  ;;  %10653 = vmatprep.mubr.msk.f32.mxu0 %vm55_vm0, %v10651_v45 }
 0xf1b   :  { %14229 = vmatprep.subr.bf16.mxu0 %v15793_v0 }
 0xf1e   :  { %14231 = vmatpush1.bf16.msra.mxu0 %v15864_v6 }
 0xf1f   :  { %14232 = vmatprep.subr.bf16.mxu0 %v15793_v0 }
 0xf22   :  { %14234 = vmatpush1.bf16.msra.mxu0 %v15879_v10 }
 0xf23   :  { %14235 = vmatprep.subr.bf16.mxu0 %v15793_v0 }
 0xf26   :  { %14237 = vmatpush1.bf16.msra.mxu0 %v15896_v14 }
 0xf27   :  { %14238 = vmatprep.subr.bf16.mxu0 %v15793_v0 }
 0xf2a   :  { %14240 = vmatpush1.bf16.msra.mxu0 %v15908_v17 }
 0xf2b   :  { %14241 = vmatprep.subr.bf16.mxu0 %v15793_v0 }
 0xf2e   :  { %14243 = vmatpush1.bf16.msra.mxu0 %v15920_v20 }
 0xf2f   :  { %14244 = vmatprep.subr.bf16.mxu0 %v15793_v0 }
 0xf32   :  { %14246 = vmatpush1.bf16.msra.mxu0 %v15932_v23 }
 0xf33   :  { %14247 = vmatprep.subr.bf16.mxu0 %v15793_v0 }
 0xf36   :  { %14249 = vmatpush1.bf16.msra.mxu0 %v15944_v26 }
 0xf37   :  { %14250 = vmatprep.subr.bf16.mxu0 %v15793_v0 }
 0xf38   :  { %v18427_v49 = vpop.f32.mrb[66].mxu1 }
 0xf39   :  { %v5476_v40 = vpop.f32.mrb[67].mxu1 }
 0xf3a   :  { %14252 = vmatpush1.bf16.msra.mxu0 %v15956_v29  ;;  %v10691_v40 = vld [vmem:[%s20605_s3 + $0x728] sm:$0xff] }
 0xf3b   :  { %5521 = vmatprep.subr.mxu0 %v15794_v30 }
 0xf3e   :  { %10652 = vmatpush1.msk.msra.mxu0 %vm59_vm1, %v17854_v44 }
 0xf3f   :  { %5550 = vmatmul.mubr.f32.vlgmr.msra.gmra.mrb[68].mxu0 %v10650_v47  ;;  %14277 = vmatprep.subr.bf16.mxu0 %v15793_v0 }
 0xf40   :  { %14279 = vmatpush1.bf16.msra.mxu0 %v15857_v4  ;;  %10673 = vmatprep.mubr.msk.f32.mxu0 %vm55_vm0, %v10671_v61  ;;  %v10710_v61 = vld [vmem:[%s20604_s0 + $0x410] sm:$0xff] }
 0xf41   :  { %14280 = vmatprep.subr.bf16.mxu0 %v15793_v0 }
 0xf44   :  { %14282 = vmatpush1.bf16.msra.mxu0 %v15864_v6 }
 0xf45   :  { %14283 = vmatprep.subr.bf16.mxu0 %v15793_v0 }
 0xf48   :  { %14285 = vmatpush1.bf16.msra.mxu0 %v15879_v10 }
 0xf49   :  { %14286 = vmatprep.subr.bf16.mxu0 %v15793_v0 }
 0xf4c   :  { %14288 = vmatpush1.bf16.msra.mxu0 %v15896_v14 }
 0xf4d   :  { %14289 = vmatprep.subr.bf16.mxu0 %v15793_v0 }
 0xf50   :  { %14291 = vmatpush1.bf16.msra.mxu0 %v15908_v17 }
 0xf51   :  { %14292 = vmatprep.subr.bf16.mxu0 %v15793_v0 }
 0xf54   :  { %14294 = vmatpush1.bf16.msra.mxu0 %v15920_v20 }
 0xf55   :  { %14295 = vmatprep.subr.bf16.mxu0 %v15793_v0 }
 0xf58   :  { %14297 = vmatpush1.bf16.msra.mxu0 %v15932_v23 }
 0xf59   :  { %14298 = vmatprep.subr.bf16.mxu0 %v15793_v0 }
 0xf5c   :  { %14300 = vmatpush1.bf16.msra.mxu0 %v15944_v26 }
 0xf5d   :  { %14301 = vmatprep.subr.bf16.mxu0 %v15793_v0 }
 0xf60   :  { %14303 = vmatpush1.bf16.msra.mxu0 %v15956_v29 }
 0xf61   :  { %5690 = vmatprep.subr.mxu0 %v15794_v30 }
 0xf64   :  { %10672 = vmatpush1.msk.msra.mxu0 %vm59_vm1, %v17854_v44  ;;  %v10657_v44 = vld [vmem:[%s20605_s3 + $0x698] sm:$0xff] }
 0xf65   :  { %14331 = vmatprep.subr.bf16.mxu0 %v15793_v0  ;;  %v14257_v56 = vpack.c.bf16 %v10657_v44, %v10656_v52  ;;  %5719 = vmatmul.mubr.f32.vlgmr.msra.gmra.mrb[70].mxu0 %v10670_v12  ;;  %v10690_v44 = vld [vmem:[%s20605_s3 + $0x720] sm:$0xff] }
 0xf66   :  { %14333 = vmatpush1.bf16.msra.mxu0 %v15857_v4  ;;  %10681 = vmatprep.mubr.msk.f32.mxu0 %vm55_vm0, %v10679_v13 }
 0xf67   :  { %14258 = vmatpush3.bf16.msra.mxu1 %v14257_v56  ;;  %14334 = vmatprep.subr.bf16.mxu0 %v15793_v0  ;;  %v14392_v56 = vpack.c.bf16 %v10691_v40, %v10690_v44  ;;  %v10724_v44 = vld [vmem:[%s20605_s3 + $0x7b0] sm:$0xff]  ;;  %v10725_v40 = vld [vmem:[%s20605_s3 + $0x7b8] sm:$0xff] }
 0xf68   :  { %14259 = vmatprep.subr.bf16.mxu1 %v15793_v0 }
 0xf6a   :  { %14336 = vmatpush1.bf16.msra.mxu0 %v15864_v6 }
 0xf6b   :  { %14261 = vmatpush3.bf16.msra.mxu1 %v14260_v59  ;;  %14337 = vmatprep.subr.bf16.mxu0 %v15793_v0  ;;  %v14395_v59 = vpack.c.bf16 %v10693_v57, %v10692_v46  ;;  %v10726_v46 = vld [vmem:[%s20605_s3 + $0x7c0] sm:$0xff]  ;;  %v10727_v57 = vld [vmem:[%s20605_s3 + $0x7c8] sm:$0xff] }
 0xf6c   :  { %14262 = vmatprep.subr.bf16.mxu1 %v15793_v0 }
 0xf6e   :  { %14339 = vmatpush1.bf16.msra.mxu0 %v15879_v10 }
 0xf6f   :  { %14264 = vmatpush3.bf16.msra.mxu1 %v14263_v48  ;;  %14340 = vmatprep.subr.bf16.mxu0 %v15793_v0  ;;  %v14398_v48 = vpack.c.bf16 %v10695_v3, %v10694_v60  ;;  %v10728_v60 = vld [vmem:[%s20605_s3 + $0x7d0] sm:$0xff]  ;;  %v10729_v3 = vld [vmem:[%s20605_s3 + $0x7d8] sm:$0xff] }
 0xf70   :  { %14265 = vmatprep.subr.bf16.mxu1 %v15793_v0 }
 0xf72   :  { %14342 = vmatpush1.bf16.msra.mxu0 %v15896_v14 }
 0xf73   :  { %14267 = vmatpush3.bf16.msra.mxu1 %v14266_v51  ;;  %14343 = vmatprep.subr.bf16.mxu0 %v15793_v0  ;;  %v14401_v51 = vpack.c.bf16 %v10697_v63, %v10696_v62  ;;  %v10730_v62 = vld [vmem:[%s20605_s3 + $0x7e0] sm:$0xff]  ;;  %v10731_v63 = vld [vmem:[%s20605_s3 + $0x7e8] sm:$0xff] }
 0xf74   :  { %14268 = vmatprep.subr.bf16.mxu1 %v15793_v0 }
 0xf76   :  { %14345 = vmatpush1.bf16.msra.mxu0 %v15908_v17 }
 0xf77   :  { %14270 = vmatpush3.bf16.msra.mxu1 %v14269_v54  ;;  %14346 = vmatprep.subr.bf16.mxu0 %v15793_v0  ;;  %v14404_v54 = vpack.c.bf16 %v10699_v5, %v10698_v2  ;;  %v10732_v2 = vld [vmem:[%s20605_s3 + $0x7f0] sm:$0xff]  ;;  %v10733_v5 = vld [vmem:[%s20605_s3 + $0x7f8] sm:$0xff] }
 0xf78   :  { %14271 = vmatprep.subr.bf16.mxu1 %v15793_v0 }
 0xf7a   :  { %14348 = vmatpush1.bf16.msra.mxu0 %v15920_v20 }
 0xf7b   :  { %14273 = vmatpush3.bf16.msra.mxu1 %v14272_v8  ;;  %14349 = vmatprep.subr.bf16.mxu0 %v15793_v0  ;;  %v14407_v8 = vpack.c.bf16 %v10701_v58, %v10700_v7  ;;  %v10735_v7 = vld [vmem:[%s20604_s0 + $0x108] sm:$0xff]  ;;  %v10734_v58 = vld [vmem:[%s20604_s0 + $0x100] sm:$0xff] }
 0xf7c   :  { %14274 = vmatprep.subr.bf16.mxu1 %v15793_v0 }
 0xf7e   :  { %14351 = vmatpush1.bf16.msra.mxu0 %v15932_v23 }
 0xf7f   :  { %14276 = vmatpush3.bf16.msra.mxu1 %v14275_v15  ;;  %14352 = vmatprep.subr.bf16.mxu0 %v15793_v0  ;;  %v10711_v15 = vld [vmem:[%s20604_s0 + $0x418] sm:$0xff] }
 0xf80   :  { %14304 = vmatprep.subr.bf16.mxu1 %v15793_v0 }
 0xf82   :  { %14354 = vmatpush1.bf16.msra.mxu0 %v15944_v26 }
 0xf83   :  { %14355 = vmatprep.subr.bf16.mxu0 %v15793_v0 }
 0xf86   :  { %14357 = vmatpush1.bf16.msra.mxu0 %v15956_v29 }
 0xf87   :  { %5843 = vmatprep.subr.mxu0 %v15794_v30 }
 0xf8a   :  { %10680 = vmatpush1.msk.msra.mxu0 %vm59_vm1, %v18520_v1 }
 0xf8b   :  { %5872 = vmatmul.mubr.f32.vlgmr.msra.gmra.mrb[72].mxu0 %v10678_v18  ;;  %14385 = vmatprep.subr.bf16.mxu0 %v15793_v0 }
 0xf8c   :  { %12006 = vmatprep.mubr.msk.f32.mxu0 %vm15795_vm2, %v15794_v30 }
 0xfc6   :  { %v5243_v16 = vpop.f32.mrb[64].mxu0 }
 0xfc7   :  { %v18528_v31 = vadd.f32 %v5243_v16, %v18338_v22  ;;  %v11938_v19 = vpop.f32.mrb[65].mxu0  ;;  %v10674_v22 = vld [vmem:[%s20604_s0 + $0x270] sm:$0xff] }
 0xfec   :  { %v5397_v21 = vpop.f32.mrb[66].mxu0 }
 0xfed   :  { %v5401_v24 = vmax.f32 %v18409_v53, %v5397_v21  ;;  %v5399_v25 = vpop.f32.mrb[67].mxu0  ;;  %v10686_v53 = vld [vmem:[%s20605_s3 + $0x700] sm:$0xff] }
 0xfee   :  { %v14386_v50 = vpack.c.bf16 %v10687_v34, %v10686_v53  ;;  %v10721_v34 = vld [vmem:[%s20605_s3 + $0x798] sm:$0xff] }
 0xfef   :  { %v5478_v27 = vmax.f32 %v5401_v24, %v18427_v49  ;;  %v10688_v49 = vld [vmem:[%s20605_s3 + $0x710] sm:$0xff] }
 0xff0   :  { %14387 = vmatpush3.bf16.msra.mxu0 %v14386_v50  ;;  %v14389_v55 = vpack.c.bf16 %v10689_v37, %v10688_v49  ;;  %v10722_v37 = vld [vmem:[%s20605_s3 + $0x7a0] sm:$0xff] }
 0xff1   :  { %14388 = vmatprep.subr.bf16.mxu0 %v15793_v0 }
 0xff4   :  { %14390 = vmatpush3.bf16.msra.mxu0 %v14389_v55 }
 0xff5   :  { %14391 = vmatprep.subr.bf16.mxu0 %v15793_v0 }
 0xff8   :  { %14393 = vmatpush3.bf16.msra.mxu0 %v14392_v56  ;;  %v14527_v56 = vpack.c.bf16 %v10725_v40, %v10724_v44  ;;  %v10759_v44 = vld [vmem:[%s20605_s3 + $0x848] sm:$0xff] }
 0xff9   :  { %14394 = vmatprep.subr.bf16.mxu0 %v15793_v0 }
 0xffc   :  { %14396 = vmatpush3.bf16.msra.mxu0 %v14395_v59  ;;  %v14530_v59 = vpack.c.bf16 %v10727_v57, %v10726_v46  ;;  %v10761_v46 = vld [vmem:[%s20605_s3 + $0x858] sm:$0xff] }
 0xffd   :  { %14397 = vmatprep.subr.bf16.mxu0 %v15793_v0 }
0x1000   :  { %14399 = vmatpush3.bf16.msra.mxu0 %v14398_v48  ;;  %v14533_v48 = vpack.c.bf16 %v10729_v3, %v10728_v60  ;;  %v10763_v60 = vld [vmem:[%s20605_s3 + $0x868] sm:$0xff] }
0x1001   :  { %14400 = vmatprep.subr.bf16.mxu0 %v15793_v0 }
0x1004   :  { %14402 = vmatpush3.bf16.msra.mxu0 %v14401_v51  ;;  %v14536_v51 = vpack.c.bf16 %v10731_v63, %v10730_v62  ;;  %v10765_v62 = vld [vmem:[%s20605_s3 + $0x878] sm:$0xff] }
0x1005   :  { %14403 = vmatprep.subr.bf16.mxu0 %v15793_v0 }
0x1008   :  { %14405 = vmatpush3.bf16.msra.mxu0 %v14404_v54  ;;  %v14539_v54 = vpack.c.bf16 %v10733_v5, %v10732_v2  ;;  %v10766_v2 = vld [vmem:[%s20604_s0 + $0x110] sm:$0xff]  ;;  %v10775_v5 = vld [vmem:[%s20604_s0 + $0x438] sm:$0xff] }
0x1009   :  { %14406 = vmatprep.subr.bf16.mxu0 %v15793_v0 }
0x100c   :  { %14408 = vmatpush3.bf16.msra.mxu0 %v14407_v8  ;;  %v10743_v8 = vld [vmem:[%s20604_s0 + $0x428] sm:$0xff] }
0x100d   :  { %14436 = vmatprep.subr.bf16.mxu0 %v15793_v0 }
0x1012   :  { %v5551_v32 = vpop.f32.mrb[68].mxu0 }
0x1013   :  { %v5555_v33 = vmax.f32 %v5478_v27, %v5551_v32  ;;  %v5553_v35 = vpop.f32.mrb[69].mxu0 }
0x1015   :  { %v5556_v36 = vadd.f32 %v18345_v39, %v5555_v33 }
0x1017   :  { %v5557_v38 = vmax.f32 %v5556_v36, 0.0  ;;  %v10707_v36 = vld [vmem:[%s20604_s0 + $0x288] sm:$0xff] }
0x1019   :  { %11972 = vmatmul.mubr.f32.vlgmr.msra.gmra.mrb[68].mxu1 %v5557_v38  ;;  %v10715_v38 = vld [vmem:[%s20604_s0 + $0x5a8] sm:$0xff] }
0x101a   :  { %14306 = vmatpush1.bf16.msra.mxu1 %v15857_v4  ;;  %10677 = vmatprep.mubr.msk.f32.mxu1 %vm55_vm0, %v10675_v41  ;;  %v10714_v41 = vld [vmem:[%s20604_s0 + $0x5a0] sm:$0xff] }
0x101b   :  { %14307 = vmatprep.subr.bf16.mxu1 %v15793_v0 }
0x101e   :  { %14309 = vmatpush1.bf16.msra.mxu1 %v15864_v6 }
0x101f   :  { %14310 = vmatprep.subr.bf16.mxu1 %v15793_v0 }
0x1022   :  { %14312 = vmatpush1.bf16.msra.mxu1 %v15879_v10 }
0x1023   :  { %14313 = vmatprep.subr.bf16.mxu1 %v15793_v0 }
0x1026   :  { %14315 = vmatpush1.bf16.msra.mxu1 %v15896_v14 }
0x1027   :  { %14316 = vmatprep.subr.bf16.mxu1 %v15793_v0 }
0x102a   :  { %14318 = vmatpush1.bf16.msra.mxu1 %v15908_v17 }
0x102b   :  { %14319 = vmatprep.subr.bf16.mxu1 %v15793_v0 }
0x102e   :  { %14321 = vmatpush1.bf16.msra.mxu1 %v15920_v20 }
0x102f   :  { %14322 = vmatprep.subr.bf16.mxu1 %v15793_v0 }
0x1032   :  { %14324 = vmatpush1.bf16.msra.mxu1 %v15932_v23 }
0x1033   :  { %14325 = vmatprep.subr.bf16.mxu1 %v15793_v0 }
0x1036   :  { %14327 = vmatpush1.bf16.msra.mxu1 %v15944_v26 }
0x1037   :  { %14328 = vmatprep.subr.bf16.mxu1 %v15793_v0 }
0x1038   :  { %v18594_v43 = vpop.f32.mrb[70].mxu0 }
0x1039   :  { %v5722_v45 = vpop.f32.mrb[71].mxu0 }
0x103a   :  { %14330 = vmatpush1.bf16.msra.mxu1 %v15956_v29  ;;  %v10719_v45 = vld [vmem:[%s20605_s3 + $0x788] sm:$0xff] }
0x103b   :  { %5766 = vmatprep.subr.mxu1 %v15794_v30 }
0x103e   :  { %10676 = vmatpush1.msk.msra.mxu1 %vm59_vm1, %v18520_v1 }
0x103f   :  { %5795 = vmatmul.mubr.f32.vlgmr.msra.gmra.mrb[70].mxu1 %v10674_v22  ;;  %14358 = vmatprep.subr.bf16.mxu1 %v15793_v0 }
0x1040   :  { %14360 = vmatpush1.bf16.msra.mxu1 %v15857_v4  ;;  %10685 = vmatprep.mubr.msk.f32.mxu1 %vm55_vm0, %v10683_v42 }
0x1041   :  { %14361 = vmatprep.subr.bf16.mxu1 %v15793_v0 }
0x1044   :  { %14363 = vmatpush1.bf16.msra.mxu1 %v15864_v6 }
0x1045   :  { %14364 = vmatprep.subr.bf16.mxu1 %v15793_v0 }
0x1048   :  { %14366 = vmatpush1.bf16.msra.mxu1 %v15879_v10 }
0x1049   :  { %14367 = vmatprep.subr.bf16.mxu1 %v15793_v0 }
0x104c   :  { %14369 = vmatpush1.bf16.msra.mxu1 %v15896_v14 }
0x104d   :  { %14370 = vmatprep.subr.bf16.mxu1 %v15793_v0 }
0x1050   :  { %14372 = vmatpush1.bf16.msra.mxu1 %v15908_v17 }
0x1051   :  { %14373 = vmatprep.subr.bf16.mxu1 %v15793_v0 }
0x1054   :  { %14375 = vmatpush1.bf16.msra.mxu1 %v15920_v20 }
0x1055   :  { %14376 = vmatprep.subr.bf16.mxu1 %v15793_v0 }
0x1058   :  { %14378 = vmatpush1.bf16.msra.mxu1 %v15932_v23 }
0x1059   :  { %14379 = vmatprep.subr.bf16.mxu1 %v15793_v0 }
0x105c   :  { %14381 = vmatpush1.bf16.msra.mxu1 %v15944_v26 }
0x105d   :  { %14382 = vmatprep.subr.bf16.mxu1 %v15793_v0 }
0x105e   :  { %v18612_v47 = vpop.f32.mrb[72].mxu0 }
0x105f   :  { %v5875_v52 = vpop.f32.mrb[73].mxu0 }
0x1060   :  { %14384 = vmatpush1.bf16.msra.mxu1 %v15956_v29  ;;  %v10723_v52 = vld [vmem:[%s20605_s3 + $0x7a8] sm:$0xff] }
0x1061   :  { %5920 = vmatprep.subr.mxu1 %v15794_v30  ;;  %v14524_v55 = vpack.c.bf16 %v10723_v52, %v10722_v37  ;;  %v10757_v37 = vld [vmem:[%s20605_s3 + $0x838] sm:$0xff] }
0x1064   :  { %10684 = vmatpush1.msk.msra.mxu1 %vm59_vm1, %v18520_v1 }
0x1065   :  { %5949 = vmatmul.mubr.f32.vlgmr.msra.gmra.mrb[72].mxu1 %v10682_v28  ;;  %14409 = vmatprep.subr.bf16.mxu1 %v15793_v0 }
0x1066   :  { %14411 = vmatpush1.bf16.msra.mxu1 %v15857_v4  ;;  %10705 = vmatprep.mubr.msk.f32.mxu1 %vm55_vm0, %v10703_v9  ;;  %v10742_v9 = vld [vmem:[%s20604_s0 + $0x420] sm:$0xff] }
0x1067   :  { %14412 = vmatprep.subr.bf16.mxu1 %v15793_v0 }
0x106a   :  { %14414 = vmatpush1.bf16.msra.mxu1 %v15864_v6 }
0x106b   :  { %14415 = vmatprep.subr.bf16.mxu1 %v15793_v0 }
0x106e   :  { %14417 = vmatpush1.bf16.msra.mxu1 %v15879_v10 }
0x106f   :  { %14418 = vmatprep.subr.bf16.mxu1 %v15793_v0 }
0x1072   :  { %14420 = vmatpush1.bf16.msra.mxu1 %v15896_v14 }
0x1073   :  { %14421 = vmatprep.subr.bf16.mxu1 %v15793_v0 }
0x1076   :  { %14423 = vmatpush1.bf16.msra.mxu1 %v15908_v17 }
0x1077   :  { %14424 = vmatprep.subr.bf16.mxu1 %v15793_v0 }
0x107a   :  { %14426 = vmatpush1.bf16.msra.mxu1 %v15920_v20 }
0x107b   :  { %14427 = vmatprep.subr.bf16.mxu1 %v15793_v0 }
0x107e   :  { %14429 = vmatpush1.bf16.msra.mxu1 %v15932_v23 }
0x107f   :  { %14430 = vmatprep.subr.bf16.mxu1 %v15793_v0 }
0x1082   :  { %14432 = vmatpush1.bf16.msra.mxu1 %v15944_v26 }
0x1083   :  { %14433 = vmatprep.subr.bf16.mxu1 %v15793_v0 }
0x1086   :  { %14435 = vmatpush1.bf16.msra.mxu1 %v15956_v29 }
0x1087   :  { %6089 = vmatprep.subr.mxu1 %v15794_v30 }
0x108a   :  { %10704 = vmatpush1.msk.msra.mxu1 %vm59_vm1, %v18520_v1 }
0x108b   :  { %14463 = vmatprep.subr.bf16.mxu1 %v15793_v0  ;;  %6118 = vmatmul.mubr.f32.vlgmr.msra.gmra.mrb[74].mxu1 %v10702_v11 }
0x108c   :  { %14465 = vmatpush1.bf16.msra.mxu1 %v15857_v4  ;;  %10713 = vmatprep.mubr.msk.f32.mxu1 %vm55_vm0, %v10711_v15 }
0x108d   :  { %14466 = vmatprep.subr.bf16.mxu1 %v15793_v0 }
0x1090   :  { %14468 = vmatpush1.bf16.msra.mxu1 %v15864_v6 }
0x1091   :  { %14469 = vmatprep.subr.bf16.mxu1 %v15793_v0 }
0x1094   :  { %14471 = vmatpush1.bf16.msra.mxu1 %v15879_v10 }
0x1095   :  { %14472 = vmatprep.subr.bf16.mxu1 %v15793_v0 }
0x1098   :  { %14474 = vmatpush1.bf16.msra.mxu1 %v15896_v14 }
0x1099   :  { %14475 = vmatprep.subr.bf16.mxu1 %v15793_v0 }
0x109c   :  { %14477 = vmatpush1.bf16.msra.mxu1 %v15908_v17 }
0x109d   :  { %14478 = vmatprep.subr.bf16.mxu1 %v15793_v0 }
0x10a0   :  { %14480 = vmatpush1.bf16.msra.mxu1 %v15920_v20 }
0x10a1   :  { %14481 = vmatprep.subr.bf16.mxu1 %v15793_v0 }
0x10a4   :  { %14483 = vmatpush1.bf16.msra.mxu1 %v15932_v23 }
0x10a5   :  { %14484 = vmatprep.subr.bf16.mxu1 %v15793_v0 }
0x10a8   :  { %14486 = vmatpush1.bf16.msra.mxu1 %v15944_v26 }
0x10a9   :  { %14487 = vmatprep.subr.bf16.mxu1 %v15793_v0 }
0x10ac   :  { %14489 = vmatpush1.bf16.msra.mxu1 %v15956_v29 }
0x10ad   :  { %6242 = vmatprep.subr.mxu1 %v15794_v30 }
0x10b0   :  { %10712 = vmatpush1.msk.msra.mxu1 %vm59_vm1, %v18520_v1 }
0x10b1   :  { %6271 = vmatmul.mubr.f32.vlgmr.msra.gmra.mrb[76].mxu1 %v10710_v61  ;;  %14517 = vmatprep.subr.bf16.mxu1 %v15793_v0 }
0x10b2   :  { %12041 = vmatprep.mubr.msk.f32.mxu1 %vm15795_vm2, %v15794_v30 }
0x10ec   :  { %v5642_v12 = vpop.f32.mrb[68].mxu1 }
0x10ed   :  { %v18708_v13 = vadd.f32 %v5642_v12, %v18528_v31  ;;  %v11973_v18 = vpop.f32.mrb[69].mxu1  ;;  %v10706_v31 = vld [vmem:[%s20604_s0 + $0x280] sm:$0xff] }
0x1112   :  { %v5796_v16 = vpop.f32.mrb[70].mxu1 }
0x1113   :  { %v5800_v19 = vmax.f32 %v18594_v43, %v5796_v16  ;;  %v5798_v21 = vpop.f32.mrb[71].mxu1  ;;  %v10718_v43 = vld [vmem:[%s20605_s3 + $0x780] sm:$0xff] }
0x1114   :  { %v14518_v53 = vpack.c.bf16 %v10719_v45, %v10718_v43  ;;  %v10753_v43 = vld [vmem:[%s20605_s3 + $0x818] sm:$0xff] }
0x1115   :  { %v5877_v24 = vmax.f32 %v5800_v19, %v18612_v47  ;;  %v10720_v47 = vld [vmem:[%s20605_s3 + $0x790] sm:$0xff] }
0x1116   :  { %14519 = vmatpush3.bf16.msra.mxu1 %v14518_v53  ;;  %v14521_v50 = vpack.c.bf16 %v10721_v34, %v10720_v47  ;;  %v10754_v53 = vld [vmem:[%s20605_s3 + $0x820] sm:$0xff]  ;;  %v10755_v34 = vld [vmem:[%s20605_s3 + $0x828] sm:$0xff] }
0x1117   :  { %14520 = vmatprep.subr.bf16.mxu1 %v15793_v0 }
0x111a   :  { %14522 = vmatpush3.bf16.msra.mxu1 %v14521_v50  ;;  %v10756_v50 = vld [vmem:[%s20605_s3 + $0x830] sm:$0xff] }
0x111b   :  { %14523 = vmatprep.subr.bf16.mxu1 %v15793_v0  ;;  %v14659_v52 = vpack.c.bf16 %v10757_v37, %v10756_v50  ;;  %v10790_v50 = vld [vmem:[%s20605_s3 + $0x8c0] sm:$0xff]  ;;  %v10791_v37 = vld [vmem:[%s20605_s3 + $0x8c8] sm:$0xff] }
0x111e   :  { %14525 = vmatpush3.bf16.msra.mxu1 %v14524_v55  ;;  %v10758_v55 = vld [vmem:[%s20605_s3 + $0x840] sm:$0xff] }
0x111f   :  { %14526 = vmatprep.subr.bf16.mxu1 %v15793_v0  ;;  %v14662_v40 = vpack.c.bf16 %v10759_v44, %v10758_v55  ;;  %v10792_v55 = vld [vmem:[%s20605_s3 + $0x8d0] sm:$0xff]  ;;  %v10793_v44 = vld [vmem:[%s20605_s3 + $0x8d8] sm:$0xff] }
0x1122   :  { %14528 = vmatpush3.bf16.msra.mxu1 %v14527_v56  ;;  %v10760_v56 = vld [vmem:[%s20605_s3 + $0x850] sm:$0xff] }
0x1123   :  { %14529 = vmatprep.subr.bf16.mxu1 %v15793_v0  ;;  %v14665_v57 = vpack.c.bf16 %v10761_v46, %v10760_v56  ;;  %v10794_v56 = vld [vmem:[%s20605_s3 + $0x8e0] sm:$0xff]  ;;  %v10795_v46 = vld [vmem:[%s20605_s3 + $0x8e8] sm:$0xff] }
0x1126   :  { %14531 = vmatpush3.bf16.msra.mxu1 %v14530_v59  ;;  %v10762_v59 = vld [vmem:[%s20605_s3 + $0x860] sm:$0xff] }
0x1127   :  { %14532 = vmatprep.subr.bf16.mxu1 %v15793_v0  ;;  %v14668_v3 = vpack.c.bf16 %v10763_v60, %v10762_v59  ;;  %v10796_v59 = vld [vmem:[%s20605_s3 + $0x8f0] sm:$0xff]  ;;  %v10797_v60 = vld [vmem:[%s20605_s3 + $0x8f8] sm:$0xff] }
0x112a   :  { %14534 = vmatpush3.bf16.msra.mxu1 %v14533_v48  ;;  %v10764_v48 = vld [vmem:[%s20605_s3 + $0x870] sm:$0xff] }
0x112b   :  { %14535 = vmatprep.subr.bf16.mxu1 %v15793_v0  ;;  %v14671_v63 = vpack.c.bf16 %v10765_v62, %v10764_v48  ;;  %v10799_v48 = vld [vmem:[%s20604_s0 + $0x128] sm:$0xff]  ;;  %v10798_v62 = vld [vmem:[%s20604_s0 + $0x120] sm:$0xff] }
0x112e   :  { %14537 = vmatpush3.bf16.msra.mxu1 %v14536_v51  ;;  %v10767_v51 = vld [vmem:[%s20604_s0 + $0x118] sm:$0xff] }
0x112f   :  { %14538 = vmatprep.subr.bf16.mxu1 %v15793_v0 }
0x1132   :  { %14540 = vmatpush3.bf16.msra.mxu1 %v14539_v54  ;;  %v10774_v54 = vld [vmem:[%s20604_s0 + $0x430] sm:$0xff] }
0x1133   :  { %14568 = vmatprep.subr.bf16.mxu1 %v15793_v0 }
0x1138   :  { %v5950_v25 = vpop.f32.mrb[72].mxu1 }
0x1139   :  { %v5954_v27 = vmax.f32 %v5877_v24, %v5950_v25  ;;  %v5952_v32 = vpop.f32.mrb[73].mxu1 }
0x113b   :  { %v5955_v33 = vadd.f32 %v18345_v39, %v5954_v27 }
0x113d   :  { %v5956_v35 = vmax.f32 %v5955_v33, 0.0  ;;  %v10739_v33 = vld [vmem:[%s20604_s0 + $0x298] sm:$0xff] }
0x113f   :  { %12007 = vmatmul.mubr.f32.vlgmr.msra.gmra.mrb[74].mxu0 %v5956_v35  ;;  %v10746_v35 = vld [vmem:[%s20604_s0 + $0x5b0] sm:$0xff] }
0x1140   :  { %14438 = vmatpush1.bf16.msra.mxu0 %v15857_v4  ;;  %10709 = vmatprep.mubr.msk.f32.mxu0 %vm55_vm0, %v10707_v36 }
0x1141   :  { %14439 = vmatprep.subr.bf16.mxu0 %v15793_v0 }
0x1144   :  { %14441 = vmatpush1.bf16.msra.mxu0 %v15864_v6 }
0x1145   :  { %14442 = vmatprep.subr.bf16.mxu0 %v15793_v0 }
0x1148   :  { %14444 = vmatpush1.bf16.msra.mxu0 %v15879_v10 }
0x1149   :  { %14445 = vmatprep.subr.bf16.mxu0 %v15793_v0 }
0x114c   :  { %14447 = vmatpush1.bf16.msra.mxu0 %v15896_v14 }
0x114d   :  { %14448 = vmatprep.subr.bf16.mxu0 %v15793_v0 }
0x1150   :  { %14450 = vmatpush1.bf16.msra.mxu0 %v15908_v17 }
0x1151   :  { %14451 = vmatprep.subr.bf16.mxu0 %v15793_v0 }
0x1154   :  { %14453 = vmatpush1.bf16.msra.mxu0 %v15920_v20 }
0x1155   :  { %14454 = vmatprep.subr.bf16.mxu0 %v15793_v0 }
0x1158   :  { %14456 = vmatpush1.bf16.msra.mxu0 %v15932_v23 }
0x1159   :  { %14457 = vmatprep.subr.bf16.mxu0 %v15793_v0 }
0x115c   :  { %14459 = vmatpush1.bf16.msra.mxu0 %v15944_v26 }
0x115d   :  { %14460 = vmatprep.subr.bf16.mxu0 %v15793_v0 }
0x115e   :  { %v18774_v22 = vpop.f32.mrb[74].mxu1 }
0x115f   :  { %v6121_v42 = vpop.f32.mrb[75].mxu1 }
0x1160   :  { %14462 = vmatpush1.bf16.msra.mxu0 %v15956_v29  ;;  %v10752_v42 = vld [vmem:[%s20605_s3 + $0x810] sm:$0xff] }
0x1161   :  { %6165 = vmatprep.subr.mxu0 %v15794_v30  ;;  %v14653_v47 = vpack.c.bf16 %v10753_v43, %v10752_v42  ;;  %v10786_v43 = vld [vmem:[%s20605_s3 + $0x8a0] sm:$0xff] }
0x1164   :  { %10708 = vmatpush1.msk.msra.mxu0 %vm59_vm1, %v18520_v1 }
0x1165   :  { %6194 = vmatmul.mubr.f32.vlgmr.msra.gmra.mrb[76].mxu0 %v10706_v31  ;;  %14490 = vmatprep.subr.bf16.mxu0 %v15793_v0 }
0x1166   :  { %14492 = vmatpush1.bf16.msra.mxu0 %v15857_v4  ;;  %10717 = vmatprep.mubr.msk.f32.mxu0 %vm55_vm0, %v10715_v38 }
0x1167   :  { %14493 = vmatprep.subr.bf16.mxu0 %v15793_v0 }
0x116a   :  { %14495 = vmatpush1.bf16.msra.mxu0 %v15864_v6 }
0x116b   :  { %14496 = vmatprep.subr.bf16.mxu0 %v15793_v0 }
0x116e   :  { %14498 = vmatpush1.bf16.msra.mxu0 %v15879_v10 }
0x116f   :  { %14499 = vmatprep.subr.bf16.mxu0 %v15793_v0 }
0x1172   :  { %14501 = vmatpush1.bf16.msra.mxu0 %v15896_v14 }
0x1173   :  { %14502 = vmatprep.subr.bf16.mxu0 %v15793_v0 }
0x1176   :  { %14504 = vmatpush1.bf16.msra.mxu0 %v15908_v17 }
0x1177   :  { %14505 = vmatprep.subr.bf16.mxu0 %v15793_v0 }
0x117a   :  { %14507 = vmatpush1.bf16.msra.mxu0 %v15920_v20 }
0x117b   :  { %14508 = vmatprep.subr.bf16.mxu0 %v15793_v0 }
0x117e   :  { %14510 = vmatpush1.bf16.msra.mxu0 %v15932_v23 }
0x117f   :  { %14511 = vmatprep.subr.bf16.mxu0 %v15793_v0 }
0x1182   :  { %14513 = vmatpush1.bf16.msra.mxu0 %v15944_v26 }
0x1183   :  { %14514 = vmatprep.subr.bf16.mxu0 %v15793_v0 }
0x1184   :  { %v18792_v28 = vpop.f32.mrb[76].mxu1 }
0x1185   :  { %v6274_v49 = vpop.f32.mrb[77].mxu1 }
0x1186   :  { %14516 = vmatpush1.bf16.msra.mxu0 %v15956_v29  ;;  %v14656_v49 = vpack.c.bf16 %v10755_v34, %v10754_v53  ;;  %v10788_v53 = vld [vmem:[%s20605_s3 + $0x8b0] sm:$0xff]  ;;  %v10789_v34 = vld [vmem:[%s20605_s3 + $0x8b8] sm:$0xff] }
0x1187   :  { %6319 = vmatprep.subr.mxu0 %v15794_v30 }
0x118a   :  { %10716 = vmatpush1.msk.msra.mxu0 %vm59_vm1, %v18520_v1 }
0x118b   :  { %6348 = vmatmul.mubr.f32.vlgmr.msra.gmra.mrb[78].mxu0 %v10714_v41  ;;  %14541 = vmatprep.subr.bf16.mxu0 %v15793_v0  ;;  %v10750_v41 = vld [vmem:[%s20605_s3 + $0x800] sm:$0xff] }
0x118c   :  { %14543 = vmatpush1.bf16.msra.mxu0 %v15857_v4  ;;  %10737 = vmatprep.mubr.msk.f32.mxu0 %vm55_vm0, %v10735_v7 }
0x118d   :  { %14544 = vmatprep.subr.bf16.mxu0 %v15793_v0 }
0x1190   :  { %14546 = vmatpush1.bf16.msra.mxu0 %v15864_v6 }
0x1191   :  { %14547 = vmatprep.subr.bf16.mxu0 %v15793_v0 }
0x1194   :  { %14549 = vmatpush1.bf16.msra.mxu0 %v15879_v10 }
0x1195   :  { %14550 = vmatprep.subr.bf16.mxu0 %v15793_v0 }
0x1198   :  { %14552 = vmatpush1.bf16.msra.mxu0 %v15896_v14 }
0x1199   :  { %14553 = vmatprep.subr.bf16.mxu0 %v15793_v0 }
0x119c   :  { %14555 = vmatpush1.bf16.msra.mxu0 %v15908_v17 }
0x119d   :  { %14556 = vmatprep.subr.bf16.mxu0 %v15793_v0 }
0x11a0   :  { %14558 = vmatpush1.bf16.msra.mxu0 %v15920_v20 }
0x11a1   :  { %14559 = vmatprep.subr.bf16.mxu0 %v15793_v0 }
0x11a4   :  { %14561 = vmatpush1.bf16.msra.mxu0 %v15932_v23 }
0x11a5   :  { %14562 = vmatprep.subr.bf16.mxu0 %v15793_v0 }
0x11a8   :  { %14564 = vmatpush1.bf16.msra.mxu0 %v15944_v26 }
0x11a9   :  { %14565 = vmatprep.subr.bf16.mxu0 %v15793_v0 }
0x11ac   :  { %14567 = vmatpush1.bf16.msra.mxu0 %v15956_v29 }
0x11ad   :  { %6488 = vmatprep.subr.mxu0 %v15794_v30 }
0x11b0   :  { %10736 = vmatpush1.msk.msra.mxu0 %vm59_vm1, %v18520_v1 }
0x11b1   :  { %14595 = vmatprep.subr.bf16.mxu0 %v15793_v0  ;;  %6517 = vmatmul.mubr.f32.vlgmr.msra.gmra.mrb[80].mxu0 %v10734_v58 }
0x11b2   :  { %14597 = vmatpush1.bf16.msra.mxu0 %v15857_v4  ;;  %10745 = vmatprep.mubr.msk.f32.mxu0 %vm55_vm0, %v10743_v8 }
0x11b3   :  { %14598 = vmatprep.subr.bf16.mxu0 %v15793_v0 }
0x11b6   :  { %14600 = vmatpush1.bf16.msra.mxu0 %v15864_v6 }
0x11b7   :  { %14601 = vmatprep.subr.bf16.mxu0 %v15793_v0 }
0x11ba   :  { %14603 = vmatpush1.bf16.msra.mxu0 %v15879_v10 }
0x11bb   :  { %14604 = vmatprep.subr.bf16.mxu0 %v15793_v0 }
0x11be   :  { %14606 = vmatpush1.bf16.msra.mxu0 %v15896_v14 }
0x11bf   :  { %14607 = vmatprep.subr.bf16.mxu0 %v15793_v0 }
0x11c2   :  { %14609 = vmatpush1.bf16.msra.mxu0 %v15908_v17 }
0x11c3   :  { %14610 = vmatprep.subr.bf16.mxu0 %v15793_v0 }
0x11c6   :  { %14612 = vmatpush1.bf16.msra.mxu0 %v15920_v20 }
0x11c7   :  { %14613 = vmatprep.subr.bf16.mxu0 %v15793_v0 }
0x11ca   :  { %14615 = vmatpush1.bf16.msra.mxu0 %v15932_v23 }
0x11cb   :  { %14616 = vmatprep.subr.bf16.mxu0 %v15793_v0 }
0x11ce   :  { %14618 = vmatpush1.bf16.msra.mxu0 %v15944_v26 }
0x11cf   :  { %14619 = vmatprep.subr.bf16.mxu0 %v15793_v0 }
0x11d2   :  { %14621 = vmatpush1.bf16.msra.mxu0 %v15956_v29 }
0x11d3   :  { %6641 = vmatprep.subr.mxu0 %v15794_v30 }
0x11d6   :  { %10744 = vmatpush1.msk.msra.mxu0 %vm59_vm1, %v18520_v1 }
0x11d7   :  { %6670 = vmatmul.mubr.f32.vlgmr.msra.gmra.mrb[82].mxu0 %v10742_v9  ;;  %14649 = vmatprep.subr.bf16.mxu0 %v15793_v0 }
0x11d8   :  { %12076 = vmatprep.mubr.msk.f32.mxu0 %vm15795_vm2, %v15794_v30 }
0x1212   :  { %v6041_v11 = vpop.f32.mrb[74].mxu0 }
0x1213   :  { %v18888_v15 = vadd.f32 %v6041_v11, %v18708_v13  ;;  %v12008_v61 = vpop.f32.mrb[75].mxu0  ;;  %v10747_v13 = vld [vmem:[%s20604_s0 + $0x5b8] sm:$0xff] }
0x1238   :  { %v6195_v12 = vpop.f32.mrb[76].mxu0 }
0x1239   :  { %v6199_v18 = vmax.f32 %v18774_v22, %v6195_v12  ;;  %v6197_v16 = vpop.f32.mrb[77].mxu0  ;;  %v10751_v22 = vld [vmem:[%s20605_s3 + $0x808] sm:$0xff] }
0x123b   :  { %v6276_v19 = vmax.f32 %v6199_v18, %v18792_v28  ;;  %v14650_v28 = vpack.c.bf16 %v10751_v22, %v10750_v41  ;;  %v10785_v22 = vld [vmem:[%s20605_s3 + $0x898] sm:$0xff] }
0x123d   :  { %14651 = vmatpush3.bf16.msra.mxu0 %v14650_v28 }
0x123e   :  { %14652 = vmatprep.subr.bf16.mxu0 %v15793_v0 }
0x1241   :  { %14654 = vmatpush3.bf16.msra.mxu0 %v14653_v47 }
0x1242   :  { %14655 = vmatprep.subr.bf16.mxu0 %v15793_v0 }
0x1245   :  { %14657 = vmatpush3.bf16.msra.mxu0 %v14656_v49  ;;  %v14791_v49 = vpack.c.bf16 %v10789_v34, %v10788_v53  ;;  %v10822_v53 = vld [vmem:[%s20605_s3 + $0x940] sm:$0xff]  ;;  %v10823_v34 = vld [vmem:[%s20605_s3 + $0x948] sm:$0xff] }
0x1246   :  { %14658 = vmatprep.subr.bf16.mxu0 %v15793_v0 }
0x1249   :  { %14660 = vmatpush3.bf16.msra.mxu0 %v14659_v52  ;;  %v14794_v52 = vpack.c.bf16 %v10791_v37, %v10790_v50  ;;  %v10824_v50 = vld [vmem:[%s20605_s3 + $0x950] sm:$0xff]  ;;  %v10825_v37 = vld [vmem:[%s20605_s3 + $0x958] sm:$0xff] }
0x124a   :  { %14661 = vmatprep.subr.bf16.mxu0 %v15793_v0 }
0x124d   :  { %14663 = vmatpush3.bf16.msra.mxu0 %v14662_v40  ;;  %v14797_v40 = vpack.c.bf16 %v10793_v44, %v10792_v55  ;;  %v10826_v55 = vld [vmem:[%s20605_s3 + $0x960] sm:$0xff]  ;;  %v10827_v44 = vld [vmem:[%s20605_s3 + $0x968] sm:$0xff] }
0x124e   :  { %14664 = vmatprep.subr.bf16.mxu0 %v15793_v0 }
0x1251   :  { %14666 = vmatpush3.bf16.msra.mxu0 %v14665_v57  ;;  %v14800_v57 = vpack.c.bf16 %v10795_v46, %v10794_v56  ;;  %v10828_v56 = vld [vmem:[%s20605_s3 + $0x970] sm:$0xff]  ;;  %v10829_v46 = vld [vmem:[%s20605_s3 + $0x978] sm:$0xff] }
0x1252   :  { %14667 = vmatprep.subr.bf16.mxu0 %v15793_v0 }
0x1255   :  { %14669 = vmatpush3.bf16.msra.mxu0 %v14668_v3  ;;  %v14803_v3 = vpack.c.bf16 %v10797_v60, %v10796_v59  ;;  %v10831_v59 = vld [vmem:[%s20604_s0 + $0x138] sm:$0xff]  ;;  %v10830_v60 = vld [vmem:[%s20604_s0 + $0x130] sm:$0xff] }
0x1256   :  { %14670 = vmatprep.subr.bf16.mxu0 %v15793_v0 }
0x1259   :  { %14672 = vmatpush3.bf16.msra.mxu0 %v14671_v63  ;;  %v10807_v63 = vld [vmem:[%s20604_s0 + $0x448] sm:$0xff] }
0x125a   :  { %14700 = vmatprep.subr.bf16.mxu0 %v15793_v0 }
0x125e   :  { %v6349_v21 = vpop.f32.mrb[78].mxu0 }
0x125f   :  { %v6353_v24 = vmax.f32 %v6276_v19, %v6349_v21  ;;  %v6351_v25 = vpop.f32.mrb[79].mxu0  ;;  %v19075_v21 = vld [vmem:[%s20606_s2] ss:$0 sm:$0xff] }
0x1261   :  { %v6354_v27 = vadd.f32 %v18345_v39, %v6353_v24  ;;  %v10738_v39 = vld [vmem:[%s20604_s0 + $0x290] sm:$0xff] }
0x1263   :  { %v6355_v32 = vmax.f32 %v6354_v27, 0.0  ;;  %v10770_v27 = vld [vmem:[%s20604_s0 + $0x2a0] sm:$0xff] }
0x1265   :  { %12042 = vmatmul.mubr.f32.vlgmr.msra.gmra.mrb[78].mxu1 %v6355_v32  ;;  %v10779_v32 = vld [vmem:[%s20604_s0 + $0x5c8] sm:$0xff] }
0x1266   :  { %14570 = vmatpush1.bf16.msra.mxu1 %v15857_v4  ;;  %10741 = vmatprep.mubr.msk.f32.mxu1 %vm55_vm0, %v10739_v33  ;;  %v19134_v33 = vld [vmem:[%s20603_s1 + $0x90] sm:$0x3f] }
0x1267   :  { %14571 = vmatprep.subr.bf16.mxu1 %v15793_v0 }
0x126a   :  { %14573 = vmatpush1.bf16.msra.mxu1 %v15864_v6 }
0x126b   :  { %14574 = vmatprep.subr.bf16.mxu1 %v15793_v0 }
0x126e   :  { %14576 = vmatpush1.bf16.msra.mxu1 %v15879_v10 }
0x126f   :  { %14577 = vmatprep.subr.bf16.mxu1 %v15793_v0 }
0x1272   :  { %14579 = vmatpush1.bf16.msra.mxu1 %v15896_v14 }
0x1273   :  { %14580 = vmatprep.subr.bf16.mxu1 %v15793_v0 }
0x1276   :  { %14582 = vmatpush1.bf16.msra.mxu1 %v15908_v17 }
0x1277   :  { %14583 = vmatprep.subr.bf16.mxu1 %v15793_v0 }
0x127a   :  { %14585 = vmatpush1.bf16.msra.mxu1 %v15920_v20 }
0x127b   :  { %14586 = vmatprep.subr.bf16.mxu1 %v15793_v0 }
0x127e   :  { %14588 = vmatpush1.bf16.msra.mxu1 %v15932_v23 }
0x127f   :  { %14589 = vmatprep.subr.bf16.mxu1 %v15793_v0 }
0x1282   :  { %14591 = vmatpush1.bf16.msra.mxu1 %v15944_v26 }
0x1283   :  { %14592 = vmatprep.subr.bf16.mxu1 %v15793_v0 }
0x1284   :  { %v18954_v36 = vpop.f32.mrb[80].mxu0 }
0x1285   :  { %v6520_v31 = vpop.f32.mrb[81].mxu0 }
0x1286   :  { %14594 = vmatpush1.bf16.msra.mxu1 %v15956_v29  ;;  %v10783_v31 = vld [vmem:[%s20605_s3 + $0x888] sm:$0xff] }
0x1287   :  { %6564 = vmatprep.subr.mxu1 %v15794_v30 }
0x128a   :  { %10740 = vmatpush1.msk.msra.mxu1 %vm59_vm1, %v18520_v1 }
0x128b   :  { %6593 = vmatmul.mubr.f32.vlgmr.msra.gmra.mrb[80].mxu1 %v10738_v39  ;;  %14622 = vmatprep.subr.bf16.mxu1 %v15793_v0 }
0x128c   :  { %14624 = vmatpush1.bf16.msra.mxu1 %v15857_v4  ;;  %10749 = vmatprep.mubr.msk.f32.mxu1 %vm55_vm0, %v10747_v13 }
0x128d   :  { %14625 = vmatprep.subr.bf16.mxu1 %v15793_v0 }
0x1290   :  { %14627 = vmatpush1.bf16.msra.mxu1 %v15864_v6 }
0x1291   :  { %14628 = vmatprep.subr.bf16.mxu1 %v15793_v0 }
0x1294   :  { %14630 = vmatpush1.bf16.msra.mxu1 %v15879_v10 }
0x1295   :  { %14631 = vmatprep.subr.bf16.mxu1 %v15793_v0 }
0x1298   :  { %14633 = vmatpush1.bf16.msra.mxu1 %v15896_v14 }
0x1299   :  { %14634 = vmatprep.subr.bf16.mxu1 %v15793_v0 }
0x129c   :  { %14636 = vmatpush1.bf16.msra.mxu1 %v15908_v17 }
0x129d   :  { %14637 = vmatprep.subr.bf16.mxu1 %v15793_v0 }
0x12a0   :  { %14639 = vmatpush1.bf16.msra.mxu1 %v15920_v20 }
0x12a1   :  { %14640 = vmatprep.subr.bf16.mxu1 %v15793_v0 }
0x12a4   :  { %14642 = vmatpush1.bf16.msra.mxu1 %v15932_v23 }
0x12a5   :  { %14643 = vmatprep.subr.bf16.mxu1 %v15793_v0 }
0x12a8   :  { %14645 = vmatpush1.bf16.msra.mxu1 %v15944_v26 }
0x12a9   :  { %14646 = vmatprep.subr.bf16.mxu1 %v15793_v0 }
0x12aa   :  { %v18972_v38 = vpop.f32.mrb[82].mxu0 }
0x12ab   :  { %v6673_v45 = vpop.f32.mrb[83].mxu0 }
0x12ac   :  { %14648 = vmatpush1.bf16.msra.mxu1 %v15956_v29  ;;  %v10787_v45 = vld [vmem:[%s20605_s3 + $0x8a8] sm:$0xff] }
0x12ad   :  { %6718 = vmatprep.subr.mxu1 %v15794_v30  ;;  %v14788_v47 = vpack.c.bf16 %v10787_v45, %v10786_v43  ;;  %v10820_v43 = vld [vmem:[%s20605_s3 + $0x930] sm:$0xff]  ;;  %v10821_v45 = vld [vmem:[%s20605_s3 + $0x938] sm:$0xff] }
0x12b0   :  { %10748 = vmatpush1.msk.msra.mxu1 %vm59_vm1, %v18520_v1 }
0x12b1   :  { %6747 = vmatmul.mubr.f32.vlgmr.msra.gmra.mrb[82].mxu1 %v10746_v35  ;;  %14673 = vmatprep.subr.bf16.mxu1 %v15793_v0 }
0x12b2   :  { %14675 = vmatpush1.bf16.msra.mxu1 %v15857_v4  ;;  %10769 = vmatprep.mubr.msk.f32.mxu1 %vm55_vm0, %v10767_v51  ;;  %v10806_v51 = vld [vmem:[%s20604_s0 + $0x440] sm:$0xff] }
0x12b3   :  { %14676 = vmatprep.subr.bf16.mxu1 %v15793_v0 }
0x12b6   :  { %14678 = vmatpush1.bf16.msra.mxu1 %v15864_v6 }
0x12b7   :  { %14679 = vmatprep.subr.bf16.mxu1 %v15793_v0 }
0x12ba   :  { %14681 = vmatpush1.bf16.msra.mxu1 %v15879_v10 }
0x12bb   :  { %14682 = vmatprep.subr.bf16.mxu1 %v15793_v0 }
0x12be   :  { %14684 = vmatpush1.bf16.msra.mxu1 %v15896_v14 }
0x12bf   :  { %14685 = vmatprep.subr.bf16.mxu1 %v15793_v0 }
0x12c2   :  { %14687 = vmatpush1.bf16.msra.mxu1 %v15908_v17 }
0x12c3   :  { %14688 = vmatprep.subr.bf16.mxu1 %v15793_v0 }
0x12c6   :  { %14690 = vmatpush1.bf16.msra.mxu1 %v15920_v20 }
0x12c7   :  { %14691 = vmatprep.subr.bf16.mxu1 %v15793_v0 }
0x12ca   :  { %14693 = vmatpush1.bf16.msra.mxu1 %v15932_v23 }
0x12cb   :  { %14694 = vmatprep.subr.bf16.mxu1 %v15793_v0 }
0x12ce   :  { %14696 = vmatpush1.bf16.msra.mxu1 %v15944_v26 }
0x12cf   :  { %14697 = vmatprep.subr.bf16.mxu1 %v15793_v0 }
0x12d2   :  { %14699 = vmatpush1.bf16.msra.mxu1 %v15956_v29 }
0x12d3   :  { %6887 = vmatprep.subr.mxu1 %v15794_v30 }
0x12d6   :  { %10768 = vmatpush1.msk.msra.mxu1 %vm59_vm1, %v18520_v1 }
0x12d7   :  { %14727 = vmatprep.subr.bf16.mxu1 %v15793_v0  ;;  %6916 = vmatmul.mubr.f32.vlgmr.msra.gmra.mrb[84].mxu1 %v10766_v2 }
0x12d8   :  { %14729 = vmatpush1.bf16.msra.mxu1 %v15857_v4  ;;  %10777 = vmatprep.mubr.msk.f32.mxu1 %vm55_vm0, %v10775_v5 }
0x12d9   :  { %14730 = vmatprep.subr.bf16.mxu1 %v15793_v0 }
0x12dc   :  { %14732 = vmatpush1.bf16.msra.mxu1 %v15864_v6 }
0x12dd   :  { %14733 = vmatprep.subr.bf16.mxu1 %v15793_v0 }
0x12e0   :  { %14735 = vmatpush1.bf16.msra.mxu1 %v15879_v10 }
0x12e1   :  { %14736 = vmatprep.subr.bf16.mxu1 %v15793_v0 }
0x12e4   :  { %14738 = vmatpush1.bf16.msra.mxu1 %v15896_v14 }
0x12e5   :  { %14739 = vmatprep.subr.bf16.mxu1 %v15793_v0 }
0x12e8   :  { %14741 = vmatpush1.bf16.msra.mxu1 %v15908_v17 }
0x12e9   :  { %14742 = vmatprep.subr.bf16.mxu1 %v15793_v0 }
0x12ec   :  { %14744 = vmatpush1.bf16.msra.mxu1 %v15920_v20 }
0x12ed   :  { %14745 = vmatprep.subr.bf16.mxu1 %v15793_v0 }
0x12f0   :  { %14747 = vmatpush1.bf16.msra.mxu1 %v15932_v23 }
0x12f1   :  { %14748 = vmatprep.subr.bf16.mxu1 %v15793_v0 }
0x12f4   :  { %14750 = vmatpush1.bf16.msra.mxu1 %v15944_v26 }
0x12f5   :  { %14751 = vmatprep.subr.bf16.mxu1 %v15793_v0 }
0x12f8   :  { %14753 = vmatpush1.bf16.msra.mxu1 %v15956_v29 }
0x12f9   :  { %7040 = vmatprep.subr.mxu1 %v15794_v30 }
0x12fc   :  { %10776 = vmatpush1.msk.msra.mxu1 %vm59_vm1, %v18520_v1 }
0x12fd   :  { %7069 = vmatmul.mubr.f32.vlgmr.msra.gmra.mrb[86].mxu1 %v10774_v54  ;;  %14781 = vmatprep.subr.bf16.mxu1 %v15793_v0 }
0x12fe   :  { %12111 = vmatprep.mubr.msk.f32.mxu1 %vm15795_vm2, %v15794_v30 }
0x1338   :  { %v6440_v7 = vpop.f32.mrb[78].mxu1 }
0x1339   :  { %v19068_v58 = vadd.f32 %v6440_v7, %v18888_v15  ;;  %v12043_v8 = vpop.f32.mrb[79].mxu1  ;;  %v10771_v15 = vld [vmem:[%s20604_s0 + $0x2a8] sm:$0xff] }
0x135e   :  { %v6594_v9 = vpop.f32.mrb[80].mxu1 }
0x135f   :  { %v6598_v11 = vmax.f32 %v18954_v36, %v6594_v9  ;;  %v6596_v61 = vpop.f32.mrb[81].mxu1  ;;  %v10782_v36 = vld [vmem:[%s20605_s3 + $0x880] sm:$0xff] }
0x1360   :  { %v14782_v41 = vpack.c.bf16 %v10783_v31, %v10782_v36  ;;  %v10817_v31 = vld [vmem:[%s20605_s3 + $0x918] sm:$0xff] }
0x1361   :  { %v6675_v12 = vmax.f32 %v6598_v11, %v18972_v38  ;;  %v10784_v38 = vld [vmem:[%s20605_s3 + $0x890] sm:$0xff] }
0x1362   :  { %14783 = vmatpush3.bf16.msra.mxu1 %v14782_v41  ;;  %v14785_v28 = vpack.c.bf16 %v10785_v22, %v10784_v38  ;;  %v10818_v22 = vld [vmem:[%s20605_s3 + $0x920] sm:$0xff] }
0x1363   :  { %14784 = vmatprep.subr.bf16.mxu1 %v15793_v0 }
0x1366   :  { %14786 = vmatpush3.bf16.msra.mxu1 %v14785_v28 }
0x1367   :  { %14787 = vmatprep.subr.bf16.mxu1 %v15793_v0 }
0x136a   :  { %14789 = vmatpush3.bf16.msra.mxu1 %v14788_v47  ;;  %v14923_v47 = vpack.c.bf16 %v10821_v45, %v10820_v43  ;;  %v10854_v43 = vld [vmem:[%s20605_s3 + $0x9c0] sm:$0xff]  ;;  %v10855_v45 = vld [vmem:[%s20605_s3 + $0x9c8] sm:$0xff] }
0x136b   :  { %14790 = vmatprep.subr.bf16.mxu1 %v15793_v0 }
0x136e   :  { %14792 = vmatpush3.bf16.msra.mxu1 %v14791_v49  ;;  %v14926_v49 = vpack.c.bf16 %v10823_v34, %v10822_v53  ;;  %v10856_v53 = vld [vmem:[%s20605_s3 + $0x9d0] sm:$0xff]  ;;  %v10857_v34 = vld [vmem:[%s20605_s3 + $0x9d8] sm:$0xff] }
0x136f   :  { %14793 = vmatprep.subr.bf16.mxu1 %v15793_v0 }
0x1372   :  { %14795 = vmatpush3.bf16.msra.mxu1 %v14794_v52  ;;  %v14929_v52 = vpack.c.bf16 %v10825_v37, %v10824_v50  ;;  %v10858_v50 = vld [vmem:[%s20605_s3 + $0x9e0] sm:$0xff]  ;;  %v10859_v37 = vld [vmem:[%s20605_s3 + $0x9e8] sm:$0xff] }
0x1373   :  { %14796 = vmatprep.subr.bf16.mxu1 %v15793_v0 }
0x1376   :  { %14798 = vmatpush3.bf16.msra.mxu1 %v14797_v40  ;;  %v14932_v40 = vpack.c.bf16 %v10827_v44, %v10826_v55  ;;  %v10860_v55 = vld [vmem:[%s20605_s3 + $0x9f0] sm:$0xff]  ;;  %v10861_v44 = vld [vmem:[%s20605_s3 + $0x9f8] sm:$0xff] }
0x1377   :  { %14799 = vmatprep.subr.bf16.mxu1 %v15793_v0 }
0x137a   :  { %14801 = vmatpush3.bf16.msra.mxu1 %v14800_v57  ;;  %v14935_v57 = vpack.c.bf16 %v10829_v46, %v10828_v56  ;;  %v10863_v56 = vld [vmem:[%s20604_s0 + $0x148] sm:$0xff]  ;;  %v10862_v46 = vld [vmem:[%s20604_s0 + $0x140] sm:$0xff] }
0x137b   :  { %14802 = vmatprep.subr.bf16.mxu1 %v15793_v0 }
0x137e   :  { %14804 = vmatpush3.bf16.msra.mxu1 %v14803_v3  ;;  %v10839_v3 = vld [vmem:[%s20604_s0 + $0x458] sm:$0xff] }
0x137f   :  { %14832 = vmatprep.subr.bf16.mxu1 %v15793_v0 }
0x1384   :  { %v6748_v18 = vpop.f32.mrb[82].mxu1 }
0x1385   :  { %v6752_v16 = vmax.f32 %v6675_v12, %v6748_v18  ;;  %v6750_v19 = vpop.f32.mrb[83].mxu1 }
0x1387   :  { %v6753_v24 = vadd.f32 %v19075_v21, %v6752_v16 }
0x1389   :  { %v6754_v25 = vmax.f32 %v6753_v24, 0.0  ;;  %v10803_v24 = vld [vmem:[%s20604_s0 + $0x2b8] sm:$0xff] }
0x138b   :  { %12077 = vmatmul.mubr.f32.vlgmr.msra.gmra.mrb[84].mxu0 %v6754_v25  ;;  %v10811_v25 = vld [vmem:[%s20604_s0 + $0x5d8] sm:$0xff] }
0x138c   :  { %14702 = vmatpush1.bf16.msra.mxu0 %v15857_v4  ;;  %10773 = vmatprep.mubr.msk.f32.mxu0 %vm55_vm0, %v10771_v15  ;;  %v10810_v15 = vld [vmem:[%s20604_s0 + $0x5d0] sm:$0xff] }
0x138d   :  { %14703 = vmatprep.subr.bf16.mxu0 %v15793_v0 }
0x1390   :  { %14705 = vmatpush1.bf16.msra.mxu0 %v15864_v6 }
0x1391   :  { %14706 = vmatprep.subr.bf16.mxu0 %v15793_v0 }
0x1394   :  { %14708 = vmatpush1.bf16.msra.mxu0 %v15879_v10 }
0x1395   :  { %14709 = vmatprep.subr.bf16.mxu0 %v15793_v0 }
0x1398   :  { %14711 = vmatpush1.bf16.msra.mxu0 %v15896_v14 }
0x1399   :  { %14712 = vmatprep.subr.bf16.mxu0 %v15793_v0 }
0x139c   :  { %14714 = vmatpush1.bf16.msra.mxu0 %v15908_v17 }
0x139d   :  { %14715 = vmatprep.subr.bf16.mxu0 %v15793_v0 }
0x13a0   :  { %14717 = vmatpush1.bf16.msra.mxu0 %v15920_v20 }
0x13a1   :  { %14718 = vmatprep.subr.bf16.mxu0 %v15793_v0 }
0x13a4   :  { %14720 = vmatpush1.bf16.msra.mxu0 %v15932_v23 }
0x13a5   :  { %14721 = vmatprep.subr.bf16.mxu0 %v15793_v0 }
0x13a8   :  { %14723 = vmatpush1.bf16.msra.mxu0 %v15944_v26 }
0x13a9   :  { %14724 = vmatprep.subr.bf16.mxu0 %v15793_v0 }
0x13aa   :  { %v19144_v39 = vpop.f32.mrb[84].mxu1 }
0x13ab   :  { %v6919_v13 = vpop.f32.mrb[85].mxu1 }
0x13ac   :  { %14726 = vmatpush1.bf16.msra.mxu0 %v15956_v29  ;;  %v10815_v13 = vld [vmem:[%s20605_s3 + $0x908] sm:$0xff] }
0x13ad   :  { %6963 = vmatprep.subr.mxu0 %v15794_v30 }
0x13b0   :  { %10772 = vmatpush1.msk.msra.mxu0 %vm59_vm1, %v18520_v1  ;;  %v10778_v1 = vld [vmem:[%s20604_s0 + $0x5c0] sm:$0xff] }
0x13b1   :  { %6992 = vmatmul.mubr.f32.vlgmr.msra.gmra.mrb[86].mxu0 %v10770_v27  ;;  %14754 = vmatprep.subr.bf16.mxu0 %v15793_v0 }
0x13b2   :  { %14756 = vmatpush1.bf16.msra.mxu0 %v15857_v4  ;;  %10781 = vmatprep.mubr.msk.f32.mxu0 %vm55_vm0, %v10779_v32 }
0x13b3   :  { %14757 = vmatprep.subr.bf16.mxu0 %v15793_v0 }
0x13b6   :  { %14759 = vmatpush1.bf16.msra.mxu0 %v15864_v6 }
0x13b7   :  { %14760 = vmatprep.subr.bf16.mxu0 %v15793_v0 }
0x13ba   :  { %14762 = vmatpush1.bf16.msra.mxu0 %v15879_v10 }
0x13bb   :  { %14763 = vmatprep.subr.bf16.mxu0 %v15793_v0 }
0x13be   :  { %14765 = vmatpush1.bf16.msra.mxu0 %v15896_v14 }
0x13bf   :  { %14766 = vmatprep.subr.bf16.mxu0 %v15793_v0 }
0x13c2   :  { %14768 = vmatpush1.bf16.msra.mxu0 %v15908_v17 }
0x13c3   :  { %14769 = vmatprep.subr.bf16.mxu0 %v15793_v0 }
0x13c6   :  { %14771 = vmatpush1.bf16.msra.mxu0 %v15920_v20 }
0x13c7   :  { %14772 = vmatprep.subr.bf16.mxu0 %v15793_v0 }
0x13ca   :  { %14774 = vmatpush1.bf16.msra.mxu0 %v15932_v23 }
0x13cb   :  { %14775 = vmatprep.subr.bf16.mxu0 %v15793_v0 }
0x13ce   :  { %14777 = vmatpush1.bf16.msra.mxu0 %v15944_v26 }
0x13cf   :  { %14778 = vmatprep.subr.bf16.mxu0 %v15793_v0 }
0x13d0   :  { %v19162_v35 = vpop.f32.mrb[86].mxu1 }
0x13d1   :  { %v7072_v42 = vpop.f32.mrb[87].mxu1 }
0x13d2   :  { %14780 = vmatpush1.bf16.msra.mxu0 %v15956_v29  ;;  %v10819_v42 = vld [vmem:[%s20605_s3 + $0x928] sm:$0xff] }
0x13d3   :  { %7117 = vmatprep.subr.mxu0 %v15794_v30  ;;  %v14920_v28 = vpack.c.bf16 %v10819_v42, %v10818_v22  ;;  %v10852_v22 = vld [vmem:[%s20605_s3 + $0x9b0] sm:$0xff]  ;;  %v10853_v42 = vld [vmem:[%s20605_s3 + $0x9b8] sm:$0xff] }
0x13d6   :  { %10780 = vmatpush1.msk.msra.mxu0 %vm59_vm1, %v19134_v33 }
0x13d7   :  { %7146 = vmatmul.mubr.f32.vlgmr.msra.gmra.mrb[88].mxu0 %v10778_v1  ;;  %14805 = vmatprep.subr.bf16.mxu0 %v15793_v0 }
0x13d8   :  { %14807 = vmatpush1.bf16.msra.mxu0 %v15857_v4  ;;  %10801 = vmatprep.mubr.msk.f32.mxu0 %vm55_vm0, %v10799_v48  ;;  %v10838_v48 = vld [vmem:[%s20604_s0 + $0x450] sm:$0xff] }
0x13d9   :  { %14808 = vmatprep.subr.bf16.mxu0 %v15793_v0 }
0x13dc   :  { %14810 = vmatpush1.bf16.msra.mxu0 %v15864_v6 }
0x13dd   :  { %14811 = vmatprep.subr.bf16.mxu0 %v15793_v0 }
0x13e0   :  { %14813 = vmatpush1.bf16.msra.mxu0 %v15879_v10 }
0x13e1   :  { %14814 = vmatprep.subr.bf16.mxu0 %v15793_v0 }
0x13e4   :  { %14816 = vmatpush1.bf16.msra.mxu0 %v15896_v14 }
0x13e5   :  { %14817 = vmatprep.subr.bf16.mxu0 %v15793_v0 }
0x13e8   :  { %14819 = vmatpush1.bf16.msra.mxu0 %v15908_v17 }
0x13e9   :  { %14820 = vmatprep.subr.bf16.mxu0 %v15793_v0 }
0x13ec   :  { %14822 = vmatpush1.bf16.msra.mxu0 %v15920_v20 }
0x13ed   :  { %14823 = vmatprep.subr.bf16.mxu0 %v15793_v0 }
0x13f0   :  { %14825 = vmatpush1.bf16.msra.mxu0 %v15932_v23 }
0x13f1   :  { %14826 = vmatprep.subr.bf16.mxu0 %v15793_v0 }
0x13f4   :  { %14828 = vmatpush1.bf16.msra.mxu0 %v15944_v26 }
0x13f5   :  { %14829 = vmatprep.subr.bf16.mxu0 %v15793_v0 }
0x13f8   :  { %14831 = vmatpush1.bf16.msra.mxu0 %v15956_v29 }
0x13f9   :  { %7286 = vmatprep.subr.mxu0 %v15794_v30 }
0x13fc   :  { %10800 = vmatpush1.msk.msra.mxu0 %vm59_vm1, %v19134_v33 }
0x13fd   :  { %14859 = vmatprep.subr.bf16.mxu0 %v15793_v0  ;;  %7315 = vmatmul.mubr.f32.vlgmr.msra.gmra.mrb[90].mxu0 %v10798_v62 }
0x13fe   :  { %14861 = vmatpush1.bf16.msra.mxu0 %v15857_v4  ;;  %10809 = vmatprep.mubr.msk.f32.mxu0 %vm55_vm0, %v10807_v63 }
0x13ff   :  { %14862 = vmatprep.subr.bf16.mxu0 %v15793_v0 }
0x1402   :  { %14864 = vmatpush1.bf16.msra.mxu0 %v15864_v6 }
0x1403   :  { %14865 = vmatprep.subr.bf16.mxu0 %v15793_v0 }
0x1406   :  { %14867 = vmatpush1.bf16.msra.mxu0 %v15879_v10 }
0x1407   :  { %14868 = vmatprep.subr.bf16.mxu0 %v15793_v0 }
0x140a   :  { %14870 = vmatpush1.bf16.msra.mxu0 %v15896_v14 }
0x140b   :  { %14871 = vmatprep.subr.bf16.mxu0 %v15793_v0 }
0x140e   :  { %14873 = vmatpush1.bf16.msra.mxu0 %v15908_v17 }
0x140f   :  { %14874 = vmatprep.subr.bf16.mxu0 %v15793_v0 }
0x1412   :  { %14876 = vmatpush1.bf16.msra.mxu0 %v15920_v20 }
0x1413   :  { %14877 = vmatprep.subr.bf16.mxu0 %v15793_v0 }
0x1416   :  { %14879 = vmatpush1.bf16.msra.mxu0 %v15932_v23 }
0x1417   :  { %14880 = vmatprep.subr.bf16.mxu0 %v15793_v0 }
0x141a   :  { %14882 = vmatpush1.bf16.msra.mxu0 %v15944_v26 }
0x141b   :  { %14883 = vmatprep.subr.bf16.mxu0 %v15793_v0 }
0x141e   :  { %14885 = vmatpush1.bf16.msra.mxu0 %v15956_v29 }
0x141f   :  { %7439 = vmatprep.subr.mxu0 %v15794_v30 }
0x1422   :  { %10808 = vmatpush1.msk.msra.mxu0 %vm59_vm1, %v19134_v33 }
0x1423   :  { %7468 = vmatmul.mubr.f32.vlgmr.msra.gmra.mrb[92].mxu0 %v10806_v51  ;;  %14913 = vmatprep.subr.bf16.mxu0 %v15793_v0 }
0x1424   :  { %12146 = vmatprep.mubr.msk.f32.mxu0 %vm15795_vm2, %v15794_v30 }
0x145e   :  { %v6839_v2 = vpop.f32.mrb[84].mxu0 }
0x145f   :  { %v19258_v5 = vadd.f32 %v6839_v2, %v19068_v58  ;;  %v12078_v54 = vpop.f32.mrb[85].mxu0  ;;  %v10802_v58 = vld [vmem:[%s20604_s0 + $0x2b0] sm:$0xff] }
0x1484   :  { %v6993_v7 = vpop.f32.mrb[86].mxu0 }
0x1485   :  { %v6997_v8 = vmax.f32 %v19144_v39, %v6993_v7  ;;  %v6995_v9 = vpop.f32.mrb[87].mxu0  ;;  %v10814_v39 = vld [vmem:[%s20605_s3 + $0x900] sm:$0xff] }
0x1486   :  { %v14914_v36 = vpack.c.bf16 %v10815_v13, %v10814_v39  ;;  %v10849_v13 = vld [vmem:[%s20605_s3 + $0x998] sm:$0xff] }
0x1487   :  { %v7074_v11 = vmax.f32 %v6997_v8, %v19162_v35  ;;  %v10816_v35 = vld [vmem:[%s20605_s3 + $0x910] sm:$0xff] }
0x1488   :  { %14915 = vmatpush3.bf16.msra.mxu0 %v14914_v36  ;;  %v14917_v41 = vpack.c.bf16 %v10817_v31, %v10816_v35  ;;  %v10850_v31 = vld [vmem:[%s20605_s3 + $0x9a0] sm:$0xff] }
0x1489   :  { %14916 = vmatprep.subr.bf16.mxu0 %v15793_v0 }
0x148c   :  { %14918 = vmatpush3.bf16.msra.mxu0 %v14917_v41 }
0x148d   :  { %14919 = vmatprep.subr.bf16.mxu0 %v15793_v0 }
0x1490   :  { %14921 = vmatpush3.bf16.msra.mxu0 %v14920_v28  ;;  %v15055_v28 = vpack.c.bf16 %v10853_v42, %v10852_v22  ;;  %v10888_v42 = vld [vmem:[%s20605_s3 + $0xa50] sm:$0xff] }
0x1491   :  { %14922 = vmatprep.subr.bf16.mxu0 %v15793_v0 }
0x1494   :  { %14924 = vmatpush3.bf16.msra.mxu0 %v14923_v47  ;;  %v15058_v47 = vpack.c.bf16 %v10855_v45, %v10854_v43  ;;  %v10890_v45 = vld [vmem:[%s20605_s3 + $0xa60] sm:$0xff] }
0x1495   :  { %14925 = vmatprep.subr.bf16.mxu0 %v15793_v0 }
0x1498   :  { %14927 = vmatpush3.bf16.msra.mxu0 %v14926_v49  ;;  %v15061_v49 = vpack.c.bf16 %v10857_v34, %v10856_v53  ;;  %v10892_v34 = vld [vmem:[%s20605_s3 + $0xa70] sm:$0xff] }
0x1499   :  { %14928 = vmatprep.subr.bf16.mxu0 %v15793_v0 }
0x149c   :  { %14930 = vmatpush3.bf16.msra.mxu0 %v14929_v52  ;;  %v15064_v52 = vpack.c.bf16 %v10859_v37, %v10858_v50  ;;  %v10895_v37 = vld [vmem:[%s20604_s0 + $0x158] sm:$0xff] }
0x149d   :  { %14931 = vmatprep.subr.bf16.mxu0 %v15793_v0 }
0x14a0   :  { %14933 = vmatpush3.bf16.msra.mxu0 %v14932_v40  ;;  %v15067_v40 = vpack.c.bf16 %v10861_v44, %v10860_v55  ;;  %v10903_v55 = vld [vmem:[%s20604_s0 + $0x478] sm:$0xff]  ;;  %v10902_v44 = vld [vmem:[%s20604_s0 + $0x470] sm:$0xff] }
0x14a1   :  { %14934 = vmatprep.subr.bf16.mxu0 %v15793_v0 }
0x14a4   :  { %14936 = vmatpush3.bf16.msra.mxu0 %v14935_v57  ;;  %v10871_v57 = vld [vmem:[%s20604_s0 + $0x468] sm:$0xff] }
0x14a5   :  { %14964 = vmatprep.subr.bf16.mxu0 %v15793_v0 }
0x14aa   :  { %v7147_v61 = vpop.f32.mrb[88].mxu0 }
0x14ab   :  { %v7151_v12 = vmax.f32 %v7074_v11, %v7147_v61  ;;  %v7149_v18 = vpop.f32.mrb[89].mxu0 }
0x14ad   :  { %v7152_v16 = vadd.f32 %v19075_v21, %v7151_v12 }
0x14af   :  { %v7153_v19 = vmax.f32 %v7152_v16, 0.0  ;;  %v10835_v16 = vld [vmem:[%s20604_s0 + $0x2c8] sm:$0xff] }
0x14b1   :  { %12112 = vmatmul.mubr.f32.vlgmr.msra.gmra.mrb[88].mxu1 %v7153_v19  ;;  %v10843_v19 = vld [vmem:[%s20604_s0 + $0x5e8] sm:$0xff] }
0x14b2   :  { %14834 = vmatpush1.bf16.msra.mxu1 %v15857_v4  ;;  %10805 = vmatprep.mubr.msk.f32.mxu1 %vm55_vm0, %v10803_v24  ;;  %v10842_v24 = vld [vmem:[%s20604_s0 + $0x5e0] sm:$0xff] }
0x14b3   :  { %14835 = vmatprep.subr.bf16.mxu1 %v15793_v0 }
0x14b6   :  { %14837 = vmatpush1.bf16.msra.mxu1 %v15864_v6 }
0x14b7   :  { %14838 = vmatprep.subr.bf16.mxu1 %v15793_v0 }
0x14ba   :  { %14840 = vmatpush1.bf16.msra.mxu1 %v15879_v10 }
0x14bb   :  { %14841 = vmatprep.subr.bf16.mxu1 %v15793_v0 }
0x14be   :  { %14843 = vmatpush1.bf16.msra.mxu1 %v15896_v14 }
0x14bf   :  { %14844 = vmatprep.subr.bf16.mxu1 %v15793_v0 }
0x14c2   :  { %14846 = vmatpush1.bf16.msra.mxu1 %v15908_v17 }
0x14c3   :  { %14847 = vmatprep.subr.bf16.mxu1 %v15793_v0 }
0x14c6   :  { %14849 = vmatpush1.bf16.msra.mxu1 %v15920_v20 }
0x14c7   :  { %14850 = vmatprep.subr.bf16.mxu1 %v15793_v0 }
0x14ca   :  { %14852 = vmatpush1.bf16.msra.mxu1 %v15932_v23 }
0x14cb   :  { %14853 = vmatprep.subr.bf16.mxu1 %v15793_v0 }
0x14ce   :  { %14855 = vmatpush1.bf16.msra.mxu1 %v15944_v26 }
0x14cf   :  { %14856 = vmatprep.subr.bf16.mxu1 %v15793_v0 }
0x14d0   :  { %v19324_v27 = vpop.f32.mrb[90].mxu0 }
0x14d1   :  { %v7318_v32 = vpop.f32.mrb[91].mxu0 }
0x14d2   :  { %14858 = vmatpush1.bf16.msra.mxu1 %v15956_v29  ;;  %v10847_v32 = vld [vmem:[%s20605_s3 + $0x988] sm:$0xff] }
0x14d3   :  { %7362 = vmatprep.subr.mxu1 %v15794_v30 }
0x14d6   :  { %10804 = vmatpush1.msk.msra.mxu1 %vm59_vm1, %v19134_v33 }
0x14d7   :  { %7391 = vmatmul.mubr.f32.vlgmr.msra.gmra.mrb[90].mxu1 %v10802_v58  ;;  %14886 = vmatprep.subr.bf16.mxu1 %v15793_v0 }
0x14d8   :  { %14888 = vmatpush1.bf16.msra.mxu1 %v15857_v4  ;;  %10813 = vmatprep.mubr.msk.f32.mxu1 %vm55_vm0, %v10811_v25 }
0x14d9   :  { %14889 = vmatprep.subr.bf16.mxu1 %v15793_v0 }
0x14dc   :  { %14891 = vmatpush1.bf16.msra.mxu1 %v15864_v6 }
0x14dd   :  { %14892 = vmatprep.subr.bf16.mxu1 %v15793_v0 }
0x14e0   :  { %14894 = vmatpush1.bf16.msra.mxu1 %v15879_v10 }
0x14e1   :  { %14895 = vmatprep.subr.bf16.mxu1 %v15793_v0 }
0x14e4   :  { %14897 = vmatpush1.bf16.msra.mxu1 %v15896_v14 }
0x14e5   :  { %14898 = vmatprep.subr.bf16.mxu1 %v15793_v0 }
0x14e8   :  { %14900 = vmatpush1.bf16.msra.mxu1 %v15908_v17 }
0x14e9   :  { %14901 = vmatprep.subr.bf16.mxu1 %v15793_v0 }
0x14ec   :  { %14903 = vmatpush1.bf16.msra.mxu1 %v15920_v20 }
0x14ed   :  { %14904 = vmatprep.subr.bf16.mxu1 %v15793_v0 }
0x14f0   :  { %14906 = vmatpush1.bf16.msra.mxu1 %v15932_v23 }
0x14f1   :  { %14907 = vmatprep.subr.bf16.mxu1 %v15793_v0 }
0x14f4   :  { %14909 = vmatpush1.bf16.msra.mxu1 %v15944_v26 }
0x14f5   :  { %14910 = vmatprep.subr.bf16.mxu1 %v15793_v0 }
0x14f6   :  { %v19342_v1 = vpop.f32.mrb[92].mxu0 }
0x14f7   :  { %v7471_v38 = vpop.f32.mrb[93].mxu0 }
0x14f8   :  { %14912 = vmatpush1.bf16.msra.mxu1 %v15956_v29  ;;  %v10851_v38 = vld [vmem:[%s20605_s3 + $0x9a8] sm:$0xff] }
0x14f9   :  { %7516 = vmatprep.subr.mxu1 %v15794_v30  ;;  %v15052_v41 = vpack.c.bf16 %v10851_v38, %v10850_v31  ;;  %v10886_v38 = vld [vmem:[%s20605_s3 + $0xa40] sm:$0xff] }
0x14fc   :  { %10812 = vmatpush1.msk.msra.mxu1 %vm59_vm1, %v19134_v33 }
0x14fd   :  { %7545 = vmatmul.mubr.f32.vlgmr.msra.gmra.mrb[92].mxu1 %v10810_v15  ;;  %14937 = vmatprep.subr.bf16.mxu1 %v15793_v0 }
0x14fe   :  { %14939 = vmatpush1.bf16.msra.mxu1 %v15857_v4  ;;  %10833 = vmatprep.mubr.msk.f32.mxu1 %vm55_vm0, %v10831_v59  ;;  %v10870_v59 = vld [vmem:[%s20604_s0 + $0x460] sm:$0xff] }
0x14ff   :  { %14940 = vmatprep.subr.bf16.mxu1 %v15793_v0 }
0x1502   :  { %14942 = vmatpush1.bf16.msra.mxu1 %v15864_v6 }
0x1503   :  { %14943 = vmatprep.subr.bf16.mxu1 %v15793_v0 }
0x1506   :  { %14945 = vmatpush1.bf16.msra.mxu1 %v15879_v10 }
0x1507   :  { %14946 = vmatprep.subr.bf16.mxu1 %v15793_v0 }
0x150a   :  { %14948 = vmatpush1.bf16.msra.mxu1 %v15896_v14 }
0x150b   :  { %14949 = vmatprep.subr.bf16.mxu1 %v15793_v0 }
0x150e   :  { %14951 = vmatpush1.bf16.msra.mxu1 %v15908_v17 }
0x150f   :  { %14952 = vmatprep.subr.bf16.mxu1 %v15793_v0 }
0x1512   :  { %14954 = vmatpush1.bf16.msra.mxu1 %v15920_v20 }
0x1513   :  { %14955 = vmatprep.subr.bf16.mxu1 %v15793_v0 }
0x1516   :  { %14957 = vmatpush1.bf16.msra.mxu1 %v15932_v23 }
0x1517   :  { %14958 = vmatprep.subr.bf16.mxu1 %v15793_v0 }
0x151a   :  { %14960 = vmatpush1.bf16.msra.mxu1 %v15944_v26 }
0x151b   :  { %14961 = vmatprep.subr.bf16.mxu1 %v15793_v0 }
0x151e   :  { %14963 = vmatpush1.bf16.msra.mxu1 %v15956_v29 }
0x151f   :  { %7685 = vmatprep.subr.mxu1 %v15794_v30 }
0x1522   :  { %10832 = vmatpush1.msk.msra.mxu1 %vm59_vm1, %v19134_v33 }
0x1523   :  { %14991 = vmatprep.subr.bf16.mxu1 %v15793_v0  ;;  %7714 = vmatmul.mubr.f32.vlgmr.msra.gmra.mrb[94].mxu1 %v10830_v60 }
0x1524   :  { %14993 = vmatpush1.bf16.msra.mxu1 %v15857_v4  ;;  %10841 = vmatprep.mubr.msk.f32.mxu1 %vm55_vm0, %v10839_v3 }
0x1525   :  { %14994 = vmatprep.subr.bf16.mxu1 %v15793_v0 }
0x1528   :  { %14996 = vmatpush1.bf16.msra.mxu1 %v15864_v6 }
0x1529   :  { %14997 = vmatprep.subr.bf16.mxu1 %v15793_v0 }
0x152c   :  { %14999 = vmatpush1.bf16.msra.mxu1 %v15879_v10 }
0x152d   :  { %15000 = vmatprep.subr.bf16.mxu1 %v15793_v0 }
0x1530   :  { %15002 = vmatpush1.bf16.msra.mxu1 %v15896_v14 }
0x1531   :  { %15003 = vmatprep.subr.bf16.mxu1 %v15793_v0 }
0x1534   :  { %15005 = vmatpush1.bf16.msra.mxu1 %v15908_v17 }
0x1535   :  { %15006 = vmatprep.subr.bf16.mxu1 %v15793_v0 }
0x1538   :  { %15008 = vmatpush1.bf16.msra.mxu1 %v15920_v20 }
0x1539   :  { %15009 = vmatprep.subr.bf16.mxu1 %v15793_v0 }
0x153c   :  { %15011 = vmatpush1.bf16.msra.mxu1 %v15932_v23 }
0x153d   :  { %15012 = vmatprep.subr.bf16.mxu1 %v15793_v0 }
0x1540   :  { %15014 = vmatpush1.bf16.msra.mxu1 %v15944_v26 }
0x1541   :  { %15015 = vmatprep.subr.bf16.mxu1 %v15793_v0 }
0x1544   :  { %15017 = vmatpush1.bf16.msra.mxu1 %v15956_v29 }
0x1545   :  { %7838 = vmatprep.subr.mxu1 %v15794_v30 }
0x1548   :  { %10840 = vmatpush1.msk.msra.mxu1 %vm59_vm1, %v19134_v33 }
0x1549   :  { %7867 = vmatmul.mubr.f32.vlgmr.msra.gmra.mrb[96].mxu1 %v10838_v48  ;;  %15045 = vmatprep.subr.bf16.mxu1 %v15793_v0 }
0x154a   :  { %12181 = vmatprep.mubr.msk.f32.mxu1 %vm15795_vm2, %v15794_v30 }
0x1584   :  { %v7238_v62 = vpop.f32.mrb[88].mxu1 }
0x1585   :  { %v19438_v63 = vadd.f32 %v7238_v62, %v19258_v5  ;;  %v12113_v51 = vpop.f32.mrb[89].mxu1  ;;  %v10834_v5 = vld [vmem:[%s20604_s0 + $0x2c0] sm:$0xff] }
0x15aa   :  { %v7392_v2 = vpop.f32.mrb[90].mxu1 }
0x15ab   :  { %v7396_v54 = vmax.f32 %v19324_v27, %v7392_v2  ;;  %v7394_v7 = vpop.f32.mrb[91].mxu1  ;;  %v10846_v27 = vld [vmem:[%s20605_s3 + $0x980] sm:$0xff] }
0x15ac   :  { %v15046_v39 = vpack.c.bf16 %v10847_v32, %v10846_v27 }
0x15ad   :  { %v7473_v8 = vmax.f32 %v7396_v54, %v19342_v1  ;;  %v10848_v1 = vld [vmem:[%s20605_s3 + $0x990] sm:$0xff] }
0x15ae   :  { %15047 = vmatpush3.bf16.msra.mxu1 %v15046_v39  ;;  %v15049_v36 = vpack.c.bf16 %v10849_v13, %v10848_v1  ;;  %v10882_v1 = vld [vmem:[%s20605_s3 + $0xa20] sm:$0xff]  ;;  %v10883_v39 = vld [vmem:[%s20605_s3 + $0xa28] sm:$0xff] }
0x15af   :  { %15048 = vmatprep.subr.bf16.mxu1 %v15793_v0  ;;  %v15184_v13 = vpack.c.bf16 %v10883_v39, %v10882_v1  ;;  %v10916_v1 = vld [vmem:[%s20605_s3 + $0xab0] sm:$0xff]  ;;  %v10917_v39 = vld [vmem:[%s20605_s3 + $0xab8] sm:$0xff] }
0x15b2   :  { %15050 = vmatpush3.bf16.msra.mxu1 %v15049_v36  ;;  %v10885_v36 = vld [vmem:[%s20605_s3 + $0xa38] sm:$0xff] }
0x15b3   :  { %15051 = vmatprep.subr.bf16.mxu1 %v15793_v0 }
0x15b6   :  { %15053 = vmatpush3.bf16.msra.mxu1 %v15052_v41  ;;  %v10887_v41 = vld [vmem:[%s20605_s3 + $0xa48] sm:$0xff] }
0x15b7   :  { %15054 = vmatprep.subr.bf16.mxu1 %v15793_v0  ;;  %v15190_v22 = vpack.c.bf16 %v10887_v41, %v10886_v38  ;;  %v10920_v38 = vld [vmem:[%s20605_s3 + $0xad0] sm:$0xff]  ;;  %v10921_v41 = vld [vmem:[%s20605_s3 + $0xad8] sm:$0xff] }
0x15ba   :  { %15056 = vmatpush3.bf16.msra.mxu1 %v15055_v28  ;;  %v10889_v28 = vld [vmem:[%s20605_s3 + $0xa58] sm:$0xff] }
0x15bb   :  { %15057 = vmatprep.subr.bf16.mxu1 %v15793_v0  ;;  %v15193_v43 = vpack.c.bf16 %v10889_v28, %v10888_v42  ;;  %v10922_v42 = vld [vmem:[%s20605_s3 + $0xae0] sm:$0xff]  ;;  %v10923_v28 = vld [vmem:[%s20605_s3 + $0xae8] sm:$0xff] }
0x15be   :  { %15059 = vmatpush3.bf16.msra.mxu1 %v15058_v47  ;;  %v10891_v47 = vld [vmem:[%s20605_s3 + $0xa68] sm:$0xff] }
0x15bf   :  { %15060 = vmatprep.subr.bf16.mxu1 %v15793_v0  ;;  %v15196_v53 = vpack.c.bf16 %v10891_v47, %v10890_v45  ;;  %v10924_v45 = vld [vmem:[%s20605_s3 + $0xaf0] sm:$0xff]  ;;  %v10925_v47 = vld [vmem:[%s20605_s3 + $0xaf8] sm:$0xff] }
0x15c2   :  { %15062 = vmatpush3.bf16.msra.mxu1 %v15061_v49  ;;  %v10893_v49 = vld [vmem:[%s20605_s3 + $0xa78] sm:$0xff] }
0x15c3   :  { %15063 = vmatprep.subr.bf16.mxu1 %v15793_v0  ;;  %v15199_v50 = vpack.c.bf16 %v10893_v49, %v10892_v34  ;;  %v10927_v34 = vld [vmem:[%s20604_s0 + $0x168] sm:$0xff]  ;;  %v10926_v49 = vld [vmem:[%s20604_s0 + $0x160] sm:$0xff] }
0x15c6   :  { %15065 = vmatpush3.bf16.msra.mxu1 %v15064_v52  ;;  %v10894_v52 = vld [vmem:[%s20604_s0 + $0x150] sm:$0xff] }
0x15c7   :  { %15066 = vmatprep.subr.bf16.mxu1 %v15793_v0 }
0x15ca   :  { %15068 = vmatpush3.bf16.msra.mxu1 %v15067_v40  ;;  %v19795_v40 = vld [vmem:[%s20603_s1 + $0x90] sm:$0x3f] }
0x15cb   :  { %15096 = vmatprep.subr.bf16.mxu1 %v15793_v0 }
0x15d0   :  { %v7546_v9 = vpop.f32.mrb[92].mxu1 }
0x15d1   :  { %v7550_v11 = vmax.f32 %v7473_v8, %v7546_v9  ;;  %v7548_v61 = vpop.f32.mrb[93].mxu1 }
0x15d3   :  { %v7551_v12 = vadd.f32 %v19075_v21, %v7550_v11 }
0x15d5   :  { %v7552_v18 = vmax.f32 %v7551_v12, 0.0  ;;  %v10867_v12 = vld [vmem:[%s20604_s0 + $0x2d8] sm:$0xff] }
0x15d7   :  { %12147 = vmatmul.mubr.f32.vlgmr.msra.gmra.mrb[94].mxu0 %v7552_v18  ;;  %v10874_v18 = vld [vmem:[%s20604_s0 + $0x5f0] sm:$0xff] }
0x15d8   :  { %14966 = vmatpush1.bf16.msra.mxu0 %v15857_v4  ;;  %10837 = vmatprep.mubr.msk.f32.mxu0 %vm55_vm0, %v10835_v16 }
0x15d9   :  { %14967 = vmatprep.subr.bf16.mxu0 %v15793_v0 }
0x15dc   :  { %14969 = vmatpush1.bf16.msra.mxu0 %v15864_v6 }
0x15dd   :  { %14970 = vmatprep.subr.bf16.mxu0 %v15793_v0 }
0x15e0   :  { %14972 = vmatpush1.bf16.msra.mxu0 %v15879_v10 }
0x15e1   :  { %14973 = vmatprep.subr.bf16.mxu0 %v15793_v0 }
0x15e4   :  { %14975 = vmatpush1.bf16.msra.mxu0 %v15896_v14 }
0x15e5   :  { %14976 = vmatprep.subr.bf16.mxu0 %v15793_v0 }
0x15e8   :  { %14978 = vmatpush1.bf16.msra.mxu0 %v15908_v17 }
0x15e9   :  { %14979 = vmatprep.subr.bf16.mxu0 %v15793_v0 }
0x15ec   :  { %14981 = vmatpush1.bf16.msra.mxu0 %v15920_v20 }
0x15ed   :  { %14982 = vmatprep.subr.bf16.mxu0 %v15793_v0 }
0x15f0   :  { %14984 = vmatpush1.bf16.msra.mxu0 %v15932_v23 }
0x15f1   :  { %14985 = vmatprep.subr.bf16.mxu0 %v15793_v0 }
0x15f4   :  { %14987 = vmatpush1.bf16.msra.mxu0 %v15944_v26 }
0x15f5   :  { %14988 = vmatprep.subr.bf16.mxu0 %v15793_v0 }
0x15f6   :  { %v19504_v58 = vpop.f32.mrb[94].mxu1 }
0x15f7   :  { %v7717_v25 = vpop.f32.mrb[95].mxu1 }
0x15f8   :  { %14990 = vmatpush1.bf16.msra.mxu0 %v15956_v29  ;;  %v10880_v25 = vld [vmem:[%s20605_s3 + $0xa10] sm:$0xff] }
0x15f9   :  { %7761 = vmatprep.subr.mxu0 %v15794_v30 }
0x15fc   :  { %10836 = vmatpush1.msk.msra.mxu0 %vm59_vm1, %v19134_v33 }
0x15fd   :  { %7790 = vmatmul.mubr.f32.vlgmr.msra.gmra.mrb[96].mxu0 %v10834_v5  ;;  %15018 = vmatprep.subr.bf16.mxu0 %v15793_v0 }
0x15fe   :  { %15020 = vmatpush1.bf16.msra.mxu0 %v15857_v4  ;;  %10845 = vmatprep.mubr.msk.f32.mxu0 %vm55_vm0, %v10843_v19 }
0x15ff   :  { %15021 = vmatprep.subr.bf16.mxu0 %v15793_v0 }
0x1602   :  { %15023 = vmatpush1.bf16.msra.mxu0 %v15864_v6 }
0x1603   :  { %15024 = vmatprep.subr.bf16.mxu0 %v15793_v0 }
0x1606   :  { %15026 = vmatpush1.bf16.msra.mxu0 %v15879_v10 }
0x1607   :  { %15027 = vmatprep.subr.bf16.mxu0 %v15793_v0 }
0x160a   :  { %15029 = vmatpush1.bf16.msra.mxu0 %v15896_v14 }
0x160b   :  { %15030 = vmatprep.subr.bf16.mxu0 %v15793_v0 }
0x160e   :  { %15032 = vmatpush1.bf16.msra.mxu0 %v15908_v17 }
0x160f   :  { %15033 = vmatprep.subr.bf16.mxu0 %v15793_v0 }
0x1612   :  { %15035 = vmatpush1.bf16.msra.mxu0 %v15920_v20 }
0x1613   :  { %15036 = vmatprep.subr.bf16.mxu0 %v15793_v0 }
0x1616   :  { %15038 = vmatpush1.bf16.msra.mxu0 %v15932_v23 }
0x1617   :  { %15039 = vmatprep.subr.bf16.mxu0 %v15793_v0 }
0x161a   :  { %15041 = vmatpush1.bf16.msra.mxu0 %v15944_v26 }
0x161b   :  { %15042 = vmatprep.subr.bf16.mxu0 %v15793_v0 }
0x161c   :  { %v19522_v15 = vpop.f32.mrb[96].mxu1 }
0x161d   :  { %v7870_v35 = vpop.f32.mrb[97].mxu1 }
0x161e   :  { %15044 = vmatpush1.bf16.msra.mxu0 %v15956_v29  ;;  %v10884_v35 = vld [vmem:[%s20605_s3 + $0xa30] sm:$0xff] }
0x161f   :  { %7915 = vmatprep.subr.mxu0 %v15794_v30  ;;  %v15187_v31 = vpack.c.bf16 %v10885_v36, %v10884_v35  ;;  %v10918_v35 = vld [vmem:[%s20605_s3 + $0xac0] sm:$0xff]  ;;  %v10919_v36 = vld [vmem:[%s20605_s3 + $0xac8] sm:$0xff] }
0x1622   :  { %10844 = vmatpush1.msk.msra.mxu0 %vm59_vm1, %v19134_v33 }
0x1623   :  { %7944 = vmatmul.mubr.f32.vlgmr.msra.gmra.mrb[98].mxu0 %v10842_v24  ;;  %15069 = vmatprep.subr.bf16.mxu0 %v15793_v0  ;;  %v10878_v24 = vld [vmem:[%s20605_s3 + $0xa00] sm:$0xff] }
0x1624   :  { %15071 = vmatpush1.bf16.msra.mxu0 %v15857_v4  ;;  %10865 = vmatprep.mubr.msk.f32.mxu0 %vm55_vm0, %v10863_v56 }
0x1625   :  { %15072 = vmatprep.subr.bf16.mxu0 %v15793_v0 }
0x1628   :  { %15074 = vmatpush1.bf16.msra.mxu0 %v15864_v6 }
0x1629   :  { %15075 = vmatprep.subr.bf16.mxu0 %v15793_v0 }
0x162c   :  { %15077 = vmatpush1.bf16.msra.mxu0 %v15879_v10 }
0x162d   :  { %15078 = vmatprep.subr.bf16.mxu0 %v15793_v0 }
0x1630   :  { %15080 = vmatpush1.bf16.msra.mxu0 %v15896_v14 }
0x1631   :  { %15081 = vmatprep.subr.bf16.mxu0 %v15793_v0 }
0x1634   :  { %15083 = vmatpush1.bf16.msra.mxu0 %v15908_v17 }
0x1635   :  { %15084 = vmatprep.subr.bf16.mxu0 %v15793_v0 }
0x1638   :  { %15086 = vmatpush1.bf16.msra.mxu0 %v15920_v20 }
0x1639   :  { %15087 = vmatprep.subr.bf16.mxu0 %v15793_v0 }
0x163c   :  { %15089 = vmatpush1.bf16.msra.mxu0 %v15932_v23 }
0x163d   :  { %15090 = vmatprep.subr.bf16.mxu0 %v15793_v0 }
0x1640   :  { %15092 = vmatpush1.bf16.msra.mxu0 %v15944_v26 }
0x1641   :  { %15093 = vmatprep.subr.bf16.mxu0 %v15793_v0 }
0x1644   :  { %15095 = vmatpush1.bf16.msra.mxu0 %v15956_v29 }
0x1645   :  { %8084 = vmatprep.subr.mxu0 %v15794_v30 }
0x1648   :  { %10864 = vmatpush1.msk.msra.mxu0 %vm59_vm1, %v19134_v33 }
0x1649   :  { %15123 = vmatprep.subr.bf16.mxu0 %v15793_v0  ;;  %8113 = vmatmul.mubr.f32.vlgmr.msra.gmra.mrb[100].mxu0 %v10862_v46 }
0x164a   :  { %15125 = vmatpush1.bf16.msra.mxu0 %v15857_v4  ;;  %10873 = vmatprep.mubr.msk.f32.mxu0 %vm55_vm0, %v10871_v57 }
0x164b   :  { %15126 = vmatprep.subr.bf16.mxu0 %v15793_v0 }
0x164e   :  { %15128 = vmatpush1.bf16.msra.mxu0 %v15864_v6 }
0x164f   :  { %15129 = vmatprep.subr.bf16.mxu0 %v15793_v0 }
0x1652   :  { %15131 = vmatpush1.bf16.msra.mxu0 %v15879_v10 }
0x1653   :  { %15132 = vmatprep.subr.bf16.mxu0 %v15793_v0 }
0x1656   :  { %15134 = vmatpush1.bf16.msra.mxu0 %v15896_v14 }
0x1657   :  { %15135 = vmatprep.subr.bf16.mxu0 %v15793_v0 }
0x165a   :  { %15137 = vmatpush1.bf16.msra.mxu0 %v15908_v17 }
0x165b   :  { %15138 = vmatprep.subr.bf16.mxu0 %v15793_v0 }
0x165e   :  { %15140 = vmatpush1.bf16.msra.mxu0 %v15920_v20 }
0x165f   :  { %15141 = vmatprep.subr.bf16.mxu0 %v15793_v0 }
0x1662   :  { %15143 = vmatpush1.bf16.msra.mxu0 %v15932_v23 }
0x1663   :  { %15144 = vmatprep.subr.bf16.mxu0 %v15793_v0 }
0x1666   :  { %15146 = vmatpush1.bf16.msra.mxu0 %v15944_v26 }
0x1667   :  { %15147 = vmatprep.subr.bf16.mxu0 %v15793_v0 }
0x166a   :  { %15149 = vmatpush1.bf16.msra.mxu0 %v15956_v29 }
0x166b   :  { %8237 = vmatprep.subr.mxu0 %v15794_v30 }
0x166e   :  { %10872 = vmatpush1.msk.msra.mxu0 %vm59_vm1, %v19134_v33 }
0x166f   :  { %8266 = vmatmul.mubr.f32.vlgmr.msra.gmra.mrb[102].mxu0 %v10870_v59  ;;  %15177 = vmatprep.subr.bf16.mxu0 %v15793_v0 }
0x1670   :  { %12216 = vmatprep.mubr.msk.f32.mxu0 %vm15795_vm2, %v15794_v30 }
0x16aa   :  { %v7637_v60 = vpop.f32.mrb[94].mxu0 }
0x16ab   :  { %v19618_v3 = vadd.f32 %v7637_v60, %v19438_v63  ;;  %v12148_v48 = vpop.f32.mrb[95].mxu0  ;;  %v10875_v63 = vld [vmem:[%s20604_s0 + $0x5f8] sm:$0xff] }
0x16d0   :  { %v7791_v62 = vpop.f32.mrb[96].mxu0 }
0x16d1   :  { %v7795_v51 = vmax.f32 %v19504_v58, %v7791_v62  ;;  %v7793_v2 = vpop.f32.mrb[97].mxu0  ;;  %v10879_v58 = vld [vmem:[%s20605_s3 + $0xa08] sm:$0xff] }
0x16d3   :  { %v7872_v54 = vmax.f32 %v7795_v51, %v19522_v15  ;;  %v15178_v15 = vpack.c.bf16 %v10879_v58, %v10878_v24  ;;  %v10913_v58 = vld [vmem:[%s20605_s3 + $0xa98] sm:$0xff] }
0x16d5   :  { %15179 = vmatpush3.bf16.msra.mxu0 %v15178_v15 }
0x16d6   :  { %15180 = vmatprep.subr.bf16.mxu0 %v15793_v0 }
0x16f6   :  { %v7945_v7 = vpop.f32.mrb[98].mxu0 }
0x16f7   :  { %v7949_v8 = vmax.f32 %v7872_v54, %v7945_v7  ;;  %v7947_v9 = vpop.f32.mrb[99].mxu0  ;;  %v19810_v7 = vld [vmem:[%s20606_s2] ss:$0 sm:$0xff] }
0x16f9   :  { %v7950_v11 = vadd.f32 %v19075_v21, %v7949_v8  ;;  %v10866_v21 = vld [vmem:[%s20604_s0 + $0x2d0] sm:$0xff] }
0x16fb   :  { %v7951_v61 = vmax.f32 %v7950_v11, 0.0  ;;  %v10898_v11 = vld [vmem:[%s20604_s0 + $0x2e0] sm:$0xff] }
0x16fd   :  { %12182 = vmatmul.mubr.f32.vlgmr.msra.gmra.mrb[98].mxu1 %v7951_v61  ;;  %v10907_v61 = vld [vmem:[%s20604_s0 + $0x608] sm:$0xff] }
0x16fe   :  { %15098 = vmatpush1.bf16.msra.mxu1 %v15857_v4  ;;  %10869 = vmatprep.mubr.msk.f32.mxu1 %vm55_vm0, %v10867_v12  ;;  %v10906_v12 = vld [vmem:[%s20604_s0 + $0x600] sm:$0xff] }
0x16ff   :  { %15099 = vmatprep.subr.bf16.mxu1 %v15793_v0 }
0x1702   :  { %15101 = vmatpush1.bf16.msra.mxu1 %v15864_v6 }
0x1703   :  { %15102 = vmatprep.subr.bf16.mxu1 %v15793_v0 }
0x1706   :  { %15104 = vmatpush1.bf16.msra.mxu1 %v15879_v10 }
0x1707   :  { %15105 = vmatprep.subr.bf16.mxu1 %v15793_v0 }
0x170a   :  { %15107 = vmatpush1.bf16.msra.mxu1 %v15896_v14 }
0x170b   :  { %15108 = vmatprep.subr.bf16.mxu1 %v15793_v0 }
0x170e   :  { %15110 = vmatpush1.bf16.msra.mxu1 %v15908_v17 }
0x170f   :  { %15111 = vmatprep.subr.bf16.mxu1 %v15793_v0 }
0x1712   :  { %15113 = vmatpush1.bf16.msra.mxu1 %v15920_v20 }
0x1713   :  { %15114 = vmatprep.subr.bf16.mxu1 %v15793_v0 }
0x1716   :  { %15116 = vmatpush1.bf16.msra.mxu1 %v15932_v23 }
0x1717   :  { %15117 = vmatprep.subr.bf16.mxu1 %v15793_v0 }
0x171a   :  { %15119 = vmatpush1.bf16.msra.mxu1 %v15944_v26 }
0x171b   :  { %15120 = vmatprep.subr.bf16.mxu1 %v15793_v0 }
0x171c   :  { %v19684_v16 = vpop.f32.mrb[100].mxu0 }
0x171d   :  { %v8116_v5 = vpop.f32.mrb[101].mxu0 }
0x171e   :  { %15122 = vmatpush1.bf16.msra.mxu1 %v15956_v29  ;;  %v10911_v5 = vld [vmem:[%s20605_s3 + $0xa88] sm:$0xff] }
0x171f   :  { %8160 = vmatprep.subr.mxu1 %v15794_v30 }
0x1722   :  { %10868 = vmatpush1.msk.msra.mxu1 %vm59_vm1, %v19134_v33 }
0x1723   :  { %8189 = vmatmul.mubr.f32.vlgmr.msra.gmra.mrb[100].mxu1 %v10866_v21  ;;  %15150 = vmatprep.subr.bf16.mxu1 %v15793_v0 }
0x1724   :  { %15152 = vmatpush1.bf16.msra.mxu1 %v15857_v4  ;;  %10877 = vmatprep.mubr.msk.f32.mxu1 %vm55_vm0, %v10875_v63 }
0x1725   :  { %15153 = vmatprep.subr.bf16.mxu1 %v15793_v0 }
0x1728   :  { %15155 = vmatpush1.bf16.msra.mxu1 %v15864_v6 }
0x1729   :  { %15156 = vmatprep.subr.bf16.mxu1 %v15793_v0 }
0x172c   :  { %15158 = vmatpush1.bf16.msra.mxu1 %v15879_v10 }
0x172d   :  { %15159 = vmatprep.subr.bf16.mxu1 %v15793_v0 }
0x1730   :  { %15161 = vmatpush1.bf16.msra.mxu1 %v15896_v14 }
0x1731   :  { %15162 = vmatprep.subr.bf16.mxu1 %v15793_v0 }
0x1734   :  { %15164 = vmatpush1.bf16.msra.mxu1 %v15908_v17 }
0x1735   :  { %15165 = vmatprep.subr.bf16.mxu1 %v15793_v0 }
0x1738   :  { %15167 = vmatpush1.bf16.msra.mxu1 %v15920_v20 }
0x1739   :  { %15168 = vmatprep.subr.bf16.mxu1 %v15793_v0 }
0x173c   :  { %15170 = vmatpush1.bf16.msra.mxu1 %v15932_v23 }
0x173d   :  { %15171 = vmatprep.subr.bf16.mxu1 %v15793_v0 }
0x1740   :  { %15173 = vmatpush1.bf16.msra.mxu1 %v15944_v26 }
0x1741   :  { %15174 = vmatprep.subr.bf16.mxu1 %v15793_v0 }
0x1742   :  { %v19702_v19 = vpop.f32.mrb[102].mxu0 }
0x1743   :  { %v8269_v27 = vpop.f32.mrb[103].mxu0 }
0x1744   :  { %15176 = vmatpush1.bf16.msra.mxu1 %v15956_v29  ;;  %v10915_v27 = vld [vmem:[%s20605_s3 + $0xaa8] sm:$0xff] }
0x1745   :  { %8314 = vmatprep.subr.mxu1 %v15794_v30 }
0x1748   :  { %10876 = vmatpush1.msk.msra.mxu1 %vm59_vm1, %v19134_v33 }
0x1749   :  { %8343 = vmatmul.mubr.f32.vlgmr.msra.gmra.mrb[102].mxu1 %v10874_v18  ;;  %15201 = vmatprep.subr.bf16.mxu1 %v15793_v0 }
0x174a   :  { %15203 = vmatpush1.bf16.msra.mxu1 %v15857_v4  ;;  %10897 = vmatprep.mubr.msk.f32.mxu1 %vm55_vm0, %v10895_v37  ;;  %v10934_v37 = vld [vmem:[%s20604_s0 + $0x480] sm:$0xff] }
0x174b   :  { %15204 = vmatprep.subr.bf16.mxu1 %v15793_v0 }
0x174e   :  { %15206 = vmatpush1.bf16.msra.mxu1 %v15864_v6 }
0x174f   :  { %15207 = vmatprep.subr.bf16.mxu1 %v15793_v0 }
0x1752   :  { %15209 = vmatpush1.bf16.msra.mxu1 %v15879_v10 }
0x1753   :  { %15210 = vmatprep.subr.bf16.mxu1 %v15793_v0 }
0x1756   :  { %15212 = vmatpush1.bf16.msra.mxu1 %v15896_v14 }
0x1757   :  { %15213 = vmatprep.subr.bf16.mxu1 %v15793_v0 }
0x175a   :  { %15215 = vmatpush1.bf16.msra.mxu1 %v15908_v17 }
0x175b   :  { %15216 = vmatprep.subr.bf16.mxu1 %v15793_v0 }
0x175e   :  { %15218 = vmatpush1.bf16.msra.mxu1 %v15920_v20 }
0x175f   :  { %15219 = vmatprep.subr.bf16.mxu1 %v15793_v0 }
0x1762   :  { %15221 = vmatpush1.bf16.msra.mxu1 %v15932_v23 }
0x1763   :  { %15222 = vmatprep.subr.bf16.mxu1 %v15793_v0 }
0x1766   :  { %15224 = vmatpush1.bf16.msra.mxu1 %v15944_v26 }
0x1767   :  { %15225 = vmatprep.subr.bf16.mxu1 %v15793_v0 }
0x176a   :  { %15227 = vmatpush1.bf16.msra.mxu1 %v15956_v29 }
0x176b   :  { %8483 = vmatprep.subr.mxu1 %v15794_v30 }
0x176e   :  { %10896 = vmatpush1.msk.msra.mxu1 %vm59_vm1, %v19134_v33  ;;  %v10881_v33 = vld [vmem:[%s20605_s3 + $0xa18] sm:$0xff] }
0x176f   :  { %15255 = vmatprep.subr.bf16.mxu1 %v15793_v0  ;;  %v15181_v32 = vpack.c.bf16 %v10881_v33, %v10880_v25  ;;  %8512 = vmatmul.mubr.f32.vlgmr.msra.gmra.mrb[104].mxu1 %v10894_v52  ;;  %v10914_v33 = vld [vmem:[%s20605_s3 + $0xaa0] sm:$0xff] }
0x1770   :  { %15257 = vmatpush1.bf16.msra.mxu1 %v15857_v4  ;;  %10905 = vmatprep.mubr.msk.f32.mxu1 %vm55_vm0, %v10903_v55 }
0x1771   :  { %15182 = vmatpush3.bf16.msra.mxu0 %v15181_v32  ;;  %15258 = vmatprep.subr.bf16.mxu1 %v15793_v0  ;;  %v15316_v32 = vpack.c.bf16 %v10915_v27, %v10914_v33  ;;  %v10948_v33 = vld [vmem:[%s20605_s3 + $0xb30] sm:$0xff]  ;;  %v10949_v27 = vld [vmem:[%s20605_s3 + $0xb38] sm:$0xff] }
0x1772   :  { %15183 = vmatprep.subr.bf16.mxu0 %v15793_v0 }
0x1774   :  { %15260 = vmatpush1.bf16.msra.mxu1 %v15864_v6 }
0x1775   :  { %15185 = vmatpush3.bf16.msra.mxu0 %v15184_v13  ;;  %15261 = vmatprep.subr.bf16.mxu1 %v15793_v0  ;;  %v15319_v13 = vpack.c.bf16 %v10917_v39, %v10916_v1  ;;  %v10950_v1 = vld [vmem:[%s20605_s3 + $0xb40] sm:$0xff]  ;;  %v10951_v39 = vld [vmem:[%s20605_s3 + $0xb48] sm:$0xff] }
0x1776   :  { %15186 = vmatprep.subr.bf16.mxu0 %v15793_v0 }
0x1778   :  { %15263 = vmatpush1.bf16.msra.mxu1 %v15879_v10 }
0x1779   :  { %15188 = vmatpush3.bf16.msra.mxu0 %v15187_v31  ;;  %15264 = vmatprep.subr.bf16.mxu1 %v15793_v0  ;;  %v15322_v31 = vpack.c.bf16 %v10919_v36, %v10918_v35  ;;  %v10952_v35 = vld [vmem:[%s20605_s3 + $0xb50] sm:$0xff]  ;;  %v10953_v36 = vld [vmem:[%s20605_s3 + $0xb58] sm:$0xff] }
0x177a   :  { %15189 = vmatprep.subr.bf16.mxu0 %v15793_v0 }
0x177c   :  { %15266 = vmatpush1.bf16.msra.mxu1 %v15896_v14 }
0x177d   :  { %15191 = vmatpush3.bf16.msra.mxu0 %v15190_v22  ;;  %15267 = vmatprep.subr.bf16.mxu1 %v15793_v0  ;;  %v15325_v22 = vpack.c.bf16 %v10921_v41, %v10920_v38  ;;  %v10954_v38 = vld [vmem:[%s20605_s3 + $0xb60] sm:$0xff]  ;;  %v10955_v41 = vld [vmem:[%s20605_s3 + $0xb68] sm:$0xff] }
0x177e   :  { %15192 = vmatprep.subr.bf16.mxu0 %v15793_v0 }
0x1780   :  { %15269 = vmatpush1.bf16.msra.mxu1 %v15908_v17 }
0x1781   :  { %15194 = vmatpush3.bf16.msra.mxu0 %v15193_v43  ;;  %15270 = vmatprep.subr.bf16.mxu1 %v15793_v0  ;;  %v15328_v43 = vpack.c.bf16 %v10923_v28, %v10922_v42  ;;  %v10956_v42 = vld [vmem:[%s20605_s3 + $0xb70] sm:$0xff]  ;;  %v10957_v28 = vld [vmem:[%s20605_s3 + $0xb78] sm:$0xff] }
0x1782   :  { %15195 = vmatprep.subr.bf16.mxu0 %v15793_v0 }
0x1784   :  { %15272 = vmatpush1.bf16.msra.mxu1 %v15920_v20 }
0x1785   :  { %15197 = vmatpush3.bf16.msra.mxu0 %v15196_v53  ;;  %15273 = vmatprep.subr.bf16.mxu1 %v15793_v0  ;;  %v15331_v53 = vpack.c.bf16 %v10925_v47, %v10924_v45  ;;  %v10959_v45 = vld [vmem:[%s20604_s0 + $0x178] sm:$0xff]  ;;  %v10958_v47 = vld [vmem:[%s20604_s0 + $0x170] sm:$0xff] }
0x1786   :  { %15198 = vmatprep.subr.bf16.mxu0 %v15793_v0 }
0x1788   :  { %15275 = vmatpush1.bf16.msra.mxu1 %v15932_v23 }
0x1789   :  { %15200 = vmatpush3.bf16.msra.mxu0 %v15199_v50  ;;  %15276 = vmatprep.subr.bf16.mxu1 %v15793_v0  ;;  %v10935_v50 = vld [vmem:[%s20604_s0 + $0x488] sm:$0xff] }
0x178a   :  { %15228 = vmatprep.subr.bf16.mxu0 %v15793_v0 }
0x178c   :  { %15278 = vmatpush1.bf16.msra.mxu1 %v15944_v26 }
0x178d   :  { %15279 = vmatprep.subr.bf16.mxu1 %v15793_v0 }
0x1790   :  { %15281 = vmatpush1.bf16.msra.mxu1 %v15956_v29 }
0x1791   :  { %8636 = vmatprep.subr.mxu1 %v15794_v30 }
0x1794   :  { %10904 = vmatpush1.msk.msra.mxu1 %vm59_vm1, %v19795_v40 }
0x1795   :  { %8665 = vmatmul.mubr.f32.vlgmr.msra.gmra.mrb[106].mxu1 %v10902_v44  ;;  %15309 = vmatprep.subr.bf16.mxu1 %v15793_v0 }
0x1796   :  { %12251 = vmatprep.mubr.msk.f32.mxu1 %vm15795_vm2, %v15794_v30 }
0x17d0   :  { %v8036_v56 = vpop.f32.mrb[98].mxu1 }
0x17d1   :  { %v19803_v46 = vadd.f32 %v8036_v56, %v19618_v3  ;;  %v12183_v57 = vpop.f32.mrb[99].mxu1  ;;  %v10899_v3 = vld [vmem:[%s20604_s0 + $0x2e8] sm:$0xff] }
0x17f6   :  { %v8190_v59 = vpop.f32.mrb[100].mxu1 }
0x17f7   :  { %v8194_v60 = vmax.f32 %v19684_v16, %v8190_v59  ;;  %v8192_v48 = vpop.f32.mrb[101].mxu1  ;;  %v10910_v16 = vld [vmem:[%s20605_s3 + $0xa80] sm:$0xff] }
0x17f8   :  { %v15310_v24 = vpack.c.bf16 %v10911_v5, %v10910_v16  ;;  %v10945_v5 = vld [vmem:[%s20605_s3 + $0xb18] sm:$0xff] }
0x17f9   :  { %v8271_v62 = vmax.f32 %v8194_v60, %v19702_v19  ;;  %v10912_v19 = vld [vmem:[%s20605_s3 + $0xa90] sm:$0xff] }
0x17fa   :  { %15311 = vmatpush3.bf16.msra.mxu1 %v15310_v24  ;;  %v15313_v15 = vpack.c.bf16 %v10913_v58, %v10912_v19  ;;  %v10946_v58 = vld [vmem:[%s20605_s3 + $0xb20] sm:$0xff] }
0x17fb   :  { %15312 = vmatprep.subr.bf16.mxu1 %v15793_v0 }
0x17fe   :  { %15314 = vmatpush3.bf16.msra.mxu1 %v15313_v15 }
0x17ff   :  { %15315 = vmatprep.subr.bf16.mxu1 %v15793_v0 }
0x1802   :  { %15317 = vmatpush3.bf16.msra.mxu1 %v15316_v32  ;;  %v15451_v32 = vpack.c.bf16 %v10949_v27, %v10948_v33  ;;  %v10982_v33 = vld [vmem:[%s20605_s3 + $0xbc0] sm:$0xff]  ;;  %v10983_v27 = vld [vmem:[%s20605_s3 + $0xbc8] sm:$0xff] }
0x1803   :  { %15318 = vmatprep.subr.bf16.mxu1 %v15793_v0 }
0x1806   :  { %15320 = vmatpush3.bf16.msra.mxu1 %v15319_v13  ;;  %v15454_v13 = vpack.c.bf16 %v10951_v39, %v10950_v1  ;;  %v10984_v1 = vld [vmem:[%s20605_s3 + $0xbd0] sm:$0xff]  ;;  %v10985_v39 = vld [vmem:[%s20605_s3 + $0xbd8] sm:$0xff] }
0x1807   :  { %15321 = vmatprep.subr.bf16.mxu1 %v15793_v0 }
0x180a   :  { %15323 = vmatpush3.bf16.msra.mxu1 %v15322_v31  ;;  %v15457_v31 = vpack.c.bf16 %v10953_v36, %v10952_v35  ;;  %v10986_v35 = vld [vmem:[%s20605_s3 + $0xbe0] sm:$0xff]  ;;  %v10987_v36 = vld [vmem:[%s20605_s3 + $0xbe8] sm:$0xff] }
0x180b   :  { %15324 = vmatprep.subr.bf16.mxu1 %v15793_v0 }
0x180e   :  { %15326 = vmatpush3.bf16.msra.mxu1 %v15325_v22  ;;  %v15460_v22 = vpack.c.bf16 %v10955_v41, %v10954_v38  ;;  %v10988_v38 = vld [vmem:[%s20605_s3 + $0xbf0] sm:$0xff]  ;;  %v10989_v41 = vld [vmem:[%s20605_s3 + $0xbf8] sm:$0xff] }
0x180f   :  { %15327 = vmatprep.subr.bf16.mxu1 %v15793_v0 }
0x1812   :  { %15329 = vmatpush3.bf16.msra.mxu1 %v15328_v43  ;;  %v15463_v43 = vpack.c.bf16 %v10957_v28, %v10956_v42  ;;  %v10991_v42 = vld [vmem:[%s20604_s0 + $0x188] sm:$0xff]  ;;  %v10990_v28 = vld [vmem:[%s20604_s0 + $0x180] sm:$0xff] }
0x1813   :  { %15330 = vmatprep.subr.bf16.mxu1 %v15793_v0 }
0x1816   :  { %15332 = vmatpush3.bf16.msra.mxu1 %v15331_v53  ;;  %v10967_v53 = vld [vmem:[%s20604_s0 + $0x498] sm:$0xff] }
0x1817   :  { %15360 = vmatprep.subr.bf16.mxu1 %v15793_v0 }
0x181c   :  { %v8344_v51 = vpop.f32.mrb[102].mxu1 }
0x181d   :  { %v8348_v2 = vmax.f32 %v8271_v62, %v8344_v51  ;;  %v8346_v54 = vpop.f32.mrb[103].mxu1 }
0x181f   :  { %v8349_v8 = vadd.f32 %v19810_v7, %v8348_v2 }
0x1821   :  { %v8350_v9 = vmax.f32 %v8349_v8, 0.0  ;;  %v10931_v8 = vld [vmem:[%s20604_s0 + $0x2f8] sm:$0xff] }
0x1823   :  { %12217 = vmatmul.mubr.f32.vlgmr.msra.gmra.mrb[104].mxu0 %v8350_v9  ;;  %v10939_v9 = vld [vmem:[%s20604_s0 + $0x618] sm:$0xff] }
0x1824   :  { %15230 = vmatpush1.bf16.msra.mxu0 %v15857_v4  ;;  %10901 = vmatprep.mubr.msk.f32.mxu0 %vm55_vm0, %v10899_v3  ;;  %v10938_v3 = vld [vmem:[%s20604_s0 + $0x610] sm:$0xff] }
0x1825   :  { %15231 = vmatprep.subr.bf16.mxu0 %v15793_v0 }
0x1828   :  { %15233 = vmatpush1.bf16.msra.mxu0 %v15864_v6 }
0x1829   :  { %15234 = vmatprep.subr.bf16.mxu0 %v15793_v0 }
0x182c   :  { %15236 = vmatpush1.bf16.msra.mxu0 %v15879_v10 }
0x182d   :  { %15237 = vmatprep.subr.bf16.mxu0 %v15793_v0 }
0x1830   :  { %15239 = vmatpush1.bf16.msra.mxu0 %v15896_v14 }
0x1831   :  { %15240 = vmatprep.subr.bf16.mxu0 %v15793_v0 }
0x1834   :  { %15242 = vmatpush1.bf16.msra.mxu0 %v15908_v17 }
0x1835   :  { %15243 = vmatprep.subr.bf16.mxu0 %v15793_v0 }
0x1838   :  { %15245 = vmatpush1.bf16.msra.mxu0 %v15920_v20 }
0x1839   :  { %15246 = vmatprep.subr.bf16.mxu0 %v15793_v0 }
0x183c   :  { %15248 = vmatpush1.bf16.msra.mxu0 %v15932_v23 }
0x183d   :  { %15249 = vmatprep.subr.bf16.mxu0 %v15793_v0 }
0x1840   :  { %15251 = vmatpush1.bf16.msra.mxu0 %v15944_v26 }
0x1841   :  { %15252 = vmatprep.subr.bf16.mxu0 %v15793_v0 }
0x1842   :  { %v19874_v21 = vpop.f32.mrb[104].mxu1 }
0x1843   :  { %v8515_v63 = vpop.f32.mrb[105].mxu1 }
0x1844   :  { %15254 = vmatpush1.bf16.msra.mxu0 %v15956_v29  ;;  %v10943_v63 = vld [vmem:[%s20605_s3 + $0xb08] sm:$0xff] }
0x1845   :  { %8559 = vmatprep.subr.mxu0 %v15794_v30 }
0x1848   :  { %10900 = vmatpush1.msk.msra.mxu0 %vm59_vm1, %v19795_v40 }
0x1849   :  { %8588 = vmatmul.mubr.f32.vlgmr.msra.gmra.mrb[106].mxu0 %v10898_v11  ;;  %15282 = vmatprep.subr.bf16.mxu0 %v15793_v0 }
0x184a   :  { %15284 = vmatpush1.bf16.msra.mxu0 %v15857_v4  ;;  %10909 = vmatprep.mubr.msk.f32.mxu0 %vm55_vm0, %v10907_v61 }
0x184b   :  { %15285 = vmatprep.subr.bf16.mxu0 %v15793_v0 }
0x184e   :  { %15287 = vmatpush1.bf16.msra.mxu0 %v15864_v6 }
0x184f   :  { %15288 = vmatprep.subr.bf16.mxu0 %v15793_v0 }
0x1852   :  { %15290 = vmatpush1.bf16.msra.mxu0 %v15879_v10 }
0x1853   :  { %15291 = vmatprep.subr.bf16.mxu0 %v15793_v0 }
0x1856   :  { %15293 = vmatpush1.bf16.msra.mxu0 %v15896_v14 }
0x1857   :  { %15294 = vmatprep.subr.bf16.mxu0 %v15793_v0 }
0x185a   :  { %15296 = vmatpush1.bf16.msra.mxu0 %v15908_v17 }
0x185b   :  { %15297 = vmatprep.subr.bf16.mxu0 %v15793_v0 }
0x185e   :  { %15299 = vmatpush1.bf16.msra.mxu0 %v15920_v20 }
0x185f   :  { %15300 = vmatprep.subr.bf16.mxu0 %v15793_v0 }
0x1862   :  { %15302 = vmatpush1.bf16.msra.mxu0 %v15932_v23 }
0x1863   :  { %15303 = vmatprep.subr.bf16.mxu0 %v15793_v0 }
0x1866   :  { %15305 = vmatpush1.bf16.msra.mxu0 %v15944_v26 }
0x1867   :  { %15306 = vmatprep.subr.bf16.mxu0 %v15793_v0 }
0x1868   :  { %v19892_v18 = vpop.f32.mrb[106].mxu1 }
0x1869   :  { %v8668_v25 = vpop.f32.mrb[107].mxu1 }
0x186a   :  { %15308 = vmatpush1.bf16.msra.mxu0 %v15956_v29  ;;  %v10947_v25 = vld [vmem:[%s20605_s3 + $0xb28] sm:$0xff] }
0x186b   :  { %8713 = vmatprep.subr.mxu0 %v15794_v30  ;;  %v15448_v15 = vpack.c.bf16 %v10947_v25, %v10946_v58  ;;  %v10980_v58 = vld [vmem:[%s20605_s3 + $0xbb0] sm:$0xff]  ;;  %v10981_v25 = vld [vmem:[%s20605_s3 + $0xbb8] sm:$0xff] }
0x186e   :  { %10908 = vmatpush1.msk.msra.mxu0 %vm59_vm1, %v19795_v40 }
0x186f   :  { %8742 = vmatmul.mubr.f32.vlgmr.msra.gmra.mrb[108].mxu0 %v10906_v12  ;;  %15333 = vmatprep.subr.bf16.mxu0 %v15793_v0 }
0x1870   :  { %15335 = vmatpush1.bf16.msra.mxu0 %v15857_v4  ;;  %10929 = vmatprep.mubr.msk.f32.mxu0 %vm55_vm0, %v10927_v34  ;;  %v10966_v34 = vld [vmem:[%s20604_s0 + $0x490] sm:$0xff] }
0x1871   :  { %15336 = vmatprep.subr.bf16.mxu0 %v15793_v0 }
0x1874   :  { %15338 = vmatpush1.bf16.msra.mxu0 %v15864_v6 }
0x1875   :  { %15339 = vmatprep.subr.bf16.mxu0 %v15793_v0 }
0x1878   :  { %15341 = vmatpush1.bf16.msra.mxu0 %v15879_v10 }
0x1879   :  { %15342 = vmatprep.subr.bf16.mxu0 %v15793_v0 }
0x187c   :  { %15344 = vmatpush1.bf16.msra.mxu0 %v15896_v14 }
0x187d   :  { %15345 = vmatprep.subr.bf16.mxu0 %v15793_v0 }
0x1880   :  { %15347 = vmatpush1.bf16.msra.mxu0 %v15908_v17 }
0x1881   :  { %15348 = vmatprep.subr.bf16.mxu0 %v15793_v0 }
0x1884   :  { %15350 = vmatpush1.bf16.msra.mxu0 %v15920_v20 }
0x1885   :  { %15351 = vmatprep.subr.bf16.mxu0 %v15793_v0 }
0x1888   :  { %15353 = vmatpush1.bf16.msra.mxu0 %v15932_v23 }
0x1889   :  { %15354 = vmatprep.subr.bf16.mxu0 %v15793_v0 }
0x188c   :  { %15356 = vmatpush1.bf16.msra.mxu0 %v15944_v26 }
0x188d   :  { %15357 = vmatprep.subr.bf16.mxu0 %v15793_v0 }
0x1890   :  { %15359 = vmatpush1.bf16.msra.mxu0 %v15956_v29 }
0x1891   :  { %8882 = vmatprep.subr.mxu0 %v15794_v30 }
0x1894   :  { %10928 = vmatpush1.msk.msra.mxu0 %vm59_vm1, %v19795_v40 }
0x1895   :  { %15387 = vmatprep.subr.bf16.mxu0 %v15793_v0  ;;  %8911 = vmatmul.mubr.f32.vlgmr.msra.gmra.mrb[110].mxu0 %v10926_v49 }
0x1896   :  { %15389 = vmatpush1.bf16.msra.mxu0 %v15857_v4  ;;  %10937 = vmatprep.mubr.msk.f32.mxu0 %vm55_vm0, %v10935_v50 }
0x1897   :  { %15390 = vmatprep.subr.bf16.mxu0 %v15793_v0 }
0x189a   :  { %15392 = vmatpush1.bf16.msra.mxu0 %v15864_v6 }
0x189b   :  { %15393 = vmatprep.subr.bf16.mxu0 %v15793_v0 }
0x189e   :  { %15395 = vmatpush1.bf16.msra.mxu0 %v15879_v10 }
0x189f   :  { %15396 = vmatprep.subr.bf16.mxu0 %v15793_v0 }
0x18a2   :  { %15398 = vmatpush1.bf16.msra.mxu0 %v15896_v14 }
0x18a3   :  { %15399 = vmatprep.subr.bf16.mxu0 %v15793_v0 }
0x18a6   :  { %15401 = vmatpush1.bf16.msra.mxu0 %v15908_v17 }
0x18a7   :  { %15402 = vmatprep.subr.bf16.mxu0 %v15793_v0 }
0x18aa   :  { %15404 = vmatpush1.bf16.msra.mxu0 %v15920_v20 }
0x18ab   :  { %15405 = vmatprep.subr.bf16.mxu0 %v15793_v0 }
0x18ae   :  { %15407 = vmatpush1.bf16.msra.mxu0 %v15932_v23 }
0x18af   :  { %15408 = vmatprep.subr.bf16.mxu0 %v15793_v0 }
0x18b2   :  { %15410 = vmatpush1.bf16.msra.mxu0 %v15944_v26 }
0x18b3   :  { %15411 = vmatprep.subr.bf16.mxu0 %v15793_v0 }
0x18b6   :  { %15413 = vmatpush1.bf16.msra.mxu0 %v15956_v29 }
0x18b7   :  { %9035 = vmatprep.subr.mxu0 %v15794_v30 }
0x18ba   :  { %10936 = vmatpush1.msk.msra.mxu0 %vm59_vm1, %v19795_v40 }
0x18bb   :  { %9064 = vmatmul.mubr.f32.vlgmr.msra.gmra.mrb[112].mxu0 %v10934_v37  ;;  %15441 = vmatprep.subr.bf16.mxu0 %v15793_v0 }
0x18bc   :  { %12286 = vmatprep.mubr.msk.f32.mxu0 %vm15795_vm2, %v15794_v30 }
0x18f6   :  { %v8435_v52 = vpop.f32.mrb[104].mxu0 }
0x18f7   :  { %v19988_v55 = vadd.f32 %v8435_v52, %v19803_v46  ;;  %v12218_v44 = vpop.f32.mrb[105].mxu0  ;;  %v10930_v46 = vld [vmem:[%s20604_s0 + $0x2f0] sm:$0xff] }
0x191c   :  { %v8589_v56 = vpop.f32.mrb[106].mxu0 }
0x191d   :  { %v8593_v57 = vmax.f32 %v19874_v21, %v8589_v56  ;;  %v8591_v59 = vpop.f32.mrb[107].mxu0  ;;  %v10942_v21 = vld [vmem:[%s20605_s3 + $0xb00] sm:$0xff] }
0x191e   :  { %v15442_v16 = vpack.c.bf16 %v10943_v63, %v10942_v21  ;;  %v10977_v63 = vld [vmem:[%s20605_s3 + $0xb98] sm:$0xff] }
0x191f   :  { %v8670_v60 = vmax.f32 %v8593_v57, %v19892_v18  ;;  %v10944_v18 = vld [vmem:[%s20605_s3 + $0xb10] sm:$0xff] }
0x1920   :  { %15443 = vmatpush3.bf16.msra.mxu0 %v15442_v16  ;;  %v15445_v24 = vpack.c.bf16 %v10945_v5, %v10944_v18  ;;  %v10978_v5 = vld [vmem:[%s20605_s3 + $0xba0] sm:$0xff] }
0x1921   :  { %15444 = vmatprep.subr.bf16.mxu0 %v15793_v0 }
0x1924   :  { %15446 = vmatpush3.bf16.msra.mxu0 %v15445_v24 }
0x1925   :  { %15447 = vmatprep.subr.bf16.mxu0 %v15793_v0 }
0x1928   :  { %15449 = vmatpush3.bf16.msra.mxu0 %v15448_v15  ;;  %v15583_v15 = vpack.c.bf16 %v10981_v25, %v10980_v58  ;;  %v11021_v58 = vld [vmem:[%s20605_s3 + $0xc78] sm:$0xff] }
0x1929   :  { %15450 = vmatprep.subr.bf16.mxu0 %v15793_v0 }
0x192c   :  { %15452 = vmatpush3.bf16.msra.mxu0 %v15451_v32  ;;  %v15586_v32 = vpack.c.bf16 %v10983_v27, %v10982_v33  ;;  %v10048_v33 = vld [vmem:[%s20607_s5 + $0x8] sm:$0xff]  ;;  %v10049_v27 = vld [vmem:[%s20607_s5 + $0x10] sm:$0xff] }
0x192d   :  { %15453 = vmatprep.subr.bf16.mxu0 %v15793_v0 }
0x1930   :  { %15455 = vmatpush3.bf16.msra.mxu0 %v15454_v13  ;;  %v15589_v13 = vpack.c.bf16 %v10985_v39, %v10984_v1  ;;  %v10050_v1 = vld [vmem:[%s20607_s5 + $0x18] sm:$0xff] }
0x1931   :  { %15456 = vmatprep.subr.bf16.mxu0 %v15793_v0  ;;  %v15733_v39 = vpack.c.bf16 %v10050_v1, %v10049_v27  ;;  %v10156_v27 = vld [vmem:[%s20608_s7 + $0x78] sm:$0xff] }
0x1934   :  { %15458 = vmatpush3.bf16.msra.mxu0 %v15457_v31  ;;  %v15592_v31 = vpack.c.bf16 %v10987_v36, %v10986_v35  ;;  %v10052_v35 = vld [vmem:[%s20607_s5 + $0x28] sm:$0xff] }
0x1935   :  { %15459 = vmatprep.subr.bf16.mxu0 %v15793_v0 }
0x1938   :  { %15461 = vmatpush3.bf16.msra.mxu0 %v15460_v22  ;;  %v15595_v22 = vpack.c.bf16 %v10989_v41, %v10988_v38  ;;  %v10054_v38 = vld [vmem:[%s20607_s5 + $0x38] sm:$0xff] }
0x1939   :  { %15462 = vmatprep.subr.bf16.mxu0 %v15793_v0 }
0x193c   :  { %15464 = vmatpush3.bf16.msra.mxu0 %v15463_v43  ;;  %v10999_v43 = vld [vmem:[%s20604_s0 + $0x4a8] sm:$0xff] }
0x193d   :  { %15492 = vmatprep.subr.bf16.mxu0 %v15793_v0 }
0x1942   :  { %v8743_v48 = vpop.f32.mrb[108].mxu0 }
0x1943   :  { %v8747_v62 = vmax.f32 %v8670_v60, %v8743_v48  ;;  %v8745_v51 = vpop.f32.mrb[109].mxu0 }
0x1945   :  { %v8748_v2 = vadd.f32 %v19810_v7, %v8747_v62 }
0x1947   :  { %v8749_v54 = vmax.f32 %v8748_v2, 0.0  ;;  %v10963_v2 = vld [vmem:[%s20604_s0 + $0x308] sm:$0xff] }
0x1949   :  { %12252 = vmatmul.mubr.f32.vlgmr.msra.gmra.mrb[108].mxu1 %v8749_v54  ;;  %v10971_v54 = vld [vmem:[%s20604_s0 + $0x628] sm:$0xff] }
0x194a   :  { %15362 = vmatpush1.bf16.msra.mxu1 %v15857_v4  ;;  %10933 = vmatprep.mubr.msk.f32.mxu1 %vm55_vm0, %v10931_v8  ;;  %v10970_v8 = vld [vmem:[%s20604_s0 + $0x620] sm:$0xff] }
0x194b   :  { %15363 = vmatprep.subr.bf16.mxu1 %v15793_v0 }
0x194e   :  { %15365 = vmatpush1.bf16.msra.mxu1 %v15864_v6 }
0x194f   :  { %15366 = vmatprep.subr.bf16.mxu1 %v15793_v0 }
0x1952   :  { %15368 = vmatpush1.bf16.msra.mxu1 %v15879_v10 }
0x1953   :  { %15369 = vmatprep.subr.bf16.mxu1 %v15793_v0 }
0x1956   :  { %15371 = vmatpush1.bf16.msra.mxu1 %v15896_v14 }
0x1957   :  { %15372 = vmatprep.subr.bf16.mxu1 %v15793_v0 }
0x195a   :  { %15374 = vmatpush1.bf16.msra.mxu1 %v15908_v17 }
0x195b   :  { %15375 = vmatprep.subr.bf16.mxu1 %v15793_v0 }
0x195e   :  { %15377 = vmatpush1.bf16.msra.mxu1 %v15920_v20 }
0x195f   :  { %15378 = vmatprep.subr.bf16.mxu1 %v15793_v0 }
0x1962   :  { %15380 = vmatpush1.bf16.msra.mxu1 %v15932_v23 }
0x1963   :  { %15381 = vmatprep.subr.bf16.mxu1 %v15793_v0 }
0x1966   :  { %15383 = vmatpush1.bf16.msra.mxu1 %v15944_v26 }
0x1967   :  { %15384 = vmatprep.subr.bf16.mxu1 %v15793_v0 }
0x1968   :  { %v20054_v11 = vpop.f32.mrb[110].mxu0 }
0x1969   :  { %v8914_v61 = vpop.f32.mrb[111].mxu0 }
0x196a   :  { %15386 = vmatpush1.bf16.msra.mxu1 %v15956_v29  ;;  %v10975_v61 = vld [vmem:[%s20605_s3 + $0xb88] sm:$0xff] }
0x196b   :  { %8958 = vmatprep.subr.mxu1 %v15794_v30 }
0x196e   :  { %10932 = vmatpush1.msk.msra.mxu1 %vm59_vm1, %v19795_v40 }
0x196f   :  { %8987 = vmatmul.mubr.f32.vlgmr.msra.gmra.mrb[110].mxu1 %v10930_v46  ;;  %15414 = vmatprep.subr.bf16.mxu1 %v15793_v0 }
0x1970   :  { %15416 = vmatpush1.bf16.msra.mxu1 %v15857_v4  ;;  %10941 = vmatprep.mubr.msk.f32.mxu1 %vm55_vm0, %v10939_v9 }
0x1971   :  { %15417 = vmatprep.subr.bf16.mxu1 %v15793_v0 }
0x1974   :  { %15419 = vmatpush1.bf16.msra.mxu1 %v15864_v6 }
0x1975   :  { %15420 = vmatprep.subr.bf16.mxu1 %v15793_v0 }
0x1978   :  { %15422 = vmatpush1.bf16.msra.mxu1 %v15879_v10 }
0x1979   :  { %15423 = vmatprep.subr.bf16.mxu1 %v15793_v0 }
0x197c   :  { %15425 = vmatpush1.bf16.msra.mxu1 %v15896_v14 }
0x197d   :  { %15426 = vmatprep.subr.bf16.mxu1 %v15793_v0 }
0x1980   :  { %15428 = vmatpush1.bf16.msra.mxu1 %v15908_v17 }
0x1981   :  { %15429 = vmatprep.subr.bf16.mxu1 %v15793_v0 }
0x1984   :  { %15431 = vmatpush1.bf16.msra.mxu1 %v15920_v20 }
0x1985   :  { %15432 = vmatprep.subr.bf16.mxu1 %v15793_v0 }
0x1988   :  { %15434 = vmatpush1.bf16.msra.mxu1 %v15932_v23 }
0x1989   :  { %15435 = vmatprep.subr.bf16.mxu1 %v15793_v0 }
0x198c   :  { %15437 = vmatpush1.bf16.msra.mxu1 %v15944_v26 }
0x198d   :  { %15438 = vmatprep.subr.bf16.mxu1 %v15793_v0 }
0x198e   :  { %v20072_v12 = vpop.f32.mrb[112].mxu0 }
0x198f   :  { %v9067_v19 = vpop.f32.mrb[113].mxu0 }
0x1990   :  { %15440 = vmatpush1.bf16.msra.mxu1 %v15956_v29  ;;  %v10979_v19 = vld [vmem:[%s20605_s3 + $0xba8] sm:$0xff] }
0x1991   :  { %9112 = vmatprep.subr.mxu1 %v15794_v30  ;;  %v15580_v24 = vpack.c.bf16 %v10979_v19, %v10978_v5  ;;  %v11019_v5 = vld [vmem:[%s20605_s3 + $0xc68] sm:$0xff] }
0x1994   :  { %10940 = vmatpush1.msk.msra.mxu1 %vm59_vm1, %v19795_v40 }
0x1995   :  { %9141 = vmatmul.mubr.f32.vlgmr.msra.gmra.mrb[112].mxu1 %v10938_v3  ;;  %15465 = vmatprep.subr.bf16.mxu1 %v15793_v0 }
0x1996   :  { %15467 = vmatpush1.bf16.msra.mxu1 %v15857_v4  ;;  %10961 = vmatprep.mubr.msk.f32.mxu1 %vm55_vm0, %v10959_v45  ;;  %v10998_v45 = vld [vmem:[%s20604_s0 + $0x4a0] sm:$0xff] }
0x1997   :  { %15468 = vmatprep.subr.bf16.mxu1 %v15793_v0 }
0x199a   :  { %15470 = vmatpush1.bf16.msra.mxu1 %v15864_v6 }
0x199b   :  { %15471 = vmatprep.subr.bf16.mxu1 %v15793_v0 }
0x199e   :  { %15473 = vmatpush1.bf16.msra.mxu1 %v15879_v10 }
0x199f   :  { %15474 = vmatprep.subr.bf16.mxu1 %v15793_v0 }
0x19a2   :  { %15476 = vmatpush1.bf16.msra.mxu1 %v15896_v14 }
0x19a3   :  { %15477 = vmatprep.subr.bf16.mxu1 %v15793_v0 }
0x19a6   :  { %15479 = vmatpush1.bf16.msra.mxu1 %v15908_v17 }
0x19a7   :  { %15480 = vmatprep.subr.bf16.mxu1 %v15793_v0 }
0x19aa   :  { %15482 = vmatpush1.bf16.msra.mxu1 %v15920_v20 }
0x19ab   :  { %15483 = vmatprep.subr.bf16.mxu1 %v15793_v0 }
0x19ae   :  { %15485 = vmatpush1.bf16.msra.mxu1 %v15932_v23 }
0x19af   :  { %15486 = vmatprep.subr.bf16.mxu1 %v15793_v0 }
0x19b2   :  { %15488 = vmatpush1.bf16.msra.mxu1 %v15944_v26 }
0x19b3   :  { %15489 = vmatprep.subr.bf16.mxu1 %v15793_v0 }
0x19b6   :  { %15491 = vmatpush1.bf16.msra.mxu1 %v15956_v29 }
0x19b7   :  { %9281 = vmatprep.subr.mxu1 %v15794_v30 }
0x19ba   :  { %10960 = vmatpush1.msk.msra.mxu1 %vm59_vm1, %v19795_v40 }
0x19bb   :  { %15519 = vmatprep.subr.bf16.mxu1 %v15793_v0  ;;  %9310 = vmatmul.mubr.f32.vlgmr.msra.gmra.mrb[114].mxu1 %v10958_v47 }
0x19bc   :  { %15521 = vmatpush1.bf16.msra.mxu1 %v15857_v4  ;;  %10969 = vmatprep.mubr.msk.f32.mxu1 %vm55_vm0, %v10967_v53 }
0x19bd   :  { %15522 = vmatprep.subr.bf16.mxu1 %v15793_v0 }
0x19c0   :  { %15524 = vmatpush1.bf16.msra.mxu1 %v15864_v6 }
0x19c1   :  { %15525 = vmatprep.subr.bf16.mxu1 %v15793_v0 }
0x19c4   :  { %15527 = vmatpush1.bf16.msra.mxu1 %v15879_v10 }
0x19c5   :  { %15528 = vmatprep.subr.bf16.mxu1 %v15793_v0 }
0x19c8   :  { %15530 = vmatpush1.bf16.msra.mxu1 %v15896_v14 }
0x19c9   :  { %15531 = vmatprep.subr.bf16.mxu1 %v15793_v0 }
0x19cc   :  { %15533 = vmatpush1.bf16.msra.mxu1 %v15908_v17 }
0x19cd   :  { %15534 = vmatprep.subr.bf16.mxu1 %v15793_v0 }
0x19d0   :  { %15536 = vmatpush1.bf16.msra.mxu1 %v15920_v20 }
0x19d1   :  { %15537 = vmatprep.subr.bf16.mxu1 %v15793_v0 }
0x19d4   :  { %15539 = vmatpush1.bf16.msra.mxu1 %v15932_v23 }
0x19d5   :  { %15540 = vmatprep.subr.bf16.mxu1 %v15793_v0 }
0x19d8   :  { %15542 = vmatpush1.bf16.msra.mxu1 %v15944_v26 }
0x19d9   :  { %15543 = vmatprep.subr.bf16.mxu1 %v15793_v0 }
0x19dc   :  { %15545 = vmatpush1.bf16.msra.mxu1 %v15956_v29 }
0x19dd   :  { %9434 = vmatprep.subr.mxu1 %v15794_v30 }
0x19e0   :  { %10968 = vmatpush1.msk.msra.mxu1 %vm59_vm1, %v19795_v40 }
0x19e1   :  { %9463 = vmatmul.mubr.f32.vlgmr.msra.gmra.mrb[116].mxu1 %v10966_v34  ;;  %15573 = vmatprep.subr.bf16.mxu1 %v15793_v0 }
0x19e2   :  { %12321 = vmatprep.mubr.msk.f32.mxu1 %vm15795_vm2, %v15794_v30 }
0x1a1c   :  { %v8834_v49 = vpop.f32.mrb[108].mxu1 }
0x1a1d   :  { %v20168_v50 = vadd.f32 %v8834_v49, %v19988_v55  ;;  %v12253_v37 = vpop.f32.mrb[109].mxu1  ;;  %v10962_v55 = vld [vmem:[%s20604_s0 + $0x300] sm:$0xff] }
0x1a42   :  { %v8988_v52 = vpop.f32.mrb[110].mxu1 }
0x1a43   :  { %v8992_v44 = vmax.f32 %v20054_v11, %v8988_v52  ;;  %v8990_v56 = vpop.f32.mrb[111].mxu1  ;;  %v10974_v11 = vld [vmem:[%s20605_s3 + $0xb80] sm:$0xff] }
0x1a44   :  { %v15574_v21 = vpack.c.bf16 %v10975_v61, %v10974_v11  ;;  %v11014_v11 = vld [vmem:[%s20605_s3 + $0xc40] sm:$0xff]  ;;  %v11015_v61 = vld [vmem:[%s20605_s3 + $0xc48] sm:$0xff] }
0x1a45   :  { %v9069_v57 = vmax.f32 %v8992_v44, %v20072_v12  ;;  %v10976_v12 = vld [vmem:[%s20605_s3 + $0xb90] sm:$0xff] }
0x1a46   :  { %15575 = vmatpush3.bf16.msra.mxu1 %v15574_v21  ;;  %v15577_v16 = vpack.c.bf16 %v10977_v63, %v10976_v12  ;;  %v15718_v12 = vpack.c.bf16 %v11015_v61, %v11014_v11  ;;  %v11016_v21 = vld [vmem:[%s20605_s3 + $0xc50] sm:$0xff]  ;;  %v11017_v63 = vld [vmem:[%s20605_s3 + $0xc58] sm:$0xff] }
0x1a47   :  { %15576 = vmatprep.subr.bf16.mxu1 %v15793_v0  ;;  %v10151_v61 = vld [vmem:[%s20608_s7 + $0x50] sm:$0xff] }
0x1a4a   :  { %15578 = vmatpush3.bf16.msra.mxu1 %v15577_v16  ;;  %v11018_v16 = vld [vmem:[%s20605_s3 + $0xc60] sm:$0xff] }
0x1a4b   :  { %15579 = vmatprep.subr.bf16.mxu1 %v15793_v0  ;;  %v15724_v19 = vpack.c.bf16 %v11019_v5, %v11018_v16 }
0x1a4e   :  { %15581 = vmatpush3.bf16.msra.mxu1 %v15580_v24  ;;  %v11020_v24 = vld [vmem:[%s20605_s3 + $0xc70] sm:$0xff] }
0x1a4f   :  { %15582 = vmatprep.subr.bf16.mxu1 %v15793_v0  ;;  %v15727_v25 = vpack.c.bf16 %v11021_v58, %v11020_v24 }
0x1a52   :  { %15584 = vmatpush3.bf16.msra.mxu1 %v15583_v15  ;;  %v10047_v15 = vld [vmem:[%s20607_s5] sm:$0xff] }
0x1a53   :  { %15585 = vmatprep.subr.bf16.mxu1 %v15793_v0 }
0x1a56   :  { %15587 = vmatpush3.bf16.msra.mxu1 %v15586_v32  ;;  %v15730_v32 = vpack.c.bf16 %v10048_v33, %v10047_v15  ;;  %v10155_v33 = vld [vmem:[%s20608_s7 + $0x70] sm:$0xff] }
0x1a57   :  { %15588 = vmatprep.subr.bf16.mxu1 %v15793_v0 }
0x1a5a   :  { %15590 = vmatpush3.bf16.msra.mxu1 %v15589_v13  ;;  %v10051_v13 = vld [vmem:[%s20607_s5 + $0x20] sm:$0xff] }
0x1a5b   :  { %15591 = vmatprep.subr.bf16.mxu1 %v15793_v0  ;;  %v15736_v36 = vpack.c.bf16 %v10052_v35, %v10051_v13 }
0x1a5e   :  { %15593 = vmatpush3.bf16.msra.mxu1 %v15592_v31  ;;  %v10053_v31 = vld [vmem:[%s20607_s5 + $0x30] sm:$0xff] }
0x1a5f   :  { %15594 = vmatprep.subr.bf16.mxu1 %v15793_v0  ;;  %v15739_v41 = vpack.c.bf16 %v10054_v38, %v10053_v31 }
0x1a62   :  { %15596 = vmatpush3.bf16.msra.mxu1 %v15595_v22  ;;  %v10055_v22 = vld [vmem:[%s20607_s5 + $0x40] sm:$0xff] }
0x1a63   :  { %15624 = vmatprep.subr.bf16.mxu1 %v15793_v0 }
0x1a68   :  { %v9142_v59 = vpop.f32.mrb[112].mxu1 }
0x1a69   :  { %v9146_v60 = vmax.f32 %v9069_v57, %v9142_v59  ;;  %v9144_v48 = vpop.f32.mrb[113].mxu1 }
0x1a6b   :  { %v9147_v62 = vadd.f32 %v19810_v7, %v9146_v60 }
0x1a6d   :  { %v9148_v51 = vmax.f32 %v9147_v62, 0.0  ;;  %v10995_v62 = vld [vmem:[%s20604_s0 + $0x318] sm:$0xff] }
0x1a6f   :  { %12287 = vmatmul.mubr.f32.vlgmr.msra.gmra.mrb[114].mxu0 %v9148_v51 }
0x1a70   :  { %15494 = vmatpush1.bf16.msra.mxu0 %v15857_v4  ;;  %10965 = vmatprep.mubr.msk.f32.mxu0 %vm55_vm0, %v10963_v2 }
0x1a71   :  { %15495 = vmatprep.subr.bf16.mxu0 %v15793_v0 }
0x1a74   :  { %15497 = vmatpush1.bf16.msra.mxu0 %v15864_v6 }
0x1a75   :  { %15498 = vmatprep.subr.bf16.mxu0 %v15793_v0 }
0x1a78   :  { %15500 = vmatpush1.bf16.msra.mxu0 %v15879_v10 }
0x1a79   :  { %15501 = vmatprep.subr.bf16.mxu0 %v15793_v0 }
0x1a7c   :  { %15503 = vmatpush1.bf16.msra.mxu0 %v15896_v14 }
0x1a7d   :  { %15504 = vmatprep.subr.bf16.mxu0 %v15793_v0 }
0x1a80   :  { %15506 = vmatpush1.bf16.msra.mxu0 %v15908_v17 }
0x1a81   :  { %15507 = vmatprep.subr.bf16.mxu0 %v15793_v0 }
0x1a84   :  { %15509 = vmatpush1.bf16.msra.mxu0 %v15920_v20 }
0x1a85   :  { %15510 = vmatprep.subr.bf16.mxu0 %v15793_v0 }
0x1a88   :  { %15512 = vmatpush1.bf16.msra.mxu0 %v15932_v23 }
0x1a89   :  { %15513 = vmatprep.subr.bf16.mxu0 %v15793_v0 }
0x1a8c   :  { %15515 = vmatpush1.bf16.msra.mxu0 %v15944_v26 }
0x1a8d   :  { %15516 = vmatprep.subr.bf16.mxu0 %v15793_v0 }
0x1a8e   :  { %v20234_v46 = vpop.f32.mrb[114].mxu1 }
0x1a8f   :  { %v9313_v9 = vpop.f32.mrb[115].mxu1 }
0x1a90   :  { %15518 = vmatpush1.bf16.msra.mxu0 %v15956_v29  ;;  %v11013_v9 = vld [vmem:[%s20605_s3 + $0xc38] sm:$0xff] }
0x1a91   :  { %9357 = vmatprep.subr.mxu0 %v15794_v30 }
0x1a94   :  { %10964 = vmatpush1.msk.msra.mxu0 %vm59_vm1, %v19795_v40 }
0x1a95   :  { %9386 = vmatmul.mubr.f32.vlgmr.msra.gmra.mrb[116].mxu0 %v10962_v55  ;;  %15546 = vmatprep.subr.bf16.mxu0 %v15793_v0  ;;  %v11010_v55 = vld [vmem:[%s20605_s3 + $0xc20] sm:$0xff] }
0x1a96   :  { %15548 = vmatpush1.bf16.msra.mxu0 %v15857_v4  ;;  %10973 = vmatprep.mubr.msk.f32.mxu0 %vm55_vm0, %v10971_v54  ;;  %v11011_v54 = vld [vmem:[%s20605_s3 + $0xc28] sm:$0xff] }
0x1a97   :  { %15549 = vmatprep.subr.bf16.mxu0 %v15793_v0 }
0x1a9a   :  { %15551 = vmatpush1.bf16.msra.mxu0 %v15864_v6 }
0x1a9b   :  { %15552 = vmatprep.subr.bf16.mxu0 %v15793_v0 }
0x1a9e   :  { %15554 = vmatpush1.bf16.msra.mxu0 %v15879_v10 }
0x1a9f   :  { %15555 = vmatprep.subr.bf16.mxu0 %v15793_v0 }
0x1aa2   :  { %15557 = vmatpush1.bf16.msra.mxu0 %v15896_v14 }
0x1aa3   :  { %15558 = vmatprep.subr.bf16.mxu0 %v15793_v0 }
0x1aa6   :  { %15560 = vmatpush1.bf16.msra.mxu0 %v15908_v17 }
0x1aa7   :  { %15561 = vmatprep.subr.bf16.mxu0 %v15793_v0 }
0x1aaa   :  { %15563 = vmatpush1.bf16.msra.mxu0 %v15920_v20 }
0x1aab   :  { %15564 = vmatprep.subr.bf16.mxu0 %v15793_v0 }
0x1aae   :  { %15566 = vmatpush1.bf16.msra.mxu0 %v15932_v23 }
0x1aaf   :  { %15567 = vmatprep.subr.bf16.mxu0 %v15793_v0 }
0x1ab2   :  { %15569 = vmatpush1.bf16.msra.mxu0 %v15944_v26 }
0x1ab3   :  { %15570 = vmatprep.subr.bf16.mxu0 %v15793_v0 }
0x1ab4   :  { %v20252_v3 = vpop.f32.mrb[116].mxu1 }
0x1ab5   :  { %v9466_v18 = vpop.f32.mrb[117].mxu1 }
0x1ab6   :  { %15572 = vmatpush1.bf16.msra.mxu0 %v15956_v29  ;;  %v15721_v18 = vpack.c.bf16 %v11017_v63, %v11016_v21  ;;  %v10153_v63 = vld [vmem:[%s20608_s7 + $0x60] sm:$0xff] }
0x1ab7   :  { %9511 = vmatprep.subr.mxu0 %v15794_v30 }
0x1aba   :  { %10972 = vmatpush1.msk.msra.mxu0 %vm59_vm1, %v19795_v40 }
0x1abb   :  { %9540 = vmatmul.mubr.f32.vlgmr.msra.gmra.mrb[118].mxu0 %v10970_v8  ;;  %15597 = vmatprep.subr.bf16.mxu0 %v15793_v0  ;;  %v15712_v8 = vpack.c.bf16 %v11011_v54, %v11010_v55  ;;  %v10147_v54 = vld [vmem:[%s20608_s7 + $0x30] sm:$0xff] }
0x1abc   :  { %15599 = vmatpush1.bf16.msra.mxu0 %v15857_v4  ;;  %10993 = vmatprep.mubr.msk.f32.mxu0 %vm55_vm0, %v10991_v42  ;;  %v10056_v42 = vld [vmem:[%s20607_s5 + $0x48] sm:$0xff] }
0x1abd   :  { %15600 = vmatprep.subr.bf16.mxu0 %v15793_v0 }
0x1ac0   :  { %15602 = vmatpush1.bf16.msra.mxu0 %v15864_v6 }
0x1ac1   :  { %15603 = vmatprep.subr.bf16.mxu0 %v15793_v0 }
0x1ac4   :  { %15605 = vmatpush1.bf16.msra.mxu0 %v15879_v10 }
0x1ac5   :  { %15606 = vmatprep.subr.bf16.mxu0 %v15793_v0 }
0x1ac8   :  { %15608 = vmatpush1.bf16.msra.mxu0 %v15896_v14 }
0x1ac9   :  { %15609 = vmatprep.subr.bf16.mxu0 %v15793_v0 }
0x1acc   :  { %15611 = vmatpush1.bf16.msra.mxu0 %v15908_v17 }
0x1acd   :  { %15612 = vmatprep.subr.bf16.mxu0 %v15793_v0 }
0x1ad0   :  { %15614 = vmatpush1.bf16.msra.mxu0 %v15920_v20 }
0x1ad1   :  { %15615 = vmatprep.subr.bf16.mxu0 %v15793_v0 }
0x1ad4   :  { %15617 = vmatpush1.bf16.msra.mxu0 %v15932_v23 }
0x1ad5   :  { %15618 = vmatprep.subr.bf16.mxu0 %v15793_v0 }
0x1ad8   :  { %15620 = vmatpush1.bf16.msra.mxu0 %v15944_v26 }
0x1ad9   :  { %15621 = vmatprep.subr.bf16.mxu0 %v15793_v0 }
0x1adc   :  { %15623 = vmatpush1.bf16.msra.mxu0 %v15956_v29 }
0x1add   :  { %9680 = vmatprep.subr.mxu0 %v15794_v30 }
0x1ae0   :  { %10992 = vmatpush1.msk.msra.mxu0 %vm59_vm1, %v19795_v40 }
0x1ae1   :  { %15651 = vmatprep.subr.bf16.mxu0 %v15793_v0  ;;  %9709 = vmatmul.mubr.f32.vlgmr.msra.gmra.mrb[120].mxu0 %v10990_v28  ;;  %v15742_v28 = vpack.c.bf16 %v10056_v42, %v10055_v22 }
0x1ae2   :  { %15653 = vmatpush1.bf16.msra.mxu0 %v15857_v4  ;;  %11001 = vmatprep.mubr.msk.f32.mxu0 %vm55_vm0, %v10999_v43  ;;  %v10057_v43 = vld [vmem:[%s20607_s5 + $0x50] sm:$0xff] }
0x1ae3   :  { %15654 = vmatprep.subr.bf16.mxu0 %v15793_v0 }
0x1ae6   :  { %15656 = vmatpush1.bf16.msra.mxu0 %v15864_v6 }
0x1ae7   :  { %15657 = vmatprep.subr.bf16.mxu0 %v15793_v0 }
0x1aea   :  { %15659 = vmatpush1.bf16.msra.mxu0 %v15879_v10 }
0x1aeb   :  { %15660 = vmatprep.subr.bf16.mxu0 %v15793_v0 }
0x1aee   :  { %15662 = vmatpush1.bf16.msra.mxu0 %v15896_v14 }
0x1aef   :  { %15663 = vmatprep.subr.bf16.mxu0 %v15793_v0 }
0x1af2   :  { %15665 = vmatpush1.bf16.msra.mxu0 %v15908_v17 }
0x1af3   :  { %15666 = vmatprep.subr.bf16.mxu0 %v15793_v0 }
0x1af6   :  { %15668 = vmatpush1.bf16.msra.mxu0 %v15920_v20 }
0x1af7   :  { %15669 = vmatprep.subr.bf16.mxu0 %v15793_v0 }
0x1afa   :  { %15671 = vmatpush1.bf16.msra.mxu0 %v15932_v23 }
0x1afb   :  { %15672 = vmatprep.subr.bf16.mxu0 %v15793_v0 }
0x1afe   :  { %15674 = vmatpush1.bf16.msra.mxu0 %v15944_v26 }
0x1aff   :  { %15675 = vmatprep.subr.bf16.mxu0 %v15793_v0 }
0x1b02   :  { %15677 = vmatpush1.bf16.msra.mxu0 %v15956_v29 }
0x1b03   :  { %9833 = vmatprep.subr.mxu0 %v15794_v30 }
0x1b06   :  { %11000 = vmatpush1.msk.msra.mxu0 %vm59_vm1, %v19795_v40 }
0x1b07   :  { %9862 = vmatmul.mubr.f32.vlgmr.msra.gmra.mrb[122].mxu0 %v10998_v45  ;;  %15705 = vmatprep.subr.bf16.mxu0 %v15793_v0  ;;  %v10058_v45 = vld [vmem:[%s20607_s5 + $0x58] sm:$0xff] }
0x1b08   :  { %12356 = vmatprep.mubr.msk.f32.mxu0 %vm15795_vm2, %v15794_v30 }
0x1b42   :  { %v9233_v47 = vpop.f32.mrb[114].mxu0 }
0x1b43   :  { %v20348_v53 = vadd.f32 %v9233_v47, %v20168_v50  ;;  %v12288_v34 = vpop.f32.mrb[115].mxu0  ;;  %v11003_v50 = vld [vmem:[%s20604_s0 + $0x638] sm:$0xff]  ;;  %v15745_v47 = vpack.c.bf16 %v10058_v45, %v10057_v43 }
0x1b68   :  { %v9387_v49 = vpop.f32.mrb[116].mxu0 }
0x1b69   :  { %v9391_v37 = vmax.f32 %v20234_v46, %v9387_v49  ;;  %v9389_v52 = vpop.f32.mrb[117].mxu0  ;;  %v11012_v46 = vld [vmem:[%s20605_s3 + $0xc30] sm:$0xff] }
0x1b6b   :  { %v9468_v44 = vmax.f32 %v9391_v37, %v20252_v3  ;;  %v15715_v3 = vpack.c.bf16 %v11013_v9, %v11012_v46  ;;  %v10149_v9 = vld [vmem:[%s20608_s7 + $0x40] sm:$0xff] }
0x1b8e   :  { %v9541_v56 = vpop.f32.mrb[118].mxu0 }
0x1b8f   :  { %v9545_v57 = vmax.f32 %v9468_v44, %v9541_v56  ;;  %v9543_v59 = vpop.f32.mrb[119].mxu0 }
0x1b91   :  { %v9546_v60 = vadd.f32 %v19810_v7, %v9545_v57  ;;  %v10994_v7 = vld [vmem:[%s20604_s0 + $0x310] sm:$0xff] }
0x1b93   :  { %v9547_v48 = vmax.f32 %v9546_v60, 0.0 }
0x1b95   :  { %12322 = vmatmul.mubr.f32.vlgmr.msra.gmra.mrb[118].mxu1 %v9547_v48 }
0x1b96   :  { %15626 = vmatpush1.bf16.msra.mxu1 %v15857_v4  ;;  %10997 = vmatprep.mubr.msk.f32.mxu1 %vm55_vm0, %v10995_v62  ;;  %v15792_v62 = vld [vmem:[%s20606_s2] ss:$0 sm:$0xff] }
0x1b97   :  { %15627 = vmatprep.subr.bf16.mxu1 %v15793_v0 }
0x1b9a   :  { %15629 = vmatpush1.bf16.msra.mxu1 %v15864_v6 }
0x1b9b   :  { %15630 = vmatprep.subr.bf16.mxu1 %v15793_v0 }
0x1b9e   :  { %15632 = vmatpush1.bf16.msra.mxu1 %v15879_v10 }
0x1b9f   :  { %15633 = vmatprep.subr.bf16.mxu1 %v15793_v0 }
0x1ba2   :  { %15635 = vmatpush1.bf16.msra.mxu1 %v15896_v14 }
0x1ba3   :  { %15636 = vmatprep.subr.bf16.mxu1 %v15793_v0 }
0x1ba6   :  { %15638 = vmatpush1.bf16.msra.mxu1 %v15908_v17 }
0x1ba7   :  { %15639 = vmatprep.subr.bf16.mxu1 %v15793_v0 }
0x1baa   :  { %15641 = vmatpush1.bf16.msra.mxu1 %v15920_v20 }
0x1bab   :  { %15642 = vmatprep.subr.bf16.mxu1 %v15793_v0 }
0x1bae   :  { %15644 = vmatpush1.bf16.msra.mxu1 %v15932_v23 }
0x1baf   :  { %15645 = vmatprep.subr.bf16.mxu1 %v15793_v0 }
0x1bb2   :  { %15647 = vmatpush1.bf16.msra.mxu1 %v15944_v26 }
0x1bb3   :  { %15648 = vmatprep.subr.bf16.mxu1 %v15793_v0 }
0x1bb6   :  { %15650 = vmatpush1.bf16.msra.mxu1 %v15956_v29 }
0x1bb7   :  { %9756 = vmatprep.subr.mxu1 %v15794_v30 }
0x1bba   :  { %10996 = vmatpush1.msk.msra.mxu1 %vm59_vm1, %v19795_v40  ;;  %v11009_v40 = vld [vmem:[%s20605_s3 + $0xc18] sm:$0xff] }
0x1bbb   :  { %9785 = vmatmul.mubr.f32.vlgmr.msra.gmra.mrb[120].mxu1 %v10994_v7  ;;  %15678 = vmatprep.subr.bf16.mxu1 %v15793_v0 }
0x1bbc   :  { %15680 = vmatpush1.bf16.msra.mxu1 %v15857_v4  ;;  %11005 = vmatprep.mubr.msk.f32.mxu1 %vm55_vm0, %v11003_v50  ;;  %v11002_v4 = vld [vmem:[%s20604_s0 + $0x630] sm:$0xff] }
0x1bbd   :  { %15681 = vmatprep.subr.bf16.mxu1 %v15793_v0 }
0x1bc0   :  { %15683 = vmatpush1.bf16.msra.mxu1 %v15864_v6  ;;  %v15791_v6 = vld [vmem:[%s20603_s1 + $0x90] sm:$0x3f] }
0x1bc1   :  { %15684 = vmatprep.subr.bf16.mxu1 %v15793_v0 }
0x1bc4   :  { %15686 = vmatpush1.bf16.msra.mxu1 %v15879_v10  ;;  %v20413_v10 = vpop.f32.mrb[120].mxu0 }
0x1bc5   :  { %15687 = vmatprep.subr.bf16.mxu1 %v15793_v0 }
0x1bc8   :  { %15689 = vmatpush1.bf16.msra.mxu1 %v15896_v14  ;;  %v9712_v14 = vpop.f32.mrb[121].mxu0 }
0x1bc9   :  { %15690 = vmatprep.subr.bf16.mxu1 %v15793_v0 }
0x1bcc   :  { %15692 = vmatpush1.bf16.msra.mxu1 %v15908_v17 }
0x1bcd   :  { %15693 = vmatprep.subr.bf16.mxu1 %v15793_v0 }
0x1bd0   :  { %15695 = vmatpush1.bf16.msra.mxu1 %v15920_v20  ;;  %v11006_v20 = vld [vmem:[%s20605_s3 + $0xc00] sm:$0xff] }
0x1bd1   :  { %15696 = vmatprep.subr.bf16.mxu1 %v15793_v0 }
0x1bd4   :  { %15698 = vmatpush1.bf16.msra.mxu1 %v15932_v23  ;;  %v11007_v23 = vld [vmem:[%s20605_s3 + $0xc08] sm:$0xff] }
0x1bd5   :  { %15699 = vmatprep.subr.bf16.mxu1 %v15793_v0 }
0x1bd8   :  { %15701 = vmatpush1.bf16.msra.mxu1 %v15944_v26  ;;  %v11008_v26 = vld [vmem:[%s20605_s3 + $0xc10] sm:$0xff] }
0x1bd9   :  { %15702 = vmatprep.subr.bf16.mxu1 %v15793_v0  ;;  %v15709_v2 = vpack.c.bf16 %v11009_v40, %v11008_v26 }
0x1bda   :  { %v20415_v17 = vpop.f32.mrb[122].mxu0 }
0x1bdb   :  { %v9865_v51 = vpop.f32.mrb[123].mxu0 }
0x1bdc   :  { %15704 = vmatpush1.bf16.msra.mxu1 %v15956_v29  ;;  %v15706_v29 = vpack.c.bf16 %v11007_v23, %v11006_v20  ;;  %v10142_v20 = vld [vmem:[%s20608_s7 + $0x8] sm:$0xff]  ;;  %v10143_v23 = vld [vmem:[%s20608_s7 + $0x10] sm:$0xff]  ;;  %v10145_v51 = vld [vmem:[%s20608_s7 + $0x20] sm:$0xff] }
0x1bdd   :  { %9910 = vmatprep.subr.mxu1 %v15794_v30 }
0x1bde   :  { %15707 = vmatpush3.bf16.msra.mxu0 %v15706_v29  ;;  %v10144_v29 = vld [vmem:[%s20608_s7 + $0x18] sm:$0xff] }
0x1bdf   :  { %15708 = vmatprep.subr.bf16.mxu0 %v15793_v0  ;;  %v15757_v40 = vpack.c.bf16 %v10144_v29, %v10143_v23 }
0x1be0   :  { %11004 = vmatpush1.msk.msra.mxu1 %vm59_vm1, %v15791_v6 }
0x1be1   :  { %9939 = vmatmul.mubr.f32.vlgmr.msra.gmra.mrb[122].mxu1 %v11002_v4  ;;  %15729 = vmatprep.subr.bf16.mxu1 %v15793_v0  ;;  %v10060_v4 = vld [vmem:[%s20607_s5 + $0x68] sm:$0xff] }
0x1be2   :  { %12391 = vmatprep.mubr.msk.f32.mxu1 %vm15795_vm2, %v15794_v30  ;;  %15710 = vmatpush3.bf16.msra.mxu0 %v15709_v2  ;;  %v10146_v2 = vld [vmem:[%s20608_s7 + $0x28] sm:$0xff] }
0x1be3   :  { %15711 = vmatprep.subr.bf16.mxu0 %v15793_v0  ;;  %15731 = vmatpush3.bf16.msra.mxu1 %v15730_v32  ;;  %v15760_v55 = vpack.c.bf16 %v10146_v2, %v10145_v51  ;;  %v15775_v32 = vpack.c.bf16 %v10156_v27, %v10155_v33 }
0x1be4   :  { %15732 = vmatprep.subr.bf16.mxu1 %v15793_v0 }
0x1be6   :  { %15713 = vmatpush3.bf16.msra.mxu0 %v15712_v8  ;;  %v10148_v8 = vld [vmem:[%s20608_s7 + $0x38] sm:$0xff] }
0x1be7   :  { %15714 = vmatprep.subr.bf16.mxu0 %v15793_v0  ;;  %15734 = vmatpush3.bf16.msra.mxu1 %v15733_v39  ;;  %v15763_v46 = vpack.c.bf16 %v10148_v8, %v10147_v54 }
0x1be8   :  { %15735 = vmatprep.subr.bf16.mxu1 %v15793_v0 }
0x1bea   :  { %15716 = vmatpush3.bf16.msra.mxu0 %v15715_v3  ;;  %v10150_v3 = vld [vmem:[%s20608_s7 + $0x48] sm:$0xff] }
0x1beb   :  { %15717 = vmatprep.subr.bf16.mxu0 %v15793_v0  ;;  %15737 = vmatpush3.bf16.msra.mxu1 %v15736_v36  ;;  %v15766_v11 = vpack.c.bf16 %v10150_v3, %v10149_v9  ;;  %v11024_v36 = vld [vmem:[%s20611_s8] ss:$0 sm:$0xff] }
0x1bec   :  { %15738 = vmatprep.subr.bf16.mxu1 %v15793_v0 }
0x1bee   :  { %15719 = vmatpush3.bf16.msra.mxu0 %v15718_v12  ;;  %v10152_v12 = vld [vmem:[%s20608_s7 + $0x58] sm:$0xff] }
0x1bef   :  { %15720 = vmatprep.subr.bf16.mxu0 %v15793_v0  ;;  %15740 = vmatpush3.bf16.msra.mxu1 %v15739_v41  ;;  %v15769_v21 = vpack.c.bf16 %v10152_v12, %v10151_v61 }
0x1bf0   :  { %15741 = vmatprep.subr.bf16.mxu1 %v15793_v0 }
0x1bf2   :  { %15722 = vmatpush3.bf16.msra.mxu0 %v15721_v18  ;;  %v10154_v18 = vld [vmem:[%s20608_s7 + $0x68] sm:$0xff] }
0x1bf3   :  { %15723 = vmatprep.subr.bf16.mxu0 %v15793_v0  ;;  %15743 = vmatpush3.bf16.msra.mxu1 %v15742_v28  ;;  %v15772_v16 = vpack.c.bf16 %v10154_v18, %v10153_v63 }
0x1bf4   :  { %15744 = vmatprep.subr.bf16.mxu1 %v15793_v0 }
0x1bf6   :  { %15725 = vmatpush3.bf16.msra.mxu0 %v15724_v19  ;;  %v11022_v19 = vld [vmem:[%s20609_s4] ss:$0 sm:$0xff] }
0x1bf7   :  { %15726 = vmatprep.subr.bf16.mxu0 %v15793_v0  ;;  %15746 = vmatpush3.bf16.msra.mxu1 %v15745_v47 }
0x1bf8   :  { %15747 = vmatprep.subr.bf16.mxu1 %v15793_v0 }
0x1bfa   :  { %15728 = vmatpush3.bf16.msra.mxu0 %v15727_v25 }
0x1bfb   :  { %15753 = vmatprep.subr.bf16.mxu0 %v15793_v0 }
0x1c68   :  { %v9632_v34 = vpop.f32.mrb[118].mxu1 }
0x1c69   :  { %v9636_v49 = vadd.f32 %v9632_v34, %v20348_v53  ;;  %v12323_v37 = vpop.f32.mrb[119].mxu1  ;;  %v10059_v53 = vld [vmem:[%s20607_s5 + $0x60] sm:$0xff] }
0x1c6a   :  { %v15748_v6 = vpack.c.bf16 %v10060_v4, %v10059_v53 }
0x1c6c   :  { %15749 = vmatpush3.bf16.msra.mxu1 %v15748_v6 }
0x1c6d   :  { %15750 = vmatprep.subr.bf16.mxu1 %v15793_v0 }
0x1c8e   :  { %v9786_v52 = vpop.f32.mrb[120].mxu1 }
0x1c8f   :  { %v9790_v44 = vmax.f32 %v20413_v10, %v9786_v52  ;;  %v9788_v56 = vpop.f32.mrb[121].mxu1  ;;  %v10061_v10 = vld [vmem:[%s20607_s5 + $0x70] sm:$0xff] }
0x1c91   :  { %v9867_v57 = vmax.f32 %v9790_v44, %v20415_v17  ;;  %v10141_v17 = vld [vmem:[%s20608_s7] sm:$0xff] }
0x1c92   :  { %v15754_v26 = vpack.c.bf16 %v10142_v20, %v10141_v17 }
0x1cb4   :  { %v9940_v59 = vpop.f32.mrb[122].mxu1 }
0x1cb5   :  { %v9944_v60 = vmax.f32 %v9867_v57, %v9940_v59  ;;  %v9942_v48 = vpop.f32.mrb[123].mxu1 }
0x1cb7   :  { %v9945_v7 = vadd.f32 %v15792_v62, %v9944_v60 }
0x1cb9   :  { %v9946_v50 = vmax.f32 %v9945_v7, 0.0 }
0x1cbb   :  { %12357 = vmatmul.mubr.f32.vlgmr.msra.gmra.mrb[124].mxu0 %v9946_v50 }
0x1cbc   :  { %12426 = vmatprep.mubr.msk.f32.mxu0 %vm15795_vm2, %v15794_v30  ;;  %v10062_v30 = vld [vmem:[%s20607_s5 + $0x78] sm:$0xff]  ;;  %15755 = vmatpush3.bf16.msra.mxu0 %v15754_v26 }
0x1cbd   :  { %v15751_v14 = vpack.c.bf16 %v10062_v30, %v10061_v10  ;;  %15756 = vmatprep.subr.bf16.mxu0 %v15793_v0 }
0x1cbf   :  { %15752 = vmatpush3.bf16.msra.mxu1 %v15751_v14 }
0x1cc0   :  { %15758 = vmatpush3.bf16.msra.mxu0 %v15757_v40 }
0x1cc1   :  { %15759 = vmatprep.subr.bf16.mxu0 %v15793_v0 }
0x1cc4   :  { %15761 = vmatpush3.bf16.msra.mxu0 %v15760_v55 }
0x1cc5   :  { %15762 = vmatprep.subr.bf16.mxu0 %v15793_v0 }
0x1cc8   :  { %15764 = vmatpush3.bf16.msra.mxu0 %v15763_v46 }
0x1cc9   :  { %15765 = vmatprep.subr.bf16.mxu0 %v15793_v0 }
0x1ccc   :  { %15767 = vmatpush3.bf16.msra.mxu0 %v15766_v11 }
0x1ccd   :  { %15768 = vmatprep.subr.bf16.mxu0 %v15793_v0 }
0x1cd0   :  { %15770 = vmatpush3.bf16.msra.mxu0 %v15769_v21 }
0x1cd1   :  { %15771 = vmatprep.subr.bf16.mxu0 %v15793_v0 }
0x1cd4   :  { %15773 = vmatpush3.bf16.msra.mxu0 %v15772_v16 }
0x1cd5   :  { %15774 = vmatprep.subr.bf16.mxu0 %v15793_v0  ;;  %v11023_v0 = vld [vmem:[%s20610_s6] ss:$0 sm:$0xff] }
0x1cd8   :  { %15776 = vmatpush3.bf16.msra.mxu0 %v15775_v32 }
0x1d8e   :  { %v10031_v5 = vpop.f32.mrb[124].mxu0 }
0x1d8f   :  { %v10035_v24 = vadd.f32 %v10031_v5, %v9636_v49  ;;  %v12358_v58 = vpop.f32.mrb[125].mxu0 }
0x1d91   :  { %v10045_v25 = vadd.f32 %v11022_v19, %v10035_v24 }
0x1d93   :  { %v10046_v15 = vmax.f32 %v10045_v25, 0.0 }
0x1d95   :  { %12392 = vmatmul.mubr.f32.vlgmr.msra.gmra.mrb[124].mxu1 %v10046_v15 }
0x1e68   :  { %v10136_v1 = vpop.f32.mrb[124].mxu1 }
0x1e69   :  { %v10137_v39 = vadd.f32 %v11023_v0, %v10136_v1  ;;  %v12393_v13 = vpop.f32.mrb[125].mxu1 }
0x1e6b   :  { %v10140_v35 = vmax.f32 %v10137_v39, 0.0 }
0x1e6d   :  { %12427 = vmatmul.mubr.f32.vlgmr.msra.gmra.mrb[126].mxu0 %v10140_v35 }
0x1f40   :  { %v10230_v31 = vpop.f32.mrb[126].mxu0 }
0x1f41   :  { %v10231_v38 = vadd.f32 %v11024_v36, %v10230_v31  ;;  %v12428_v41 = vpop.f32.mrb[127].mxu0 }
0x1f43   :  { %10234 = vst [vmem:[%s20612_s9] sm:$0xff] %v10231_v38 }

</bundles_post_ra>
